<compile_context>
chip_gen: v5e
topology: v5e:2x2
jax: 0.10.0
libtpu: 0.0.40
codegen_flags: <defaults>
</compile_context>

<pallas_src>
import functools

import jax
import jax.numpy as jnp
from jax.experimental import pallas as pl
from jax.experimental.pallas import tpu as pltpu

# ---- model dimensions implied by the PyTorch module ----
VOCAB = 10            # len(word_to_idx)
VOCAB_PAD = 128       # lane-dense logits (zero-padded columns, sliced outside)
EMBED = 256           # embedding_dim
HIDDEN = 256          # hidden_dim
FEAT = 512            # CNN feature dim expected by fc_input (512 + embedding_dim)
FC_IN_OUT = 256       # fc_input output / LSTM input_size
CONV_C = 16           # width of the simplified CNN backbone
K = 3                 # conv kernel size
KK_PAD = 32           # Cin*K*K = 27, padded to the next multiple of 16 (bf16 sublane)


# ---------------------------------------------------------------------------
# Fused kernel: CNN feature extractor + fc_input + LSTM + output fc
#   grid = (batch tiles [parallel], HW tiles [arbitrary reduction])
# ---------------------------------------------------------------------------
def fused_caption_kernel(inv_hw,
                         patch_ref, emb_ref,
                         wconv_ref, bconv_ref, wproj_ref, bproj_ref,
                         w1f_ref, w1e_ref, b1_ref,
                         wih_ref, whh_ref, bl_ref,
                         wfc_ref, bfc_ref,
                         out_ref, hs_ref, pool_ref):
    TB, THW, KKP = patch_ref.shape
    T = emb_ref.shape[1]
    H = HIDDEN
    hw = pl.program_id(1)

    @pl.when(hw == 0)
    def _init():
        pool_ref[...] = jnp.zeros_like(pool_ref)

    # ---- CNN stage (per HW tile): 3x3 conv as im2col matmul (bf16 operands,
    #      f32 accumulate), ReLU, then a running sum for the global avg pool.
    p = patch_ref[...].reshape(TB * THW, KKP)                         # bf16
    y = jnp.dot(p, wconv_ref[...], preferred_element_type=jnp.float32)
    y = jnp.maximum(y + bconv_ref[...], 0.0)                          # (TB*THW, C)
    pool_ref[...] += y.reshape(TB, THW, CONV_C).sum(axis=1)           # XLU reduce

    @pl.when(hw == pl.num_programs(1) - 1)
    def _tail():
        pooled = (pool_ref[...] * inv_hw).astype(jnp.bfloat16)        # (TB, C)
        feat = (jnp.dot(pooled, wproj_ref[...],
                        preferred_element_type=jnp.float32)
                + bproj_ref[...])                                     # (TB, 512) f32

        # fc_input: cat([feat.repeat(T), emb], -1) @ W1 + b1, split by operand
        x_feat = jnp.dot(feat.astype(jnp.bfloat16), w1f_ref[...],
                         preferred_element_type=jnp.float32)          # (TB, 256)
        emb = emb_ref[...].reshape(TB * T, EMBED)                     # bf16
        x_emb = jnp.dot(emb, w1e_ref[...],
                        preferred_element_type=jnp.float32)           # (TB*T, 256)
        x = (x_emb.reshape(TB, T, FC_IN_OUT)
             + x_feat.reshape(TB, 1, FC_IN_OUT)
             + b1_ref[...].reshape(1, 1, FC_IN_OUT))                  # f32

        # ---- LSTM: input contribution of all timesteps in one big matmul
        gates_x = (jnp.dot(x.reshape(TB * T, FC_IN_OUT).astype(jnp.bfloat16),
                           wih_ref[...], preferred_element_type=jnp.float32)
                   + bl_ref[...]).reshape(TB, T, 4 * H)

        whh = whh_ref[...]                                            # bf16
        h = jnp.zeros((TB, H), jnp.float32)
        c = jnp.zeros((TB, H), jnp.float32)
        for t in range(T):   # T small & static -> fully unrolled, batched over TB
            g = gates_x[:, t, :] + jnp.dot(h.astype(jnp.bfloat16), whh,
                                           preferred_element_type=jnp.float32)
            i = jax.nn.sigmoid(g[:, 0:H])        # PyTorch gate order: i, f, g, o
            f = jax.nn.sigmoid(g[:, H:2 * H])
            gg = jnp.tanh(g[:, 2 * H:3 * H])
            o = jax.nn.sigmoid(g[:, 3 * H:4 * H])
            c = f * c + i * gg
            h = o * jnp.tanh(c)
            hs_ref[t] = h                        # full (TB, H) slab, unmasked store

        # ---- output fc over all (T*TB) rows at once; lane-dense 128-wide logits
        hs = hs_ref[...].reshape(T * TB, H)
        logits = (jnp.dot(hs.astype(jnp.bfloat16), wfc_ref[...],
                          preferred_element_type=jnp.float32) + bfc_ref[...])
        out_ref[...] = logits.reshape(T, TB, VOCAB_PAD)


# ---------------------------------------------------------------------------
# Glue
# ---------------------------------------------------------------------------
def im2col(x_nchw, k=K):
    """3x3, stride 1, pad 1 patches -> (B, H*W, Cin*k*k), Cin-major like PyTorch."""
    B, C, H, W = x_nchw.shape
    xp = jnp.pad(x_nchw, ((0, 0), (0, 0), (1, 1), (1, 1)))
    cols = []
    for c in range(C):
        for di in range(k):
            for dj in range(k):
                cols.append(xp[:, c, di:di + H, dj:dj + W])     # (B, H, W)
    patches = jnp.stack(cols, axis=-1)                          # (B, H, W, C*k*k)
    return patches.reshape(B, H * W, C * k * k)


def _pick_tile_b(B):
    if B <= 8:
        return B
    for tb in (64, 32, 16, 8):        # >= 2 grid steps so v7x's 2nd TC gets work
        if B % tb == 0 and B // tb >= 2:
            return tb
    return B                          # awkward batch sizes: one full-extent tile


def _pick_tile_hw(HW):
    if HW <= 4096:
        return HW
    for t in (4096, 2048, 1024, 512, 256, 128, 64, 32, 16):
        if HW % t == 0:
            return t
    return HW


def image_captioning_forward(images, captions, params):
    B, _, H_img, W_img = images.shape
    HW = H_img * W_img
    T = captions.shape[1]

    # im2col + lane pad 27 -> 32 + bf16 for the MXU (was 128-wide: ~4x less HBM)
    patches = im2col(images)                                    # (B, HW, 27) f32
    KK = patches.shape[-1]
    assert KK <= KK_PAD
    patches = jnp.pad(patches, ((0, 0), (0, 0), (0, KK_PAD - KK))).astype(jnp.bfloat16)
    wconv = jnp.pad(params["wconv"], ((0, KK_PAD - KK), (0, 0))).astype(jnp.bfloat16)

    # embedding lookup as an XLA gather; bf16 activation stream
    emb_x = params["emb"][captions].astype(jnp.bfloat16)        # (B, T, EMBED)

    # vocab lane padding 10 -> 128 (zero columns; sliced off after the call)
    wfc = jnp.pad(params["wfc"], ((0, 0), (0, VOCAB_PAD - VOCAB))).astype(jnp.bfloat16)
    bfc = jnp.pad(params["bfc"], ((0, 0), (0, VOCAB_PAD - VOCAB)))

    # bf16 matmul weights (f32 accumulation in-kernel); biases stay f32
    w1f = params["w1"][:FEAT, :].astype(jnp.bfloat16)
    w1e = params["w1"][FEAT:, :].astype(jnp.bfloat16)
    wproj = params["wproj"].astype(jnp.bfloat16)
    wih = params["wih"].astype(jnp.bfloat16)
    whh = params["whh"].astype(jnp.bfloat16)

    TILE_B = _pick_tile_b(B)
    TILE_HW = _pick_tile_hw(HW)
    assert B % TILE_B == 0 and HW % TILE_HW == 0
    grid = (B // TILE_B, HW // TILE_HW)   # (parallel batch, arbitrary HW reduction)

    weights = (wconv, params["bconv"], wproj, params["bproj"],
               w1f, w1e, params["b1"], wih, whh, params["bl"], wfc, bfc)
    weight_bytes = sum(int(w.size) * w.dtype.itemsize for w in weights)

    # VMEM budget: double-buffered patch/emb/out blocks + resident weights +
    # scratch + activation temporaries, with headroom; clamped under v7x limits.
    vmem_est = (2 * TILE_B * TILE_HW * KK_PAD * 2
                + 2 * TILE_B * T * EMBED * 2
                + 2 * T * TILE_B * VOCAB_PAD * 4
                + weight_bytes
                + T * TILE_B * HIDDEN * 4 + TILE_B * CONV_C * 4
                + 6 * TILE_B * T * 4 * HIDDEN * 4)
    vmem_limit = int(min(max(2 * vmem_est, 16 << 20), 48 << 20))

    flops = int(2 * B * HW * KK_PAD * CONV_C
                + 2 * B * CONV_C * FEAT
                + 2 * B * FEAT * FC_IN_OUT
                + 2 * B * T * (EMBED * FC_IN_OUT
                               + FC_IN_OUT * 4 * HIDDEN
                               + HIDDEN * 4 * HIDDEN
                               + HIDDEN * VOCAB_PAD))
    bytes_accessed = int(patches.size * 2 + emb_x.size * 2
                         + T * B * VOCAB_PAD * 4 + weight_bytes)
    cost = pl.CostEstimate(flops=flops,
                           transcendentals=int(B * T * 5 * HIDDEN),
                           bytes_accessed=bytes_accessed)

    kernel = functools.partial(fused_caption_kernel, 1.0 / HW)

    out = pl.pallas_call(
        kernel,
        out_shape=jax.ShapeDtypeStruct((T, B, VOCAB_PAD), jnp.float32),
        grid=grid,
        in_specs=[
            pl.BlockSpec((TILE_B, TILE_HW, KK_PAD), lambda b, hw: (b, hw, 0)),
            pl.BlockSpec((TILE_B, T, EMBED), lambda b, hw: (b, 0, 0)),
            pl.BlockSpec((KK_PAD, CONV_C), lambda b, hw: (0, 0)),
            pl.BlockSpec((1, CONV_C), lambda b, hw: (0, 0)),
            pl.BlockSpec((CONV_C, FEAT), lambda b, hw: (0, 0)),
            pl.BlockSpec((1, FEAT), lambda b, hw: (0, 0)),
            pl.BlockSpec((FEAT, FC_IN_OUT), lambda b, hw: (0, 0)),
            pl.BlockSpec((EMBED, FC_IN_OUT), lambda b, hw: (0, 0)),
            pl.BlockSpec((1, FC_IN_OUT), lambda b, hw: (0, 0)),
            pl.BlockSpec((FC_IN_OUT, 4 * HIDDEN), lambda b, hw: (0, 0)),
            pl.BlockSpec((HIDDEN, 4 * HIDDEN), lambda b, hw: (0, 0)),
            pl.BlockSpec((1, 4 * HIDDEN), lambda b, hw: (0, 0)),
            pl.BlockSpec((HIDDEN, VOCAB_PAD), lambda b, hw: (0, 0)),
            pl.BlockSpec((1, VOCAB_PAD), lambda b, hw: (0, 0)),
        ],
        out_specs=pl.BlockSpec((T, TILE_B, VOCAB_PAD), lambda b, hw: (0, b, 0)),
        scratch_shapes=[pltpu.VMEM((T, TILE_B, HIDDEN), jnp.float32),
                        pltpu.VMEM((TILE_B, CONV_C), jnp.float32)],
        compiler_params=pltpu.CompilerParams(
            dimension_semantics=("parallel", "arbitrary"),
            vmem_limit_bytes=vmem_limit),
        cost_estimate=cost,
    )(patches, emb_x, wconv, params["bconv"], wproj, params["bproj"],
      w1f, w1e, params["b1"], wih, whh, params["bl"], wfc, bfc)

    # (T, B, 128) lane-dense kernel output -> (B, T, vocab)
    return jnp.swapaxes(out, 0, 1)[..., :VOCAB]


# ---------------------------------------------------------------------------
# pure-JAX reference for a sanity check (mirrors the kernel's bf16 matmul
# operand rounding with f32 accumulation; elementwise math in f32)
# ---------------------------------------------------------------------------
def reference_forward(images, captions, p):
    def bdot(a, b):
        return jnp.dot(a.astype(jnp.bfloat16), b.astype(jnp.bfloat16),
                       preferred_element_type=jnp.float32)

    B = images.shape[0]
    T = captions.shape[1]
    patches = im2col(images)                                          # (B, HW, 27)
    HW = patches.shape[1]
    y = jnp.maximum(bdot(patches.reshape(B * HW, -1), p["wconv"]) + p["bconv"], 0.0)
    pooled = y.reshape(B, HW, CONV_C).sum(axis=1) / HW                # (B, C)
    feat = bdot(pooled, p["wproj"]) + p["bproj"]                      # (B, 512)
    emb = p["emb"][captions]                                          # (B, T, E)
    x_feat = bdot(feat, p["w1"][:FEAT, :])
    x_emb = bdot(emb.reshape(B * T, EMBED), p["w1"][FEAT:, :])
    x = (x_emb.reshape(B, T, FC_IN_OUT) + x_feat[:, None, :]
         + p["b1"].reshape(1, 1, FC_IN_OUT))
    gates_x = (bdot(x.reshape(B * T, FC_IN_OUT), p["wih"])
               + p["bl"]).reshape(B, T, 4 * HIDDEN)
    h = jnp.zeros((B, HIDDEN), jnp.float32)
    c = jnp.zeros((B, HIDDEN), jnp.float32)
    outs = []
    for t in range(T):
        g = gates_x[:, t, :] + bdot(h, p["whh"])
        i = jax.nn.sigmoid(g[:, :HIDDEN]); f = jax.nn.sigmoid(g[:, HIDDEN:2 * HIDDEN])
        gg = jnp.tanh(g[:, 2 * HIDDEN:3 * HIDDEN]); o = jax.nn.sigmoid(g[:, 3 * HIDDEN:])
        c = f * c + i * gg
        h = o * jnp.tanh(c)
        outs.append(h)
    hs = jnp.stack(outs, axis=1)                                      # (B, T, H)
    logits = bdot(hs.reshape(B * T, HIDDEN), p["wfc"]) + p["bfc"]
    return logits.reshape(B, T, VOCAB)


def init_params(key):
    ks = jax.random.split(key, 12)
    s = 0.05
    return {
        "wconv": jax.random.normal(ks[0], (3 * K * K, CONV_C), jnp.float32) * s,
        "bconv": jax.random.normal(ks[1], (1, CONV_C), jnp.float32) * s,
        "wproj": jax.random.normal(ks[2], (CONV_C, FEAT), jnp.float32) * s,
        "bproj": jax.random.normal(ks[3], (1, FEAT), jnp.float32) * s,
        "emb":   jax.random.normal(ks[4], (VOCAB, EMBED), jnp.float32) * s,
        "w1":    jax.random.normal(ks[5], (FEAT + EMBED, FC_IN_OUT), jnp.float32) * s,
        "b1":    jax.random.normal(ks[6], (1, FC_IN_OUT), jnp.float32) * s,
        "wih":   jax.random.normal(ks[7], (FC_IN_OUT, 4 * HIDDEN), jnp.float32) * s,
        "whh":   jax.random.normal(ks[8], (HIDDEN, 4 * HIDDEN), jnp.float32) * s,
        "bl":    jax.random.normal(ks[9], (1, 4 * HIDDEN), jnp.float32) * s,
        "wfc":   jax.random.normal(ks[10], (HIDDEN, VOCAB), jnp.float32) * s,
        "bfc":   jax.random.normal(ks[11], (1, VOCAB), jnp.float32) * s,
    }


if __name__ == "__main__":
    key = jax.random.PRNGKey(0)
    k_img, k_cap, k_par = jax.random.split(key, 3)

    B, T = 2, 8
    images = jax.random.normal(k_img, (B, 3, 16, 16), jnp.float32)     # NCHW
    captions = jax.random.randint(k_cap, (B, T), 0, VOCAB, jnp.int32)
    params = init_params(k_par)

    out = jax.jit(image_captioning_forward)(images, captions, params)
    out = jax.block_until_ready(out)

    ref = reference_forward(images, captions, params)
    assert out.shape == (B, T, VOCAB)
    assert jnp.allclose(out, ref, atol=2e-3, rtol=2e-3), \
        float(jnp.max(jnp.abs(out - ref)))
    print("KERNEL_OK")
</pallas_src>

<mosaic_0001>
module attributes {stable_mosaic.version = 11 : i64} {
  func.func @fused_caption_kernel(%arg0: i32, %arg1: i32, %arg2: memref<2x256x32xbf16, #tpu.memory_space<vmem>>, %arg3: memref<2x8x256xbf16, #tpu.memory_space<vmem>>, %arg4: memref<32x16xbf16, #tpu.memory_space<vmem>>, %arg5: memref<1x16xf32, #tpu.memory_space<vmem>>, %arg6: memref<16x512xbf16, #tpu.memory_space<vmem>>, %arg7: memref<1x512xf32, #tpu.memory_space<vmem>>, %arg8: memref<512x256xbf16, #tpu.memory_space<vmem>>, %arg9: memref<256x256xbf16, #tpu.memory_space<vmem>>, %arg10: memref<1x256xf32, #tpu.memory_space<vmem>>, %arg11: memref<256x1024xbf16, #tpu.memory_space<vmem>>, %arg12: memref<256x1024xbf16, #tpu.memory_space<vmem>>, %arg13: memref<1x1024xf32, #tpu.memory_space<vmem>>, %arg14: memref<256x128xbf16, #tpu.memory_space<vmem>>, %arg15: memref<1x128xf32, #tpu.memory_space<vmem>>, %arg16: memref<8x2x128xf32, #tpu.memory_space<vmem>>, %arg17: memref<8x2x256xf32, #tpu.memory_space<vmem>>, %arg18: memref<2x16xf32, #tpu.memory_space<vmem>>) attributes {dimension_semantics = [#tpu.dimension_semantics<parallel>, #tpu.dimension_semantics<arbitrary>], iteration_bounds = array<i64: 1, 1>, scalar_prefetch = 0 : i64, scratch_operands = 2 : i64, tpu.core_type = #tpu.core_type<tc>, window_params = [{transform_indices = @transform_0, window_bounds = array<i64: 2, 256, 32>}, {transform_indices = @transform_1, window_bounds = array<i64: 2, 8, 256>}, {pipeline_mode = #tpu.pipeline_mode<synchronous>, transform_indices = @transform_2, window_bounds = array<i64: 32, 16>}, {pipeline_mode = #tpu.pipeline_mode<synchronous>, transform_indices = @transform_3, window_bounds = array<i64: 1, 16>}, {pipeline_mode = #tpu.pipeline_mode<synchronous>, transform_indices = @transform_4, window_bounds = array<i64: 16, 512>}, {pipeline_mode = #tpu.pipeline_mode<synchronous>, transform_indices = @transform_5, window_bounds = array<i64: 1, 512>}, {pipeline_mode = #tpu.pipeline_mode<synchronous>, transform_indices = @transform_6, window_bounds = array<i64: 512, 256>}, {pipeline_mode = #tpu.pipeline_mode<synchronous>, transform_indices = @transform_7, window_bounds = array<i64: 256, 256>}, {pipeline_mode = #tpu.pipeline_mode<synchronous>, transform_indices = @transform_8, window_bounds = array<i64: 1, 256>}, {pipeline_mode = #tpu.pipeline_mode<synchronous>, transform_indices = @transform_9, window_bounds = array<i64: 256, 1024>}, {pipeline_mode = #tpu.pipeline_mode<synchronous>, transform_indices = @transform_10, window_bounds = array<i64: 256, 1024>}, {pipeline_mode = #tpu.pipeline_mode<synchronous>, transform_indices = @transform_11, window_bounds = array<i64: 1, 1024>}, {pipeline_mode = #tpu.pipeline_mode<synchronous>, transform_indices = @transform_12, window_bounds = array<i64: 256, 128>}, {pipeline_mode = #tpu.pipeline_mode<synchronous>, transform_indices = @transform_13, window_bounds = array<i64: 1, 128>}, {transform_indices = @transform_14, window_bounds = array<i64: 8, 2, 128>}]} {
    %c0_i32 = arith.constant 0 : i32
    %0 = arith.cmpi eq, %arg1, %c0_i32 : i32
    %1 = arith.extui %0 : i1 to i32
    %c0_i32_0 = arith.constant 0 : i32
    %2 = arith.cmpi ne, %1, %c0_i32_0 : i32
    scf.if %2 {
      %cst_15 = arith.constant 0.000000e+00 : f32
      %20 = vector.broadcast %cst_15 : f32 to vector<2x16xf32>
      %c0_16 = arith.constant 0 : index
      %c0_17 = arith.constant 0 : index
      %21 = vector.load %arg18[%c0_16, %c0_17] : memref<2x16xf32, #tpu.memory_space<vmem>>, vector<2x16xf32>
      tpu.vector_store %arg18[%c0_16, %c0_17], %20 {strides = array<i32>} : memref<2x16xf32, #tpu.memory_space<vmem>>, vector<2x16xf32>,
    } else {
    }
    %c0 = arith.constant 0 : index
    %c0_1 = arith.constant 0 : index
    %c0_2 = arith.constant 0 : index
    %3 = vector.load %arg2[%c0, %c0_1, %c0_2] : memref<2x256x32xbf16, #tpu.memory_space<vmem>>, vector<2x256x32xbf16>
    %4 = vector.shape_cast %3 : vector<2x256x32xbf16> to vector<512x32xbf16>
    %c0_3 = arith.constant 0 : index
    %c0_4 = arith.constant 0 : index
    %5 = vector.load %arg4[%c0_3, %c0_4] : memref<32x16xbf16, #tpu.memory_space<vmem>>, vector<32x16xbf16>
    %cst = arith.constant dense<0.000000e+00> : vector<512x16xf32>
    %6 = tpu.matmul %4, %5, %cst {dimension_numbers = #tpu.dot_dimension_numbers<[1], [0], [0], [1], [0, 0, 1, 1], [], []>} : vector<512x32xbf16>, vector<32x16xbf16>, vector<512x16xf32> -> vector<512x16xf32>
    %c0_5 = arith.constant 0 : index
    %c0_6 = arith.constant 0 : index
    %7 = vector.load %arg5[%c0_5, %c0_6] : memref<1x16xf32, #tpu.memory_space<vmem>>, vector<1x16xf32>
    %8 = vector.broadcast %7 : vector<1x16xf32> to vector<512x16xf32>
    %9 = arith.addf %6, %8 : vector<512x16xf32>
    %cst_7 = arith.constant 0.000000e+00 : f32
    %10 = vector.broadcast %cst_7 : f32 to vector<512x16xf32>
    %11 = arith.maximumf %9, %10 : vector<512x16xf32>
    %c0_8 = arith.constant 0 : index
    %c0_9 = arith.constant 0 : index
    %12 = vector.load %arg18[%c0_8, %c0_9] : memref<2x16xf32, #tpu.memory_space<vmem>>, vector<2x16xf32>
    %13 = vector.shape_cast %11 : vector<512x16xf32> to vector<2x256x16xf32>
    %cst_10 = arith.constant dense<0.000000e+00> : vector<2x16xf32>
    %14 = vector.multi_reduction <add>, %13, %cst_10 [1] : vector<2x256x16xf32> to vector<2x16xf32>
    %15 = arith.addf %12, %14 : vector<2x16xf32>
    %c0_11 = arith.constant 0 : index
    %c0_12 = arith.constant 0 : index
    %16 = vector.load %arg18[%c0_11, %c0_12] : memref<2x16xf32, #tpu.memory_space<vmem>>, vector<2x16xf32>
    tpu.vector_store %arg18[%c0_11, %c0_12], %15 {strides = array<i32>} : memref<2x16xf32, #tpu.memory_space<vmem>>, vector<2x16xf32>,
    %c0_i32_13 = arith.constant 0 : i32
    %17 = arith.cmpi eq, %arg1, %c0_i32_13 : i32
    %18 = arith.extui %17 : i1 to i32
    %c0_i32_14 = arith.constant 0 : i32
    %19 = arith.cmpi ne, %18, %c0_i32_14 : i32
    scf.if %19 {
      %c0_15 = arith.constant 0 : index
      %c0_16 = arith.constant 0 : index
      %20 = vector.load %arg18[%c0_15, %c0_16] : memref<2x16xf32, #tpu.memory_space<vmem>>, vector<2x16xf32>
      %cst_17 = arith.constant 3.906250e-03 : f32
      %21 = vector.broadcast %cst_17 : f32 to vector<2x16xf32>
      %22 = arith.mulf %20, %21 : vector<2x16xf32>
      %23 = arith.truncf %22 : vector<2x16xf32> to vector<2x16xbf16>
      %c0_18 = arith.constant 0 : index
      %c0_19 = arith.constant 0 : index
      %24 = vector.load %arg6[%c0_18, %c0_19] : memref<16x512xbf16, #tpu.memory_space<vmem>>, vector<16x512xbf16>
      %cst_20 = arith.constant dense<0.000000e+00> : vector<2x512xf32>
      %25 = tpu.matmul %23, %24, %cst_20 {dimension_numbers = #tpu.dot_dimension_numbers<[1], [0], [0], [1], [0, 0, 1, 1], [], []>} : vector<2x16xbf16>, vector<16x512xbf16>, vector<2x512xf32> -> vector<2x512xf32>
      %c0_21 = arith.constant 0 : index
      %c0_22 = arith.constant 0 : index
      %26 = vector.load %arg7[%c0_21, %c0_22] : memref<1x512xf32, #tpu.memory_space<vmem>>, vector<1x512xf32>
      %27 = vector.broadcast %26 : vector<1x512xf32> to vector<2x512xf32>
      %28 = arith.addf %25, %27 : vector<2x512xf32>
      %29 = arith.truncf %28 : vector<2x512xf32> to vector<2x512xbf16>
      %c0_23 = arith.constant 0 : index
      %c0_24 = arith.constant 0 : index
      %30 = vector.load %arg8[%c0_23, %c0_24] : memref<512x256xbf16, #tpu.memory_space<vmem>>, vector<512x256xbf16>
      %cst_25 = arith.constant dense<0.000000e+00> : vector<2x256xf32>
      %31 = tpu.matmul %29, %30, %cst_25 {dimension_numbers = #tpu.dot_dimension_numbers<[1], [0], [0], [1], [0, 0, 1, 1], [], []>} : vector<2x512xbf16>, vector<512x256xbf16>, vector<2x256xf32> -> vector<2x256xf32>
      %c0_26 = arith.constant 0 : index
      %c0_27 = arith.constant 0 : index
      %c0_28 = arith.constant 0 : index
      %32 = vector.load %arg3[%c0_26, %c0_27, %c0_28] : memref<2x8x256xbf16, #tpu.memory_space<vmem>>, vector<2x8x256xbf16>
      %33 = vector.shape_cast %32 : vector<2x8x256xbf16> to vector<16x256xbf16>
      %c0_29 = arith.constant 0 : index
      %c0_30 = arith.constant 0 : index
      %34 = vector.load %arg9[%c0_29, %c0_30] : memref<256x256xbf16, #tpu.memory_space<vmem>>, vector<256x256xbf16>
      %cst_31 = arith.constant dense<0.000000e+00> : vector<16x256xf32>
      %35 = tpu.matmul %33, %34, %cst_31 {dimension_numbers = #tpu.dot_dimension_numbers<[1], [0], [0], [1], [0, 0, 1, 1], [], []>} : vector<16x256xbf16>, vector<256x256xbf16>, vector<16x256xf32> -> vector<16x256xf32>
      %36 = vector.shape_cast %35 : vector<16x256xf32> to vector<2x8x256xf32>
      %37 = vector.shape_cast %31 : vector<2x256xf32> to vector<2x1x256xf32>
      %38 = vector.broadcast %37 : vector<2x1x256xf32> to vector<2x8x256xf32>
      %39 = arith.addf %36, %38 : vector<2x8x256xf32>
      %c0_32 = arith.constant 0 : index
      %c0_33 = arith.constant 0 : index
      %40 = vector.load %arg10[%c0_32, %c0_33] : memref<1x256xf32, #tpu.memory_space<vmem>>, vector<1x256xf32>
      %41 = vector.shape_cast %40 : vector<1x256xf32> to vector<1x1x256xf32>
      %42 = vector.broadcast %41 : vector<1x1x256xf32> to vector<2x8x256xf32>
      %43 = arith.addf %39, %42 : vector<2x8x256xf32>
      %44 = vector.shape_cast %43 : vector<2x8x256xf32> to vector<16x256xf32>
      %45 = arith.truncf %44 : vector<16x256xf32> to vector<16x256xbf16>
      %c0_34 = arith.constant 0 : index
      %c0_35 = arith.constant 0 : index
      %46 = vector.load %arg11[%c0_34, %c0_35] : memref<256x1024xbf16, #tpu.memory_space<vmem>>, vector<256x1024xbf16>
      %cst_36 = arith.constant dense<0.000000e+00> : vector<16x1024xf32>
      %47 = tpu.matmul %45, %46, %cst_36 {dimension_numbers = #tpu.dot_dimension_numbers<[1], [0], [0], [1], [0, 0, 1, 1], [], []>} : vector<16x256xbf16>, vector<256x1024xbf16>, vector<16x1024xf32> -> vector<16x1024xf32>
      %c0_37 = arith.constant 0 : index
      %c0_38 = arith.constant 0 : index
      %48 = vector.load %arg13[%c0_37, %c0_38] : memref<1x1024xf32, #tpu.memory_space<vmem>>, vector<1x1024xf32>
      %49 = vector.broadcast %48 : vector<1x1024xf32> to vector<16x1024xf32>
      %50 = arith.addf %47, %49 : vector<16x1024xf32>
      %51 = vector.shape_cast %50 : vector<16x1024xf32> to vector<2x8x1024xf32>
      %c0_39 = arith.constant 0 : index
      %c0_40 = arith.constant 0 : index
      %52 = vector.load %arg12[%c0_39, %c0_40] : memref<256x1024xbf16, #tpu.memory_space<vmem>>, vector<256x1024xbf16>
      %cst_41 = arith.constant 0.000000e+00 : f32
      %53 = vector.broadcast %cst_41 : f32 to vector<2x256xf32>
      %cst_42 = arith.constant 0.000000e+00 : f32
      %54 = vector.broadcast %cst_42 : f32 to vector<2x256xf32>
      %55 = vector.extract_strided_slice %51 {offsets = [0, 0, 0], sizes = [2, 1, 1024], strides = [1, 1, 1]} : vector<2x8x1024xf32> to vector<2x1x1024xf32>
      %56 = vector.shape_cast %55 : vector<2x1x1024xf32> to vector<2x1024xf32>
      %57 = arith.truncf %53 : vector<2x256xf32> to vector<2x256xbf16>
      %cst_43 = arith.constant dense<0.000000e+00> : vector<2x1024xf32>
      %58 = tpu.matmul %57, %52, %cst_43 {dimension_numbers = #tpu.dot_dimension_numbers<[1], [0], [0], [1], [0, 0, 1, 1], [], []>} : vector<2x256xbf16>, vector<256x1024xbf16>, vector<2x1024xf32> -> vector<2x1024xf32>
      %59 = arith.addf %56, %58 : vector<2x1024xf32>
      %60 = vector.extract_strided_slice %59 {offsets = [0, 0], sizes = [2, 256], strides = [1, 1]} : vector<2x1024xf32> to vector<2x256xf32>
      %61 = arith.negf %60 : vector<2x256xf32>
      %62 = math.exp %61 : vector<2x256xf32>
      %cst_44 = arith.constant 1.000000e+00 : f32
      %63 = vector.broadcast %cst_44 : f32 to vector<2x256xf32>
      %64 = arith.addf %63, %62 : vector<2x256xf32>
      %65 = arith.divf %63, %64 : vector<2x256xf32>
      %66 = vector.extract_strided_slice %59 {offsets = [0, 256], sizes = [2, 256], strides = [1, 1]} : vector<2x1024xf32> to vector<2x256xf32>
      %67 = arith.negf %66 : vector<2x256xf32>
      %68 = math.exp %67 : vector<2x256xf32>
      %cst_45 = arith.constant 1.000000e+00 : f32
      %69 = vector.broadcast %cst_45 : f32 to vector<2x256xf32>
      %70 = arith.addf %69, %68 : vector<2x256xf32>
      %71 = arith.divf %69, %70 : vector<2x256xf32>
      %72 = vector.extract_strided_slice %59 {offsets = [0, 512], sizes = [2, 256], strides = [1, 1]} : vector<2x1024xf32> to vector<2x256xf32>
      %73 = math.tanh %72 : vector<2x256xf32>
      %74 = vector.extract_strided_slice %59 {offsets = [0, 768], sizes = [2, 256], strides = [1, 1]} : vector<2x1024xf32> to vector<2x256xf32>
      %75 = arith.negf %74 : vector<2x256xf32>
      %76 = math.exp %75 : vector<2x256xf32>
      %cst_46 = arith.constant 1.000000e+00 : f32
      %77 = vector.broadcast %cst_46 : f32 to vector<2x256xf32>
      %78 = arith.addf %77, %76 : vector<2x256xf32>
      %79 = arith.divf %77, %78 : vector<2x256xf32>
      %80 = arith.mulf %71, %54 : vector<2x256xf32>
      %81 = arith.mulf %65, %73 : vector<2x256xf32>
      %82 = arith.addf %80, %81 : vector<2x256xf32>
      %83 = math.tanh %82 : vector<2x256xf32>
      %84 = arith.mulf %79, %83 : vector<2x256xf32>
      %c0_47 = arith.constant 0 : index
      %c0_48 = arith.constant 0 : index
      %c0_49 = arith.constant 0 : index
      %85 = vector.load %arg17[%c0_47, %c0_48, %c0_49] : memref<8x2x256xf32, #tpu.memory_space<vmem>>, vector<1x2x256xf32>
      %86 = vector.shape_cast %85 : vector<1x2x256xf32> to vector<2x256xf32>
      %87 = vector.shape_cast %84 : vector<2x256xf32> to vector<1x2x256xf32>
      tpu.vector_store %arg17[%c0_47, %c0_48, %c0_49], %87 {strides = array<i32>} : memref<8x2x256xf32, #tpu.memory_space<vmem>>, vector<1x2x256xf32>,
      %88 = vector.extract_strided_slice %51 {offsets = [0, 1, 0], sizes = [2, 1, 1024], strides = [1, 1, 1]} : vector<2x8x1024xf32> to vector<2x1x1024xf32>
      %89 = vector.shape_cast %88 : vector<2x1x1024xf32> to vector<2x1024xf32>
      %90 = arith.truncf %84 : vector<2x256xf32> to vector<2x256xbf16>
      %cst_50 = arith.constant dense<0.000000e+00> : vector<2x1024xf32>
      %91 = tpu.matmul %90, %52, %cst_50 {dimension_numbers = #tpu.dot_dimension_numbers<[1], [0], [0], [1], [0, 0, 1, 1], [], []>} : vector<2x256xbf16>, vector<256x1024xbf16>, vector<2x1024xf32> -> vector<2x1024xf32>
      %92 = arith.addf %89, %91 : vector<2x1024xf32>
      %93 = vector.extract_strided_slice %92 {offsets = [0, 0], sizes = [2, 256], strides = [1, 1]} : vector<2x1024xf32> to vector<2x256xf32>
      %94 = arith.negf %93 : vector<2x256xf32>
      %95 = math.exp %94 : vector<2x256xf32>
      %cst_51 = arith.constant 1.000000e+00 : f32
      %96 = vector.broadcast %cst_51 : f32 to vector<2x256xf32>
      %97 = arith.addf %96, %95 : vector<2x256xf32>
      %98 = arith.divf %96, %97 : vector<2x256xf32>
      %99 = vector.extract_strided_slice %92 {offsets = [0, 256], sizes = [2, 256], strides = [1, 1]} : vector<2x1024xf32> to vector<2x256xf32>
      %100 = arith.negf %99 : vector<2x256xf32>
      %101 = math.exp %100 : vector<2x256xf32>
      %cst_52 = arith.constant 1.000000e+00 : f32
      %102 = vector.broadcast %cst_52 : f32 to vector<2x256xf32>
      %103 = arith.addf %102, %101 : vector<2x256xf32>
      %104 = arith.divf %102, %103 : vector<2x256xf32>
      %105 = vector.extract_strided_slice %92 {offsets = [0, 512], sizes = [2, 256], strides = [1, 1]} : vector<2x1024xf32> to vector<2x256xf32>
      %106 = math.tanh %105 : vector<2x256xf32>
      %107 = vector.extract_strided_slice %92 {offsets = [0, 768], sizes = [2, 256], strides = [1, 1]} : vector<2x1024xf32> to vector<2x256xf32>
      %108 = arith.negf %107 : vector<2x256xf32>
      %109 = math.exp %108 : vector<2x256xf32>
      %cst_53 = arith.constant 1.000000e+00 : f32
      %110 = vector.broadcast %cst_53 : f32 to vector<2x256xf32>
      %111 = arith.addf %110, %109 : vector<2x256xf32>
      %112 = arith.divf %110, %111 : vector<2x256xf32>
      %113 = arith.mulf %104, %82 : vector<2x256xf32>
      %114 = arith.mulf %98, %106 : vector<2x256xf32>
      %115 = arith.addf %113, %114 : vector<2x256xf32>
      %116 = math.tanh %115 : vector<2x256xf32>
      %117 = arith.mulf %112, %116 : vector<2x256xf32>
      %c1 = arith.constant 1 : index
      %c0_54 = arith.constant 0 : index
      %c0_55 = arith.constant 0 : index
      %118 = vector.load %arg17[%c1, %c0_54, %c0_55] : memref<8x2x256xf32, #tpu.memory_space<vmem>>, vector<1x2x256xf32>
      %119 = vector.shape_cast %118 : vector<1x2x256xf32> to vector<2x256xf32>
      %120 = vector.shape_cast %117 : vector<2x256xf32> to vector<1x2x256xf32>
      tpu.vector_store %arg17[%c1, %c0_54, %c0_55], %120 {strides = array<i32>} : memref<8x2x256xf32, #tpu.memory_space<vmem>>, vector<1x2x256xf32>,
      %121 = vector.extract_strided_slice %51 {offsets = [0, 2, 0], sizes = [2, 1, 1024], strides = [1, 1, 1]} : vector<2x8x1024xf32> to vector<2x1x1024xf32>
      %122 = vector.shape_cast %121 : vector<2x1x1024xf32> to vector<2x1024xf32>
      %123 = arith.truncf %117 : vector<2x256xf32> to vector<2x256xbf16>
      %cst_56 = arith.constant dense<0.000000e+00> : vector<2x1024xf32>
      %124 = tpu.matmul %123, %52, %cst_56 {dimension_numbers = #tpu.dot_dimension_numbers<[1], [0], [0], [1], [0, 0, 1, 1], [], []>} : vector<2x256xbf16>, vector<256x1024xbf16>, vector<2x1024xf32> -> vector<2x1024xf32>
      %125 = arith.addf %122, %124 : vector<2x1024xf32>
      %126 = vector.extract_strided_slice %125 {offsets = [0, 0], sizes = [2, 256], strides = [1, 1]} : vector<2x1024xf32> to vector<2x256xf32>
      %127 = arith.negf %126 : vector<2x256xf32>
      %128 = math.exp %127 : vector<2x256xf32>
      %cst_57 = arith.constant 1.000000e+00 : f32
      %129 = vector.broadcast %cst_57 : f32 to vector<2x256xf32>
      %130 = arith.addf %129, %128 : vector<2x256xf32>
      %131 = arith.divf %129, %130 : vector<2x256xf32>
      %132 = vector.extract_strided_slice %125 {offsets = [0, 256], sizes = [2, 256], strides = [1, 1]} : vector<2x1024xf32> to vector<2x256xf32>
      %133 = arith.negf %132 : vector<2x256xf32>
      %134 = math.exp %133 : vector<2x256xf32>
      %cst_58 = arith.constant 1.000000e+00 : f32
      %135 = vector.broadcast %cst_58 : f32 to vector<2x256xf32>
      %136 = arith.addf %135, %134 : vector<2x256xf32>
      %137 = arith.divf %135, %136 : vector<2x256xf32>
      %138 = vector.extract_strided_slice %125 {offsets = [0, 512], sizes = [2, 256], strides = [1, 1]} : vector<2x1024xf32> to vector<2x256xf32>
      %139 = math.tanh %138 : vector<2x256xf32>
      %140 = vector.extract_strided_slice %125 {offsets = [0, 768], sizes = [2, 256], strides = [1, 1]} : vector<2x1024xf32> to vector<2x256xf32>
      %141 = arith.negf %140 : vector<2x256xf32>
      %142 = math.exp %141 : vector<2x256xf32>
      %cst_59 = arith.constant 1.000000e+00 : f32
      %143 = vector.broadcast %cst_59 : f32 to vector<2x256xf32>
      %144 = arith.addf %143, %142 : vector<2x256xf32>
      %145 = arith.divf %143, %144 : vector<2x256xf32>
      %146 = arith.mulf %137, %115 : vector<2x256xf32>
      %147 = arith.mulf %131, %139 : vector<2x256xf32>
      %148 = arith.addf %146, %147 : vector<2x256xf32>
      %149 = math.tanh %148 : vector<2x256xf32>
      %150 = arith.mulf %145, %149 : vector<2x256xf32>
      %c2 = arith.constant 2 : index
      %c0_60 = arith.constant 0 : index
      %c0_61 = arith.constant 0 : index
      %151 = vector.load %arg17[%c2, %c0_60, %c0_61] : memref<8x2x256xf32, #tpu.memory_space<vmem>>, vector<1x2x256xf32>
      %152 = vector.shape_cast %151 : vector<1x2x256xf32> to vector<2x256xf32>
      %153 = vector.shape_cast %150 : vector<2x256xf32> to vector<1x2x256xf32>
      tpu.vector_store %arg17[%c2, %c0_60, %c0_61], %153 {strides = array<i32>} : memref<8x2x256xf32, #tpu.memory_space<vmem>>, vector<1x2x256xf32>,
      %154 = vector.extract_strided_slice %51 {offsets = [0, 3, 0], sizes = [2, 1, 1024], strides = [1, 1, 1]} : vector<2x8x1024xf32> to vector<2x1x1024xf32>
      %155 = vector.shape_cast %154 : vector<2x1x1024xf32> to vector<2x1024xf32>
      %156 = arith.truncf %150 : vector<2x256xf32> to vector<2x256xbf16>
      %cst_62 = arith.constant dense<0.000000e+00> : vector<2x1024xf32>
      %157 = tpu.matmul %156, %52, %cst_62 {dimension_numbers = #tpu.dot_dimension_numbers<[1], [0], [0], [1], [0, 0, 1, 1], [], []>} : vector<2x256xbf16>, vector<256x1024xbf16>, vector<2x1024xf32> -> vector<2x1024xf32>
      %158 = arith.addf %155, %157 : vector<2x1024xf32>
      %159 = vector.extract_strided_slice %158 {offsets = [0, 0], sizes = [2, 256], strides = [1, 1]} : vector<2x1024xf32> to vector<2x256xf32>
      %160 = arith.negf %159 : vector<2x256xf32>
      %161 = math.exp %160 : vector<2x256xf32>
      %cst_63 = arith.constant 1.000000e+00 : f32
      %162 = vector.broadcast %cst_63 : f32 to vector<2x256xf32>
      %163 = arith.addf %162, %161 : vector<2x256xf32>
      %164 = arith.divf %162, %163 : vector<2x256xf32>
      %165 = vector.extract_strided_slice %158 {offsets = [0, 256], sizes = [2, 256], strides = [1, 1]} : vector<2x1024xf32> to vector<2x256xf32>
      %166 = arith.negf %165 : vector<2x256xf32>
      %167 = math.exp %166 : vector<2x256xf32>
      %cst_64 = arith.constant 1.000000e+00 : f32
      %168 = vector.broadcast %cst_64 : f32 to vector<2x256xf32>
      %169 = arith.addf %168, %167 : vector<2x256xf32>
      %170 = arith.divf %168, %169 : vector<2x256xf32>
      %171 = vector.extract_strided_slice %158 {offsets = [0, 512], sizes = [2, 256], strides = [1, 1]} : vector<2x1024xf32> to vector<2x256xf32>
      %172 = math.tanh %171 : vector<2x256xf32>
      %173 = vector.extract_strided_slice %158 {offsets = [0, 768], sizes = [2, 256], strides = [1, 1]} : vector<2x1024xf32> to vector<2x256xf32>
      %174 = arith.negf %173 : vector<2x256xf32>
      %175 = math.exp %174 : vector<2x256xf32>
      %cst_65 = arith.constant 1.000000e+00 : f32
      %176 = vector.broadcast %cst_65 : f32 to vector<2x256xf32>
      %177 = arith.addf %176, %175 : vector<2x256xf32>
      %178 = arith.divf %176, %177 : vector<2x256xf32>
      %179 = arith.mulf %170, %148 : vector<2x256xf32>
      %180 = arith.mulf %164, %172 : vector<2x256xf32>
      %181 = arith.addf %179, %180 : vector<2x256xf32>
      %182 = math.tanh %181 : vector<2x256xf32>
      %183 = arith.mulf %178, %182 : vector<2x256xf32>
      %c3 = arith.constant 3 : index
      %c0_66 = arith.constant 0 : index
      %c0_67 = arith.constant 0 : index
      %184 = vector.load %arg17[%c3, %c0_66, %c0_67] : memref<8x2x256xf32, #tpu.memory_space<vmem>>, vector<1x2x256xf32>
      %185 = vector.shape_cast %184 : vector<1x2x256xf32> to vector<2x256xf32>
      %186 = vector.shape_cast %183 : vector<2x256xf32> to vector<1x2x256xf32>
      tpu.vector_store %arg17[%c3, %c0_66, %c0_67], %186 {strides = array<i32>} : memref<8x2x256xf32, #tpu.memory_space<vmem>>, vector<1x2x256xf32>,
      %187 = vector.extract_strided_slice %51 {offsets = [0, 4, 0], sizes = [2, 1, 1024], strides = [1, 1, 1]} : vector<2x8x1024xf32> to vector<2x1x1024xf32>
      %188 = vector.shape_cast %187 : vector<2x1x1024xf32> to vector<2x1024xf32>
      %189 = arith.truncf %183 : vector<2x256xf32> to vector<2x256xbf16>
      %cst_68 = arith.constant dense<0.000000e+00> : vector<2x1024xf32>
      %190 = tpu.matmul %189, %52, %cst_68 {dimension_numbers = #tpu.dot_dimension_numbers<[1], [0], [0], [1], [0, 0, 1, 1], [], []>} : vector<2x256xbf16>, vector<256x1024xbf16>, vector<2x1024xf32> -> vector<2x1024xf32>
      %191 = arith.addf %188, %190 : vector<2x1024xf32>
      %192 = vector.extract_strided_slice %191 {offsets = [0, 0], sizes = [2, 256], strides = [1, 1]} : vector<2x1024xf32> to vector<2x256xf32>
      %193 = arith.negf %192 : vector<2x256xf32>
      %194 = math.exp %193 : vector<2x256xf32>
      %cst_69 = arith.constant 1.000000e+00 : f32
      %195 = vector.broadcast %cst_69 : f32 to vector<2x256xf32>
      %196 = arith.addf %195, %194 : vector<2x256xf32>
      %197 = arith.divf %195, %196 : vector<2x256xf32>
      %198 = vector.extract_strided_slice %191 {offsets = [0, 256], sizes = [2, 256], strides = [1, 1]} : vector<2x1024xf32> to vector<2x256xf32>
      %199 = arith.negf %198 : vector<2x256xf32>
      %200 = math.exp %199 : vector<2x256xf32>
      %cst_70 = arith.constant 1.000000e+00 : f32
      %201 = vector.broadcast %cst_70 : f32 to vector<2x256xf32>
      %202 = arith.addf %201, %200 : vector<2x256xf32>
      %203 = arith.divf %201, %202 : vector<2x256xf32>
      %204 = vector.extract_strided_slice %191 {offsets = [0, 512], sizes = [2, 256], strides = [1, 1]} : vector<2x1024xf32> to vector<2x256xf32>
      %205 = math.tanh %204 : vector<2x256xf32>
      %206 = vector.extract_strided_slice %191 {offsets = [0, 768], sizes = [2, 256], strides = [1, 1]} : vector<2x1024xf32> to vector<2x256xf32>
      %207 = arith.negf %206 : vector<2x256xf32>
      %208 = math.exp %207 : vector<2x256xf32>
      %cst_71 = arith.constant 1.000000e+00 : f32
      %209 = vector.broadcast %cst_71 : f32 to vector<2x256xf32>
      %210 = arith.addf %209, %208 : vector<2x256xf32>
      %211 = arith.divf %209, %210 : vector<2x256xf32>
      %212 = arith.mulf %203, %181 : vector<2x256xf32>
      %213 = arith.mulf %197, %205 : vector<2x256xf32>
      %214 = arith.addf %212, %213 : vector<2x256xf32>
      %215 = math.tanh %214 : vector<2x256xf32>
      %216 = arith.mulf %211, %215 : vector<2x256xf32>
      %c4 = arith.constant 4 : index
      %c0_72 = arith.constant 0 : index
      %c0_73 = arith.constant 0 : index
      %217 = vector.load %arg17[%c4, %c0_72, %c0_73] : memref<8x2x256xf32, #tpu.memory_space<vmem>>, vector<1x2x256xf32>
      %218 = vector.shape_cast %217 : vector<1x2x256xf32> to vector<2x256xf32>
      %219 = vector.shape_cast %216 : vector<2x256xf32> to vector<1x2x256xf32>
      tpu.vector_store %arg17[%c4, %c0_72, %c0_73], %219 {strides = array<i32>} : memref<8x2x256xf32, #tpu.memory_space<vmem>>, vector<1x2x256xf32>,
      %220 = vector.extract_strided_slice %51 {offsets = [0, 5, 0], sizes = [2, 1, 1024], strides = [1, 1, 1]} : vector<2x8x1024xf32> to vector<2x1x1024xf32>
      %221 = vector.shape_cast %220 : vector<2x1x1024xf32> to vector<2x1024xf32>
      %222 = arith.truncf %216 : vector<2x256xf32> to vector<2x256xbf16>
      %cst_74 = arith.constant dense<0.000000e+00> : vector<2x1024xf32>
      %223 = tpu.matmul %222, %52, %cst_74 {dimension_numbers = #tpu.dot_dimension_numbers<[1], [0], [0], [1], [0, 0, 1, 1], [], []>} : vector<2x256xbf16>, vector<256x1024xbf16>, vector<2x1024xf32> -> vector<2x1024xf32>
      %224 = arith.addf %221, %223 : vector<2x1024xf32>
      %225 = vector.extract_strided_slice %224 {offsets = [0, 0], sizes = [2, 256], strides = [1, 1]} : vector<2x1024xf32> to vector<2x256xf32>
      %226 = arith.negf %225 : vector<2x256xf32>
      %227 = math.exp %226 : vector<2x256xf32>
      %cst_75 = arith.constant 1.000000e+00 : f32
      %228 = vector.broadcast %cst_75 : f32 to vector<2x256xf32>
      %229 = arith.addf %228, %227 : vector<2x256xf32>
      %230 = arith.divf %228, %229 : vector<2x256xf32>
      %231 = vector.extract_strided_slice %224 {offsets = [0, 256], sizes = [2, 256], strides = [1, 1]} : vector<2x1024xf32> to vector<2x256xf32>
      %232 = arith.negf %231 : vector<2x256xf32>
      %233 = math.exp %232 : vector<2x256xf32>
      %cst_76 = arith.constant 1.000000e+00 : f32
      %234 = vector.broadcast %cst_76 : f32 to vector<2x256xf32>
      %235 = arith.addf %234, %233 : vector<2x256xf32>
      %236 = arith.divf %234, %235 : vector<2x256xf32>
      %237 = vector.extract_strided_slice %224 {offsets = [0, 512], sizes = [2, 256], strides = [1, 1]} : vector<2x1024xf32> to vector<2x256xf32>
      %238 = math.tanh %237 : vector<2x256xf32>
      %239 = vector.extract_strided_slice %224 {offsets = [0, 768], sizes = [2, 256], strides = [1, 1]} : vector<2x1024xf32> to vector<2x256xf32>
      %240 = arith.negf %239 : vector<2x256xf32>
      %241 = math.exp %240 : vector<2x256xf32>
      %cst_77 = arith.constant 1.000000e+00 : f32
      %242 = vector.broadcast %cst_77 : f32 to vector<2x256xf32>
      %243 = arith.addf %242, %241 : vector<2x256xf32>
      %244 = arith.divf %242, %243 : vector<2x256xf32>
      %245 = arith.mulf %236, %214 : vector<2x256xf32>
      %246 = arith.mulf %230, %238 : vector<2x256xf32>
      %247 = arith.addf %245, %246 : vector<2x256xf32>
      %248 = math.tanh %247 : vector<2x256xf32>
      %249 = arith.mulf %244, %248 : vector<2x256xf32>
      %c5 = arith.constant 5 : index
      %c0_78 = arith.constant 0 : index
      %c0_79 = arith.constant 0 : index
      %250 = vector.load %arg17[%c5, %c0_78, %c0_79] : memref<8x2x256xf32, #tpu.memory_space<vmem>>, vector<1x2x256xf32>
      %251 = vector.shape_cast %250 : vector<1x2x256xf32> to vector<2x256xf32>
      %252 = vector.shape_cast %249 : vector<2x256xf32> to vector<1x2x256xf32>
      tpu.vector_store %arg17[%c5, %c0_78, %c0_79], %252 {strides = array<i32>} : memref<8x2x256xf32, #tpu.memory_space<vmem>>, vector<1x2x256xf32>,
      %253 = vector.extract_strided_slice %51 {offsets = [0, 6, 0], sizes = [2, 1, 1024], strides = [1, 1, 1]} : vector<2x8x1024xf32> to vector<2x1x1024xf32>
      %254 = vector.shape_cast %253 : vector<2x1x1024xf32> to vector<2x1024xf32>
      %255 = arith.truncf %249 : vector<2x256xf32> to vector<2x256xbf16>
      %cst_80 = arith.constant dense<0.000000e+00> : vector<2x1024xf32>
      %256 = tpu.matmul %255, %52, %cst_80 {dimension_numbers = #tpu.dot_dimension_numbers<[1], [0], [0], [1], [0, 0, 1, 1], [], []>} : vector<2x256xbf16>, vector<256x1024xbf16>, vector<2x1024xf32> -> vector<2x1024xf32>
      %257 = arith.addf %254, %256 : vector<2x1024xf32>
      %258 = vector.extract_strided_slice %257 {offsets = [0, 0], sizes = [2, 256], strides = [1, 1]} : vector<2x1024xf32> to vector<2x256xf32>
      %259 = arith.negf %258 : vector<2x256xf32>
      %260 = math.exp %259 : vector<2x256xf32>
      %cst_81 = arith.constant 1.000000e+00 : f32
      %261 = vector.broadcast %cst_81 : f32 to vector<2x256xf32>
      %262 = arith.addf %261, %260 : vector<2x256xf32>
      %263 = arith.divf %261, %262 : vector<2x256xf32>
      %264 = vector.extract_strided_slice %257 {offsets = [0, 256], sizes = [2, 256], strides = [1, 1]} : vector<2x1024xf32> to vector<2x256xf32>
      %265 = arith.negf %264 : vector<2x256xf32>
      %266 = math.exp %265 : vector<2x256xf32>
      %cst_82 = arith.constant 1.000000e+00 : f32
      %267 = vector.broadcast %cst_82 : f32 to vector<2x256xf32>
      %268 = arith.addf %267, %266 : vector<2x256xf32>
      %269 = arith.divf %267, %268 : vector<2x256xf32>
      %270 = vector.extract_strided_slice %257 {offsets = [0, 512], sizes = [2, 256], strides = [1, 1]} : vector<2x1024xf32> to vector<2x256xf32>
      %271 = math.tanh %270 : vector<2x256xf32>
      %272 = vector.extract_strided_slice %257 {offsets = [0, 768], sizes = [2, 256], strides = [1, 1]} : vector<2x1024xf32> to vector<2x256xf32>
      %273 = arith.negf %272 : vector<2x256xf32>
      %274 = math.exp %273 : vector<2x256xf32>
      %cst_83 = arith.constant 1.000000e+00 : f32
      %275 = vector.broadcast %cst_83 : f32 to vector<2x256xf32>
      %276 = arith.addf %275, %274 : vector<2x256xf32>
      %277 = arith.divf %275, %276 : vector<2x256xf32>
      %278 = arith.mulf %269, %247 : vector<2x256xf32>
      %279 = arith.mulf %263, %271 : vector<2x256xf32>
      %280 = arith.addf %278, %279 : vector<2x256xf32>
      %281 = math.tanh %280 : vector<2x256xf32>
      %282 = arith.mulf %277, %281 : vector<2x256xf32>
      %c6 = arith.constant 6 : index
      %c0_84 = arith.constant 0 : index
      %c0_85 = arith.constant 0 : index
      %283 = vector.load %arg17[%c6, %c0_84, %c0_85] : memref<8x2x256xf32, #tpu.memory_space<vmem>>, vector<1x2x256xf32>
      %284 = vector.shape_cast %283 : vector<1x2x256xf32> to vector<2x256xf32>
      %285 = vector.shape_cast %282 : vector<2x256xf32> to vector<1x2x256xf32>
      tpu.vector_store %arg17[%c6, %c0_84, %c0_85], %285 {strides = array<i32>} : memref<8x2x256xf32, #tpu.memory_space<vmem>>, vector<1x2x256xf32>,
      %286 = vector.extract_strided_slice %51 {offsets = [0, 7, 0], sizes = [2, 1, 1024], strides = [1, 1, 1]} : vector<2x8x1024xf32> to vector<2x1x1024xf32>
      %287 = vector.shape_cast %286 : vector<2x1x1024xf32> to vector<2x1024xf32>
      %288 = arith.truncf %282 : vector<2x256xf32> to vector<2x256xbf16>
      %cst_86 = arith.constant dense<0.000000e+00> : vector<2x1024xf32>
      %289 = tpu.matmul %288, %52, %cst_86 {dimension_numbers = #tpu.dot_dimension_numbers<[1], [0], [0], [1], [0, 0, 1, 1], [], []>} : vector<2x256xbf16>, vector<256x1024xbf16>, vector<2x1024xf32> -> vector<2x1024xf32>
      %290 = arith.addf %287, %289 : vector<2x1024xf32>
      %291 = vector.extract_strided_slice %290 {offsets = [0, 0], sizes = [2, 256], strides = [1, 1]} : vector<2x1024xf32> to vector<2x256xf32>
      %292 = arith.negf %291 : vector<2x256xf32>
      %293 = math.exp %292 : vector<2x256xf32>
      %cst_87 = arith.constant 1.000000e+00 : f32
      %294 = vector.broadcast %cst_87 : f32 to vector<2x256xf32>
      %295 = arith.addf %294, %293 : vector<2x256xf32>
      %296 = arith.divf %294, %295 : vector<2x256xf32>
      %297 = vector.extract_strided_slice %290 {offsets = [0, 256], sizes = [2, 256], strides = [1, 1]} : vector<2x1024xf32> to vector<2x256xf32>
      %298 = arith.negf %297 : vector<2x256xf32>
      %299 = math.exp %298 : vector<2x256xf32>
      %cst_88 = arith.constant 1.000000e+00 : f32
      %300 = vector.broadcast %cst_88 : f32 to vector<2x256xf32>
      %301 = arith.addf %300, %299 : vector<2x256xf32>
      %302 = arith.divf %300, %301 : vector<2x256xf32>
      %303 = vector.extract_strided_slice %290 {offsets = [0, 512], sizes = [2, 256], strides = [1, 1]} : vector<2x1024xf32> to vector<2x256xf32>
      %304 = math.tanh %303 : vector<2x256xf32>
      %305 = vector.extract_strided_slice %290 {offsets = [0, 768], sizes = [2, 256], strides = [1, 1]} : vector<2x1024xf32> to vector<2x256xf32>
      %306 = arith.negf %305 : vector<2x256xf32>
      %307 = math.exp %306 : vector<2x256xf32>
      %cst_89 = arith.constant 1.000000e+00 : f32
      %308 = vector.broadcast %cst_89 : f32 to vector<2x256xf32>
      %309 = arith.addf %308, %307 : vector<2x256xf32>
      %310 = arith.divf %308, %309 : vector<2x256xf32>
      %311 = arith.mulf %302, %280 : vector<2x256xf32>
      %312 = arith.mulf %296, %304 : vector<2x256xf32>
      %313 = arith.addf %311, %312 : vector<2x256xf32>
      %314 = math.tanh %313 : vector<2x256xf32>
      %315 = arith.mulf %310, %314 : vector<2x256xf32>
      %c7 = arith.constant 7 : index
      %c0_90 = arith.constant 0 : index
      %c0_91 = arith.constant 0 : index
      %316 = vector.load %arg17[%c7, %c0_90, %c0_91] : memref<8x2x256xf32, #tpu.memory_space<vmem>>, vector<1x2x256xf32>
      %317 = vector.shape_cast %316 : vector<1x2x256xf32> to vector<2x256xf32>
      %318 = vector.shape_cast %315 : vector<2x256xf32> to vector<1x2x256xf32>
      tpu.vector_store %arg17[%c7, %c0_90, %c0_91], %318 {strides = array<i32>} : memref<8x2x256xf32, #tpu.memory_space<vmem>>, vector<1x2x256xf32>,
      %c0_92 = arith.constant 0 : index
      %c0_93 = arith.constant 0 : index
      %c0_94 = arith.constant 0 : index
      %319 = vector.load %arg17[%c0_92, %c0_93, %c0_94] : memref<8x2x256xf32, #tpu.memory_space<vmem>>, vector<8x2x256xf32>
      %320 = vector.shape_cast %319 : vector<8x2x256xf32> to vector<16x256xf32>
      %321 = arith.truncf %320 : vector<16x256xf32> to vector<16x256xbf16>
      %c0_95 = arith.constant 0 : index
      %c0_96 = arith.constant 0 : index
      %322 = vector.load %arg14[%c0_95, %c0_96] : memref<256x128xbf16, #tpu.memory_space<vmem>>, vector<256x128xbf16>
      %cst_97 = arith.constant dense<0.000000e+00> : vector<16x128xf32>
      %323 = tpu.matmul %321, %322, %cst_97 {dimension_numbers = #tpu.dot_dimension_numbers<[1], [0], [0], [1], [0, 0, 1, 1], [], []>} : vector<16x256xbf16>, vector<256x128xbf16>, vector<16x128xf32> -> vector<16x128xf32>
      %c0_98 = arith.constant 0 : index
      %c0_99 = arith.constant 0 : index
      %324 = vector.load %arg15[%c0_98, %c0_99] : memref<1x128xf32, #tpu.memory_space<vmem>>, vector<1x128xf32>
      %325 = vector.broadcast %324 : vector<1x128xf32> to vector<16x128xf32>
      %326 = arith.addf %323, %325 : vector<16x128xf32>
      %327 = vector.shape_cast %326 : vector<16x128xf32> to vector<8x2x128xf32>
      %c0_100 = arith.constant 0 : index
      %c0_101 = arith.constant 0 : index
      %c0_102 = arith.constant 0 : index
      %328 = vector.load %arg16[%c0_100, %c0_101, %c0_102] : memref<8x2x128xf32, #tpu.memory_space<vmem>>, vector<8x2x128xf32>
      tpu.vector_store %arg16[%c0_100, %c0_101, %c0_102], %327 {strides = array<i32>} : memref<8x2x128xf32, #tpu.memory_space<vmem>>, vector<8x2x128xf32>,
    } else {
    }
    return
  }
  func.func @transform_0(%arg0: i32, %arg1: i32) -> (i32, i32, i32) {
    %c0_i32 = arith.constant 0 : i32
    %c0_i32_0 = arith.constant 0 : i32
    return %arg0, %arg1, %c0_i32 : i32, i32, i32
  }
  func.func @transform_1(%arg0: i32, %arg1: i32) -> (i32, i32, i32) {
    %c0_i32 = arith.constant 0 : i32
    %c0_i32_0 = arith.constant 0 : i32
    %c0_i32_1 = arith.constant 0 : i32
    return %arg0, %c0_i32, %c0_i32_0 : i32, i32, i32
  }
  func.func @transform_2(%arg0: i32, %arg1: i32) -> (i32, i32) {
    %c0_i32 = arith.constant 0 : i32
    %c0_i32_0 = arith.constant 0 : i32
    %c0_i32_1 = arith.constant 0 : i32
    return %c0_i32, %c0_i32_0 : i32, i32
  }
  func.func @transform_3(%arg0: i32, %arg1: i32) -> (i32, i32) {
    %c0_i32 = arith.constant 0 : i32
    %c0_i32_0 = arith.constant 0 : i32
    %c0_i32_1 = arith.constant 0 : i32
    return %c0_i32, %c0_i32_0 : i32, i32
  }
  func.func @transform_4(%arg0: i32, %arg1: i32) -> (i32, i32) {
    %c0_i32 = arith.constant 0 : i32
    %c0_i32_0 = arith.constant 0 : i32
    %c0_i32_1 = arith.constant 0 : i32
    return %c0_i32, %c0_i32_0 : i32, i32
  }
  func.func @transform_5(%arg0: i32, %arg1: i32) -> (i32, i32) {
    %c0_i32 = arith.constant 0 : i32
    %c0_i32_0 = arith.constant 0 : i32
    %c0_i32_1 = arith.constant 0 : i32
    return %c0_i32, %c0_i32_0 : i32, i32
  }
  func.func @transform_6(%arg0: i32, %arg1: i32) -> (i32, i32) {
    %c0_i32 = arith.constant 0 : i32
    %c0_i32_0 = arith.constant 0 : i32
    %c0_i32_1 = arith.constant 0 : i32
    return %c0_i32, %c0_i32_0 : i32, i32
  }
  func.func @transform_7(%arg0: i32, %arg1: i32) -> (i32, i32) {
    %c0_i32 = arith.constant 0 : i32
    %c0_i32_0 = arith.constant 0 : i32
    %c0_i32_1 = arith.constant 0 : i32
    return %c0_i32, %c0_i32_0 : i32, i32
  }
  func.func @transform_8(%arg0: i32, %arg1: i32) -> (i32, i32) {
    %c0_i32 = arith.constant 0 : i32
    %c0_i32_0 = arith.constant 0 : i32
    %c0_i32_1 = arith.constant 0 : i32
    return %c0_i32, %c0_i32_0 : i32, i32
  }
  func.func @transform_9(%arg0: i32, %arg1: i32) -> (i32, i32) {
    %c0_i32 = arith.constant 0 : i32
    %c0_i32_0 = arith.constant 0 : i32
    %c0_i32_1 = arith.constant 0 : i32
    return %c0_i32, %c0_i32_0 : i32, i32
  }
  func.func @transform_10(%arg0: i32, %arg1: i32) -> (i32, i32) {
    %c0_i32 = arith.constant 0 : i32
    %c0_i32_0 = arith.constant 0 : i32
    %c0_i32_1 = arith.constant 0 : i32
    return %c0_i32, %c0_i32_0 : i32, i32
  }
  func.func @transform_11(%arg0: i32, %arg1: i32) -> (i32, i32) {
    %c0_i32 = arith.constant 0 : i32
    %c0_i32_0 = arith.constant 0 : i32
    %c0_i32_1 = arith.constant 0 : i32
    return %c0_i32, %c0_i32_0 : i32, i32
  }
  func.func @transform_12(%arg0: i32, %arg1: i32) -> (i32, i32) {
    %c0_i32 = arith.constant 0 : i32
    %c0_i32_0 = arith.constant 0 : i32
    %c0_i32_1 = arith.constant 0 : i32
    return %c0_i32, %c0_i32_0 : i32, i32
  }
  func.func @transform_13(%arg0: i32, %arg1: i32) -> (i32, i32) {
    %c0_i32 = arith.constant 0 : i32
    %c0_i32_0 = arith.constant 0 : i32
    %c0_i32_1 = arith.constant 0 : i32
    return %c0_i32, %c0_i32_0 : i32, i32
  }
  func.func @transform_14(%arg0: i32, %arg1: i32) -> (i32, i32, i32) {
    %c0_i32 = arith.constant 0 : i32
    %c0_i32_0 = arith.constant 0 : i32
    %c0_i32_1 = arith.constant 0 : i32
    return %c0_i32, %arg0, %c0_i32_0 : i32, i32, i32
  }
}

</mosaic_0001>

<bundles_post_ra>
// kernel: image_captioning_forward.1
= control target key start
LH: loop header
LB: loop body
LE: loop exit
PB: predicated region body
PF: predicated region fallthrough
CT: control target
= control target key end

     0   :  { %vm298_vm0 = vcmask 261120   ;;  %vm629_vm1 = vcmask 130048   ;;  %vm52_vm2 = vcmask 123904   ;;  %vm17996_vm3 = vcmask 1041409   ;;  %s17685_s2 = inlined_call_operand.vmem [shape: bf16[32,16], index: 2, kind: input, shape index: {}]   ;;  %s17686_s3 = inlined_call_operand.vmem [shape: f32[1,16], index: 3, kind: input, shape index: {}]   ;;  %s17687_s0 = inlined_call_operand.vmem [shape: bf16[2,256,32], index: 0, kind: input, shape index: {}]   ;;  %s17688_s4 = inlined_call_operand.vmem [shape: bf16[16,512], index: 4, kind: input, shape index: {}]   ;;  %s17689_s6 = inlined_call_operand.vmem [shape: bf16[512,256], index: 6, kind: input, shape index: {}]   ;;  %s17690_s5 = inlined_call_operand.vmem [shape: f32[1,512], index: 5, kind: input, shape index: {}]   ;;  %s17691_s7 = inlined_call_operand.vmem [shape: bf16[256,256], index: 7, kind: input, shape index: {}]   ;;  %s17692_s1 = inlined_call_operand.vmem [shape: bf16[2,8,256], index: 1, kind: input, shape index: {}]   ;;  %s17693_s9 = inlined_call_operand.vmem [shape: bf16[256,1024], index: 9, kind: input, shape index: {}]   ;;  %s17694_s8 = inlined_call_operand.vmem [shape: f32[1,256], index: 8, kind: input, shape index: {}]   ;;  %s17695_s10 = inlined_call_operand.vmem [shape: bf16[256,1024], index: 10, kind: input, shape index: {}]   ;;  %s17696_s11 = inlined_call_operand.vmem [shape: f32[1,1024], index: 11, kind: input, shape index: {}]   ;;  %s17697_s13 = inlined_call_operand.vmem [shape: f32[1,128], index: 13, kind: input, shape index: {}]   ;;  %s17698_s12 = inlined_call_operand.vmem [shape: bf16[256,128], index: 12, kind: input, shape index: {}]   ;;  %s17699_s14 = inlined_call_operand.vmem [shape: f32[8,2,128], index: 14, kind: output, shape index: {}]  }
   0x1   :  { %v9975_v0 = vld [vmem:[%s17685_s2 + $0x8] sm:$0xff]  ;;  %v9974_v1 = vld [vmem:[%s17685_s2] sm:$0xff]  ;;  %v9944_v4 = vld [vmem:[%s17687_s0 + $0x10] sm:$0xff]  ;;  %vm1626_vm4 = vcmask 1040384  }
   0x2   :  { %401 = vmatpush.bf16.msra.mxu0 %v9975_v0  ;;  %v9942_v2 = vld [vmem:[%s17687_s0] sm:$0xff]  ;;  %v9943_v3 = vld [vmem:[%s17687_s0 + $0x8] sm:$0xff]  ;;  %v9945_v5 = vld [vmem:[%s17687_s0 + $0x18] sm:$0xff] }
   0x3   :  { %v9946_v6 = vld [vmem:[%s17687_s0 + $0x20] sm:$0xff]  ;;  %v9947_v7 = vld [vmem:[%s17687_s0 + $0x28] sm:$0xff]  ;;  %v9948_v8 = vld [vmem:[%s17687_s0 + $0x30] sm:$0xff] }
   0x4   :  { %v9949_v9 = vld [vmem:[%s17687_s0 + $0x38] sm:$0xff]  ;;  %v9950_v10 = vld [vmem:[%s17687_s0 + $0x40] sm:$0xff]  ;;  %v9951_v21 = vld [vmem:[%s17687_s0 + $0x48] sm:$0xff] }
   0x5   :  { %v10987_v12 = vld [vmem:[%s17686_s3] ss:$0 sm:$0xff]  ;;  %v9952_v32 = vld [vmem:[%s17687_s0 + $0x50] sm:$0xff]  ;;  %v9953_v43 = vld [vmem:[%s17687_s0 + $0x58] sm:$0xff] }
   0x6   :  { %402 = vmatpush.bf16.msra.mxu0 %v9974_v1  ;;  %v9954_v54 = vld [vmem:[%s17687_s0 + $0x60] sm:$0xff]  ;;  %v9955_v1 = vld [vmem:[%s17687_s0 + $0x68] sm:$0xff] }
   0x9   :  { %8314 = vmatmul.msk.bf16.vlgmr.msra.gmra.mxu0 %vm298_vm0, %v9942_v2 }
  0x19   :  { %8315 = vmatmul.msk.bf16.gmra.mxu0 %vm298_vm0, %v9943_v3 }
  0x29   :  { %8316 = vmatmul.msk.bf16.gmra.mxu0 %vm298_vm0, %v9944_v4 }
  0x39   :  { %8317 = vmatmul.msk.bf16.gmra.mxu0 %vm298_vm0, %v9945_v5 }
  0x49   :  { %8318 = vmatmul.msk.bf16.gmra.mxu0 %vm298_vm0, %v9946_v6 }
  0x59   :  { %8319 = vmatmul.msk.bf16.gmra.mxu0 %vm298_vm0, %v9947_v7 }
  0x69   :  { %8320 = vmatmul.msk.bf16.gmra.mxu0 %vm298_vm0, %v9948_v8 }
  0x79   :  { %8321 = vmatmul.msk.bf16.gmra.mxu0 %vm298_vm0, %v9949_v9 }
  0x86   :  { %v404_v11 = vpop.f32.mrf.mxu0 }
  0x87   :  { %v405_v13 = vadd.f32 %v10987_v12, %v404_v11 }
  0x89   :  { %8322 = vmatmul.msk.bf16.gmra.mxu0 %vm298_vm0, %v9950_v10  ;;  %v564_v15 = vmax.f32 %v405_v13, 0.0  ;;  %v9956_v13 = vld [vmem:[%s17687_s0 + $0x70] sm:$0xff] }
  0x8b   :  { %v630_v18 = vsel %vm629_vm1, %v564_v15, 0.0 }
  0x8e   :  { %v406_v14 = vpop.f32.mrf.mxu0 }
  0x8f   :  { %v407_v16 = vadd.f32 %v10987_v12, %v406_v14 }
  0x91   :  { %v565_v17 = vmax.f32 %v407_v16, 0.0 }
  0x93   :  { %v631_v19 = vsel %vm629_vm1, %v565_v17, 0.0 }
  0x94   :  { %v632_v20 = vadd.f32 %v631_v19, %v630_v18 }
  0x96   :  { %v409_v22 = vpop.f32.mrf.mxu0 }
  0x97   :  { %v410_v23 = vadd.f32 %v10987_v12, %v409_v22 }
  0x99   :  { %v566_v24 = vmax.f32 %v410_v23, 0.0  ;;  %8323 = vmatmul.msk.bf16.gmra.mxu0 %vm298_vm0, %v9951_v21 }
  0x9b   :  { %v633_v25 = vsel %vm629_vm1, %v566_v24, 0.0  ;;  %v9957_v24 = vld [vmem:[%s17687_s0 + $0x78] sm:$0xff] }
  0x9c   :  { %v634_v26 = vadd.f32 %v633_v25, %v632_v20 }
  0x9e   :  { %v411_v27 = vpop.f32.mrf.mxu0 }
  0x9f   :  { %v412_v28 = vadd.f32 %v10987_v12, %v411_v27 }
  0xa1   :  { %v567_v29 = vmax.f32 %v412_v28, 0.0 }
  0xa3   :  { %v635_v30 = vsel %vm629_vm1, %v567_v29, 0.0 }
  0xa4   :  { %v636_v31 = vadd.f32 %v635_v30, %v634_v26 }
  0xa6   :  { %v414_v33 = vpop.f32.mrf.mxu0 }
  0xa7   :  { %v415_v34 = vadd.f32 %v10987_v12, %v414_v33 }
  0xa9   :  { %v568_v35 = vmax.f32 %v415_v34, 0.0  ;;  %8324 = vmatmul.msk.bf16.gmra.mxu0 %vm298_vm0, %v9952_v32 }
  0xab   :  { %v637_v36 = vsel %vm629_vm1, %v568_v35, 0.0  ;;  %v9958_v35 = vld [vmem:[%s17687_s0 + $0x80] sm:$0xff] }
  0xac   :  { %v638_v37 = vadd.f32 %v637_v36, %v636_v31 }
  0xae   :  { %v416_v38 = vpop.f32.mrf.mxu0 }
  0xaf   :  { %v417_v39 = vadd.f32 %v10987_v12, %v416_v38 }
  0xb1   :  { %v569_v40 = vmax.f32 %v417_v39, 0.0 }
  0xb3   :  { %v639_v41 = vsel %vm629_vm1, %v569_v40, 0.0 }
  0xb4   :  { %v640_v42 = vadd.f32 %v639_v41, %v638_v37 }
  0xb6   :  { %v419_v44 = vpop.f32.mrf.mxu0 }
  0xb7   :  { %v420_v45 = vadd.f32 %v10987_v12, %v419_v44 }
  0xb9   :  { %v570_v46 = vmax.f32 %v420_v45, 0.0  ;;  %8325 = vmatmul.msk.bf16.gmra.mxu0 %vm298_vm0, %v9953_v43 }
  0xbb   :  { %v641_v47 = vsel %vm629_vm1, %v570_v46, 0.0  ;;  %v9959_v46 = vld [vmem:[%s17687_s0 + $0x88] sm:$0xff] }
  0xbc   :  { %v642_v48 = vadd.f32 %v641_v47, %v640_v42 }
  0xbe   :  { %v421_v49 = vpop.f32.mrf.mxu0 }
  0xbf   :  { %v422_v50 = vadd.f32 %v10987_v12, %v421_v49 }
  0xc1   :  { %v571_v51 = vmax.f32 %v422_v50, 0.0 }
  0xc3   :  { %v643_v52 = vsel %vm629_vm1, %v571_v51, 0.0 }
  0xc4   :  { %v644_v53 = vadd.f32 %v643_v52, %v642_v48 }
  0xc6   :  { %v424_v55 = vpop.f32.mrf.mxu0 }
  0xc7   :  { %v425_v56 = vadd.f32 %v10987_v12, %v424_v55 }
  0xc9   :  { %v572_v57 = vmax.f32 %v425_v56, 0.0  ;;  %8326 = vmatmul.msk.bf16.gmra.mxu0 %vm298_vm0, %v9954_v54 }
  0xcb   :  { %v645_v58 = vsel %vm629_vm1, %v572_v57, 0.0  ;;  %v9960_v57 = vld [vmem:[%s17687_s0 + $0x90] sm:$0xff] }
  0xcc   :  { %v646_v59 = vadd.f32 %v645_v58, %v644_v53 }
  0xce   :  { %v426_v60 = vpop.f32.mrf.mxu0 }
  0xcf   :  { %v427_v61 = vadd.f32 %v10987_v12, %v426_v60 }
  0xd1   :  { %v573_v62 = vmax.f32 %v427_v61, 0.0 }
  0xd3   :  { %v647_v63 = vsel %vm629_vm1, %v573_v62, 0.0 }
  0xd4   :  { %v648_v0 = vadd.f32 %v647_v63, %v646_v59 }
  0xd6   :  { %v429_v2 = vpop.f32.mrf.mxu0 }
  0xd7   :  { %v430_v3 = vadd.f32 %v10987_v12, %v429_v2 }
  0xd9   :  { %v574_v4 = vmax.f32 %v430_v3, 0.0  ;;  %8327 = vmatmul.msk.bf16.gmra.mxu0 %vm298_vm0, %v9955_v1 }
  0xdb   :  { %v649_v5 = vsel %vm629_vm1, %v574_v4, 0.0  ;;  %v9961_v4 = vld [vmem:[%s17687_s0 + $0x98] sm:$0xff] }
  0xdc   :  { %v650_v6 = vadd.f32 %v649_v5, %v648_v0 }
  0xde   :  { %v431_v7 = vpop.f32.mrf.mxu0 }
  0xdf   :  { %v432_v8 = vadd.f32 %v10987_v12, %v431_v7 }
  0xe1   :  { %v575_v9 = vmax.f32 %v432_v8, 0.0 }
  0xe3   :  { %v651_v10 = vsel %vm629_vm1, %v575_v9, 0.0 }
  0xe4   :  { %v652_v11 = vadd.f32 %v651_v10, %v650_v6 }
  0xe6   :  { %v434_v14 = vpop.f32.mrf.mxu0 }
  0xe7   :  { %v435_v15 = vadd.f32 %v10987_v12, %v434_v14 }
  0xe9   :  { %v576_v16 = vmax.f32 %v435_v15, 0.0  ;;  %8328 = vmatmul.msk.bf16.gmra.mxu0 %vm298_vm0, %v9956_v13 }
  0xeb   :  { %v653_v17 = vsel %vm629_vm1, %v576_v16, 0.0  ;;  %v9962_v16 = vld [vmem:[%s17687_s0 + $0xa0] sm:$0xff] }
  0xec   :  { %v654_v18 = vadd.f32 %v653_v17, %v652_v11 }
  0xee   :  { %v436_v19 = vpop.f32.mrf.mxu0 }
  0xef   :  { %v437_v20 = vadd.f32 %v10987_v12, %v436_v19 }
  0xf1   :  { %v577_v21 = vmax.f32 %v437_v20, 0.0 }
  0xf3   :  { %v655_v22 = vsel %vm629_vm1, %v577_v21, 0.0 }
  0xf4   :  { %v656_v23 = vadd.f32 %v655_v22, %v654_v18 }
  0xf6   :  { %v439_v25 = vpop.f32.mrf.mxu0 }
  0xf7   :  { %v440_v26 = vadd.f32 %v10987_v12, %v439_v25 }
  0xf9   :  { %v578_v27 = vmax.f32 %v440_v26, 0.0  ;;  %8329 = vmatmul.msk.bf16.gmra.mxu0 %vm298_vm0, %v9957_v24 }
  0xfb   :  { %v657_v28 = vsel %vm629_vm1, %v578_v27, 0.0  ;;  %v9963_v27 = vld [vmem:[%s17687_s0 + $0xa8] sm:$0xff] }
  0xfc   :  { %v658_v29 = vadd.f32 %v657_v28, %v656_v23 }
  0xfe   :  { %v441_v30 = vpop.f32.mrf.mxu0 }
  0xff   :  { %v442_v31 = vadd.f32 %v10987_v12, %v441_v30 }
 0x101   :  { %v579_v32 = vmax.f32 %v442_v31, 0.0 }
 0x103   :  { %v659_v33 = vsel %vm629_vm1, %v579_v32, 0.0 }
 0x104   :  { %v660_v34 = vadd.f32 %v659_v33, %v658_v29 }
 0x106   :  { %v444_v36 = vpop.f32.mrf.mxu0 }
 0x107   :  { %v445_v37 = vadd.f32 %v10987_v12, %v444_v36 }
 0x109   :  { %v580_v38 = vmax.f32 %v445_v37, 0.0  ;;  %8330 = vmatmul.msk.bf16.gmra.mxu0 %vm298_vm0, %v9958_v35 }
 0x10b   :  { %v661_v39 = vsel %vm629_vm1, %v580_v38, 0.0  ;;  %v9964_v38 = vld [vmem:[%s17687_s0 + $0xb0] sm:$0xff] }
 0x10c   :  { %v662_v40 = vadd.f32 %v661_v39, %v660_v34 }
 0x10e   :  { %v446_v41 = vpop.f32.mrf.mxu0 }
 0x10f   :  { %v447_v42 = vadd.f32 %v10987_v12, %v446_v41 }
 0x111   :  { %v581_v43 = vmax.f32 %v447_v42, 0.0 }
 0x113   :  { %v663_v44 = vsel %vm629_vm1, %v581_v43, 0.0 }
 0x114   :  { %v664_v45 = vadd.f32 %v663_v44, %v662_v40 }
 0x116   :  { %v449_v47 = vpop.f32.mrf.mxu0 }
 0x117   :  { %v450_v48 = vadd.f32 %v10987_v12, %v449_v47 }
 0x119   :  { %v582_v49 = vmax.f32 %v450_v48, 0.0  ;;  %8331 = vmatmul.msk.bf16.gmra.mxu0 %vm298_vm0, %v9959_v46 }
 0x11b   :  { %v665_v50 = vsel %vm629_vm1, %v582_v49, 0.0  ;;  %v9965_v49 = vld [vmem:[%s17687_s0 + $0xb8] sm:$0xff] }
 0x11c   :  { %v666_v51 = vadd.f32 %v665_v50, %v664_v45 }
 0x11e   :  { %v451_v52 = vpop.f32.mrf.mxu0 }
 0x11f   :  { %v452_v53 = vadd.f32 %v10987_v12, %v451_v52 }
 0x121   :  { %v583_v54 = vmax.f32 %v452_v53, 0.0 }
 0x123   :  { %v667_v55 = vsel %vm629_vm1, %v583_v54, 0.0 }
 0x124   :  { %v668_v56 = vadd.f32 %v667_v55, %v666_v51 }
 0x126   :  { %v454_v58 = vpop.f32.mrf.mxu0 }
 0x127   :  { %v455_v59 = vadd.f32 %v10987_v12, %v454_v58 }
 0x129   :  { %v584_v60 = vmax.f32 %v455_v59, 0.0  ;;  %8332 = vmatmul.msk.bf16.gmra.mxu0 %vm298_vm0, %v9960_v57 }
 0x12b   :  { %v669_v61 = vsel %vm629_vm1, %v584_v60, 0.0  ;;  %v9966_v60 = vld [vmem:[%s17687_s0 + $0xc0] sm:$0xff] }
 0x12c   :  { %v670_v62 = vadd.f32 %v669_v61, %v668_v56 }
 0x12e   :  { %v456_v63 = vpop.f32.mrf.mxu0 }
 0x12f   :  { %v457_v0 = vadd.f32 %v10987_v12, %v456_v63 }
 0x131   :  { %v585_v1 = vmax.f32 %v457_v0, 0.0 }
 0x133   :  { %v671_v2 = vsel %vm629_vm1, %v585_v1, 0.0 }
 0x134   :  { %v672_v3 = vadd.f32 %v671_v2, %v670_v62 }
 0x136   :  { %v459_v5 = vpop.f32.mrf.mxu0 }
 0x137   :  { %v460_v6 = vadd.f32 %v10987_v12, %v459_v5 }
 0x139   :  { %v586_v7 = vmax.f32 %v460_v6, 0.0  ;;  %8333 = vmatmul.msk.bf16.gmra.mxu0 %vm298_vm0, %v9961_v4  ;;  %v9967_v6 = vld [vmem:[%s17687_s0 + $0xc8] sm:$0xff] }
 0x13b   :  { %v673_v8 = vsel %vm629_vm1, %v586_v7, 0.0 }
 0x13c   :  { %v674_v9 = vadd.f32 %v673_v8, %v672_v3 }
 0x13e   :  { %v461_v10 = vpop.f32.mrf.mxu0 }
 0x13f   :  { %v462_v11 = vadd.f32 %v10987_v12, %v461_v10 }
 0x141   :  { %v587_v13 = vmax.f32 %v462_v11, 0.0 }
 0x143   :  { %v675_v14 = vsel %vm629_vm1, %v587_v13, 0.0 }
 0x144   :  { %v676_v15 = vadd.f32 %v675_v14, %v674_v9 }
 0x146   :  { %v464_v17 = vpop.f32.mrf.mxu0 }
 0x147   :  { %v465_v18 = vadd.f32 %v10987_v12, %v464_v17 }
 0x149   :  { %v588_v19 = vmax.f32 %v465_v18, 0.0  ;;  %8334 = vmatmul.msk.bf16.gmra.mxu0 %vm298_vm0, %v9962_v16  ;;  %v9968_v18 = vld [vmem:[%s17687_s0 + $0xd0] sm:$0xff] }
 0x14b   :  { %v677_v20 = vsel %vm629_vm1, %v588_v19, 0.0 }
 0x14c   :  { %v678_v21 = vadd.f32 %v677_v20, %v676_v15 }
 0x14e   :  { %v466_v22 = vpop.f32.mrf.mxu0 }
 0x14f   :  { %v467_v23 = vadd.f32 %v10987_v12, %v466_v22 }
 0x151   :  { %v589_v24 = vmax.f32 %v467_v23, 0.0 }
 0x153   :  { %v679_v25 = vsel %vm629_vm1, %v589_v24, 0.0 }
 0x154   :  { %v680_v26 = vadd.f32 %v679_v25, %v678_v21 }
 0x156   :  { %v469_v28 = vpop.f32.mrf.mxu0 }
 0x157   :  { %v470_v29 = vadd.f32 %v10987_v12, %v469_v28 }
 0x159   :  { %v590_v30 = vmax.f32 %v470_v29, 0.0  ;;  %8335 = vmatmul.msk.bf16.gmra.mxu0 %vm298_vm0, %v9963_v27  ;;  %v9969_v29 = vld [vmem:[%s17687_s0 + $0xd8] sm:$0xff] }
 0x15b   :  { %v681_v31 = vsel %vm629_vm1, %v590_v30, 0.0 }
 0x15c   :  { %v682_v32 = vadd.f32 %v681_v31, %v680_v26 }
 0x15e   :  { %v471_v33 = vpop.f32.mrf.mxu0 }
 0x15f   :  { %v472_v34 = vadd.f32 %v10987_v12, %v471_v33 }
 0x161   :  { %v591_v35 = vmax.f32 %v472_v34, 0.0 }
 0x163   :  { %v683_v36 = vsel %vm629_vm1, %v591_v35, 0.0 }
 0x164   :  { %v684_v37 = vadd.f32 %v683_v36, %v682_v32 }
 0x166   :  { %v474_v39 = vpop.f32.mrf.mxu0 }
 0x167   :  { %v475_v40 = vadd.f32 %v10987_v12, %v474_v39 }
 0x169   :  { %v592_v41 = vmax.f32 %v475_v40, 0.0  ;;  %8336 = vmatmul.msk.bf16.gmra.mxu0 %vm298_vm0, %v9964_v38  ;;  %v9970_v40 = vld [vmem:[%s17687_s0 + $0xe0] sm:$0xff] }
 0x16b   :  { %v685_v42 = vsel %vm629_vm1, %v592_v41, 0.0 }
 0x16c   :  { %v686_v43 = vadd.f32 %v685_v42, %v684_v37 }
 0x16e   :  { %v476_v44 = vpop.f32.mrf.mxu0 }
 0x16f   :  { %v477_v45 = vadd.f32 %v10987_v12, %v476_v44 }
 0x171   :  { %v593_v46 = vmax.f32 %v477_v45, 0.0 }
 0x173   :  { %v687_v47 = vsel %vm629_vm1, %v593_v46, 0.0 }
 0x174   :  { %v688_v48 = vadd.f32 %v687_v47, %v686_v43 }
 0x176   :  { %v479_v50 = vpop.f32.mrf.mxu0 }
 0x177   :  { %v480_v51 = vadd.f32 %v10987_v12, %v479_v50 }
 0x179   :  { %v594_v52 = vmax.f32 %v480_v51, 0.0  ;;  %8337 = vmatmul.msk.bf16.gmra.mxu0 %vm298_vm0, %v9965_v49  ;;  %v9971_v49 = vld [vmem:[%s17687_s0 + $0xe8] sm:$0xff] }
 0x17b   :  { %v689_v53 = vsel %vm629_vm1, %v594_v52, 0.0 }
 0x17c   :  { %v690_v54 = vadd.f32 %v689_v53, %v688_v48 }
 0x17e   :  { %v481_v55 = vpop.f32.mrf.mxu0 }
 0x17f   :  { %v482_v56 = vadd.f32 %v10987_v12, %v481_v55 }
 0x181   :  { %v595_v57 = vmax.f32 %v482_v56, 0.0 }
 0x183   :  { %v691_v58 = vsel %vm629_vm1, %v595_v57, 0.0 }
 0x184   :  { %v11114_v59 = vadd.f32 %v691_v58, %v690_v54 }
 0x186   :  { %v484_v61 = vpop.f32.mrf.mxu0 }
 0x187   :  { %v485_v62 = vadd.f32 %v10987_v12, %v484_v61  ;;  %v9972_v61 = vld [vmem:[%s17687_s0 + $0xf0] sm:$0xff] }
 0x189   :  { %8338 = vmatmul.msk.bf16.gmra.mxu0 %vm298_vm0, %v9966_v60  ;;  %v596_v0 = vmax.f32 %v485_v62, 0.0 }
 0x18b   :  { %v699_v3 = vsel %vm629_vm1, %v596_v0, 0.0 }
 0x18e   :  { %v486_v63 = vpop.f32.mrf.mxu0 }
 0x18f   :  { %v487_v1 = vadd.f32 %v10987_v12, %v486_v63 }
 0x191   :  { %v597_v2 = vmax.f32 %v487_v1, 0.0 }
 0x193   :  { %v700_v4 = vsel %vm629_vm1, %v597_v2, 0.0 }
 0x194   :  { %v701_v5 = vadd.f32 %v700_v4, %v699_v3 }
 0x196   :  { %v489_v7 = vpop.f32.mrf.mxu0 }
 0x197   :  { %v490_v8 = vadd.f32 %v10987_v12, %v489_v7 }
 0x199   :  { %v598_v9 = vmax.f32 %v490_v8, 0.0  ;;  %8339 = vmatmul.msk.bf16.gmra.mxu0 %vm298_vm0, %v9967_v6  ;;  %v9973_v8 = vld [vmem:[%s17687_s0 + $0xf8] sm:$0xff] }
 0x19b   :  { %v702_v10 = vsel %vm629_vm1, %v598_v9, 0.0 }
 0x19c   :  { %v703_v11 = vadd.f32 %v702_v10, %v701_v5 }
 0x19e   :  { %v491_v13 = vpop.f32.mrf.mxu0 }
 0x19f   :  { %v492_v14 = vadd.f32 %v10987_v12, %v491_v13 }
 0x1a1   :  { %v599_v15 = vmax.f32 %v492_v14, 0.0 }
 0x1a3   :  { %v704_v16 = vsel %vm629_vm1, %v599_v15, 0.0 }
 0x1a4   :  { %v705_v17 = vadd.f32 %v704_v16, %v703_v11 }
 0x1a6   :  { %v494_v19 = vpop.f32.mrf.mxu0 }
 0x1a7   :  { %v495_v20 = vadd.f32 %v10987_v12, %v494_v19 }
 0x1a9   :  { %v600_v21 = vmax.f32 %v495_v20, 0.0  ;;  %8340 = vmatmul.msk.bf16.gmra.mxu0 %vm298_vm0, %v9968_v18 }
 0x1ab   :  { %v706_v22 = vsel %vm629_vm1, %v600_v21, 0.0 }
 0x1ac   :  { %v707_v23 = vadd.f32 %v706_v22, %v705_v17 }
 0x1ae   :  { %v496_v24 = vpop.f32.mrf.mxu0 }
 0x1af   :  { %v497_v25 = vadd.f32 %v10987_v12, %v496_v24 }
 0x1b1   :  { %v601_v26 = vmax.f32 %v497_v25, 0.0 }
 0x1b3   :  { %v708_v27 = vsel %vm629_vm1, %v601_v26, 0.0 }
 0x1b4   :  { %v709_v28 = vadd.f32 %v708_v27, %v707_v23 }
 0x1b6   :  { %v499_v30 = vpop.f32.mrf.mxu0 }
 0x1b7   :  { %v500_v31 = vadd.f32 %v10987_v12, %v499_v30 }
 0x1b9   :  { %v602_v32 = vmax.f32 %v500_v31, 0.0  ;;  %8341 = vmatmul.msk.bf16.gmra.mxu0 %vm298_vm0, %v9969_v29 }
 0x1bb   :  { %v710_v33 = vsel %vm629_vm1, %v602_v32, 0.0 }
 0x1bc   :  { %v711_v34 = vadd.f32 %v710_v33, %v709_v28 }
 0x1be   :  { %v501_v35 = vpop.f32.mrf.mxu0 }
 0x1bf   :  { %v502_v36 = vadd.f32 %v10987_v12, %v501_v35 }
 0x1c1   :  { %v603_v37 = vmax.f32 %v502_v36, 0.0 }
 0x1c3   :  { %v712_v38 = vsel %vm629_vm1, %v603_v37, 0.0 }
 0x1c4   :  { %v713_v39 = vadd.f32 %v712_v38, %v711_v34 }
 0x1c6   :  { %v504_v41 = vpop.f32.mrf.mxu0 }
 0x1c7   :  { %v505_v42 = vadd.f32 %v10987_v12, %v504_v41 }
 0x1c9   :  { %v604_v43 = vmax.f32 %v505_v42, 0.0  ;;  %8342 = vmatmul.msk.bf16.gmra.mxu0 %vm298_vm0, %v9970_v40 }
 0x1cb   :  { %v714_v44 = vsel %vm629_vm1, %v604_v43, 0.0 }
 0x1cc   :  { %v715_v45 = vadd.f32 %v714_v44, %v713_v39 }
 0x1ce   :  { %v506_v46 = vpop.f32.mrf.mxu0 }
 0x1cf   :  { %v507_v47 = vadd.f32 %v10987_v12, %v506_v46 }
 0x1d1   :  { %v605_v48 = vmax.f32 %v507_v47, 0.0 }
 0x1d3   :  { %v716_v51 = vsel %vm629_vm1, %v605_v48, 0.0 }
 0x1d4   :  { %v717_v54 = vadd.f32 %v716_v51, %v715_v45 }
 0x1d6   :  { %v509_v50 = vpop.f32.mrf.mxu0 }
 0x1d7   :  { %v510_v52 = vadd.f32 %v10987_v12, %v509_v50 }
 0x1d9   :  { %v606_v53 = vmax.f32 %v510_v52, 0.0  ;;  %8343 = vmatmul.msk.bf16.gmra.mxu0 %vm298_vm0, %v9971_v49 }
 0x1db   :  { %v718_v55 = vsel %vm629_vm1, %v606_v53, 0.0  ;;  %v10866_v53 = vmov 0.0  }
 0x1dc   :  { %v719_v56 = vadd.f32 %v718_v55, %v717_v54  ;;  %53 = vst.msk [vmem:[#allocation3] sm:$0x3] %vm52_vm2, %v10866_v53 }
 0x1de   :  { %v511_v57 = vpop.f32.mrf.mxu0 }
 0x1df   :  { %v512_v58 = vadd.f32 %v10987_v12, %v511_v57 }
 0x1e1   :  { %v607_v60 = vmax.f32 %v512_v58, 0.0 }
 0x1e3   :  { %v720_v63 = vsel %vm629_vm1, %v607_v60, 0.0 }
 0x1e4   :  { %v721_v2 = vadd.f32 %v720_v63, %v719_v56 }
 0x1e6   :  { %v514_v62 = vpop.f32.mrf.mxu0 }
 0x1e7   :  { %v515_v0 = vadd.f32 %v10987_v12, %v514_v62 }
 0x1e9   :  { %v608_v1 = vmax.f32 %v515_v0, 0.0  ;;  %8344 = vmatmul.msk.bf16.gmra.mxu0 %vm298_vm0, %v9972_v61 }
 0x1eb   :  { %v722_v3 = vsel %vm629_vm1, %v608_v1, 0.0 }
 0x1ec   :  { %v723_v4 = vadd.f32 %v722_v3, %v721_v2 }
 0x1ee   :  { %v516_v5 = vpop.f32.mrf.mxu0 }
 0x1ef   :  { %v517_v6 = vadd.f32 %v10987_v12, %v516_v5 }
 0x1f1   :  { %v609_v7 = vmax.f32 %v517_v6, 0.0 }
 0x1f3   :  { %v724_v10 = vsel %vm629_vm1, %v609_v7, 0.0 }
 0x1f4   :  { %v725_v14 = vadd.f32 %v724_v10, %v723_v4 }
 0x1f6   :  { %v519_v9 = vpop.f32.mrf.mxu0 }
 0x1f7   :  { %v520_v11 = vadd.f32 %v10987_v12, %v519_v9 }
 0x1f9   :  { %v610_v13 = vmax.f32 %v520_v11, 0.0  ;;  %8345 = vmatmul.msk.bf16.gmra.mxu0 %vm298_vm0, %v9973_v8 }
 0x1fb   :  { %v726_v15 = vsel %vm629_vm1, %v610_v13, 0.0 }
 0x1fc   :  { %v727_v16 = vadd.f32 %v726_v15, %v725_v14 }
 0x1fe   :  { %v521_v17 = vpop.f32.mrf.mxu0 }
 0x1ff   :  { %v522_v18 = vadd.f32 %v10987_v12, %v521_v17 }
 0x201   :  { %v611_v19 = vmax.f32 %v522_v18, 0.0 }
 0x203   :  { %v728_v21 = vsel %vm629_vm1, %v611_v19, 0.0  ;;  %v8348_v19 = vld [vmem:[%s17688_s4] sm:$0xf] }
 0x204   :  { %v729_v24 = vadd.f32 %v728_v21, %v727_v16  ;;  %v9976_v21 = vld [vmem:[%s17688_s4 + $0x4] sm:$0xf] }
 0x206   :  { %v524_v20 = vpop.f32.mrf.mxu0 }
 0x207   :  { %v525_v22 = vadd.f32 %v10987_v12, %v524_v20  ;;  %v9978_v20 = vld [vmem:[%s17688_s4 + $0xc] sm:$0xf0] }
 0x209   :  { %v612_v23 = vmax.f32 %v525_v22, 0.0 }
 0x20b   :  { %v730_v25 = vsel %vm629_vm1, %v612_v23, 0.0 }
 0x20c   :  { %v731_v26 = vadd.f32 %v730_v25, %v729_v24  ;;  %v8349_v24 = vor.u32 %v9978_v20, %v8348_v19  ;;  %v8350_v25 = vld [vmem:[%s17688_s4 + $0x10] sm:$0xf0] }
 0x20e   :  { %v526_v27 = vpop.f32.mrf.mxu0  ;;  %826 = vmatpush.bf16.msra.mxu1 %v8349_v24 }
 0x20f   :  { %v527_v28 = vadd.f32 %v10987_v12, %v526_v27 }
 0x211   :  { %v613_v29 = vmax.f32 %v527_v28, 0.0 }
 0x213   :  { %v732_v31 = vsel %vm629_vm1, %v613_v29, 0.0  ;;  %v8353_v29 = vor.u32 %v9976_v21, %v8350_v25  ;;  %v8480_v25 = vld [vmem:[%s17689_s6 + $0xe0] sm:$0xf] }
 0x214   :  { %v733_v34 = vadd.f32 %v732_v31, %v731_v26 }
 0x215   :  { %839 = vmatpush.bf16.msra.mxu3 %v8353_v29  ;;  %v8544_v29 = vld [vmem:[%s17689_s6 + $0x160] sm:$0xf] }
 0x216   :  { %v529_v30 = vpop.f32.mrf.mxu0 }
 0x217   :  { %v530_v32 = vadd.f32 %v10987_v12, %v529_v30 }
 0x219   :  { %v614_v33 = vmax.f32 %v530_v32, 0.0 }
 0x21b   :  { %v734_v35 = vsel %vm629_vm1, %v614_v33, 0.0 }
 0x21c   :  { %v735_v36 = vadd.f32 %v734_v35, %v733_v34 }
 0x21e   :  { %v531_v37 = vpop.f32.mrf.mxu0 }
 0x21f   :  { %v532_v38 = vadd.f32 %v10987_v12, %v531_v37 }
 0x221   :  { %v615_v39 = vmax.f32 %v532_v38, 0.0 }
 0x223   :  { %v736_v41 = vsel %vm629_vm1, %v615_v39, 0.0 }
 0x224   :  { %v737_v44 = vadd.f32 %v736_v41, %v735_v36  ;;  %v693_v36 = vrot.slane %v11114_v59, 4 }
 0x226   :  { %v534_v40 = vpop.f32.mrf.mxu0 }
 0x227   :  { %v535_v42 = vadd.f32 %v10987_v12, %v534_v40 }
 0x229   :  { %v616_v43 = vmax.f32 %v535_v42, 0.0 }
 0x22b   :  { %v738_v45 = vsel %vm629_vm1, %v616_v43, 0.0  ;;  %v694_v43 = vadd.f32 %v693_v36, %v11114_v59 }
 0x22c   :  { %v739_v46 = vadd.f32 %v738_v45, %v737_v44 }
 0x22e   :  { %v536_v47 = vpop.f32.mrf.mxu0 }
 0x22f   :  { %v537_v55 = vadd.f32 %v10987_v12, %v536_v47  ;;  %v9979_v47 = vld [vmem:[%s17688_s4 + $0x14] sm:$0xf0] }
 0x231   :  { %v617_v58 = vmax.f32 %v537_v55, 0.0 }
 0x233   :  { %v740_v0 = vsel %vm629_vm1, %v617_v58, 0.0 }
 0x234   :  { %v741_v6 = vadd.f32 %v740_v0, %v739_v46  ;;  %v8356_v46 = vld [vmem:[%s17688_s4 + $0x8] sm:$0xf] }
 0x236   :  { %v539_v48 = vpop.f32.mrf.mxu0 }
 0x237   :  { %v540_v57 = vadd.f32 %v10987_v12, %v539_v48 }
 0x239   :  { %v618_v61 = vmax.f32 %v540_v57, 0.0 }
 0x23b   :  { %v742_v3 = vsel %vm629_vm1, %v618_v61, 0.0 }
 0x23c   :  { %v743_v10 = vadd.f32 %v742_v3, %v741_v6  ;;  %v8416_v3 = vld [vmem:[%s17689_s6 + $0x60] sm:$0xf]  ;;  %v9993_v6 = vld [vmem:[%s17689_s6 + $0x64] sm:$0xf0] }
 0x23e   :  { %v541_v49 = vpop.f32.mrf.mxu0 }
 0x23f   :  { %v542_v60 = vadd.f32 %v10987_v12, %v541_v49  ;;  %v8357_v49 = vor.u32 %v9979_v47, %v8356_v46  ;;  %v10005_v46 = vld [vmem:[%s17689_s6 + $0xc4] sm:$0xf0]  ;;  %v8528_v47 = vld [vmem:[%s17689_s6 + $0x140] sm:$0xf] }
 0x241   :  { %v619_v1 = vmax.f32 %v542_v60, 0.0  ;;  %852 = vmatpush.bf16.msrb.mxu3 %v8357_v49 }
 0x243   :  { %v744_v9 = vsel %vm629_vm1, %v619_v1, 0.0  ;;  %v8424_v1 = vld [vmem:[%s17689_s6 + $0x70] sm:$0xf] }
 0x244   :  { %v745_v15 = vadd.f32 %v744_v9, %v743_v10  ;;  %v8408_v9 = vld [vmem:[%s17689_s6 + $0x50] sm:$0xf]  ;;  %v9991_v10 = vld [vmem:[%s17689_s6 + $0x54] sm:$0xf0] }
 0x246   :  { %v544_v50 = vpop.f32.mrf.mxu0 }
 0x247   :  { %v545_v62 = vadd.f32 %v10987_v12, %v544_v50  ;;  %v9977_v50 = vld [vmem:[%s17688_s4 + $0xc] sm:$0xf] }
 0x249   :  { %v620_v4 = vmax.f32 %v545_v62, 0.0 }
 0x24b   :  { %v746_v11 = vsel %vm629_vm1, %v620_v4, 0.0 }
 0x24c   :  { %v747_v22 = vadd.f32 %v746_v11, %v745_v15  ;;  %v8409_v11 = vor.u32 %v9991_v10, %v8408_v9  ;;  %v8488_v15 = vld [vmem:[%s17689_s6 + $0xf0] sm:$0xf]  ;;  %v10039_v10 = vld [vmem:[%s17689_s6 + $0x1d4] sm:$0xf0] }
 0x24d   :  { %v8600_v9 = vld [vmem:[%s17689_s6 + $0x1d0] sm:$0xf] }
 0x24e   :  { %v546_v51 = vpop.f32.mrf.mxu0 }
 0x24f   :  { %v547_v63 = vadd.f32 %v10987_v12, %v546_v51 }
 0x251   :  { %v621_v7 = vmax.f32 %v547_v63, 0.0  ;;  %v628_v63 = vld [vmem:[#allocation3] sm:$0x3] }
 0x253   :  { %v748_v16 = vsel %vm629_vm1, %v621_v7, 0.0 }
 0x254   :  { %v749_v30 = vadd.f32 %v748_v16, %v747_v22  ;;  %v10011_v16 = vld [vmem:[%s17689_s6 + $0xf4] sm:$0xf0]  ;;  %v8392_v22 = vld [vmem:[%s17689_s6 + $0x30] sm:$0xf] }
 0x255   :  { %v8489_v24 = vor.u32 %v10011_v16, %v8488_v15  ;;  %v8432_v16 = vld [vmem:[%s17689_s6 + $0x80] sm:$0xf] }
 0x256   :  { %v549_v52 = vpop.f32.mrf.mxu0 }
 0x257   :  { %v550_v5 = vadd.f32 %v10987_v12, %v549_v52  ;;  %v695_v52 = vrot.slane %v694_v43, 2 }
 0x259   :  { %v622_v13 = vmax.f32 %v550_v5, 0.0  ;;  %v696_v55 = vadd.f32 %v695_v52, %v694_v43 }
 0x25b   :  { %v750_v26 = vsel %vm629_vm1, %v622_v13, 0.0  ;;  %v697_v58 = vrot.slane %v696_v55, 1  ;;  %v8400_v13 = vld [vmem:[%s17689_s6 + $0x40] sm:$0xf] }
 0x25c   :  { %v751_v33 = vadd.f32 %v750_v26, %v749_v30  ;;  %v10025_v30 = vld [vmem:[%s17689_s6 + $0x164] sm:$0xf0] }
 0x25d   :  { %v698_v62 = vadd.f32 %v697_v58, %v696_v55  ;;  %v8545_v36 = vor.u32 %v10025_v30, %v8544_v29  ;;  %v10043_v55 = vld [vmem:[%s17689_s6 + $0x1f4] sm:$0xf0] }
 0x25e   :  { %v551_v54 = vpop.f32.mrf.mxu0  ;;  %v10019_v58 = vld [vmem:[%s17689_s6 + $0x134] sm:$0xf0] }
 0x25f   :  { %v552_v8 = vadd.f32 %v10987_v12, %v551_v54 }
 0x261   :  { %v623_v17 = vmax.f32 %v552_v8, 0.0  ;;  %v8417_v8 = vor.u32 %v9993_v6, %v8416_v3  ;;  %v8512_v3 = vld [vmem:[%s17689_s6 + $0x120] sm:$0xf]  ;;  %v8440_v6 = vld [vmem:[%s17689_s6 + $0x90] sm:$0xf] }
 0x263   :  { %v752_v31 = vsel %vm629_vm1, %v623_v17, 0.0  ;;  %v8552_v17 = vld [vmem:[%s17689_s6 + $0x170] sm:$0xf] }
 0x264   :  { %v753_v37 = vadd.f32 %v752_v31, %v751_v33  ;;  %v9985_v33 = vld [vmem:[%s17689_s6 + $0x24] sm:$0xf0] }
 0x266   :  { %v554_v56 = vpop.f32.mrf.mxu0 }
 0x267   :  { %v555_v14 = vadd.f32 %v10987_v12, %v554_v56 }
 0x269   :  { %v624_v27 = vmax.f32 %v555_v14, 0.0  ;;  %v9989_v14 = vld [vmem:[%s17689_s6 + $0x44] sm:$0xf0] }
 0x26a   :  { %v8401_v20 = vor.u32 %v9989_v14, %v8400_v13  ;;  %v8504_v13 = vld [vmem:[%s17689_s6 + $0x110] sm:$0xf]  ;;  %v10015_v14 = vld [vmem:[%s17689_s6 + $0x114] sm:$0xf0] }
 0x26b   :  { %v754_v34 = vsel %vm629_vm1, %v624_v27, 0.0 }
 0x26c   :  { %v755_v39 = vadd.f32 %v754_v34, %v753_v37  ;;  %v10007_v37 = vld [vmem:[%s17689_s6 + $0xd4] sm:$0xf0] }
 0x26e   :  { %v556_v2 = vpop.f32.mrf.mxu0 }
 0x26f   :  { %v557_v18 = vadd.f32 %v10987_v12, %v556_v2  ;;  %v9995_v2 = vld [vmem:[%s17689_s6 + $0x74] sm:$0xf0] }
 0x270   :  { %v8425_v5 = vor.u32 %v9995_v2, %v8424_v1  ;;  %v10041_v1 = vld [vmem:[%s17689_s6 + $0x1e4] sm:$0xf0] }
 0x271   :  { %v625_v32 = vmax.f32 %v557_v18, 0.0  ;;  %v10027_v18 = vld [vmem:[%s17689_s6 + $0x174] sm:$0xf0] }
 0x272   :  { %1259 = vmatpush.bf16.msra.mxu2 %v8425_v5  ;;  %v8553_v26 = vor.u32 %v10027_v18, %v8552_v17  ;;  %v9997_v17 = vld [vmem:[%s17689_s6 + $0x84] sm:$0xf0]  ;;  %v8601_v18 = vor.u32 %v10039_v10, %v8600_v9  ;;  %v10002_v10 = vld [vmem:[%s17689_s6 + $0xb4] sm:$0xf] }
 0x273   :  { %v756_v38 = vsel %vm629_vm1, %v625_v32, 0.0  ;;  %v8384_v32 = vld [vmem:[%s17689_s6 + $0x20] sm:$0xf] }
 0x274   :  { %v757_v44 = vadd.f32 %v756_v38, %v755_v39  ;;  %v8536_v38 = vld [vmem:[%s17689_s6 + $0x150] sm:$0xf]  ;;  %v10023_v39 = vld [vmem:[%s17689_s6 + $0x154] sm:$0xf0] }
 0x276   :  { %v559_v23 = vpop.f32.mrf.mxu0  ;;  %1260 = vmatpush.bf16.msra.mxu2 %v8417_v8  ;;  %v9999_v8 = vld [vmem:[%s17689_s6 + $0x94] sm:$0xf0] }
 0x277   :  { %v560_v28 = vadd.f32 %v10987_v12, %v559_v23  ;;  %v9987_v23 = vld [vmem:[%s17689_s6 + $0x34] sm:$0xf0]  ;;  %v8441_v15 = vor.u32 %v9999_v8, %v8440_v6  ;;  %v8370_v8 = vld [vmem:[%s17689_s6 + $0x8] sm:$0xf0] }
 0x278   :  { %v8393_v31 = vor.u32 %v9987_v23, %v8392_v22  ;;  %v8505_v22 = vor.u32 %v10015_v14, %v8504_v13  ;;  %v8426_v23 = vld [vmem:[%s17689_s6 + $0x78] sm:$0xf0]  ;;  %v10000_v14 = vld [vmem:[%s17689_s6 + $0xa4] sm:$0xf] }
 0x279   :  { %v626_v35 = vmax.f32 %v560_v28, 0.0  ;;  %v10009_v28 = vld [vmem:[%s17689_s6 + $0xe4] sm:$0xf0] }
 0x27a   :  { %1261 = vmatpush.bf16.msra.mxu2 %v8409_v11  ;;  %v8481_v34 = vor.u32 %v10009_v28, %v8480_v25  ;;  %v10013_v25 = vld [vmem:[%s17689_s6 + $0x104] sm:$0xf0]  ;;  %v8433_v28 = vor.u32 %v9997_v17, %v8432_v16  ;;  %v9998_v17 = vld [vmem:[%s17689_s6 + $0x94] sm:$0xf] }
 0x27b   :  { %v758_v41 = vsel %vm629_vm1, %v626_v35, 0.0  ;;  %v8472_v35 = vld [vmem:[%s17689_s6 + $0xd0] sm:$0xf] }
 0x27c   :  { %v759_v48 = vadd.f32 %v758_v41, %v757_v44  ;;  %v8376_v41 = vld [vmem:[%s17689_s6 + $0x10] sm:$0xf]  ;;  %v8473_v43 = vor.u32 %v10007_v37, %v8472_v35  ;;  %v8464_v44 = vld [vmem:[%s17689_s6 + $0xc0] sm:$0xf]  ;;  %v8418_v35 = vld [vmem:[%s17689_s6 + $0x68] sm:$0xf0] }
 0x27e   :  { %v561_v40 = vpop.f32.mrf.mxu0  ;;  %1262 = vmatpush.bf16.msra.mxu2 %v8401_v20  ;;  %v8592_v20 = vld [vmem:[%s17689_s6 + $0x1c0] sm:$0xf] }
 0x27f   :  { %v562_v42 = vadd.f32 %v10987_v12, %v561_v40  ;;  %v8358_v12 = vld [vmem:[%s17688_s4 + $0x18] sm:$0xf0]  ;;  %v8385_v40 = vor.u32 %v9985_v33, %v8384_v32  ;;  %v10035_v32 = vld [vmem:[%s17689_s6 + $0x1b4] sm:$0xf0] }
 0x280   :  { %v8361_v51 = vor.u32 %v9977_v50, %v8358_v12  ;;  %v8368_v50 = vld [vmem:[%s17689_s6] sm:$0xf]  ;;  %v9981_v12 = vld [vmem:[%s17689_s6 + $0x4] sm:$0xf0] }
 0x281   :  { %v627_v45 = vmax.f32 %v562_v42, 0.0  ;;  %v9983_v42 = vld [vmem:[%s17689_s6 + $0x14] sm:$0xf0] }
 0x282   :  { %865 = vmatpush.bf16.msrb.mxu1 %v8361_v51  ;;  %1263 = vmatpush.bf16.msra.mxu2 %v8393_v31  ;;  %v8377_v49 = vor.u32 %v9983_v42, %v8376_v41  ;;  %v8456_v51 = vld [vmem:[%s17689_s6 + $0xb0] sm:$0xf]  ;;  %v9990_v41 = vld [vmem:[%s17689_s6 + $0x54] sm:$0xf]  ;;  %v8410_v42 = vld [vmem:[%s17689_s6 + $0x58] sm:$0xf0] }
 0x283   :  { %v760_v59 = vsel %vm629_vm1, %v627_v45, 0.0  ;;  %v8537_v45 = vor.u32 %v10023_v39, %v8536_v38  ;;  %v8584_v31 = vld [vmem:[%s17689_s6 + $0x1b0] sm:$0xf]  ;;  %v8576_v39 = vld [vmem:[%s17689_s6 + $0x1a0] sm:$0xf] }
 0x284   :  { %v761_v53 = vadd.f32 %v760_v59, %v759_v48  ;;  %v10021_v48 = vld [vmem:[%s17689_s6 + $0x144] sm:$0xf0]  ;;  %v8465_v59 = vor.u32 %v10005_v46, %v8464_v44  ;;  %v8585_v37 = vor.u32 %v10035_v32, %v8584_v31  ;;  %v8413_v44 = vor.u32 %v9990_v41, %v8410_v42  ;;  %v8402_v46 = vld [vmem:[%s17689_s6 + $0x48] sm:$0xf0]  ;;  %v10024_v32 = vld [vmem:[%s17689_s6 + $0x164] sm:$0xf] }
 0x285   :  { %v8529_v52 = vor.u32 %v10021_v48, %v8528_v47  ;;  %v9986_v48 = vld [vmem:[%s17689_s6 + $0x34] sm:$0xf] }
 0x286   :  { %v762_v54 = vrot.slane %v761_v53, 4  ;;  %1264 = vmatpush.bf16.msra.mxu2 %v8385_v40  ;;  %v10033_v40 = vld [vmem:[%s17689_s6 + $0x1a4] sm:$0xf0] }
 0x288   :  { %v763_v56 = vadd.f32 %v762_v54, %v761_v53  ;;  %v10003_v53 = vld [vmem:[%s17689_s6 + $0xb4] sm:$0xf0]  ;;  %v8616_v54 = vld [vmem:[%s17689_s6 + $0x1f0] sm:$0xf] }
 0x28a   :  { %v764_v57 = vrot.slane %v763_v56, 2  ;;  %1265 = vmatpush.bf16.msra.mxu2 %v8377_v49  ;;  %v8394_v49 = vld [vmem:[%s17689_s6 + $0x38] sm:$0xf0] }
 0x28c   :  { %v765_v60 = vadd.f32 %v764_v57, %v763_v56  ;;  %v8369_v56 = vor.u32 %v9981_v12, %v8368_v50  ;;  %v8520_v57 = vld [vmem:[%s17689_s6 + $0x130] sm:$0xf]  ;;  %v8397_v50 = vor.u32 %v9986_v48, %v8394_v49  ;;  %v8530_v48 = vld [vmem:[%s17689_s6 + $0x148] sm:$0xf0] }
 0x28d   :  { %v8521_v2 = vor.u32 %v10019_v58, %v8520_v57  ;;  %v8568_v12 = vld [vmem:[%s17689_s6 + $0x190] sm:$0xf]  ;;  %v8560_v58 = vld [vmem:[%s17689_s6 + $0x180] sm:$0xf] }
 0x28e   :  { %v766_v61 = vrot.slane %v765_v60, 1  ;;  %1266 = vmatpush.bf16.msra.mxu2 %v8369_v56  ;;  %v8386_v56 = vld [vmem:[%s17689_s6 + $0x28] sm:$0xf0] }
 0x290   :  { %v767_v0 = vadd.f32 %v766_v61, %v765_v60  ;;  %v8457_v60 = vor.u32 %v10003_v53, %v8456_v51  ;;  %v8448_v61 = vld [vmem:[%s17689_s6 + $0xa0] sm:$0xf]  ;;  %v8482_v53 = vld [vmem:[%s17689_s6 + $0xe8] sm:$0xf0] }
 0x292   :  { %v771_v4 = vsel %vm17996_vm3, %v767_v0, %v698_v62  ;;  %v8617_v62 = vor.u32 %v10043_v55, %v8616_v54  ;;  %v8608_v0 = vld [vmem:[%s17689_s6 + $0x1e0] sm:$0xf]  ;;  %v9984_v55 = vld [vmem:[%s17689_s6 + $0x24] sm:$0xf] }
 0x293   :  { %v773_v7 = vadd.f32 %v771_v4, %v628_v63  ;;  %v10001_v63 = vld [vmem:[%s17689_s6 + $0xa4] sm:$0xf0]  ;;  %v8389_v57 = vor.u32 %v9984_v55, %v8386_v56 }
 0x294   :  { %v10017_v4 = vld [vmem:[%s17689_s6 + $0x124] sm:$0xf0]  ;;  %v8449_v5 = vor.u32 %v10001_v63, %v8448_v61  ;;  %1298 = vmatpush.bf16.msrb.mxu2 %v8617_v62  ;;  %v10006_v62 = vld [vmem:[%s17689_s6 + $0xd4] sm:$0xf]  ;;  %v8474_v63 = vld [vmem:[%s17689_s6 + $0xd8] sm:$0xf0] }
 0x295   :  { %775 = vst.msk [vmem:[#allocation3] sm:$0x3] %vm52_vm2, %v773_v7  ;;  %v8609_v7 = vor.u32 %v10041_v1, %v8608_v0  ;;  %v8513_v11 = vor.u32 %v10017_v4, %v8512_v3  ;;  %v8477_v0 = vor.u32 %v10006_v62, %v8474_v63  ;;  %v9982_v1 = vld [vmem:[%s17689_s6 + $0x14] sm:$0xf]  ;;  %v10004_v4 = vld [vmem:[%s17689_s6 + $0xc4] sm:$0xf] }
 0x298   :  { %1299 = vmatpush.bf16.msrb.mxu2 %v8609_v7  ;;  %v9980_v7 = vld [vmem:[%s17689_s6 + $0x4] sm:$0xf] }
 0x299   :  { %v8373_v9 = vor.u32 %v9980_v7, %v8370_v8 }
 0x29c   :  { %v779_v19 = vld [vmem:[#allocation3] sm:$0x3]  ;;  %1300 = vmatpush.bf16.msrb.mxu2 %v8601_v18  ;;  %v8442_v18 = vld [vmem:[%s17689_s6 + $0x98] sm:$0xf0] }
 0x29d   :  { %v780_v21 = vmul.f32 0.00390625, %v779_v19  ;;  %v9994_v19 = vld [vmem:[%s17689_s6 + $0x74] sm:$0xf] }
 0x29e   :  { %v8429_v30 = vor.u32 %v9994_v19, %v8426_v23  ;;  %v8445_v19 = vor.u32 %v9998_v17, %v8442_v18  ;;  %v11536_v23 = vld [vmem:[%s17690_s5] sm:$0xf]  ;;  %v10059_v18 = vld [vmem:[%s17691_s7 + $0x64] sm:$0xf0] }
 0x29f   :  { %v781_v27 = vpack.c.bf16 %v780_v21, %v780_v21  ;;  %v10037_v21 = vld [vmem:[%s17689_s6 + $0x1c4] sm:$0xf0]  ;;  %v789_v31 = vperm.slane %v11536_v23, 1  ;;  %v790_v63 = vperm.slane %v11536_v23, 2 }
 0x2a0   :  { %v8593_v29 = vor.u32 %v10037_v21, %v8592_v20  ;;  %v9996_v20 = vld [vmem:[%s17689_s6 + $0x84] sm:$0xf]  ;;  %v8434_v21 = vld [vmem:[%s17689_s6 + $0x88] sm:$0xf0] }
 0x2a1   :  { %8362 = vmatmul.msk.bf16.vlgmr.msra.gmra.mxu1 %vm629_vm1, %v781_v27  ;;  %8363 = vmatmul.msk.bf16.vlgmr.msra.gmra.mxu3 %vm629_vm1, %v781_v27 }
 0x2a2   :  { %1272 = vmatpush.bf16.msra.mxu3 %v8489_v24  ;;  %1285 = vmatpush.bf16.msra.mxu1 %v8553_v26  ;;  %v8496_v24 = vld [vmem:[%s17689_s6 + $0x100] sm:$0xf]  ;;  %v10010_v26 = vld [vmem:[%s17689_s6 + $0xf4] sm:$0xf] }
 0x2a3   :  { %v8497_v33 = vor.u32 %v10013_v25, %v8496_v24  ;;  %1301 = vmatpush.bf16.msrb.mxu2 %v8593_v29  ;;  %v788_v24 = vperm.slane %v11536_v23, 0  ;;  %v10026_v25 = vld [vmem:[%s17689_s6 + $0x174] sm:$0xf] }
 0x2a6   :  { %1273 = vmatpush.bf16.msra.mxu3 %v8481_v34  ;;  %1286 = vmatpush.bf16.msra.mxu1 %v8545_v36  ;;  %v9992_v34 = vld [vmem:[%s17689_s6 + $0x64] sm:$0xf] }
 0x2a7   :  { %v8421_v38 = vor.u32 %v9992_v34, %v8418_v35  ;;  %1302 = vmatpush.bf16.msrb.mxu2 %v8585_v37  ;;  %v10042_v34 = vld [vmem:[%s17689_s6 + $0x1f4] sm:$0xf]  ;;  %v8618_v35 = vld [vmem:[%s17689_s6 + $0x1f8] sm:$0xf0] }
 0x2a8   :  { %v8621_v42 = vor.u32 %v10042_v34, %v8618_v35 }
 0x2aa   :  { %1274 = vmatpush.bf16.msra.mxu3 %v8473_v43  ;;  %1287 = vmatpush.bf16.msra.mxu1 %v8537_v45  ;;  %v8577_v43 = vor.u32 %v10033_v40, %v8576_v39  ;;  %v9988_v45 = vld [vmem:[%s17689_s6 + $0x44] sm:$0xf]  ;;  %v10022_v39 = vld [vmem:[%s17689_s6 + $0x154] sm:$0xf]  ;;  %v8538_v40 = vld [vmem:[%s17689_s6 + $0x158] sm:$0xf0] }
 0x2ab   :  { %v8405_v47 = vor.u32 %v9988_v45, %v8402_v46  ;;  %v8610_v45 = vld [vmem:[%s17689_s6 + $0x1e8] sm:$0xf0]  ;;  %v8541_v46 = vor.u32 %v10022_v39, %v8538_v40  ;;  %v8664_v39 = vld [vmem:[%s17691_s7 + $0x40] sm:$0xf]  ;;  %v10055_v40 = vld [vmem:[%s17691_s7 + $0x44] sm:$0xf0] }
 0x2ac   :  { %1303 = vmatpush.bf16.msrb.mxu2 %v8577_v43 }
 0x2ae   :  { %1275 = vmatpush.bf16.msra.mxu3 %v8465_v59  ;;  %1288 = vmatpush.bf16.msra.mxu1 %v8529_v52  ;;  %v10031_v59 = vld [vmem:[%s17689_s6 + $0x194] sm:$0xf0]  ;;  %v10008_v52 = vld [vmem:[%s17689_s6 + $0xe4] sm:$0xf] }
 0x2af   :  { %v8569_v51 = vor.u32 %v10031_v59, %v8568_v12  ;;  %v8485_v54 = vor.u32 %v10008_v52, %v8482_v53  ;;  %v10038_v12 = vld [vmem:[%s17689_s6 + $0x1d4] sm:$0xf]  ;;  %v8602_v59 = vld [vmem:[%s17689_s6 + $0x1d8] sm:$0xf0] }
 0x2b0   :  { %v10018_v53 = vld [vmem:[%s17689_s6 + $0x134] sm:$0xf]  ;;  %v8605_v56 = vor.u32 %v10038_v12, %v8602_v59  ;;  %v8656_v59 = vld [vmem:[%s17691_s7 + $0x30] sm:$0xf] }
 0x2b1   :  { %8364 = vmatmul.msk.bf16.vlgmr.msrb.gmra.mxu3 %vm629_vm1, %v781_v27  ;;  %8365 = vmatmul.msk.bf16.vlgmr.msrb.gmra.mxu1 %vm629_vm1, %v781_v27  ;;  %v8490_v27 = vld [vmem:[%s17689_s6 + $0xf8] sm:$0xf0] }
 0x2b2   :  { %1276 = vmatpush.bf16.msra.mxu3 %v8457_v60  ;;  %1289 = vmatpush.bf16.msra.mxu1 %v8521_v2  ;;  %v8493_v36 = vor.u32 %v10010_v26, %v8490_v27  ;;  %v10029_v60 = vld [vmem:[%s17689_s6 + $0x184] sm:$0xf0]  ;;  %v8378_v2 = vld [vmem:[%s17689_s6 + $0x18] sm:$0xf0] }
 0x2b3   :  { %1304 = vmatpush.bf16.msrb.mxu2 %v8569_v51  ;;  %v8561_v61 = vor.u32 %v10029_v60, %v8560_v58  ;;  %v8381_v3 = vor.u32 %v9982_v1, %v8378_v2  ;;  %v8554_v26 = vld [vmem:[%s17689_s6 + $0x178] sm:$0xf0]  ;;  %v10036_v58 = vld [vmem:[%s17689_s6 + $0x1c4] sm:$0xf]  ;;  %v8594_v60 = vld [vmem:[%s17689_s6 + $0x1c8] sm:$0xf0] }
 0x2b4   :  { %v8557_v29 = vor.u32 %v10026_v25, %v8554_v26  ;;  %v8514_v1 = vld [vmem:[%s17689_s6 + $0x128] sm:$0xf0]  ;;  %v8597_v2 = vor.u32 %v10036_v58, %v8594_v60  ;;  %v8752_v26 = vld [vmem:[%s17691_s7 + $0xf0] sm:$0xf]  ;;  %v8648_v60 = vld [vmem:[%s17691_s7 + $0x20] sm:$0xf] }
 0x2b6   :  { %1277 = vmatpush.bf16.msra.mxu3 %v8449_v5  ;;  %1290 = vmatpush.bf16.msra.mxu1 %v8513_v11  ;;  %v8466_v5 = vld [vmem:[%s17689_s6 + $0xc8] sm:$0xf0]  ;;  %v8458_v11 = vld [vmem:[%s17689_s6 + $0xb8] sm:$0xf0] }
 0x2b7   :  { %1305 = vmatpush.bf16.msrb.mxu2 %v8561_v61  ;;  %v8469_v6 = vor.u32 %v10004_v4, %v8466_v5  ;;  %v8461_v13 = vor.u32 %v10002_v10, %v8458_v11  ;;  %v10061_v4 = vld [vmem:[%s17691_s7 + $0x74] sm:$0xf0]  ;;  %v10034_v5 = vld [vmem:[%s17689_s6 + $0x1b4] sm:$0xf]  ;;  %v8506_v11 = vld [vmem:[%s17689_s6 + $0x118] sm:$0xf0] }
 0x2b8   :  { %v10014_v10 = vld [vmem:[%s17689_s6 + $0x114] sm:$0xf] }
 0x2ba   :  { %1278 = vmatpush.bf16.msra.mxu3 %v8441_v15  ;;  %1291 = vmatpush.bf16.msra.mxu1 %v8505_v22  ;;  %v8450_v15 = vld [vmem:[%s17689_s6 + $0xa8] sm:$0xf0]  ;;  %v8437_v22 = vor.u32 %v9996_v20, %v8434_v21  ;;  %v8509_v21 = vor.u32 %v10014_v10, %v8506_v11  ;;  %v8712_v10 = vld [vmem:[%s17691_s7 + $0xa0] sm:$0xf]  ;;  %v10067_v11 = vld [vmem:[%s17691_s7 + $0xa4] sm:$0xf0] }
 0x2bb   :  { %v8453_v16 = vor.u32 %v10000_v14, %v8450_v15  ;;  %v8578_v20 = vld [vmem:[%s17689_s6 + $0x1a8] sm:$0xf0] }
 0x2be   :  { %1279 = vmatpush.bf16.msra.mxu3 %v8433_v28  ;;  %1292 = vmatpush.bf16.msra.mxu1 %v8497_v33  ;;  %v8546_v33 = vld [vmem:[%s17689_s6 + $0x168] sm:$0xf0] }
 0x2bf   :  { %v8549_v37 = vor.u32 %v10024_v32, %v8546_v33 }
 0x2c2   :  { %1311 = vmatpush.bf16.msrb.mxu3 %v8429_v30  ;;  %1324 = vmatpush.bf16.msrb.mxu1 %v8493_v36 }
 0x2c6   :  { %1312 = vmatpush.bf16.msrb.mxu3 %v8421_v38  ;;  %1325 = vmatpush.bf16.msrb.mxu1 %v8485_v54  ;;  %v8522_v54 = vld [vmem:[%s17689_s6 + $0x138] sm:$0xf0] }
 0x2c7   :  { %v8525_v61 = vor.u32 %v10018_v53, %v8522_v54  ;;  %v8682_v53 = vld [vmem:[%s17691_s7 + $0x68] sm:$0xf0] }
 0x2ca   :  { %1313 = vmatpush.bf16.msrb.mxu3 %v8413_v44  ;;  %1326 = vmatpush.bf16.msrb.mxu1 %v8477_v0  ;;  %v10040_v44 = vld [vmem:[%s17689_s6 + $0x1e4] sm:$0xf] }
 0x2cb   :  { %v8613_v49 = vor.u32 %v10040_v44, %v8610_v45  ;;  %v10016_v0 = vld [vmem:[%s17689_s6 + $0x124] sm:$0xf]  ;;  %v10060_v44 = vld [vmem:[%s17691_s7 + $0x74] sm:$0xf]  ;;  %v8690_v45 = vld [vmem:[%s17691_s7 + $0x78] sm:$0xf0] }
 0x2cc   :  { %v8517_v8 = vor.u32 %v10016_v0, %v8514_v1  ;;  %v8693_v12 = vor.u32 %v10060_v44, %v8690_v45  ;;  %v8674_v0 = vld [vmem:[%s17691_s7 + $0x58] sm:$0xf0]  ;;  %v10044_v44 = vld [vmem:[%s17692_s1 + $0x4] sm:$0xf]  ;;  %v8626_v45 = vld [vmem:[%s17692_s1 + $0x8] sm:$0xf0] }
 0x2ce   :  { %1314 = vmatpush.bf16.msrb.mxu3 %v8405_v47  ;;  %1327 = vmatpush.bf16.msrb.mxu1 %v8469_v6  ;;  %v10020_v47 = vld [vmem:[%s17689_s6 + $0x144] sm:$0xf]  ;;  %v8586_v6 = vld [vmem:[%s17689_s6 + $0x1b8] sm:$0xf0] }
 0x2cf   :  { %v8533_v52 = vor.u32 %v10020_v47, %v8530_v48  ;;  %v8589_v15 = vor.u32 %v10034_v5, %v8586_v6  ;;  %v8665_v47 = vor.u32 %v10055_v40, %v8664_v39  ;;  %v8640_v6 = vld [vmem:[%s17691_s7 + $0x10] sm:$0xf]  ;;  %v8738_v39 = vld [vmem:[%s17691_s7 + $0xd8] sm:$0xf0]  ;;  %v10048_v40 = vld [vmem:[%s17691_s7 + $0x14] sm:$0xf] }
 0x2d2   :  { %1315 = vmatpush.bf16.msrb.mxu3 %v8397_v50  ;;  %1328 = vmatpush.bf16.msrb.mxu1 %v8461_v13  ;;  %v791_v50 = vperm.slane %v11536_v23, 3  ;;  %v8498_v23 = vld [vmem:[%s17689_s6 + $0x108] sm:$0xf0] }
 0x2d6   :  { %1316 = vmatpush.bf16.msrb.mxu3 %v8389_v57  ;;  %1329 = vmatpush.bf16.msrb.mxu1 %v8453_v16  ;;  %v8680_v16 = vld [vmem:[%s17691_s7 + $0x60] sm:$0xf] }
 0x2da   :  { %1317 = vmatpush.bf16.msrb.mxu3 %v8381_v3  ;;  %1330 = vmatpush.bf16.msrb.mxu1 %v8445_v19  ;;  %v8688_v3 = vld [vmem:[%s17691_s7 + $0x70] sm:$0xf]  ;;  %v10032_v19 = vld [vmem:[%s17689_s6 + $0x1a4] sm:$0xf] }
 0x2db   :  { %v8689_v14 = vor.u32 %v10061_v4, %v8688_v3  ;;  %v8581_v25 = vor.u32 %v10032_v19, %v8578_v20  ;;  %v8720_v3 = vld [vmem:[%s17691_s7 + $0xb0] sm:$0xf]  ;;  %v10069_v4 = vld [vmem:[%s17691_s7 + $0xb4] sm:$0xf0]  ;;  %v8658_v19 = vld [vmem:[%s17691_s7 + $0x38] sm:$0xf0]  ;;  %v8713_v20 = vor.u32 %v10067_v11, %v8712_v10 }
 0x2dc   :  { %v8954_v11 = vld [vmem:[%s17693_s9 + $0x1a0] sm:$0xf0] }
 0x2de   :  { %1318 = vmatpush.bf16.msrb.mxu3 %v8373_v9  ;;  %1331 = vmatpush.bf16.msrb.mxu1 %v8437_v22  ;;  %v10012_v22 = vld [vmem:[%s17689_s6 + $0x104] sm:$0xf] }
 0x2df   :  { %v8501_v33 = vor.u32 %v10012_v22, %v8498_v23  ;;  %v10065_v23 = vld [vmem:[%s17691_s7 + $0x94] sm:$0xf0] }
 0x31e   :  { %v828_v27 = vpop.f32.mrf.mxu1 }
 0x31f   :  { %v829_v28 = vadd.f32 %v828_v27, %v788_v24  ;;  %v8681_v24 = vor.u32 %v10059_v18, %v8680_v16  ;;  %v10077_v27 = vld [vmem:[%s17691_s7 + $0xf4] sm:$0xf0]  ;;  %v10076_v16 = vld [vmem:[%s17691_s7 + $0xf4] sm:$0xf] }
 0x320   :  { %v8753_v34 = vor.u32 %v10077_v27, %v8752_v26  ;;  %v10052_v18 = vld [vmem:[%s17691_s7 + $0x34] sm:$0xf] }
 0x321   :  { %v11545_v30 = vpack.c.bf16 %v829_v28, %v829_v28  ;;  %v8672_v28 = vld [vmem:[%s17691_s7 + $0x50] sm:$0xf]  ;;  %v8661_v27 = vor.u32 %v10052_v18, %v8658_v19  ;;  %v8922_v18 = vld [vmem:[%s17693_s9 + $0x160] sm:$0xf0] }
 0x323   :  { %1267 = vmatmul.bf16.vlgmr.msra.gmra.mxu2 %v11545_v30 }
 0x324   :  { %1337 = vmatpush.bf16.msra.mxu2 %v8557_v29  ;;  %v841_v36 = vpop.f32.mrf.mxu3  ;;  %v10057_v29 = vld [vmem:[%s17691_s7 + $0x54] sm:$0xf0] }
 0x325   :  { %v842_v38 = vadd.f32 %v841_v36, %v789_v31  ;;  %v8570_v31 = vld [vmem:[%s17689_s6 + $0x198] sm:$0xf0]  ;;  %v8673_v35 = vor.u32 %v10057_v29, %v8672_v28  ;;  %v10074_v28 = vld [vmem:[%s17691_s7 + $0xe4] sm:$0xf]  ;;  %v8746_v29 = vld [vmem:[%s17691_s7 + $0xe8] sm:$0xf0] }
 0x326   :  { %v830_v41 = vpop.f32.mrf.mxu1 }
 0x327   :  { %v11567_v43 = vpack.c.bf16 %v842_v38, %v842_v38  ;;  %v10075_v38 = vld [vmem:[%s17691_s7 + $0xe4] sm:$0xf0]  ;;  %v10028_v41 = vld [vmem:[%s17689_s6 + $0x184] sm:$0xf] }
 0x328   :  { %1338 = vmatpush.bf16.msra.mxu2 %v8549_v37  ;;  %v8744_v37 = vld [vmem:[%s17691_s7 + $0xe0] sm:$0xf] }
 0x329   :  { %1280 = vmatmul.bf16.vlgmr.msra.gmra.mxu3 %v11567_v43 }
 0x32a   :  { %1350 = vmatpush.bf16.msra.mxu3 %v8621_v42  ;;  %v8562_v42 = vld [vmem:[%s17689_s6 + $0x188] sm:$0xf0] }
 0x32b   :  { %v8565_v48 = vor.u32 %v10028_v41, %v8562_v42  ;;  %v8642_v41 = vld [vmem:[%s17691_s7 + $0x18] sm:$0xf0] }
 0x32c   :  { %1339 = vmatpush.bf16.msra.mxu2 %v8541_v46  ;;  %v843_v51 = vpop.f32.mrf.mxu3  ;;  %v8745_v46 = vor.u32 %v10075_v38, %v8744_v37  ;;  %v10072_v38 = vld [vmem:[%s17691_s7 + $0xd4] sm:$0xf] }
 0x32d   :  { %v10053_v51 = vld [vmem:[%s17691_s7 + $0x34] sm:$0xf0] }
 0x32e   :  { %v867_v55 = vpop.f32.mrf.mxu1  ;;  %1351 = vmatpush.bf16.msra.mxu3 %v8613_v49  ;;  %v8736_v49 = vld [vmem:[%s17691_s7 + $0xd0] sm:$0xf] }
 0x32f   :  { %v868_v57 = vadd.f32 %v867_v55, %v791_v50  ;;  %v10073_v50 = vld [vmem:[%s17691_s7 + $0xd4] sm:$0xf0]  ;;  %v8657_v55 = vor.u32 %v10053_v51, %v8656_v59  ;;  %v8634_v59 = vld [vmem:[%s17691_s7 + $0x8] sm:$0xf0] }
 0x330   :  { %1340 = vmatpush.bf16.msra.mxu2 %v8533_v52  ;;  %v10058_v52 = vld [vmem:[%s17691_s7 + $0x64] sm:$0xf]  ;;  %v8737_v54 = vor.u32 %v10073_v50, %v8736_v49  ;;  %v8629_v49 = vor.u32 %v10044_v44, %v8626_v45  ;;  %v8730_v50 = vld [vmem:[%s17691_s7 + $0xc8] sm:$0xf0] }
 0x331   :  { %v11601_v62 = vpack.c.bf16 %v868_v57, %v868_v57  ;;  %v10071_v57 = vld [vmem:[%s17691_s7 + $0xc4] sm:$0xf0]  ;;  %v8685_v58 = vor.u32 %v10058_v52, %v8682_v53  ;;  %v10068_v53 = vld [vmem:[%s17691_s7 + $0xb4] sm:$0xf]  ;;  %v8826_v44 = vld [vmem:[%s17693_s9 + $0xa0] sm:$0xf0] }
 0x332   :  { %1352 = vmatpush.bf16.msra.mxu3 %v8605_v56  ;;  %v8728_v56 = vld [vmem:[%s17691_s7 + $0xc0] sm:$0xf] }
 0x333   :  { %1306 = vmatmul.bf16.vlgmr.msrb.gmra.mxu2 %v11601_v62  ;;  %v8729_v1 = vor.u32 %v10071_v57, %v8728_v56  ;;  %v10066_v56 = vld [vmem:[%s17691_s7 + $0xa4] sm:$0xf]  ;;  %v8714_v57 = vld [vmem:[%s17691_s7 + $0xa8] sm:$0xf0] }
 0x334   :  { %1341 = vmatpush.bf16.msra.mxu2 %v8525_v61  ;;  %v854_v7 = vpop.f32.mrf.mxu3  ;;  %v10051_v61 = vld [vmem:[%s17691_s7 + $0x24] sm:$0xf0] }
 0x335   :  { %v855_v9 = vadd.f32 %v854_v7, %v790_v63  ;;  %v10056_v63 = vld [vmem:[%s17691_s7 + $0x54] sm:$0xf]  ;;  %v8666_v7 = vld [vmem:[%s17691_s7 + $0x48] sm:$0xf0] }
 0x336   :  { %v869_v13 = vpop.f32.mrf.mxu1  ;;  %1353 = vmatpush.bf16.msra.mxu3 %v8597_v2  ;;  %v8649_v2 = vor.u32 %v10051_v61, %v8648_v60  ;;  %v8677_v5 = vor.u32 %v10056_v63, %v8674_v0  ;;  %v10064_v60 = vld [vmem:[%s17691_s7 + $0x94] sm:$0xf]  ;;  %v8706_v61 = vld [vmem:[%s17691_s7 + $0x98] sm:$0xf0]  ;;  %v10062_v0 = vld [vmem:[%s17691_s7 + $0x84] sm:$0xf] }
 0x337   :  { %v873_v17 = vpack.c.bf16 %v855_v9, %v855_v9  ;;  %v8709_v63 = vor.u32 %v10064_v60, %v8706_v61  ;;  %v10178_v61 = vld [vmem:[%s17693_s9 + $0x31c] sm:$0xf0] }
 0x338   :  { %1342 = vmatpush.bf16.msra.mxu2 %v8517_v8  ;;  %v8721_v8 = vor.u32 %v10069_v4, %v8720_v3  ;;  %v8984_v3 = vld [vmem:[%s17693_s9 + $0x1c0] sm:$0xf] }
 0x339   :  { %1293 = vmatmul.bf16.vlgmr.msra.gmra.mxu1 %v873_v17  ;;  %1319 = vmatmul.bf16.vlgmr.msrb.gmra.mxu3 %v11545_v30  ;;  %v10030_v30 = vld [vmem:[%s17689_s6 + $0x194] sm:$0xf]  ;;  %v10138_v4 = vld [vmem:[%s17693_s9 + $0x1dc] sm:$0xf0] }
 0x33a   :  { %1567 = vmatpush.bf16.msra.mxu1 %v8689_v14  ;;  %1354 = vmatpush.bf16.msra.mxu3 %v8589_v15  ;;  %v8573_v36 = vor.u32 %v10030_v30, %v8570_v31  ;;  %v8632_v14 = vld [vmem:[%s17691_s7] sm:$0xf]  ;;  %v10047_v15 = vld [vmem:[%s17691_s7 + $0x4] sm:$0xf0]  ;;  %v10050_v30 = vld [vmem:[%s17691_s7 + $0x24] sm:$0xf] }
 0x33b   :  { %v8633_v22 = vor.u32 %v10047_v15, %v8632_v14  ;;  %v8650_v31 = vld [vmem:[%s17691_s7 + $0x28] sm:$0xf0]  ;;  %v8920_v14 = vld [vmem:[%s17693_s9 + $0x140] sm:$0xf] }
 0x33c   :  { %1343 = vmatpush.bf16.msra.mxu2 %v8509_v21  ;;  %v856_v32 = vpop.f32.mrf.mxu3  ;;  %v8704_v21 = vld [vmem:[%s17691_s7 + $0x90] sm:$0xf]  ;;  %v8653_v37 = vor.u32 %v10050_v30, %v8650_v31  ;;  %v10122_v15 = vld [vmem:[%s17693_s9 + $0x15c] sm:$0xf0] }
 0x33d   :  { %v8705_v32 = vor.u32 %v10065_v23, %v8704_v21  ;;  %v10114_v21 = vld [vmem:[%s17693_s9 + $0x11c] sm:$0xf0] }
 0x33e   :  { %1568 = vmatpush.bf16.msra.mxu1 %v8681_v24  ;;  %1355 = vmatpush.bf16.msra.mxu3 %v8581_v25  ;;  %v8624_v24 = vld [vmem:[%s17692_s1] sm:$0xf]  ;;  %v10045_v25 = vld [vmem:[%s17692_s1 + $0x4] sm:$0xf0] }
 0x33f   :  { %v10202_v31 = vld [vmem:[%s17693_s9 + $0x3dc] sm:$0xf0] }
 0x340   :  { %1344 = vmatpush.bf16.msra.mxu2 %v8501_v33  ;;  %v8625_v33 = vor.u32 %v10045_v25, %v8624_v24  ;;  %v8890_v24 = vld [vmem:[%s17693_s9 + $0x120] sm:$0xf0] }
 0x342   :  { %1569 = vmatpush.bf16.msra.mxu1 %v8673_v35  ;;  %1356 = vmatpush.bf16.msra.mxu3 %v8573_v36  ;;  %v10063_v35 = vld [vmem:[%s17691_s7 + $0x84] sm:$0xf0]  ;;  %v8749_v36 = vor.u32 %v10074_v28, %v8746_v29  ;;  %v10106_v28 = vld [vmem:[%s17693_s9 + $0xdc] sm:$0xf0] }
 0x343   :  { %1345 = vmatmul.bf16.vlgmr.msra.gmra.mxu2 %v873_v17  ;;  %v8754_v17 = vld [vmem:[%s17691_s7 + $0xf8] sm:$0xf0]  ;;  %v9240_v29 = vld [vmem:[%s17693_s9 + $0x3c0] sm:$0xf] }
 0x344   :  { %1581 = vmatpush.bf16.msrb.mxu2 %v8753_v34  ;;  %v8757_v26 = vor.u32 %v10076_v16, %v8754_v17  ;;  %v8696_v34 = vld [vmem:[%s17691_s7 + $0x80] sm:$0xf]  ;;  %v10118_v16 = vld [vmem:[%s17693_s9 + $0x144] sm:$0xf]  ;;  %v8921_v17 = vor.u32 %v10122_v15, %v8920_v14  ;;  %v9216_v15 = vld [vmem:[%s17693_s9 + $0x388] sm:$0xf] }
 0x345   :  { %v8697_v42 = vor.u32 %v10063_v35, %v8696_v34  ;;  %v8925_v19 = vor.u32 %v10118_v16, %v8922_v18  ;;  %v9241_v34 = vor.u32 %v10202_v31, %v9240_v29  ;;  %v9210_v14 = vld [vmem:[%s17693_s9 + $0x3a0] sm:$0xf0]  ;;  %v9080_v18 = vld [vmem:[%s17693_s9 + $0x280] sm:$0xf] }
 0x346   :  { %1570 = vmatpush.bf16.msra.mxu1 %v8665_v47  ;;  %1357 = vmatpush.bf16.msra.mxu3 %v8565_v48  ;;  %v8645_v47 = vor.u32 %v10048_v40, %v8642_v41  ;;  %v10070_v48 = vld [vmem:[%s17691_s7 + $0xc4] sm:$0xf]  ;;  %v10194_v41 = vld [vmem:[%s17693_s9 + $0x39c] sm:$0xf0] }
 0x347   :  { %v8733_v51 = vor.u32 %v10070_v48, %v8730_v50  ;;  %v8792_v48 = vld [vmem:[%s17693_s9 + $0x40] sm:$0xf] }
 0x348   :  { %1582 = vmatpush.bf16.msrb.mxu2 %v8745_v46  ;;  %v8741_v46 = vor.u32 %v10072_v38, %v8738_v39  ;;  %v9208_v38 = vld [vmem:[%s17693_s9 + $0x380] sm:$0xf] }
 0x349   :  { %1332 = vmatmul.bf16.vlgmr.msrb.gmra.mxu1 %v11567_v43  ;;  %1358 = vmatmul.bf16.vlgmr.msra.gmra.mxu3 %v11601_v62  ;;  %v10049_v43 = vld [vmem:[%s17691_s7 + $0x14] sm:$0xf0]  ;;  %v10054_v62 = vld [vmem:[%s17691_s7 + $0x44] sm:$0xf]  ;;  %v9209_v45 = vor.u32 %v10194_v41, %v9208_v38  ;;  %v9176_v50 = vld [vmem:[%s17693_s9 + $0x340] sm:$0xf] }
 0x34a   :  { %1595 = vmatpush.bf16.msrb.mxu3 %v8693_v12  ;;  %1571 = vmatpush.bf16.msra.mxu1 %v8657_v55  ;;  %v8641_v9 = vor.u32 %v10049_v43, %v8640_v6  ;;  %v8669_v13 = vor.u32 %v10054_v62, %v8666_v7  ;;  %v10046_v12 = vld [vmem:[%s17691_s7 + $0x4] sm:$0xf]  ;;  %v8985_v6 = vor.u32 %v10138_v4, %v8984_v3  ;;  %v8952_v7 = vld [vmem:[%s17693_s9 + $0x180] sm:$0xf] }
 0x34b   :  { %v8637_v52 = vor.u32 %v10046_v12, %v8634_v59  ;;  %v8986_v43 = vld [vmem:[%s17693_s9 + $0x1e0] sm:$0xf0]  ;;  %v10186_v59 = vld [vmem:[%s17693_s9 + $0x35c] sm:$0xf0] }
 0x34c   :  { %1583 = vmatpush.bf16.msrb.mxu2 %v8737_v54  ;;  %v8722_v54 = vld [vmem:[%s17691_s7 + $0xb8] sm:$0xf0]  ;;  %v10198_v3 = vld [vmem:[%s17693_s9 + $0x3c4] sm:$0xf]  ;;  %v9048_v29 = vld [vmem:[%s17693_s9 + $0x240] sm:$0xf] }
 0x34d   :  { %v8725_v55 = vor.u32 %v10068_v53, %v8722_v54  ;;  %v9177_v53 = vor.u32 %v10186_v59, %v9176_v50  ;;  %v9242_v4 = vld [vmem:[%s17693_s9 + $0x3e0] sm:$0xf0]  ;;  %v9120_v59 = vld [vmem:[%s17693_s9 + $0x2c8] sm:$0xf] }
 0x34e   :  { %1596 = vmatpush.bf16.msrb.mxu3 %v8685_v58  ;;  %1572 = vmatpush.bf16.msra.mxu1 %v8649_v2  ;;  %v8717_v58 = vor.u32 %v10066_v56, %v8714_v57  ;;  %v10082_v56 = vld [vmem:[%s17693_s9 + $0x1c] sm:$0xf0] }
 0x34f   :  { %v9144_v57 = vld [vmem:[%s17693_s9 + $0x300] sm:$0xf] }
 0x350   :  { %1584 = vmatpush.bf16.msrb.mxu2 %v8729_v1  ;;  %v8698_v1 = vld [vmem:[%s17691_s7 + $0x88] sm:$0xf0] }
 0x351   :  { %v8701_v2 = vor.u32 %v10062_v0, %v8698_v1  ;;  %v8762_v0 = vld [vmem:[%s17693_s9 + $0x20] sm:$0xf0]  ;;  %v9145_v1 = vor.u32 %v10178_v61, %v9144_v57  ;;  %v10131_v61 = vld [vmem:[%s17693_s9 + $0x1a4] sm:$0xf0] }
 0x352   :  { %1597 = vmatpush.bf16.msrb.mxu3 %v8677_v5  ;;  %1573 = vmatpush.bf16.msra.mxu1 %v8641_v9  ;;  %v10134_v5 = vld [vmem:[%s17693_s9 + $0x1c4] sm:$0xf] }
 0x353   :  { %v8989_v62 = vor.u32 %v10134_v5, %v8986_v43  ;;  %v10126_v9 = vld [vmem:[%s17693_s9 + $0x184] sm:$0xf]  ;;  %v9248_v5 = vld [vmem:[%s17693_s9 + $0x3c8] sm:$0xf] }
 0x354   :  { %1585 = vmatpush.bf16.msrb.mxu2 %v8721_v8  ;;  %v10130_v8 = vld [vmem:[%s17693_s9 + $0x19c] sm:$0xf0]  ;;  %v9082_v57 = vld [vmem:[%s17693_s9 + $0x2a0] sm:$0xf0] }
 0x355   :  { %v8953_v10 = vor.u32 %v10130_v8, %v8952_v7  ;;  %v10203_v7 = vld [vmem:[%s17693_s9 + $0x3e4] sm:$0xf0]  ;;  %v9112_v8 = vld [vmem:[%s17693_s9 + $0x2c0] sm:$0xf] }
 0x356   :  { %1598 = vmatpush.bf16.msrb.mxu3 %v8669_v13  ;;  %1574 = vmatpush.bf16.msra.mxu1 %v8633_v22  ;;  %v8957_v13 = vor.u32 %v10126_v9, %v8954_v11  ;;  %v10110_v22 = vld [vmem:[%s17693_s9 + $0x104] sm:$0xf]  ;;  %v10170_v9 = vld [vmem:[%s17693_s9 + $0x2dc] sm:$0xf0] }
 0x357   :  { %v8893_v25 = vor.u32 %v10110_v22, %v8890_v24  ;;  %v9113_v11 = vor.u32 %v10170_v9, %v9112_v8  ;;  %v9178_v22 = vld [vmem:[%s17693_s9 + $0x360] sm:$0xf0]  ;;  %v10187_v24 = vld [vmem:[%s17693_s9 + $0x364] sm:$0xf0] }
 0x358   :  { %1586 = vmatpush.bf16.msrb.mxu2 %v8713_v20  ;;  %v8888_v20 = vld [vmem:[%s17693_s9 + $0x100] sm:$0xf]  ;;  %v10123_v8 = vld [vmem:[%s17693_s9 + $0x164] sm:$0xf0] }
 0x359   :  { %1575 = vmatmul.bf16.vlgmr.msra.gmra.mxu1 %v8625_v33  ;;  %v8889_v23 = vor.u32 %v10114_v21, %v8888_v20  ;;  %v10182_v21 = vld [vmem:[%s17693_s9 + $0x344] sm:$0xf]  ;;  %v9056_v9 = vld [vmem:[%s17693_s9 + $0x248] sm:$0xf] }
 0x35a   :  { %1609 = vmatpush.bf16.msrb.mxu1 %v8757_v26  ;;  %1599 = vmatpush.bf16.msrb.mxu3 %v8661_v27  ;;  %v8856_v27 = vld [vmem:[%s17693_s9 + $0xc0] sm:$0xf] }
 0x35b   :  { %v8857_v30 = vor.u32 %v10106_v28, %v8856_v27  ;;  %v9181_v28 = vor.u32 %v10182_v21, %v9178_v22  ;;  %v9024_v21 = vld [vmem:[%s17693_s9 + $0x208] sm:$0xf] }
 0x35c   :  { %1587 = vmatpush.bf16.msrb.mxu2 %v8705_v32  ;;  %v10102_v32 = vld [vmem:[%s17693_s9 + $0xc4] sm:$0xf] }
 0x35e   :  { %1610 = vmatpush.bf16.msrb.mxu1 %v8749_v36  ;;  %1600 = vmatpush.bf16.msrb.mxu3 %v8653_v37  ;;  %v8824_v36 = vld [vmem:[%s17693_s9 + $0x80] sm:$0xf] }
 0x35f   :  { %v10098_v37 = vld [vmem:[%s17693_s9 + $0x9c] sm:$0xf0] }
 0x360   :  { %1588 = vmatpush.bf16.msrb.mxu2 %v8697_v42  ;;  %v8825_v40 = vor.u32 %v10098_v37, %v8824_v36  ;;  %v10094_v42 = vld [vmem:[%s17693_s9 + $0x84] sm:$0xf]  ;;  %v9152_v37 = vld [vmem:[%s17693_s9 + $0x308] sm:$0xf] }
 0x361   :  { %v9146_v36 = vld [vmem:[%s17693_s9 + $0x320] sm:$0xf0] }
 0x362   :  { %1611 = vmatpush.bf16.msrb.mxu1 %v8741_v46  ;;  %1601 = vmatpush.bf16.msrb.mxu3 %v8645_v47  ;;  %v8829_v46 = vor.u32 %v10094_v42, %v8826_v44  ;;  %v9016_v42 = vld [vmem:[%s17693_s9 + $0x200] sm:$0xf] }
 0x363   :  { %1589 = vmatmul.bf16.vlgmr.msrb.gmra.mxu2 %v8629_v49  ;;  %v10146_v44 = vld [vmem:[%s17693_s9 + $0x21c] sm:$0xf0] }
 0x364   :  { %2440 = vmatpush.bf16.msra.mxu2 %v8985_v6 }
 0x366   :  { %1612 = vmatpush.bf16.msrb.mxu1 %v8733_v51  ;;  %1602 = vmatpush.bf16.msrb.mxu3 %v8637_v52  ;;  %v10086_v51 = vld [vmem:[%s17693_s9 + $0x44] sm:$0xf] }
 0x367   :  { %v8794_v52 = vld [vmem:[%s17693_s9 + $0x60] sm:$0xf0] }
 0x368   :  { %2441 = vmatpush.bf16.msra.mxu2 %v8953_v10  ;;  %v8797_v54 = vor.u32 %v10086_v51, %v8794_v52  ;;  %v9249_v10 = vor.u32 %v10203_v7, %v9248_v5  ;;  %v8928_v5 = vld [vmem:[%s17693_s9 + $0x148] sm:$0xf] }
 0x369   :  { %1603 = vmatmul.bf16.vlgmr.msrb.gmra.mxu3 %v8625_v33  ;;  %v8858_v33 = vld [vmem:[%s17693_s9 + $0xe0] sm:$0xf0] }
 0x36a   :  { %1613 = vmatpush.bf16.msrb.mxu1 %v8725_v55  ;;  %v8861_v35 = vor.u32 %v10102_v32, %v8858_v33  ;;  %2454 = vmatpush.bf16.msra.mxu3 %v9241_v34  ;;  %v8760_v55 = vld [vmem:[%s17693_s9] sm:$0xf] }
 0x36b   :  { %v8761_v60 = vor.u32 %v10082_v56, %v8760_v55  ;;  %v10158_v56 = vld [vmem:[%s17693_s9 + $0x284] sm:$0xf] }
 0x36c   :  { %2442 = vmatpush.bf16.msra.mxu2 %v8921_v17  ;;  %v10195_v17 = vld [vmem:[%s17693_s9 + $0x3a4] sm:$0xf0] }
 0x36d   :  { %v9217_v20 = vor.u32 %v10195_v17, %v9216_v15  ;;  %v9018_v17 = vld [vmem:[%s17693_s9 + $0x220] sm:$0xf0] }
 0x36e   :  { %1614 = vmatpush.bf16.msrb.mxu1 %v8717_v58  ;;  %2455 = vmatpush.bf16.msra.mxu3 %v9209_v45 }
 0x370   :  { %2443 = vmatpush.bf16.msra.mxu2 %v8889_v23  ;;  %v9184_v23 = vld [vmem:[%s17693_s9 + $0x348] sm:$0xf] }
 0x371   :  { %v9185_v31 = vor.u32 %v10187_v24, %v9184_v23  ;;  %v10147_v23 = vld [vmem:[%s17693_s9 + $0x224] sm:$0xf0] }
 0x372   :  { %1615 = vmatpush.bf16.msrb.mxu1 %v8709_v63  ;;  %2456 = vmatpush.bf16.msra.mxu3 %v9177_v53  ;;  %v10078_v63 = vld [vmem:[%s17693_s9 + $0x4] sm:$0xf]  ;;  %v9025_v24 = vor.u32 %v10147_v23, %v9024_v21 }
 0x374   :  { %2444 = vmatpush.bf16.msra.mxu2 %v8857_v30  ;;  %v10154_v30 = vld [vmem:[%s17693_s9 + $0x25c] sm:$0xf0] }
 0x375   :  { %v9049_v34 = vor.u32 %v10154_v30, %v9048_v29  ;;  %v10107_v29 = vld [vmem:[%s17693_s9 + $0xe4] sm:$0xf0] }
 0x376   :  { %1616 = vmatpush.bf16.msrb.mxu1 %v8701_v2  ;;  %v8765_v2 = vor.u32 %v10078_v63, %v8762_v0  ;;  %2457 = vmatpush.bf16.msra.mxu3 %v9145_v1  ;;  %v9088_v63 = vld [vmem:[%s17693_s9 + $0x288] sm:$0xf] }
 0x377   :  { %v10163_v0 = vld [vmem:[%s17693_s9 + $0x2a4] sm:$0xf0] }
 0x378   :  { %2445 = vmatpush.bf16.msra.mxu2 %v8825_v40  ;;  %v10179_v40 = vld [vmem:[%s17693_s9 + $0x324] sm:$0xf0] }
 0x379   :  { %1617 = vmatmul.bf16.vlgmr.msrb.gmra.mxu1 %v8629_v49  ;;  %v10090_v49 = vld [vmem:[%s17693_s9 + $0x5c] sm:$0xf0]  ;;  %v9153_v41 = vor.u32 %v10179_v40, %v9152_v37 }
 0x37a   :  { %2468 = vmatpush.bf16.msra.mxu1 %v8989_v62  ;;  %v8793_v12 = vor.u32 %v10090_v49, %v8792_v48  ;;  %v9245_v62 = vor.u32 %v10198_v3, %v9242_v4  ;;  %2458 = vmatpush.bf16.msra.mxu3 %v9113_v11  ;;  %v9114_v48 = vld [vmem:[%s17693_s9 + $0x2e0] sm:$0xf0]  ;;  %v8992_v49 = vld [vmem:[%s17693_s9 + $0x1c8] sm:$0xf] }
 0x37b   :  { %v10150_v3 = vld [vmem:[%s17693_s9 + $0x244] sm:$0xf] }
 0x37c   :  { %2446 = vmatpush.bf16.msra.mxu2 %v8793_v12  ;;  %v10139_v12 = vld [vmem:[%s17693_s9 + $0x1e4] sm:$0xf0]  ;;  %v9050_v4 = vld [vmem:[%s17693_s9 + $0x260] sm:$0xf0] }
 0x37d   :  { %v8993_v53 = vor.u32 %v10139_v12, %v8992_v49  ;;  %v9053_v7 = vor.u32 %v10150_v3, %v9050_v4  ;;  %v12161_v12 = vld [vmem:[%s17694_s8] sm:$0x3]  ;;  %v10127_v4 = vld [vmem:[%s17693_s9 + $0x18c] sm:$0xf] }
 0x37e   :  { %2469 = vmatpush.bf16.msra.mxu1 %v8957_v13  ;;  %v10190_v13 = vld [vmem:[%s17693_s9 + $0x384] sm:$0xf] }
 0x37f   :  { %v9213_v16 = vor.u32 %v10190_v13, %v9210_v14  ;;  %v8929_v14 = vor.u32 %v10123_v8, %v8928_v5  ;;  %v10132_v8 = vld [vmem:[%s17693_s9 + $0x1ac] sm:$0xf0] }
 0x380   :  { %2447 = vmatpush.bf16.msra.mxu2 %v8761_v60  ;;  %v9085_v60 = vor.u32 %v10158_v56, %v9082_v57  ;;  %v10135_v56 = vld [vmem:[%s17693_s9 + $0x1cc] sm:$0xf] }
 0x382   :  { %2470 = vmatpush.bf16.msra.mxu1 %v8925_v19  ;;  %v10162_v19 = vld [vmem:[%s17693_s9 + $0x29c] sm:$0xf0] }
 0x384   :  { %2482 = vmatpush.bf16.msrb.mxu2 %v9245_v62 }
 0x386   :  { %2471 = vmatpush.bf16.msra.mxu1 %v8893_v25  ;;  %v9081_v25 = vor.u32 %v10162_v19, %v9080_v18  ;;  %v8896_v19 = vld [vmem:[%s17693_s9 + $0x108] sm:$0xf] }
 0x388   :  { %2483 = vmatpush.bf16.msrb.mxu2 %v9213_v16  ;;  %2459 = vmatpush.bf16.msra.mxu3 %v9081_v25  ;;  %v10142_v16 = vld [vmem:[%s17693_s9 + $0x204] sm:$0xf] }
 0x389   :  { %v9021_v18 = vor.u32 %v10142_v16, %v9018_v17  ;;  %v10124_v16 = vld [vmem:[%s17693_s9 + $0x16c] sm:$0xf0]  ;;  %v10326_v17 = vld [vmem:[%s17695_s10 + $0x3c4] sm:$0xf] }
 0x38a   :  { %2472 = vmatpush.bf16.msra.mxu1 %v8861_v35  ;;  %v10174_v35 = vld [vmem:[%s17693_s9 + $0x304] sm:$0xf] }
 0x38b   :  { %v9149_v38 = vor.u32 %v10174_v35, %v9146_v36 }
 0x38c   :  { %2484 = vmatpush.bf16.msrb.mxu2 %v9181_v28  ;;  %2460 = vmatpush.bf16.msra.mxu3 %v9049_v34  ;;  %v8864_v28 = vld [vmem:[%s17693_s9 + $0xc8] sm:$0xf] }
 0x38d   :  { %v8865_v30 = vor.u32 %v10107_v29, %v8864_v28  ;;  %v8904_v28 = vld [vmem:[%s17693_s9 + $0x110] sm:$0xf] }
 0x38e   :  { %2473 = vmatpush.bf16.msra.mxu1 %v8829_v46  ;;  %v9017_v46 = vor.u32 %v10146_v44, %v9016_v42  ;;  %v10116_v29 = vld [vmem:[%s17693_s9 + $0x12c] sm:$0xf0] }
 0x390   :  { %2485 = vmatpush.bf16.msrb.mxu2 %v9149_v38  ;;  %2461 = vmatpush.bf16.msra.mxu3 %v9017_v46  ;;  %v10091_v38 = vld [vmem:[%s17693_s9 + $0x64] sm:$0xf0] }
 0x392   :  { %2474 = vmatpush.bf16.msra.mxu1 %v8797_v54  ;;  %v10171_v54 = vld [vmem:[%s17693_s9 + $0x2e4] sm:$0xf0] }
 0x393   :  { %v9121_v55 = vor.u32 %v10171_v54, %v9120_v59  ;;  %v1644_v54 = vperm.slane %v12161_v12, 0 }
 0x394   :  { %2496 = vmatpush.bf16.msrb.mxu3 %v8993_v53 }
 0x396   :  { %2475 = vmatpush.bf16.msra.mxu1 %v8765_v2  ;;  %v9089_v2 = vor.u32 %v10163_v0, %v9088_v63 }
 0x39a   :  { %2510 = vmatpush.bf16.msrb.mxu1 %v9249_v10  ;;  %v10155_v10 = vld [vmem:[%s17693_s9 + $0x264] sm:$0xf0] }
 0x39b   :  { %v9057_v15 = vor.u32 %v10155_v10, %v9056_v9 }
 0x39e   :  { %2511 = vmatpush.bf16.msrb.mxu1 %v9217_v20  ;;  %v10115_v20 = vld [vmem:[%s17693_s9 + $0x124] sm:$0xf0] }
 0x39f   :  { %v8897_v22 = vor.u32 %v10115_v20, %v8896_v19 }
 0x3a2   :  { %2512 = vmatpush.bf16.msrb.mxu1 %v9185_v31 }
 0x3a6   :  { %v11902_v26 = vpop.f32.mrf.mxu2  ;;  %2513 = vmatpush.bf16.msrb.mxu1 %v9153_v41 }
 0x3aa   :  { %2514 = vmatpush.bf16.msrb.mxu1 %v9121_v55 }
 0x3ac   :  { %v11931_v39 = vpop.f32.mrf.mxu3 }
 0x3ad   :  { %v1282_v36 = vadd.f32 %v11931_v39, %v11902_v26  ;;  %v10083_v26 = vld [vmem:[%s17693_s9 + $0x24] sm:$0xf0] }
 0x3ae   :  { %v1270_v47 = vpop.f32.mrf.mxu2  ;;  %2515 = vmatpush.bf16.msrb.mxu1 %v9089_v2 }
 0x3af   :  { %v10166_v47 = vld [vmem:[%s17693_s9 + $0x2c4] sm:$0xf] }
 0x3b0   :  { %v9117_v50 = vor.u32 %v10166_v47, %v9114_v48 }
 0x3b2   :  { %2486 = vmatpush.bf16.msrb.mxu2 %v9117_v50  ;;  %2516 = vmatpush.bf16.msrb.mxu1 %v9057_v15  ;;  %v8936_v15 = vld [vmem:[%s17693_s9 + $0x150] sm:$0xf] }
 0x3b3   :  { %v8937_v23 = vor.u32 %v10124_v16, %v8936_v15 }
 0x3b4   :  { %v1283_v58 = vpop.f32.mrf.mxu3 }
 0x3b5   :  { %v8960_v58 = vld [vmem:[%s17693_s9 + $0x188] sm:$0xf] }
 0x3b6   :  { %v11987_v6 = vpop.f32.mrf.mxu1  ;;  %v11989_v43 = vpop.f32.mrf.mxu2  ;;  %v8961_v1 = vor.u32 %v10131_v61, %v8960_v58  ;;  %2487 = vmatpush.bf16.msrb.mxu2 %v9085_v60  ;;  %2517 = vmatpush.bf16.msrb.mxu1 %v9025_v24  ;;  %v8994_v58 = vld [vmem:[%s17693_s9 + $0x1e8] sm:$0xf0]  ;;  %v9000_v60 = vld [vmem:[%s17693_s9 + $0x1d0] sm:$0xf] }
 0x3b7   :  { %v1295_v41 = vadd.f32 %v11987_v6, %v1282_v36  ;;  %v10140_v61 = vld [vmem:[%s17693_s9 + $0x1ec] sm:$0xf0]  ;;  %v8997_v2 = vor.u32 %v10135_v56, %v8994_v58  ;;  %v10111_v24 = vld [vmem:[%s17693_s9 + $0x10c] sm:$0xf] }
 0x3b8   :  { %2497 = vmatpush.bf16.msrb.mxu3 %v8961_v1  ;;  %v9001_v3 = vor.u32 %v10140_v61, %v9000_v60  ;;  %v8802_v56 = vld [vmem:[%s17693_s9 + $0x68] sm:$0xf0]  ;;  %v8808_v60 = vld [vmem:[%s17693_s9 + $0x50] sm:$0xf] }
 0x3b9   :  { %v1308_v46 = vadd.f32 %v11989_v43, %v1295_v41  ;;  %v10199_v41 = vld [vmem:[%s17693_s9 + $0x3cc] sm:$0xf]  ;;  %v10092_v61 = vld [vmem:[%s17693_s9 + $0x6c] sm:$0xf0] }
 0x3ba   :  { %2488 = vmatpush.bf16.msrb.mxu2 %v9053_v7  ;;  %v8968_v7 = vld [vmem:[%s17693_s9 + $0x190] sm:$0xf]  ;;  %v9186_v58 = vld [vmem:[%s17693_s9 + $0x368] sm:$0xf0] }
 0x3bc   :  { %v12030_v27 = vpop.f32.mrf.mxu3  ;;  %2498 = vmatpush.bf16.msrb.mxu3 %v8929_v14  ;;  %v8930_v14 = vld [vmem:[%s17693_s9 + $0x168] sm:$0xf0] }
 0x3be   :  { %v1296_v32 = vpop.f32.mrf.mxu1  ;;  %v1309_v33 = vpop.f32.mrf.mxu2  ;;  %2489 = vmatpush.bf16.msrb.mxu2 %v9021_v18  ;;  %v9754_v18 = vld [vmem:[%s17695_s10 + $0x3e0] sm:$0xf0] }
 0x3bf   :  { %v8832_v32 = vld [vmem:[%s17693_s9 + $0x88] sm:$0xf]  ;;  %v12210_v20 = vor.u32 %v10326_v17, %v9754_v18 }
 0x3c0   :  { %2499 = vmatpush.bf16.msrb.mxu3 %v8897_v22  ;;  %v10099_v33 = vld [vmem:[%s17693_s9 + $0xa4] sm:$0xf0] }
 0x3c1   :  { %v8833_v34 = vor.u32 %v10099_v33, %v8832_v32  ;;  %18018 = vst [vmem:[#allocation4_spill] sm:$0xff] %v12210_v20  ;;  %4022 = vmatpush.bf16.msrb.mxu0 %v12210_v20  ;;  %v1645_v33 = vperm.slane %v12161_v12, 1  ;;  %v10191_v12 = vld [vmem:[%s17693_s9 + $0x38c] sm:$0xf] }
 0x3c4   :  { %v1322_v45 = vpop.f32.mrf.mxu3  ;;  %2500 = vmatpush.bf16.msrb.mxu3 %v8865_v30 }
 0x3c5   :  { %v8768_v45 = vld [vmem:[%s17693_s9 + $0x8] sm:$0xf] }
 0x3c6   :  { %v1333_v51 = vpop.f32.mrf.mxu1  ;;  %v1346_v52 = vpop.f32.mrf.mxu2  ;;  %v8769_v39 = vor.u32 %v10083_v26, %v8768_v45  ;;  %v10108_v45 = vld [vmem:[%s17693_s9 + $0xec] sm:$0xf0] }
 0x3c7   :  { %v1334_v31 = vadd.f32 %v1333_v51, %v12030_v27  ;;  %v8800_v27 = vld [vmem:[%s17693_s9 + $0x48] sm:$0xf] }
 0x3c8   :  { %2501 = vmatpush.bf16.msrb.mxu3 %v8833_v34  ;;  %v8801_v40 = vor.u32 %v10091_v38, %v8800_v27  ;;  %v10103_v38 = vld [vmem:[%s17693_s9 + $0xcc] sm:$0xf] }
 0x3c9   :  { %v1347_v35 = vadd.f32 %v1346_v52, %v1334_v31 }
 0x3cc   :  { %v1359_v62 = vpop.f32.mrf.mxu3  ;;  %2502 = vmatpush.bf16.msrb.mxu3 %v8801_v40  ;;  %v8866_v40 = vld [vmem:[%s17693_s9 + $0xe8] sm:$0xf0] }
 0x3cd   :  { %v1360_v37 = vadd.f32 %v1359_v62, %v1347_v35  ;;  %v8962_v62 = vld [vmem:[%s17693_s9 + $0x1a8] sm:$0xf0] }
 0x3ce   :  { %v1335_v11 = vpop.f32.mrf.mxu1  ;;  %v1348_v13 = vpop.f32.mrf.mxu2  ;;  %v8965_v10 = vor.u32 %v10127_v4, %v8962_v62  ;;  %v10175_v4 = vld [vmem:[%s17693_s9 + $0x30c] sm:$0xf] }
 0x3cf   :  { %v1625_v42 = vrot.slane %v1360_v37, 7  ;;  %v8969_v11 = vor.u32 %v10132_v8, %v8968_v7  ;;  %v10119_v13 = vld [vmem:[%s17693_s9 + $0x14c] sm:$0xf]  ;;  %v8905_v37 = vor.u32 %v10116_v29, %v8904_v28  ;;  %v8776_v7 = vld [vmem:[%s17693_s9 + $0x10] sm:$0xf] }
 0x3d0   :  { %2503 = vmatpush.bf16.msrb.mxu3 %v8769_v39  ;;  %v8933_v22 = vor.u32 %v10119_v13, %v8930_v14  ;;  %v9154_v62 = vld [vmem:[%s17693_s9 + $0x328] sm:$0xf0]  ;;  %v10084_v8 = vld [vmem:[%s17693_s9 + $0x2c] sm:$0xf0]  ;;  %v9258_v13 = vld [vmem:[%s17693_s9 + $0x3f0] sm:$0xf0] }
 0x3d1   :  { %v1628_v48 = vsel %vm17996_vm3, %v1308_v46, %v1625_v42  ;;  %v1627_v6 = vsel %vm1626_vm4, %v1308_v46, %v1625_v42  ;;  %v9250_v42 = vld [vmem:[%s17693_s9 + $0x3e8] sm:$0xf0]  ;;  %v8869_v46 = vor.u32 %v10103_v38, %v8866_v40  ;;  %v9157_v15 = vor.u32 %v10175_v4, %v9154_v62  ;;  %v10156_v62 = vld [vmem:[%s17693_s9 + $0x26c] sm:$0xf0] }
 0x3d2   :  { %v1629_v49 = vrot.slane %v1628_v48, 1  ;;  %v1630_v59 = vperm.slane %v1627_v6, 0  ;;  %v1631_v21 = vperm.slane %v1627_v6, 1  ;;  %v9253_v48 = vor.u32 %v10199_v41, %v9250_v42  ;;  %v10151_v40 = vld [vmem:[%s17693_s9 + $0x24c] sm:$0xf] }
 0x3d3   :  { %v8777_v16 = vor.u32 %v10084_v8, %v8776_v7  ;;  %v9058_v41 = vld [vmem:[%s17693_s9 + $0x268] sm:$0xf0]  ;;  %v9160_v42 = vld [vmem:[%s17693_s9 + $0x310] sm:$0xf]  ;;  %v10120_v7 = vld [vmem:[%s17693_s9 + $0x154] sm:$0xf] }
 0x3d4   :  { %v1361_v25 = vpop.f32.mrf.mxu3  ;;  %v1632_v55 = vperm.slane %v1629_v49, 0  ;;  %v1633_v35 = vperm.slane %v1629_v49, 1  ;;  %v10095_v49 = vld [vmem:[%s17693_s9 + $0x8c] sm:$0xf]  ;;  %v8938_v8 = vld [vmem:[%s17693_s9 + $0x170] sm:$0xf0] }
 0x3d5   :  { %v8898_v25 = vld [vmem:[%s17693_s9 + $0x128] sm:$0xf0] }
 0x3d6   :  { %v1576_v44 = vpop.f32.mrf.mxu1  ;;  %v8901_v36 = vor.u32 %v10111_v24, %v8898_v25  ;;  %v10192_v24 = vld [vmem:[%s17693_s9 + $0x394] sm:$0xf] }
 0x3d7   :  { %v9226_v25 = vld [vmem:[%s17693_s9 + $0x3b0] sm:$0xf0] }
 0x3de   :  { %v1578_v51 = vpop.f32.mrf.mxu1 }
 0x3e6   :  { %v1590_v47 = vpop.f32.mrf.mxu2 }
 0x3e7   :  { %v1591_v50 = vadd.f32 %v1590_v47, %v1576_v44  ;;  %v8872_v44 = vld [vmem:[%s17693_s9 + $0xd0] sm:$0xf] }
 0x3e8   :  { %v8873_v6 = vor.u32 %v10108_v45, %v8872_v44  ;;  %v10180_v44 = vld [vmem:[%s17693_s9 + $0x32c] sm:$0xf0]  ;;  %v10176_v45 = vld [vmem:[%s17693_s9 + $0x314] sm:$0xf] }
 0x3e9   :  { %v1638_v53 = vadd.f32 %v1630_v59, %v1591_v50  ;;  %v8834_v50 = vld [vmem:[%s17693_s9 + $0xa8] sm:$0xf0] }
 0x3ea   :  { %v9218_v59 = vld [vmem:[%s17693_s9 + $0x3a8] sm:$0xf0] }
 0x3eb   :  { %v1648_v63 = vadd.f32 %v1644_v54, %v1638_v53  ;;  %v8837_v53 = vor.u32 %v10095_v49, %v8834_v50  ;;  %v9026_v49 = vld [vmem:[%s17693_s9 + $0x228] sm:$0xf0]  ;;  %v9128_v50 = vld [vmem:[%s17693_s9 + $0x2d0] sm:$0xf] }
 0x3ec   :  { %v1604_v1 = vpop.f32.mrf.mxu3 }
 0x3ee   :  { %v1592_v52 = vpop.f32.mrf.mxu2 }
 0x3ef   :  { %v1593_v43 = vadd.f32 %v1592_v52, %v1578_v51  ;;  %v8840_v51 = vld [vmem:[%s17693_s9 + $0x90] sm:$0xf] }
 0x3f0   :  { %v10100_v52 = vld [vmem:[%s17693_s9 + $0xac] sm:$0xf0] }
 0x3f1   :  { %v1640_v57 = vadd.f32 %v1632_v55, %v1593_v43  ;;  %v8841_v43 = vor.u32 %v10100_v52, %v8840_v51  ;;  %v10087_v55 = vld [vmem:[%s17693_s9 + $0x4c] sm:$0xf]  ;;  %v9002_v51 = vld [vmem:[%s17693_s9 + $0x1f0] sm:$0xf0] }
 0x3f2   :  { %v10168_v52 = vld [vmem:[%s17693_s9 + $0x2d4] sm:$0xf] }
 0x3f3   :  { %v1650_v0 = vadd.f32 %v1644_v54, %v1640_v57  ;;  %v9221_v54 = vor.u32 %v10191_v12, %v9218_v59  ;;  %v10183_v57 = vld [vmem:[%s17693_s9 + $0x34c] sm:$0xf]  ;;  %v10172_v12 = vld [vmem:[%s17693_s9 + $0x2ec] sm:$0xf0]  ;;  %v10136_v59 = vld [vmem:[%s17693_s9 + $0x1d4] sm:$0xf] }
 0x3f4   :  { %v1606_v30 = vpop.f32.mrf.mxu3 }
 0x3f5   :  { %v12179_v5 = vpack.c.bf16 %v1650_v0, %v1648_v63  ;;  %v8805_v63 = vor.u32 %v10087_v55, %v8802_v56  ;;  %v10079_v0 = vld [vmem:[%s17693_s9 + $0xc] sm:$0xf]  ;;  %v9005_v55 = vor.u32 %v10136_v59, %v9002_v51  ;;  %v9096_v56 = vld [vmem:[%s17693_s9 + $0x290] sm:$0xf]  ;;  %v8912_v59 = vld [vmem:[%s17693_s9 + $0x118] sm:$0xf] }
 0x3f6   :  { %v1618_v9 = vpop.f32.mrf.mxu1  ;;  %v10117_v51 = vld [vmem:[%s17693_s9 + $0x134] sm:$0xf0] }
 0x3f7   :  { %2448 = vmatmul.bf16.vlgmr.msra.gmra.mxu2 %v12179_v5  ;;  %2476 = vmatmul.bf16.vlgmr.msra.gmra.mxu1 %v12179_v5  ;;  %v1619_v19 = vadd.f32 %v1618_v9, %v1604_v1  ;;  %v9189_v1 = vor.u32 %v10183_v57, %v9186_v58  ;;  %v9256_v9 = vld [vmem:[%s17693_s9 + $0x3d0] sm:$0xf] }
 0x3f8   :  { %2524 = vmatpush.bf16.msra.mxu2 %v8997_v2  ;;  %2552 = vmatpush.bf16.msra.mxu1 %v9001_v3  ;;  %v8809_v2 = vor.u32 %v10092_v61, %v8808_v60  ;;  %v8770_v3 = vld [vmem:[%s17693_s9 + $0x28] sm:$0xf0]  ;;  %v10164_v58 = vld [vmem:[%s17693_s9 + $0x2ac] sm:$0xf0]  ;;  %v10128_v60 = vld [vmem:[%s17693_s9 + $0x194] sm:$0xf] }
 0x3f9   :  { %v1639_v32 = vadd.f32 %v1631_v21, %v1619_v19  ;;  %v8773_v14 = vor.u32 %v10079_v0, %v8770_v3  ;;  %v10167_v19 = vld [vmem:[%s17693_s9 + $0x2cc] sm:$0xf]  ;;  %v8970_v61 = vld [vmem:[%s17693_s9 + $0x1b0] sm:$0xf0]  ;;  %v9064_v3 = vld [vmem:[%s17693_s9 + $0x250] sm:$0xf] }
 0x3fa   :  { %v9122_v21 = vld [vmem:[%s17693_s9 + $0x2e8] sm:$0xf0]  ;;  %v9098_v0 = vld [vmem:[%s17693_s9 + $0x2b0] sm:$0xf0] }
 0x3fb   :  { %v1649_v26 = vadd.f32 %v1645_v33, %v1639_v32  ;;  %v9125_v28 = vor.u32 %v10167_v19, %v9122_v21  ;;  %v9090_v32 = vld [vmem:[%s17693_s9 + $0x2a8] sm:$0xf0]  ;;  %v10144_v19 = vld [vmem:[%s17693_s9 + $0x214] sm:$0xf] }
 0x3fc   :  { %2525 = vmatpush.bf16.msra.mxu2 %v8965_v10  ;;  %2553 = vmatpush.bf16.msra.mxu1 %v8969_v11  ;;  %v10204_v10 = vld [vmem:[%s17693_s9 + $0x3ec] sm:$0xf0]  ;;  %v10200_v11 = vld [vmem:[%s17693_s9 + $0x3d4] sm:$0xf] }
 0x3fd   :  { %v9257_v17 = vor.u32 %v10204_v10, %v9256_v9  ;;  %v9261_v18 = vor.u32 %v10200_v11, %v9258_v13  ;;  %v10152_v9 = vld [vmem:[%s17693_s9 + $0x254] sm:$0xf]  ;;  %v9065_v11 = vor.u32 %v10156_v62, %v9064_v3  ;;  %v8941_v13 = vor.u32 %v10120_v7, %v8938_v8  ;;  %v10105_v3 = vld [vmem:[%s17693_s9 + $0xdc] sm:$0xf] }
 0x3fe   :  { %v1620_v31 = vpop.f32.mrf.mxu1  ;;  %v9066_v10 = vld [vmem:[%s17693_s9 + $0x270] sm:$0xf0] }
 0x3ff   :  { %v1621_v34 = vadd.f32 %v1620_v31, %v1606_v30  ;;  %v9229_v30 = vor.u32 %v10192_v24, %v9226_v25  ;;  %v10159_v31 = vld [vmem:[%s17693_s9 + $0x28c] sm:$0xf]  ;;  %v9034_v21 = vld [vmem:[%s17693_s9 + $0x230] sm:$0xf0]  ;;  %v10137_v24 = vld [vmem:[%s17693_s9 + $0x1dc] sm:$0xf] }
 0x400   :  { %2526 = vmatpush.bf16.msra.mxu2 %v8933_v22  ;;  %2554 = vmatpush.bf16.msra.mxu1 %v8937_v23  ;;  %v9224_v22 = vld [vmem:[%s17693_s9 + $0x390] sm:$0xf]  ;;  %v9010_v25 = vld [vmem:[%s17693_s9 + $0x1f8] sm:$0xf0] }
 0x401   :  { %v1641_v27 = vadd.f32 %v1633_v35, %v1621_v34  ;;  %v10196_v23 = vld [vmem:[%s17693_s9 + $0x3ac] sm:$0xf0]  ;;  %v10184_v35 = vld [vmem:[%s17693_s9 + $0x354] sm:$0xf] }
 0x402   :  { %v9225_v29 = vor.u32 %v10196_v23, %v9224_v22  ;;  %v10188_v34 = vld [vmem:[%s17693_s9 + $0x36c] sm:$0xf0]  ;;  %v9008_v22 = vld [vmem:[%s17693_s9 + $0x1d8] sm:$0xf] }
 0x403   :  { %v1651_v39 = vadd.f32 %v1645_v33, %v1641_v27  ;;  %v9192_v33 = vld [vmem:[%s17693_s9 + $0x350] sm:$0xf]  ;;  %v10141_v23 = vld [vmem:[%s17693_s9 + $0x1f4] sm:$0xf0] }
 0x404   :  { %2527 = vmatpush.bf16.msra.mxu2 %v8901_v36  ;;  %2555 = vmatpush.bf16.msra.mxu1 %v8905_v37  ;;  %v9194_v36 = vld [vmem:[%s17693_s9 + $0x370] sm:$0xf0]  ;;  %v9093_v37 = vor.u32 %v10159_v31, %v9090_v32  ;;  %v9193_v27 = vor.u32 %v10188_v34, %v9192_v33  ;;  %v9009_v31 = vor.u32 %v10141_v23, %v9008_v22  ;;  %v10093_v22 = vld [vmem:[%s17693_s9 + $0x74] sm:$0xf0] }
 0x405   :  { %v12244_v47 = vpack.c.bf16 %v1651_v39, %v1649_v26  ;;  %v9197_v38 = vor.u32 %v10184_v35, %v9194_v36  ;;  %v9162_v26 = vld [vmem:[%s17693_s9 + $0x330] sm:$0xf0]  ;;  %v9061_v39 = vor.u32 %v10151_v40, %v9058_v41  ;;  %v9013_v34 = vor.u32 %v10137_v24, %v9010_v25  ;;  %v8976_v35 = vld [vmem:[%s17693_s9 + $0x198] sm:$0xf]  ;;  %v10089_v25 = vld [vmem:[%s17693_s9 + $0x5c] sm:$0xf] }
 0x406   :  { %v10104_v32 = vld [vmem:[%s17693_s9 + $0xd4] sm:$0xf]  ;;  %v10133_v36 = vld [vmem:[%s17693_s9 + $0x1b4] sm:$0xf0] }
 0x407   :  { %2462 = vmatmul.bf16.vlgmr.msra.gmra.mxu3 %v12244_v47  ;;  %2490 = vmatmul.bf16.vlgmr.msrb.gmra.mxu2 %v12244_v47  ;;  %v8874_v33 = vld [vmem:[%s17693_s9 + $0xf0] sm:$0xf0]  ;;  %v8977_v40 = vor.u32 %v10133_v36, %v8976_v35  ;;  %v9200_v23 = vld [vmem:[%s17693_s9 + $0x358] sm:$0xf]  ;;  %v10081_v36 = vld [vmem:[%s17693_s9 + $0x1c] sm:$0xf] }
 0x408   :  { %2518 = vmatmul.bf16.vlgmr.msrb.gmra.mxu1 %v12244_v47  ;;  %2528 = vmatpush.bf16.msra.mxu2 %v8869_v46  ;;  %v9161_v46 = vor.u32 %v10180_v44, %v9160_v42  ;;  %v10096_v41 = vld [vmem:[%s17693_s9 + $0x94] sm:$0xf]  ;;  %v10189_v24 = vld [vmem:[%s17693_s9 + $0x374] sm:$0xf0] }
 0x409   :  { %2538 = vmatpush.bf16.msra.mxu3 %v9253_v48  ;;  %2556 = vmatpush.bf16.msra.mxu1 %v8873_v6  ;;  %v9165_v48 = vor.u32 %v10176_v45, %v9162_v26  ;;  %v10143_v6 = vld [vmem:[%s17693_s9 + $0x20c] sm:$0xf]  ;;  %v8842_v42 = vld [vmem:[%s17693_s9 + $0xb0] sm:$0xf0]  ;;  %v8944_v45 = vld [vmem:[%s17693_s9 + $0x158] sm:$0xf] }
 0x40a   :  { %v10125_v26 = vld [vmem:[%s17693_s9 + $0x174] sm:$0xf0] }
 0x40b   :  { %v10181_v35 = vld [vmem:[%s17693_s9 + $0x334] sm:$0xf0] }
 0x40c   :  { %2529 = vmatpush.bf16.msra.mxu2 %v8837_v53  ;;  %v9130_v53 = vld [vmem:[%s17693_s9 + $0x2f0] sm:$0xf0] }
 0x40d   :  { %2539 = vmatpush.bf16.msra.mxu3 %v9221_v54  ;;  %2557 = vmatpush.bf16.msra.mxu1 %v8841_v43  ;;  %v9029_v54 = vor.u32 %v10143_v6, %v9026_v49  ;;  %v9129_v43 = vor.u32 %v10172_v12, %v9128_v50  ;;  %v9133_v57 = vor.u32 %v10168_v52, %v9130_v53  ;;  %v10088_v49 = vld [vmem:[%s17693_s9 + $0x54] sm:$0xf]  ;;  %v10113_v52 = vld [vmem:[%s17693_s9 + $0x11c] sm:$0xf] }
 0x40e   :  { %v8945_v6 = vor.u32 %v10125_v26, %v8944_v45  ;;  %v8810_v50 = vld [vmem:[%s17693_s9 + $0x70] sm:$0xf0]  ;;  %v8914_v53 = vld [vmem:[%s17693_s9 + $0x138] sm:$0xf0] }
 0x410   :  { %2530 = vmatpush.bf16.msra.mxu2 %v8805_v63  ;;  %v10160_v63 = vld [vmem:[%s17693_s9 + $0x294] sm:$0xf] }
 0x411   :  { %2540 = vmatpush.bf16.msra.mxu3 %v9189_v1  ;;  %2558 = vmatpush.bf16.msra.mxu1 %v8809_v2  ;;  %v9097_v1 = vor.u32 %v10164_v58, %v9096_v56  ;;  %v8973_v2 = vor.u32 %v10128_v60, %v8970_v61  ;;  %v9101_v4 = vor.u32 %v10160_v63, %v9098_v0  ;;  %v10318_v58 = vld [vmem:[%s17695_s10 + $0x384] sm:$0xf]  ;;  %v10109_v63 = vld [vmem:[%s17693_s9 + $0xf4] sm:$0xf0] }
 0x412   :  { %v8913_v56 = vor.u32 %v10117_v51, %v8912_v59  ;;  %v9722_v60 = vld [vmem:[%s17695_s10 + $0x3a0] sm:$0xf0]  ;;  %v8917_v61 = vor.u32 %v10113_v52, %v8914_v53  ;;  %v9264_v0 = vld [vmem:[%s17693_s9 + $0x3d8] sm:$0xf] }
 0x413   :  { %v9104_v52 = vld [vmem:[%s17693_s9 + $0x298] sm:$0xf] }
 0x414   :  { %2531 = vmatpush.bf16.msra.mxu2 %v8773_v14  ;;  %v9032_v14 = vld [vmem:[%s17693_s9 + $0x210] sm:$0xf]  ;;  %v10165_v53 = vld [vmem:[%s17693_s9 + $0x2b4] sm:$0xf0] }
 0x415   :  { %2541 = vmatpush.bf16.msra.mxu3 %v9157_v15  ;;  %2559 = vmatpush.bf16.msra.mxu1 %v8777_v16  ;;  %v10148_v15 = vld [vmem:[%s17693_s9 + $0x22c] sm:$0xf0]  ;;  %v9069_v16 = vor.u32 %v10152_v9, %v9066_v10  ;;  %v8848_v9 = vld [vmem:[%s17693_s9 + $0x98] sm:$0xf] }
 0x417   :  { %2504 = vmatmul.bf16.vlgmr.msrb.gmra.mxu3 %v12179_v5  ;;  %2532 = vmatmul.bf16.vlgmr.msra.gmra.mxu2 %v12179_v5 }
 0x418   :  { %2566 = vmatpush.bf16.msrb.mxu2 %v9257_v17  ;;  %2560 = vmatmul.bf16.vlgmr.msra.gmra.mxu1 %v12179_v5  ;;  %v10112_v17 = vld [vmem:[%s17693_s9 + $0x114] sm:$0xf] }
 0x419   :  { %2594 = vmatpush.bf16.msrb.mxu1 %v9261_v18  ;;  %2542 = vmatpush.bf16.msra.mxu3 %v9125_v28  ;;  %v8906_v18 = vld [vmem:[%s17693_s9 + $0x130] sm:$0xf0]  ;;  %v9033_v28 = vor.u32 %v10148_v15, %v9032_v14  ;;  %v10197_v14 = vld [vmem:[%s17693_s9 + $0x3b4] sm:$0xf0]  ;;  %v10097_v15 = vld [vmem:[%s17693_s9 + $0x9c] sm:$0xf] }
 0x41c   :  { %2567 = vmatpush.bf16.msrb.mxu2 %v9225_v29  ;;  %v8909_v29 = vor.u32 %v10112_v17, %v8906_v18 }
 0x41d   :  { %2595 = vmatpush.bf16.msrb.mxu1 %v9229_v30  ;;  %2543 = vmatpush.bf16.msra.mxu3 %v9093_v37  ;;  %v9037_v30 = vor.u32 %v10144_v19, %v9034_v21  ;;  %v10129_v37 = vld [vmem:[%s17693_s9 + $0x19c] sm:$0xf]  ;;  %v8816_v19 = vld [vmem:[%s17693_s9 + $0x58] sm:$0xf] }
 0x420   :  { %2568 = vmatpush.bf16.msrb.mxu2 %v9193_v27  ;;  %v8978_v27 = vld [vmem:[%s17693_s9 + $0x1b8] sm:$0xf0] }
 0x421   :  { %2596 = vmatpush.bf16.msrb.mxu1 %v9197_v38  ;;  %2544 = vmatpush.bf16.msra.mxu3 %v9061_v39  ;;  %v8877_v38 = vor.u32 %v10104_v32, %v8874_v33  ;;  %v8981_v44 = vor.u32 %v10129_v37, %v8978_v27  ;;  %v10121_v39 = vld [vmem:[%s17693_s9 + $0x15c] sm:$0xf]  ;;  %v10085_v32 = vld [vmem:[%s17693_s9 + $0x34] sm:$0xf0] }
 0x422   :  { %v8786_v37 = vld [vmem:[%s17693_s9 + $0x38] sm:$0xf0] }
 0x423   :  { %v10201_v27 = vld [vmem:[%s17693_s9 + $0x3dc] sm:$0xf]  ;;  %v8789_v45 = vor.u32 %v10081_v36, %v8786_v37  ;;  %v10250_v36 = vld [vmem:[%s17695_s10 + $0x15c] sm:$0xf0] }
 0x424   :  { %2569 = vmatpush.bf16.msrb.mxu2 %v9161_v46  ;;  %v8946_v46 = vld [vmem:[%s17693_s9 + $0x178] sm:$0xf0] }
 0x425   :  { %2597 = vmatpush.bf16.msrb.mxu1 %v9165_v48  ;;  %2545 = vmatpush.bf16.msra.mxu3 %v9029_v54  ;;  %v8845_v48 = vor.u32 %v10096_v41, %v8842_v42  ;;  %v8949_v12 = vor.u32 %v10121_v39, %v8946_v46  ;;  %v8813_v54 = vor.u32 %v10088_v49, %v8810_v50  ;;  %v10330_v41 = vld [vmem:[%s17695_s10 + $0x3dc] sm:$0xf0]  ;;  %v9136_v39 = vld [vmem:[%s17693_s9 + $0x2d8] sm:$0xf] }
 0x426   :  { %v10173_v46 = vld [vmem:[%s17693_s9 + $0x2f4] sm:$0xf0]  ;;  %v9720_v50 = vld [vmem:[%s17695_s10 + $0x380] sm:$0xf] }
 0x427   :  { %v9137_v59 = vor.u32 %v10173_v46, %v9136_v39  ;;  %v9690_v39 = vld [vmem:[%s17695_s10 + $0x360] sm:$0xf0]  ;;  %v10242_v46 = vld [vmem:[%s17695_s10 + $0x11c] sm:$0xf0] }
 0x428   :  { %2570 = vmatpush.bf16.msrb.mxu2 %v9129_v43  ;;  %2546 = vmatmul.bf16.vlgmr.msra.gmra.mxu3 %v12244_v47  ;;  %v10080_v43 = vld [vmem:[%s17693_s9 + $0x14] sm:$0xf] }
 0x429   :  { %2580 = vmatpush.bf16.msrb.mxu3 %v9005_v55  ;;  %2598 = vmatpush.bf16.msrb.mxu1 %v9133_v57  ;;  %v8778_v55 = vld [vmem:[%s17693_s9 + $0x30] sm:$0xf0]  ;;  %v8880_v57 = vld [vmem:[%s17693_s9 + $0xd8] sm:$0xf] }
 0x42a   :  { %v8781_v62 = vor.u32 %v10080_v43, %v8778_v55  ;;  %v8881_v7 = vor.u32 %v10109_v63, %v8880_v57  ;;  %v9202_v43 = vld [vmem:[%s17693_s9 + $0x378] sm:$0xf0]  ;;  %v10314_v57 = vld [vmem:[%s17695_s10 + $0x35c] sm:$0xf0]  ;;  %v10157_v63 = vld [vmem:[%s17693_s9 + $0x274] sm:$0xf0] }
 0x42c   :  { %2571 = vmatpush.bf16.msrb.mxu2 %v9097_v1  ;;  %v10205_v1 = vld [vmem:[%s17693_s9 + $0x3f4] sm:$0xf0] }
 0x42d   :  { %2581 = vmatpush.bf16.msrb.mxu3 %v8973_v2  ;;  %2599 = vmatpush.bf16.msrb.mxu1 %v9101_v4  ;;  %v12543_v2 = vor.u32 %v10318_v58, %v9722_v60  ;;  %v8882_v4 = vld [vmem:[%s17693_s9 + $0xf8] sm:$0xf0]  ;;  %v9265_v8 = vor.u32 %v10205_v1, %v9264_v0  ;;  %v9105_v58 = vor.u32 %v10165_v53, %v9104_v52  ;;  %v9504_v52 = vld [vmem:[%s17695_s10 + $0x1c8] sm:$0xf] }
 0x42e   :  { %v8885_v10 = vor.u32 %v10105_v3, %v8882_v4  ;;  %v10177_v0 = vld [vmem:[%s17693_s9 + $0x31c] sm:$0xf]  ;;  %v9656_v3 = vld [vmem:[%s17695_s10 + $0x300] sm:$0xf]  ;;  %v10267_v53 = vld [vmem:[%s17695_s10 + $0x1e4] sm:$0xf0] }
 0x42f   :  { %18019 = vst [vmem:[#allocation5_spill] sm:$0xff] %v12543_v2  ;;  %4023 = vmatpush.bf16.msrb.mxu0 %v12543_v2  ;;  %v10306_v4 = vld [vmem:[%s17695_s10 + $0x31c] sm:$0xf0] }
 0x430   :  { %2572 = vmatpush.bf16.msrb.mxu2 %v9065_v11  ;;  %v10101_v11 = vld [vmem:[%s17693_s9 + $0xb4] sm:$0xf0] }
 0x431   :  { %2582 = vmatpush.bf16.msrb.mxu3 %v8941_v13  ;;  %2600 = vmatpush.bf16.msrb.mxu1 %v9069_v16  ;;  %v9232_v13 = vld [vmem:[%s17693_s9 + $0x398] sm:$0xf]  ;;  %v8850_v16 = vld [vmem:[%s17693_s9 + $0xb8] sm:$0xf0]  ;;  %v8849_v17 = vor.u32 %v10101_v11, %v8848_v9 }
 0x432   :  { %v9233_v18 = vor.u32 %v10197_v14, %v9232_v13  ;;  %v8853_v21 = vor.u32 %v10097_v15, %v8850_v16  ;;  %v10149_v9 = vld [vmem:[%s17693_s9 + $0x234] sm:$0xf0]  ;;  %v9138_v11 = vld [vmem:[%s17693_s9 + $0x2f8] sm:$0xf0]  ;;  %v9496_v13 = vld [vmem:[%s17695_s10 + $0x1c0] sm:$0xf]  ;;  %v12702_v15 = vor.u32 %v10306_v4, %v9656_v3  ;;  %v12831_v4 = vor.u32 %v10267_v53, %v9504_v52 }
 0x433   :  { %v10266_v14 = vld [vmem:[%s17695_s10 + $0x1dc] sm:$0xf0]  ;;  %v9466_v3 = vld [vmem:[%s17695_s10 + $0x1a0] sm:$0xf0] }
 0x434   :  { %2573 = vmatpush.bf16.msrb.mxu2 %v9033_v28  ;;  %v8818_v28 = vld [vmem:[%s17693_s9 + $0x78] sm:$0xf0]  ;;  %18023 = vst [vmem:[#allocation9_spill] sm:$0xff] %v12702_v15  ;;  %v9624_v16 = vld [vmem:[%s17695_s10 + $0x2c0] sm:$0xf] }
 0x435   :  { %2583 = vmatpush.bf16.msrb.mxu3 %v8909_v29  ;;  %2601 = vmatpush.bf16.msrb.mxu1 %v9037_v30  ;;  %v8817_v29 = vor.u32 %v10093_v22, %v8816_v19  ;;  %v9201_v30 = vor.u32 %v10189_v24, %v9200_v23  ;;  %v8821_v33 = vor.u32 %v10089_v25, %v8818_v28  ;;  %v10161_v22 = vld [vmem:[%s17693_s9 + $0x29c] sm:$0xf]  ;;  %v9464_v24 = vld [vmem:[%s17695_s10 + $0x180] sm:$0xf]  ;;  %v10270_v52 = vld [vmem:[%s17695_s10 + $0x204] sm:$0xf] }
 0x436   :  { %v9106_v23 = vld [vmem:[%s17693_s9 + $0x2b8] sm:$0xf0]  ;;  %v10258_v25 = vld [vmem:[%s17695_s10 + $0x19c] sm:$0xf0]  ;;  %18035 = vst [vmem:[#allocation21_spill] sm:$0xff] %v12831_v4 }
 0x437   :  { %2574 = vmatmul.bf16.vlgmr.msrb.gmra.mxu2 %v12244_v47  ;;  %v9530_v53 = vld [vmem:[%s17695_s10 + $0x220] sm:$0xf0] }
 0x438   :  { %2608 = vmatpush.bf16.msra.mxu2 %v9009_v31  ;;  %2602 = vmatmul.bf16.vlgmr.msrb.gmra.mxu1 %v12244_v47  ;;  %v8784_v31 = vld [vmem:[%s17693_s9 + $0x18] sm:$0xf] }
 0x439   :  { %2636 = vmatpush.bf16.msra.mxu1 %v9013_v34  ;;  %2584 = vmatpush.bf16.msrb.mxu3 %v8877_v38  ;;  %v9168_v34 = vld [vmem:[%s17693_s9 + $0x318] sm:$0xf]  ;;  %v9266_v38 = vld [vmem:[%s17693_s9 + $0x3f8] sm:$0xf0]  ;;  %v8785_v42 = vor.u32 %v10085_v32, %v8784_v31  ;;  %v9109_v31 = vor.u32 %v10161_v22, %v9106_v23  ;;  %v12734_v32 = vor.u32 %v10258_v25, %v9464_v24  ;;  %v10286_v22 = vld [vmem:[%s17695_s10 + $0x284] sm:$0xf] }
 0x43a   :  { %v9269_v26 = vor.u32 %v10201_v27, %v9266_v38  ;;  %v9560_v27 = vld [vmem:[%s17695_s10 + $0x240] sm:$0xf]  ;;  %v9594_v23 = vld [vmem:[%s17695_s10 + $0x2a0] sm:$0xf0]  ;;  %v9440_v24 = vld [vmem:[%s17695_s10 + $0x148] sm:$0xf] }
 0x43b   :  { %18026 = vst [vmem:[#allocation12_spill] sm:$0xff] %v12734_v32  ;;  %v10282_v38 = vld [vmem:[%s17695_s10 + $0x25c] sm:$0xf0]  ;;  %v10251_v25 = vld [vmem:[%s17695_s10 + $0x164] sm:$0xf0] }
 0x43c   :  { %2609 = vmatpush.bf16.msra.mxu2 %v8977_v40  ;;  %v9752_v40 = vld [vmem:[%s17695_s10 + $0x3c0] sm:$0xf] }
 0x43d   :  { %2637 = vmatpush.bf16.msra.mxu1 %v8981_v44  ;;  %2585 = vmatpush.bf16.msrb.mxu3 %v8845_v48  ;;  %v9169_v44 = vor.u32 %v10181_v35, %v9168_v34  ;;  %v10193_v48 = vld [vmem:[%s17693_s9 + $0x39c] sm:$0xf]  ;;  %v12631_v49 = vor.u32 %v10330_v41, %v9752_v40  ;;  %v9432_v35 = vld [vmem:[%s17695_s10 + $0x140] sm:$0xf]  ;;  %v10310_v41 = vld [vmem:[%s17695_s10 + $0x344] sm:$0xf] }
 0x43e   :  { %v9074_v34 = vld [vmem:[%s17693_s9 + $0x278] sm:$0xf0] }
 0x43f   :  { %18020 = vst [vmem:[#allocation6_spill] sm:$0xff] %v12631_v49  ;;  %v10145_v40 = vld [vmem:[%s17693_s9 + $0x21c] sm:$0xf] }
 0x440   :  { %2610 = vmatpush.bf16.msra.mxu2 %v8945_v6  ;;  %v9234_v6 = vld [vmem:[%s17693_s9 + $0x3b8] sm:$0xf0] }
 0x441   :  { %2638 = vmatpush.bf16.msra.mxu1 %v8949_v12  ;;  %2586 = vmatpush.bf16.msrb.mxu3 %v8813_v54  ;;  %v10322_v12 = vld [vmem:[%s17695_s10 + $0x39c] sm:$0xf0]  ;;  %v9237_v51 = vor.u32 %v10193_v48, %v9234_v6  ;;  %v10185_v54 = vld [vmem:[%s17693_s9 + $0x35c] sm:$0xf]  ;;  %v10262_v48 = vld [vmem:[%s17695_s10 + $0x1c4] sm:$0xf] }
 0x442   :  { %v12652_v55 = vor.u32 %v10322_v12, %v9720_v50  ;;  %v9205_v60 = vor.u32 %v10185_v54, %v9202_v43  ;;  %v9498_v6 = vld [vmem:[%s17695_s10 + $0x1e0] sm:$0xf0]  ;;  %v12786_v50 = vor.u32 %v10282_v38, %v9560_v27  ;;  %v12788_v12 = vor.u32 %v10310_v41, %v9690_v39  ;;  %v9408_v38 = vld [vmem:[%s17695_s10 + $0x108] sm:$0xf]  ;;  %v9272_v39 = vld [vmem:[%s17695_s10] sm:$0xf] }
 0x443   :  { %v10302_v54 = vld [vmem:[%s17695_s10 + $0x304] sm:$0xf]  ;;  %v12906_v27 = vor.u32 %v10251_v25, %v9440_v24  ;;  %v9312_v24 = vld [vmem:[%s17695_s10 + $0x48] sm:$0xf] }
 0x444   :  { %2611 = vmatpush.bf16.msra.mxu2 %v8913_v56  ;;  %18021 = vst [vmem:[#allocation7_spill] sm:$0xff] %v12652_v55  ;;  %v9688_v56 = vld [vmem:[%s17695_s10 + $0x340] sm:$0xf]  ;;  %v9658_v43 = vld [vmem:[%s17695_s10 + $0x320] sm:$0xf0]  ;;  %4024 = vmatpush.bf16.msrb.mxu0 %v12788_v12 }
 0x445   :  { %2639 = vmatpush.bf16.msra.mxu1 %v8917_v61  ;;  %2587 = vmatpush.bf16.msrb.mxu3 %v8781_v62  ;;  %v9072_v61 = vld [vmem:[%s17693_s9 + $0x258] sm:$0xf]  ;;  %v12675_v1 = vor.u32 %v10314_v57, %v9688_v56  ;;  %18029 = vst [vmem:[#allocation15_spill] sm:$0xff] %v12786_v50  ;;  %v10278_v41 = vld [vmem:[%s17695_s10 + $0x244] sm:$0xf] }
 0x446   :  { %v9073_v62 = vor.u32 %v10157_v63, %v9072_v61  ;;  %18030 = vst [vmem:[#allocation16_spill] sm:$0xff] %v12788_v12  ;;  %v10234_v61 = vld [vmem:[%s17695_s10 + $0xdc] sm:$0xf0]  ;;  %v10219_v25 = vld [vmem:[%s17695_s10 + $0x64] sm:$0xf0] }
 0x447   :  { %18022 = vst [vmem:[#allocation8_spill] sm:$0xff] %v12675_v1 }
 0x448   :  { %2612 = vmatpush.bf16.msra.mxu2 %v8881_v7  ;;  %2588 = vmatmul.bf16.vlgmr.msrb.gmra.mxu3 %v12179_v5  ;;  %18043 = vst [vmem:[#allocation29_spill] sm:$0xff] %v12906_v27 }
 0x449   :  { %2622 = vmatpush.bf16.msra.mxu3 %v9265_v8  ;;  %2640 = vmatpush.bf16.msra.mxu1 %v8885_v10  ;;  %v9040_v8 = vld [vmem:[%s17693_s9 + $0x218] sm:$0xf]  ;;  %v10169_v10 = vld [vmem:[%s17693_s9 + $0x2dc] sm:$0xf] }
 0x44a   :  { %v9141_v19 = vor.u32 %v10169_v10, %v9138_v11 }
 0x44c   :  { %2613 = vmatpush.bf16.msra.mxu2 %v8849_v17  ;;  %v10298_v17 = vld [vmem:[%s17695_s10 + $0x2dc] sm:$0xf0] }
 0x44d   :  { %2623 = vmatpush.bf16.msra.mxu3 %v9233_v18  ;;  %2641 = vmatpush.bf16.msra.mxu1 %v8853_v21  ;;  %v9041_v18 = vor.u32 %v10149_v9, %v9040_v8  ;;  %v12710_v21 = vor.u32 %v10266_v14, %v9496_v13  ;;  %v12725_v28 = vor.u32 %v10298_v17, %v9624_v16  ;;  %v10294_v8 = vld [vmem:[%s17695_s10 + $0x2c4] sm:$0xf]  ;;  %v9336_v13 = vld [vmem:[%s17695_s10 + $0x80] sm:$0xf] }
 0x44e   :  { %v9626_v9 = vld [vmem:[%s17695_s10 + $0x2e0] sm:$0xf0]  ;;  %v10226_v14 = vld [vmem:[%s17695_s10 + $0x9c] sm:$0xf0] }
 0x44f   :  { %18024 = vst [vmem:[#allocation10_spill] sm:$0xff] %v12710_v21  ;;  %v10246_v16 = vld [vmem:[%s17695_s10 + $0x144] sm:$0xf]  ;;  %v12862_v17 = vor.u32 %v10294_v8, %v9626_v9  ;;  %v9344_v8 = vld [vmem:[%s17695_s10 + $0x88] sm:$0xf] }
 0x450   :  { %2614 = vmatpush.bf16.msra.mxu2 %v8817_v29  ;;  %18025 = vst [vmem:[#allocation11_spill] sm:$0xff] %v12725_v28  ;;  %v9592_v29 = vld [vmem:[%s17695_s10 + $0x280] sm:$0xf]  ;;  %v10227_v9 = vld [vmem:[%s17695_s10 + $0xa4] sm:$0xf0] }
 0x451   :  { %2624 = vmatpush.bf16.msra.mxu3 %v9201_v30  ;;  %2642 = vmatpush.bf16.msra.mxu1 %v8821_v33  ;;  %v10290_v30 = vld [vmem:[%s17695_s10 + $0x29c] sm:$0xf0]  ;;  %v10153_v33 = vld [vmem:[%s17693_s9 + $0x25c] sm:$0xf]  ;;  %18038 = vst [vmem:[#allocation24_spill] sm:$0xff] %v12862_v17 }
 0x452   :  { %v12749_v37 = vor.u32 %v10290_v30, %v9592_v29  ;;  %v12885_v29 = vor.u32 %v10226_v14, %v9336_v13  ;;  %v17702_v30 = vmov 0   ;;  %v10214_v14 = vld [vmem:[%s17695_s10 + $0x44] sm:$0xf] }
 0x454   :  { %2615 = vmatpush.bf16.msra.mxu2 %v8785_v42  ;;  %18027 = vst [vmem:[#allocation13_spill] sm:$0xff] %v12749_v37  ;;  %v9077_v42 = vor.u32 %v10153_v33, %v9074_v34  ;;  %v10218_v33 = vld [vmem:[%s17695_s10 + $0x5c] sm:$0xf0]  ;;  %v12897_v34 = vor.u32 %v10286_v22, %v9594_v23  ;;  %v10327_v22 = vld [vmem:[%s17695_s10 + $0x3cc] sm:$0xf] }
 0x455   :  { %2625 = vmatpush.bf16.msra.mxu3 %v9169_v44  ;;  %2643 = vmatpush.bf16.msra.mxu1 %v8789_v45  ;;  %v12765_v44 = vor.u32 %v10250_v36, %v9432_v35  ;;  %v9042_v45 = vld [vmem:[%s17693_s9 + $0x238] sm:$0xf0]  ;;  %18040 = vst [vmem:[#allocation26_spill] sm:$0xff] %v12885_v29  ;;  %v10238_v35 = vld [vmem:[%s17695_s10 + $0x104] sm:$0xf] }
 0x456   :  { %v9045_v56 = vor.u32 %v10145_v40, %v9042_v45  ;;  %18042 = vst [vmem:[#allocation28_spill] sm:$0xff] %v12897_v34  ;;  %v9402_v36 = vld [vmem:[%s17695_s10 + $0x120] sm:$0xf0]  ;;  %v10243_v40 = vld [vmem:[%s17695_s10 + $0x124] sm:$0xf0] }
 0x457   :  { %2616 = vmatmul.bf16.vlgmr.msra.gmra.mxu2 %v12179_v5  ;;  %18028 = vst [vmem:[#allocation14_spill] sm:$0xff] %v12765_v44  ;;  %v9762_v23 = vld [vmem:[%s17695_s10 + $0x3e8] sm:$0xf0] }
 0x458   :  { %2650 = vmatpush.bf16.msrb.mxu2 %v9269_v26  ;;  %2644 = vmatmul.bf16.vlgmr.msra.gmra.mxu1 %v12179_v5  ;;  %v9170_v5 = vld [vmem:[%s17693_s9 + $0x338] sm:$0xf0]  ;;  %v9400_v26 = vld [vmem:[%s17695_s10 + $0x100] sm:$0xf] }
 0x459   :  { %3445 = vmatpush.bf16.msrb.mxu1 %v12631_v49  ;;  %2626 = vmatpush.bf16.msra.mxu3 %v9137_v59  ;;  %v9173_v7 = vor.u32 %v10177_v0, %v9170_v5  ;;  %v9528_v59 = vld [vmem:[%s17695_s10 + $0x200] sm:$0xf]  ;;  %v12810_v57 = vor.u32 %v10242_v46, %v9400_v26  ;;  %v12823_v0 = vor.u32 %v10302_v54, %v9658_v43  ;;  %v10254_v5 = vld [vmem:[%s17695_s10 + $0x184] sm:$0xf]  ;;  %v9376_v54 = vld [vmem:[%s17695_s10 + $0xc8] sm:$0xf] }
 0x45a   :  { %v12850_v11 = vor.u32 %v10254_v5, %v9466_v3  ;;  %v12925_v26 = vor.u32 %v10238_v35, %v9402_v36  ;;  %v10210_v46 = vld [vmem:[%s17695_s10 + $0x1c] sm:$0xf0]  ;;  %v10235_v43 = vld [vmem:[%s17695_s10 + $0xe4] sm:$0xf0]  ;;  %v10222_v3 = vld [vmem:[%s17695_s10 + $0x84] sm:$0xf] }
 0x45b   :  { %18031 = vst [vmem:[#allocation17_spill] sm:$0xff] %v12810_v57  ;;  %4025 = vmatpush.bf16.msrb.mxu0 %v12823_v0  ;;  %v10206_v36 = vld [vmem:[%s17695_s10 + $0x4] sm:$0xf] }
 0x45c   :  { %2651 = vmatpush.bf16.msrb.mxu2 %v9237_v51  ;;  %v10274_v51 = vld [vmem:[%s17695_s10 + $0x21c] sm:$0xf0]  ;;  %18034 = vst [vmem:[#allocation20_spill] sm:$0xff] %v12823_v0 }
 0x45d   :  { %3446 = vmatpush.bf16.msrb.mxu1 %v12652_v55  ;;  %2627 = vmatpush.bf16.msra.mxu3 %v9105_v58  ;;  %v12812_v58 = vor.u32 %v10262_v48, %v9498_v6  ;;  %v12821_v63 = vor.u32 %v10274_v51, %v9528_v59  ;;  %18037 = vst [vmem:[#allocation23_spill] sm:$0xff] %v12850_v11  ;;  %v10230_v48 = vld [vmem:[%s17695_s10 + $0xc4] sm:$0xf] }
 0x45e   :  { %18045 = vst [vmem:[#allocation31_spill] sm:$0xff] %v12925_v26  ;;  %v9370_v59 = vld [vmem:[%s17695_s10 + $0xe0] sm:$0xf0]  ;;  %v12942_v51 = vor.u32 %v10243_v40, %v9408_v38 }
 0x45f   :  { %18032 = vst [vmem:[#allocation18_spill] sm:$0xff] %v12812_v58  ;;  %4026 = vmatpush.bf16.msrb.mxu0 %v12862_v17  ;;  %v9274_v38 = vld [vmem:[%s17695_s10 + $0x20] sm:$0xf0] }
 0x460   :  { %2652 = vmatpush.bf16.msrb.mxu2 %v9205_v60  ;;  %v9368_v60 = vld [vmem:[%s17695_s10 + $0xc0] sm:$0xf]  ;;  %18033 = vst [vmem:[#allocation19_spill] sm:$0xff] %v12821_v63 }
 0x461   :  { %3447 = vmatpush.bf16.msrb.mxu1 %v12675_v1  ;;  %2628 = vmatpush.bf16.msra.mxu3 %v9073_v62  ;;  %v9472_v62 = vld [vmem:[%s17695_s10 + $0x188] sm:$0xf]  ;;  %v12847_v10 = vor.u32 %v10234_v61, %v9368_v60  ;;  %18047 = vst [vmem:[#allocation33_spill] sm:$0xff] %v12942_v51  ;;  %v12961_v60 = vor.u32 %v10230_v48, %v9370_v59 }
 0x462   :  { %v12963_v61 = vor.u32 %v10270_v52, %v9530_v53  ;;  %v10331_v48 = vld [vmem:[%s17695_s10 + $0x3e4] sm:$0xf0] }
 0x463   :  { %18036 = vst [vmem:[#allocation22_spill] sm:$0xff] %v12847_v10  ;;  %4027 = vmatpush.bf16.msrb.mxu0 %v12897_v34  ;;  %v9280_v59 = vld [vmem:[%s17695_s10 + $0x8] sm:$0xf] }
 0x464   :  { %2653 = vmatpush.bf16.msrb.mxu2 %v9173_v7  ;;  %v10259_v7 = vld [vmem:[%s17695_s10 + $0x1a4] sm:$0xf0]  ;;  %18049 = vst [vmem:[#allocation35_spill] sm:$0xff] %v12961_v60 }
 0x465   :  { %3448 = vmatpush.bf16.msrb.mxu1 %v12702_v15  ;;  %2629 = vmatpush.bf16.msra.mxu3 %v9041_v18  ;;  %v9434_v18 = vld [vmem:[%s17695_s10 + $0x160] sm:$0xf0]  ;;  %18050 = vst [vmem:[#allocation36_spill] sm:$0xff] %v12963_v61  ;;  %v10211_v52 = vld [vmem:[%s17695_s10 + $0x24] sm:$0xf0] }
 0x468   :  { %2654 = vmatpush.bf16.msrb.mxu2 %v9141_v19  ;;  %2630 = vmatmul.bf16.vlgmr.msra.gmra.mxu3 %v12244_v47  ;;  %v12868_v19 = vor.u32 %v10259_v7, %v9472_v62  ;;  %v9338_v62 = vld [vmem:[%s17695_s10 + $0xa0] sm:$0xf0]  ;;  %v12972_v7 = vor.u32 %v10235_v43, %v9376_v54 }
 0x469   :  { %3432 = vmatpush.bf16.msrb.mxu3 %v12710_v21  ;;  %3449 = vmatpush.bf16.msrb.mxu1 %v12725_v28  ;;  %v12984_v13 = vor.u32 %v10222_v3, %v9338_v62  ;;  %v13055_v3 = vor.u32 %v10206_v36, %v9274_v38 }
 0x46a   :  { %18039 = vst [vmem:[#allocation25_spill] sm:$0xff] %v12868_v19 }
 0x46b   :  { %18051 = vst [vmem:[#allocation37_spill] sm:$0xff] %v12972_v7 }
 0x46c   :  { %2655 = vmatpush.bf16.msrb.mxu2 %v9109_v31  ;;  %v9304_v31 = vld [vmem:[%s17695_s10 + $0x40] sm:$0xf]  ;;  %18052 = vst [vmem:[#allocation38_spill] sm:$0xff] %v12984_v13 }
 0x46d   :  { %3433 = vmatpush.bf16.msrb.mxu3 %v12734_v32  ;;  %3450 = vmatpush.bf16.msrb.mxu1 %v12749_v37  ;;  %v12922_v45 = vor.u32 %v10218_v33, %v9304_v31  ;;  %v13008_v31 = vor.u32 %v10327_v22, %v9762_v23  ;;  %v13013_v33 = vld [vmem:[%s17696_s11] sm:$0xff]  ;;  %18059 = vst [vmem:[#allocation45_spill] sm:$0xff] %v13055_v3  ;;  %v9728_v22 = vld [vmem:[%s17695_s10 + $0x388] sm:$0xf] }
 0x46e   :  { %v17700_v54 = vperm.slane %v13013_v33, 1  ;;  %v17701_v43 = vperm.slane %v13013_v33, 0  ;;  %v10323_v23 = vld [vmem:[%s17695_s10 + $0x3a4] sm:$0xf0] }
 0x46f   :  { %18044 = vst [vmem:[#allocation30_spill] sm:$0xff] %v12922_v45 }
 0x470   :  { %2656 = vmatpush.bf16.msrb.mxu2 %v9077_v42  ;;  %v9562_v42 = vld [vmem:[%s17695_s10 + $0x260] sm:$0xf0]  ;;  %18054 = vst [vmem:[#allocation40_spill] sm:$0xff] %v13008_v31 }
 0x471   :  { %3434 = vmatpush.bf16.msrb.mxu3 %v12765_v44  ;;  %3451 = vmatpush.bf16.msrb.mxu1 %v12786_v50  ;;  %v12936_v6 = vor.u32 %v10278_v41, %v9562_v42  ;;  %v9760_v41 = vld [vmem:[%s17695_s10 + $0x3c8] sm:$0xf]  ;;  %v13031_v42 = vor.u32 %v10219_v25, %v9312_v24 }
 0x473   :  { %18046 = vst [vmem:[#allocation32_spill] sm:$0xff] %v12936_v6  ;;  %4028 = vmatpush.bf16.msrb.mxu0 %v12936_v6 }
 0x474   :  { %2657 = vmatpush.bf16.msrb.mxu2 %v9045_v56  ;;  %v12958_v56 = vor.u32 %v10210_v46, %v9272_v39  ;;  %18057 = vst [vmem:[#allocation43_spill] sm:$0xff] %v13031_v42  ;;  %v10319_v39 = vld [vmem:[%s17695_s10 + $0x38c] sm:$0xf]  ;;  %v2477_v62 = vpop.f32.mrf.mxu1 }
 0x475   :  { %3435 = vmatpush.bf16.msrb.mxu3 %v12810_v57  ;;  %3452 = vmatpush.bf16.msrb.mxu1 %v12821_v63  ;;  %v9730_v46 = vld [vmem:[%s17695_s10 + $0x3a8] sm:$0xf0]  ;;  %v2478_v24 = vadd.f32 %v2477_v62, %v17700_v54  ;;  %v10315_v62 = vld [vmem:[%s17695_s10 + $0x364] sm:$0xf0] }
 0x476   :  { %18048 = vst [vmem:[#allocation34_spill] sm:$0xff] %v12958_v56  ;;  %v13049_v53 = vor.u32 %v10319_v39, %v9730_v46  ;;  %v13084_v39 = vor.u32 %v10323_v23, %v9728_v22  ;;  %v10303_v46 = vld [vmem:[%s17695_s10 + $0x30c] sm:$0xf] }
 0x477   :  { %2658 = vmatmul.bf16.vlgmr.msrb.gmra.mxu2 %v12244_v47  ;;  %v12889_v47 = vor.u32 %v10246_v16, %v9434_v18  ;;  %4029 = vmatpush.bf16.msrb.mxu0 %v12963_v61  ;;  %v9306_v16 = vld [vmem:[%s17695_s10 + $0x60] sm:$0xf0]  ;;  %v12993_v18 = vor.u32 %v10227_v9, %v9344_v8  ;;  %v13057_v8 = vor.u32 %v10331_v48, %v9760_v41  ;;  %v10295_v22 = vld [vmem:[%s17695_s10 + $0x2cc] sm:$0xf] }
 0x478   :  { %3458 = vmatpush.bf16.msra.mxu2 %v12812_v58  ;;  %3453 = vmatmul.bf16.vlgmr.msrb.gmra.mxu1 %v17702_v30  ;;  %v13017_v35 = vor.u32 %v10214_v14, %v9306_v16  ;;  %18058 = vst [vmem:[#allocation44_spill] sm:$0xff] %v13049_v53  ;;  %v13060_v9 = vor.u32 %v10211_v52, %v9280_v59  ;;  %v10311_v14 = vld [vmem:[%s17695_s10 + $0x34c] sm:$0xf]  ;;  %v9696_v52 = vld [vmem:[%s17695_s10 + $0x348] sm:$0xf] }
 0x479   :  { %3484 = vmatpush.bf16.msra.mxu1 %v12831_v4  ;;  %3436 = vmatpush.bf16.msrb.mxu3 %v12847_v10  ;;  %18041 = vst [vmem:[#allocation27_spill] sm:$0xff] %v12889_v47  ;;  %v9698_v16 = vld [vmem:[%s17695_s10 + $0x368] sm:$0xf0] }
 0x47a   :  { %v2449_v5 = vpop.f32.mrf.mxu2  ;;  %18053 = vst [vmem:[#allocation39_spill] sm:$0xff] %v12993_v18  ;;  %v13081_v36 = vor.u32 %v10311_v14, %v9698_v16  ;;  %v13111_v16 = vor.u32 %v10315_v62, %v9696_v52  ;;  %v9634_v23 = vld [vmem:[%s17695_s10 + $0x2e8] sm:$0xf0]  ;;  %v9632_v52 = vld [vmem:[%s17695_s10 + $0x2c8] sm:$0xf] }
 0x47b   :  { %18055 = vst [vmem:[#allocation41_spill] sm:$0xff] %v13017_v35  ;;  %4074 = vmatpush.bf16.msra.mxu0 %v13008_v31  ;;  %v2450_v25 = vadd.f32 %v2449_v5, %v17701_v43  ;;  %v9666_v5 = vld [vmem:[%s17695_s10 + $0x328] sm:$0xf0] }
 0x47c   :  { %3459 = vmatpush.bf16.msra.mxu2 %v12850_v11  ;;  %18060 = vst [vmem:[#allocation46_spill] sm:$0xff] %v13057_v8  ;;  %v13107_v14 = vor.u32 %v10303_v46, %v9666_v5  ;;  %v10287_v62 = vld [vmem:[%s17695_s10 + $0x28c] sm:$0xf] }
 0x47d   :  { %3485 = vmatpush.bf16.msra.mxu1 %v12868_v19  ;;  %3437 = vmatpush.bf16.msrb.mxu3 %v12885_v29  ;;  %18061 = vst [vmem:[#allocation47_spill] sm:$0xff] %v13060_v9  ;;  %v10255_v54 = vld [vmem:[%s17695_s10 + $0x18c] sm:$0xf] }
 0x47e   :  { %18062 = vst [vmem:[#allocation48_spill] sm:$0xff] %v13081_v36 }
 0x47f   :  { %4075 = vmatpush.bf16.msra.mxu0 %v13049_v53  ;;  %18063 = vst [vmem:[#allocation49_spill] sm:$0xff] %v13084_v39 }
 0x480   :  { %3460 = vmatpush.bf16.msra.mxu2 %v12889_v47  ;;  %18066 = vst [vmem:[#allocation52_spill] sm:$0xff] %v13107_v14 }
 0x481   :  { %3486 = vmatpush.bf16.msra.mxu1 %v12906_v27  ;;  %3438 = vmatpush.bf16.msrb.mxu3 %v12922_v45  ;;  %18067 = vst [vmem:[#allocation53_spill] sm:$0xff] %v13111_v16 }
 0x482   :  { %v13025_v40 = vpop.f32.mrf.mxu2 }
 0x483   :  { %18056 = vst [vmem:[#allocation42_spill] sm:$0xff] %v13025_v40  ;;  %4076 = vmatpush.bf16.msra.mxu0 %v13081_v36  ;;  %v10300_v40 = vld [vmem:[%s17695_s10 + $0x2ec] sm:$0xf0] }
 0x484   :  { %3461 = vmatpush.bf16.msra.mxu2 %v12925_v26 }
 0x485   :  { %3487 = vmatpush.bf16.msra.mxu1 %v12942_v51  ;;  %3439 = vmatpush.bf16.msrb.mxu3 %v12958_v56 }
 0x487   :  { %4077 = vmatpush.bf16.msra.mxu0 %v13107_v14 }
 0x488   :  { %3462 = vmatpush.bf16.msra.mxu2 %v12961_v60  ;;  %3440 = vmatmul.bf16.vlgmr.msrb.gmra.mxu3 %v17702_v30 }
 0x489   :  { %3471 = vmatpush.bf16.msra.mxu3 %v12210_v20  ;;  %3488 = vmatpush.bf16.msra.mxu1 %v12972_v7  ;;  %v10275_v20 = vld [vmem:[%s17695_s10 + $0x224] sm:$0xf0] }
 0x48a   :  { %v2463_v38 = vpop.f32.mrf.mxu3  ;;  %v2491_v41 = vpop.f32.mrf.mxu2 }
 0x48b   :  { %v13093_v48 = vadd.f32 %v2463_v38, %v2450_v25  ;;  %v13095_v59 = vadd.f32 %v2491_v41, %v2478_v24  ;;  %v9664_v24 = vld [vmem:[%s17695_s10 + $0x308] sm:$0xf]  ;;  %v13128_v38 = vor.u32 %v10295_v22, %v9634_v23  ;;  %v13130_v41 = vpop.f32.mrf.mxu1  ;;  %v9602_v22 = vld [vmem:[%s17695_s10 + $0x2a8] sm:$0xf0] }
 0x48c   :  { %3463 = vmatpush.bf16.msra.mxu2 %v12984_v13  ;;  %v10307_v25 = vld [vmem:[%s17695_s10 + $0x324] sm:$0xf0]  ;;  %18069 = vst [vmem:[#allocation55_spill] sm:$0xff] %v13130_v41  ;;  %v13159_v43 = vor.u32 %v10287_v62, %v9602_v22  ;;  %v9474_v62 = vld [vmem:[%s17695_s10 + $0x1a8] sm:$0xf0] }
 0x48d   :  { %3472 = vmatpush.bf16.msra.mxu3 %v12543_v2  ;;  %3489 = vmatpush.bf16.msra.mxu1 %v12993_v18  ;;  %18064 = vst [vmem:[#allocation50_spill] sm:$0xff] %v13093_v48  ;;  %v13135_v5 = vor.u32 %v10307_v25, %v9664_v24  ;;  %v10299_v23 = vld [vmem:[%s17695_s10 + $0x2e4] sm:$0xf0]  ;;  %v10263_v24 = vld [vmem:[%s17695_s10 + $0x1cc] sm:$0xf] }
 0x48e   :  { %18065 = vst [vmem:[#allocation51_spill] sm:$0xff] %v13095_v59  ;;  %v9506_v25 = vld [vmem:[%s17695_s10 + $0x1e8] sm:$0xf0]  ;;  %4078 = vmatpush.bf16.msra.mxu0 %v13128_v38 }
 0x48f   :  { %18068 = vst [vmem:[#allocation54_spill] sm:$0xff] %v13128_v38  ;;  %v9570_v22 = vld [vmem:[%s17695_s10 + $0x268] sm:$0xf0] }
 0x490   :  { %3464 = vmatpush.bf16.msra.mxu2 %v13017_v35  ;;  %18071 = vst [vmem:[#allocation57_spill] sm:$0xff] %v13135_v5  ;;  %v10231_v41 = vld [vmem:[%s17695_s10 + $0xcc] sm:$0xf] }
 0x491   :  { %3473 = vmatpush.bf16.msra.mxu3 %v12788_v12  ;;  %3490 = vmatpush.bf16.msra.mxu1 %v13031_v42  ;;  %18072 = vst [vmem:[#allocation58_spill] sm:$0xff] %v13159_v43  ;;  %v9536_v12 = vld [vmem:[%s17695_s10 + $0x208] sm:$0xf]  ;;  %v9378_v59 = vld [vmem:[%s17695_s10 + $0xe8] sm:$0xf0] }
 0x492   :  { %v13133_v46 = vpop.f32.mrf.mxu3  ;;  %4079 = vmatpush.bf16.msra.mxu0 %v13159_v43 }
 0x493   :  { %18070 = vst [vmem:[#allocation56_spill] sm:$0xff] %v13133_v46  ;;  %v9314_v46 = vld [vmem:[%s17695_s10 + $0x68] sm:$0xf0] }
 0x494   :  { %3465 = vmatpush.bf16.msra.mxu2 %v13055_v3 }
 0x495   :  { %3474 = vmatpush.bf16.msra.mxu3 %v12823_v0  ;;  %3491 = vmatpush.bf16.msra.mxu1 %v13060_v9  ;;  %v2519_v0 = vpop.f32.mrf.mxu1 }
 0x497   :  { %3466 = vmatmul.bf16.vlgmr.msra.gmra.mxu2 %v17702_v30 }
 0x498   :  { %3497 = vmatpush.bf16.msrb.mxu2 %v13057_v8  ;;  %3492 = vmatmul.bf16.vlgmr.msra.gmra.mxu1 %v17702_v30  ;;  %v13162_v30 = vor.u32 %v10299_v23, %v9632_v52  ;;  %v10279_v52 = vld [vmem:[%s17695_s10 + $0x24c] sm:$0xf] }
 0x499   :  { %3523 = vmatpush.bf16.msrb.mxu1 %v13008_v31  ;;  %3475 = vmatpush.bf16.msra.mxu3 %v12862_v17  ;;  %v9600_v31 = vld [vmem:[%s17695_s10 + $0x288] sm:$0xf]  ;;  %v18078_v17 = vperm.slane %v13013_v33, 2 }
 0x49a   :  { %18073 = vst [vmem:[#allocation59_spill] sm:$0xff] %v13162_v30  ;;  %v2505_v23 = vpop.f32.mrf.mxu3 }
 0x49c   :  { %3498 = vmatpush.bf16.msrb.mxu2 %v13084_v39 }
 0x49d   :  { %3524 = vmatpush.bf16.msrb.mxu1 %v13049_v53  ;;  %3476 = vmatpush.bf16.msra.mxu3 %v12897_v34  ;;  %v13164_v53 = vor.u32 %v10263_v24, %v9506_v25  ;;  %v13191_v25 = vor.u32 %v10255_v54, %v9474_v62  ;;  %v13202_v34 = vor.u32 %v10279_v52, %v9570_v22  ;;  %v9442_v54 = vld [vmem:[%s17695_s10 + $0x168] sm:$0xf0]  ;;  %v13216_v52 = vpop.f32.mrf.mxu2  ;;  %v18080_v22 = vmov 0  }
 0x49e   :  { %v9538_v62 = vld [vmem:[%s17695_s10 + $0x228] sm:$0xf0]  ;;  %18079 = vst [vmem:[#allocation64_spill] sm:$0xff] %v13216_v52 }
 0x49f   :  { %18074 = vst [vmem:[#allocation60_spill] sm:$0xff] %v13164_v53  ;;  %4080 = vmatpush.bf16.msra.mxu0 %v13202_v34 }
 0x4a0   :  { %3499 = vmatpush.bf16.msrb.mxu2 %v13111_v16  ;;  %18076 = vst [vmem:[#allocation62_spill] sm:$0xff] %v13191_v25 }
 0x4a1   :  { %3525 = vmatpush.bf16.msrb.mxu1 %v13081_v36  ;;  %3477 = vmatpush.bf16.msra.mxu3 %v12936_v6  ;;  %v10291_v36 = vld [vmem:[%s17695_s10 + $0x2a4] sm:$0xf0]  ;;  %18077 = vst [vmem:[#allocation63_spill] sm:$0xff] %v13202_v34 }
 0x4a2   :  { %v13189_v24 = vor.u32 %v10291_v36, %v9600_v31  ;;  %v10283_v6 = vld [vmem:[%s17695_s10 + $0x264] sm:$0xf0]  ;;  %v2506_v31 = vadd.f32 %v2505_v23, %v18078_v17  ;;  %v10271_v36 = vld [vmem:[%s17695_s10 + $0x20c] sm:$0xf] }
 0x4a3   :  { %v13231_v2 = vor.u32 %v10271_v36, %v9538_v62  ;;  %v13258_v36 = vpop.f32.mrf.mxu3  ;;  %v13260_v62 = vor.u32 %v10275_v20, %v9536_v12  ;;  %v10260_v20 = vld [vmem:[%s17695_s10 + $0x1ac] sm:$0xf0] }
 0x4a4   :  { %3500 = vmatpush.bf16.msrb.mxu2 %v13135_v5  ;;  %18075 = vst [vmem:[#allocation61_spill] sm:$0xff] %v13189_v24  ;;  %v13220_v17 = vadd.f32 %v2519_v0, %v2506_v31  ;;  %v10239_v0 = vld [vmem:[%s17695_s10 + $0x10c] sm:$0xf]  ;;  %v10264_v31 = vld [vmem:[%s17695_s10 + $0x1d4] sm:$0xf] }
 0x4a5   :  { %3526 = vmatpush.bf16.msrb.mxu1 %v13107_v14  ;;  %3478 = vmatpush.bf16.msra.mxu3 %v12963_v61  ;;  %v9568_v14 = vld [vmem:[%s17695_s10 + $0x248] sm:$0xf]  ;;  %v10247_v61 = vld [vmem:[%s17695_s10 + $0x14c] sm:$0xf]  ;;  %18084 = vst [vmem:[#allocation68_spill] sm:$0xff] %v13231_v2 }
 0x4a6   :  { %18081 = vst [vmem:[#allocation65_spill] sm:$0xff] %v13220_v17  ;;  %v13224_v23 = vor.u32 %v10283_v6, %v9568_v14  ;;  %v9410_v6 = vld [vmem:[%s17695_s10 + $0x128] sm:$0xf0]  ;;  %v10268_v14 = vld [vmem:[%s17695_s10 + $0x1ec] sm:$0xf0]  ;;  %4081 = vmatpush.bf16.msra.mxu0 %v13231_v2 }
 0x4a7   :  { %18085 = vst [vmem:[#allocation69_spill] sm:$0xff] %v13260_v62  ;;  %v10228_v17 = vld [vmem:[%s17695_s10 + $0xac] sm:$0xf0] }
 0x4a8   :  { %3501 = vmatpush.bf16.msrb.mxu2 %v13162_v30  ;;  %3479 = vmatmul.bf16.vlgmr.msra.gmra.mxu3 %v18080_v22  ;;  %18082 = vst [vmem:[#allocation66_spill] sm:$0xff] %v13224_v23 }
 0x4a9   :  { %3510 = vmatpush.bf16.msrb.mxu3 %v13164_v53  ;;  %3527 = vmatpush.bf16.msrb.mxu1 %v13128_v38  ;;  %v13226_v38 = vor.u32 %v10247_v61, %v9442_v54  ;;  %v9512_v61 = vld [vmem:[%s17695_s10 + $0x1d0] sm:$0xf]  ;;  %v9514_v54 = vld [vmem:[%s17695_s10 + $0x1f0] sm:$0xf0] }
 0x4aa   :  { %v13264_v52 = vor.u32 %v10268_v14, %v9512_v61  ;;  %v13279_v12 = vor.u32 %v10264_v31, %v9514_v54  ;;  %v2533_v14 = vpop.f32.mrf.mxu2  ;;  %v10223_v54 = vld [vmem:[%s17695_s10 + $0x8c] sm:$0xf]  ;;  %v9448_v61 = vld [vmem:[%s17695_s10 + $0x150] sm:$0xf] }
 0x4ab   :  { %18083 = vst [vmem:[#allocation67_spill] sm:$0xff] %v13226_v38 }
 0x4ac   :  { %3502 = vmatpush.bf16.msrb.mxu2 %v13189_v24  ;;  %18087 = vst [vmem:[#allocation71_spill] sm:$0xff] %v13264_v52 }
 0x4ad   :  { %3511 = vmatpush.bf16.msrb.mxu3 %v13191_v25  ;;  %3528 = vmatpush.bf16.msrb.mxu1 %v13159_v43  ;;  %v13262_v43 = vor.u32 %v10239_v0, %v9410_v6  ;;  %18088 = vst [vmem:[#allocation72_spill] sm:$0xff] %v13279_v12  ;;  %v10256_v0 = vld [vmem:[%s17695_s10 + $0x194] sm:$0xf] }
 0x4ae   :  { %v9482_v6 = vld [vmem:[%s17695_s10 + $0x1b0] sm:$0xf0] }
 0x4af   :  { %18086 = vst [vmem:[#allocation70_spill] sm:$0xff] %v13262_v43 }
 0x4b0   :  { %3503 = vmatpush.bf16.msrb.mxu2 %v13224_v23  ;;  %v9480_v23 = vld [vmem:[%s17695_s10 + $0x190] sm:$0xf] }
 0x4b1   :  { %3512 = vmatpush.bf16.msrb.mxu3 %v13226_v38  ;;  %3529 = vmatpush.bf16.msrb.mxu1 %v13202_v34  ;;  %v13290_v34 = vor.u32 %v10231_v41, %v9378_v59  ;;  %v13293_v31 = vor.u32 %v10260_v20, %v9480_v23  ;;  %v9346_v38 = vld [vmem:[%s17695_s10 + $0xa8] sm:$0xf0]  ;;  %v10252_v59 = vld [vmem:[%s17695_s10 + $0x16c] sm:$0xf0]  ;;  %v13309_v41 = vor.u32 %v10256_v0, %v9482_v6  ;;  %v10248_v23 = vld [vmem:[%s17695_s10 + $0x154] sm:$0xf]  ;;  %v2547_v0 = vpop.f32.mrf.mxu3 }
 0x4b2   :  { %v9450_v20 = vld [vmem:[%s17695_s10 + $0x170] sm:$0xf0]  ;;  %v13327_v6 = vor.u32 %v10252_v59, %v9448_v61 }
 0x4b3   :  { %18089 = vst [vmem:[#allocation73_spill] sm:$0xff] %v13290_v34  ;;  %v13344_v61 = vor.u32 %v10248_v23, %v9450_v20  ;;  %v10207_v23 = vld [vmem:[%s17695_s10 + $0xc] sm:$0xf] }
 0x4b4   :  { %3504 = vmatpush.bf16.msrb.mxu2 %v13260_v62  ;;  %18090 = vst [vmem:[#allocation74_spill] sm:$0xff] %v13293_v31  ;;  %v9282_v20 = vld [vmem:[%s17695_s10 + $0x28] sm:$0xf0] }
 0x4b5   :  { %3513 = vmatpush.bf16.msrb.mxu3 %v13262_v43  ;;  %3530 = vmatpush.bf16.msrb.mxu1 %v13231_v2  ;;  %18091 = vst [vmem:[#allocation75_spill] sm:$0xff] %v13309_v41  ;;  %v13318_v2 = vpop.f32.mrf.mxu1  ;;  %v10215_v43 = vld [vmem:[%s17695_s10 + $0x4c] sm:$0xf] }
 0x4b6   :  { %18094 = vst [vmem:[#allocation77_spill] sm:$0xff] %v13327_v6  ;;  %v13353_v59 = vor.u32 %v10215_v43, %v9314_v46  ;;  %v10236_v43 = vld [vmem:[%s17695_s10 + $0xec] sm:$0xf0] }
 0x4b7   :  { %3505 = vmatmul.bf16.vlgmr.msrb.gmra.mxu2 %v18080_v22  ;;  %18096 = vst [vmem:[#allocation79_spill] sm:$0xff] %v13344_v61  ;;  %v9768_v46 = vld [vmem:[%s17695_s10 + $0x3d0] sm:$0xf] }
 0x4b8   :  { %3536 = vmatpush.bf16.msra.mxu2 %v13264_v52  ;;  %v18092_v52 = vperm.slane %v13013_v33, 3  ;;  %3531 = vmatmul.bf16.vlgmr.msrb.gmra.mxu1 %v18080_v22  ;;  %18097 = vst [vmem:[#allocation80_spill] sm:$0xff] %v13353_v59 }
 0x4b9   :  { %3562 = vmatpush.bf16.msra.mxu1 %v13279_v12  ;;  %3514 = vmatpush.bf16.msrb.mxu3 %v13290_v34  ;;  %v13323_v12 = vor.u32 %v10223_v54, %v9346_v38  ;;  %v9416_v38 = vld [vmem:[%s17695_s10 + $0x110] sm:$0xf]  ;;  %v10240_v54 = vld [vmem:[%s17695_s10 + $0x114] sm:$0xf] }
 0x4ba   :  { %v2534_v62 = vadd.f32 %v2533_v14, %v18092_v52  ;;  %v10244_v14 = vld [vmem:[%s17695_s10 + $0x12c] sm:$0xf0] }
 0x4bb   :  { %18093 = vst [vmem:[#allocation76_spill] sm:$0xff] %v13323_v12 }
 0x4bc   :  { %3537 = vmatpush.bf16.msra.mxu2 %v13293_v31  ;;  %v13335_v52 = vadd.f32 %v2547_v0, %v2534_v62  ;;  %v9418_v62 = vld [vmem:[%s17695_s10 + $0x130] sm:$0xf0]  ;;  %v13356_v0 = vor.u32 %v10244_v14, %v9416_v38  ;;  %v13367_v31 = vpop.f32.mrf.mxu2  ;;  %v10332_v38 = vld [vmem:[%s17695_s10 + $0x3ec] sm:$0xf0] }
 0x4bd   :  { %3563 = vmatpush.bf16.msra.mxu1 %v13309_v41  ;;  %3515 = vmatpush.bf16.msrb.mxu3 %v13323_v12  ;;  %v9384_v41 = vld [vmem:[%s17695_s10 + $0xd0] sm:$0xf]  ;;  %18099 = vst [vmem:[#allocation82_spill] sm:$0xff] %v13367_v31  ;;  %v13379_v14 = vor.u32 %v10240_v54, %v9418_v62  ;;  %v9386_v12 = vld [vmem:[%s17695_s10 + $0xf0] sm:$0xf0]  ;;  %v17769_v31 = vperm.slane %v13013_v33, 4  ;;  %v13394_v54 = vor.u32 %v10332_v38, %v9768_v46 }
 0x4be   :  { %18095 = vst [vmem:[#allocation78_spill] sm:$0xff] %v13335_v52  ;;  %v13388_v52 = vor.u32 %v10207_v23, %v9282_v20  ;;  %v13392_v34 = vor.u32 %v10236_v43, %v9384_v41  ;;  %v9352_v62 = vld [vmem:[%s17695_s10 + $0x90] sm:$0xf]  ;;  %v10224_v43 = vld [vmem:[%s17695_s10 + $0x94] sm:$0xf] }
 0x4bf   :  { %18098 = vst [vmem:[#allocation81_spill] sm:$0xff] %v13356_v0  ;;  %v9736_v23 = vld [vmem:[%s17695_s10 + $0x390] sm:$0xf]  ;;  %v9354_v46 = vld [vmem:[%s17695_s10 + $0xb0] sm:$0xf0] }
 0x4c0   :  { %3538 = vmatpush.bf16.msra.mxu2 %v13327_v6  ;;  %18100 = vst [vmem:[#allocation83_spill] sm:$0xff] %v13379_v14  ;;  %v10232_v6 = vld [vmem:[%s17695_s10 + $0xd4] sm:$0xf]  ;;  %v10324_v41 = vld [vmem:[%s17695_s10 + $0x3ac] sm:$0xf0] }
 0x4c1   :  { %3564 = vmatpush.bf16.msra.mxu1 %v13344_v61  ;;  %3516 = vmatpush.bf16.msrb.mxu3 %v13353_v59  ;;  %18101 = vst [vmem:[#allocation84_spill] sm:$0xff] %v13388_v52  ;;  %v2561_v61 = vpop.f32.mrf.mxu1  ;;  %v13409_v20 = vor.u32 %v10232_v6, %v9386_v12  ;;  %v13424_v12 = vor.u32 %v10324_v41, %v9736_v23  ;;  %v9320_v6 = vld [vmem:[%s17695_s10 + $0x50] sm:$0xf]  ;;  %v10216_v41 = vld [vmem:[%s17695_s10 + $0x54] sm:$0xf] }
 0x4c2   :  { %18102 = vst [vmem:[#allocation85_spill] sm:$0xff] %v13392_v34  ;;  %v2562_v38 = vadd.f32 %v2561_v61, %v17769_v31  ;;  %v9704_v61 = vld [vmem:[%s17695_s10 + $0x350] sm:$0xf]  ;;  %v9322_v31 = vld [vmem:[%s17695_s10 + $0x70] sm:$0xf0] }
 0x4c3   :  { %18103 = vst [vmem:[#allocation86_spill] sm:$0xff] %v13394_v54  ;;  %v9640_v59 = vld [vmem:[%s17695_s10 + $0x2d0] sm:$0xf] }
 0x4c4   :  { %3539 = vmatpush.bf16.msra.mxu2 %v13356_v0  ;;  %18104 = vst [vmem:[#allocation87_spill] sm:$0xff] %v13409_v20  ;;  %v2575_v0 = vpop.f32.mrf.mxu2 }
 0x4c5   :  { %3565 = vmatpush.bf16.msra.mxu1 %v13379_v14  ;;  %3517 = vmatpush.bf16.msrb.mxu3 %v13388_v52  ;;  %v13422_v14 = vor.u32 %v10228_v17, %v9352_v62  ;;  %18106 = vst [vmem:[#allocation89_spill] sm:$0xff] %v13424_v12  ;;  %v10220_v52 = vld [vmem:[%s17695_s10 + $0x6c] sm:$0xf0]  ;;  %v13439_v62 = vor.u32 %v10224_v43, %v9354_v46 }
 0x4c6   :  { %v10316_v17 = vld [vmem:[%s17695_s10 + $0x36c] sm:$0xf0]  ;;  %v13441_v23 = vadd.f32 %v2575_v0, %v2562_v38 }
 0x4c7   :  { %18105 = vst [vmem:[#allocation88_spill] sm:$0xff] %v13422_v14  ;;  %v13454_v43 = vor.u32 %v10316_v17, %v9704_v61  ;;  %v9288_v0 = vld [vmem:[%s17695_s10 + $0x10] sm:$0xf]  ;;  %v9770_v61 = vld [vmem:[%s17695_s10 + $0x3f0] sm:$0xf0] }
 0x4c8   :  { %3540 = vmatpush.bf16.msra.mxu2 %v13392_v34  ;;  %18107 = vst [vmem:[#allocation90_spill] sm:$0xff] %v13439_v62  ;;  %3518 = vmatmul.bf16.vlgmr.msrb.gmra.mxu3 %v18080_v22  ;;  %v10212_v46 = vld [vmem:[%s17695_s10 + $0x2c] sm:$0xf0]  ;;  %v10208_v17 = vld [vmem:[%s17695_s10 + $0x14] sm:$0xf]  ;;  %v13495_v34 = vpop.f32.mrf.mxu3 }
 0x4c9   :  { %3549 = vmatpush.bf16.msra.mxu3 %v13394_v54  ;;  %3566 = vmatpush.bf16.msra.mxu1 %v13409_v20  ;;  %18108 = vst [vmem:[#allocation91_spill] sm:$0xff] %v13441_v23  ;;  %v13452_v54 = vor.u32 %v10220_v52, %v9320_v6  ;;  %v9672_v38 = vld [vmem:[%s17695_s10 + $0x310] sm:$0xf]  ;;  %v10328_v52 = vld [vmem:[%s17695_s10 + $0x3d4] sm:$0xf]  ;;  %v13472_v6 = vor.u32 %v10216_v41, %v9322_v31 }
 0x4ca   :  { %18110 = vst [vmem:[#allocation93_spill] sm:$0xff] %v13454_v43  ;;  %v9776_v20 = vld [vmem:[%s17695_s10 + $0x3d8] sm:$0xf]  ;;  %v13491_v41 = vor.u32 %v10212_v46, %v9288_v0  ;;  %v13497_v23 = vor.u32 %v10328_v52, %v9770_v61  ;;  %v13508_v0 = vpop.f32.mrf.mxu1  ;;  %v9738_v46 = vld [vmem:[%s17695_s10 + $0x3b0] sm:$0xf0]  ;;  %v13526_v61 = vor.u32 %v10300_v40, %v9640_v59 }
 0x4cb   :  { %18109 = vst [vmem:[#allocation92_spill] sm:$0xff] %v13452_v54  ;;  %v10333_v31 = vld [vmem:[%s17695_s10 + $0x3f4] sm:$0xf0]  ;;  %v10312_v40 = vld [vmem:[%s17695_s10 + $0x354] sm:$0xf] }
 0x4cc   :  { %3541 = vmatpush.bf16.msra.mxu2 %v13422_v14  ;;  %18111 = vst [vmem:[#allocation94_spill] sm:$0xff] %v13472_v6  ;;  %v9290_v14 = vld [vmem:[%s17695_s10 + $0x30] sm:$0xf0]  ;;  %v9744_v52 = vld [vmem:[%s17695_s10 + $0x398] sm:$0xf] }
 0x4cd   :  { %3550 = vmatpush.bf16.msra.mxu3 %v13424_v12  ;;  %v10308_v12 = vld [vmem:[%s17695_s10 + $0x32c] sm:$0xf0]  ;;  %3567 = vmatpush.bf16.msra.mxu1 %v13439_v62  ;;  %18112 = vst [vmem:[#allocation95_spill] sm:$0xff] %v13491_v41  ;;  %v9706_v59 = vld [vmem:[%s17695_s10 + $0x370] sm:$0xf0] }
 0x4ce   :  { %v13493_v62 = vor.u32 %v10308_v12, %v9672_v38  ;;  %18114 = vst [vmem:[#allocation97_spill] sm:$0xff] %v13497_v23  ;;  %v10320_v12 = vld [vmem:[%s17695_s10 + $0x394] sm:$0xf]  ;;  %v13516_v38 = vor.u32 %v10333_v31, %v9776_v20  ;;  %v9608_v20 = vld [vmem:[%s17695_s10 + $0x290] sm:$0xf] }
 0x4cf   :  { %18116 = vst [vmem:[#allocation99_spill] sm:$0xff] %v13508_v0  ;;  %v10292_v31 = vld [vmem:[%s17695_s10 + $0x2ac] sm:$0xf0] }
 0x4d0   :  { %3542 = vmatpush.bf16.msra.mxu2 %v13452_v54  ;;  %18113 = vst [vmem:[#allocation96_spill] sm:$0xff] %v13493_v62  ;;  %v13506_v54 = vor.u32 %v10208_v17, %v9290_v14  ;;  %v10325_v14 = vld [vmem:[%s17695_s10 + $0x3b4] sm:$0xf0]  ;;  %v13529_v17 = vor.u32 %v10320_v12, %v9738_v46 }
 0x4d1   :  { %3551 = vmatpush.bf16.msra.mxu3 %v13454_v43  ;;  %3568 = vmatpush.bf16.msra.mxu1 %v13472_v6  ;;  %18117 = vst [vmem:[#allocation100_spill] sm:$0xff] %v13516_v38  ;;  %v13546_v12 = vor.u32 %v10325_v14, %v9744_v52  ;;  %v9712_v46 = vld [vmem:[%s17695_s10 + $0x358] sm:$0xf]  ;;  %v13560_v52 = vor.u32 %v10312_v40, %v9706_v59  ;;  %v9576_v14 = vld [vmem:[%s17695_s10 + $0x250] sm:$0xf] }
 0x4d2   :  { %18115 = vst [vmem:[#allocation98_spill] sm:$0xff] %v13506_v54  ;;  %v10317_v43 = vld [vmem:[%s17695_s10 + $0x374] sm:$0xf0]  ;;  %v9674_v40 = vld [vmem:[%s17695_s10 + $0x330] sm:$0xf0] }
 0x4d3   :  { %18118 = vst [vmem:[#allocation101_spill] sm:$0xff] %v13526_v61  ;;  %v13577_v59 = vor.u32 %v10317_v43, %v9712_v46  ;;  %v9544_v43 = vld [vmem:[%s17695_s10 + $0x210] sm:$0xf] }
 0x4d4   :  { %3543 = vmatpush.bf16.msra.mxu2 %v13491_v41  ;;  %18119 = vst [vmem:[#allocation102_spill] sm:$0xff] %v13529_v17  ;;  %v10276_v46 = vld [vmem:[%s17695_s10 + $0x22c] sm:$0xf0] }
 0x4d5   :  { %3552 = vmatpush.bf16.msra.mxu3 %v13493_v62  ;;  %3569 = vmatpush.bf16.msra.mxu1 %v13506_v54  ;;  %18120 = vst [vmem:[#allocation103_spill] sm:$0xff] %v13546_v12  ;;  %v13556_v62 = vor.u32 %v10292_v31, %v9608_v20  ;;  %v2603_v54 = vpop.f32.mrf.mxu1  ;;  %v10304_v31 = vld [vmem:[%s17695_s10 + $0x314] sm:$0xf] }
 0x4d6   :  { %18122 = vst [vmem:[#allocation105_spill] sm:$0xff] %v13560_v52  ;;  %v13591_v6 = vor.u32 %v10304_v31, %v9674_v40  ;;  %v9648_v40 = vld [vmem:[%s17695_s10 + $0x2d8] sm:$0xf] }
 0x4d7   :  { %3544 = vmatmul.bf16.vlgmr.msra.gmra.mxu2 %v18080_v22  ;;  %18121 = vst [vmem:[#allocation104_spill] sm:$0xff] %v13556_v62 }
 0x4d8   :  { %3575 = vmatpush.bf16.msrb.mxu2 %v13497_v23  ;;  %3570 = vmatmul.bf16.vlgmr.msra.gmra.mxu1 %v18080_v22  ;;  %v2589_v23 = vpop.f32.mrf.mxu3  ;;  %18124 = vst [vmem:[#allocation106_spill] sm:$0xff] %v13577_v59 }
 0x4d9   :  { %3601 = vmatpush.bf16.msrb.mxu1 %v13516_v38  ;;  %3553 = vmatpush.bf16.msra.mxu3 %v13526_v61  ;;  %v10284_v38 = vld [vmem:[%s17695_s10 + $0x26c] sm:$0xf0]  ;;  %v18123_v61 = vperm.slane %v13013_v33, 5  ;;  %18127 = vst [vmem:[#allocation109_spill] sm:$0xff] %v13591_v6 }
 0x4da   :  { %v13588_v41 = vor.u32 %v10284_v38, %v9576_v14  ;;  %v9642_v38 = vld [vmem:[%s17695_s10 + $0x2f0] sm:$0xf0]  ;;  %v9520_v14 = vld [vmem:[%s17695_s10 + $0x1d8] sm:$0xf] }
 0x4db   :  { %v2590_v20 = vadd.f32 %v2589_v23, %v18123_v61  ;;  %v10309_v23 = vld [vmem:[%s17695_s10 + $0x334] sm:$0xf0] }
 0x4dc   :  { %3576 = vmatpush.bf16.msrb.mxu2 %v13529_v17  ;;  %v9680_v17 = vld [vmem:[%s17695_s10 + $0x318] sm:$0xf]  ;;  %18126 = vst [vmem:[#allocation108_spill] sm:$0xff] %v13588_v41 }
 0x4dd   :  { %3602 = vmatpush.bf16.msrb.mxu1 %v13546_v12  ;;  %v13585_v61 = vadd.f32 %v2603_v54, %v2590_v20  ;;  %3554 = vmatpush.bf16.msra.mxu3 %v13556_v62  ;;  %v10296_v54 = vld [vmem:[%s17695_s10 + $0x2d4] sm:$0xf]  ;;  %v10269_v20 = vld [vmem:[%s17695_s10 + $0x1f4] sm:$0xf0]  ;;  %v13612_v31 = vor.u32 %v10309_v23, %v9680_v17  ;;  %v13621_v62 = vor.u32 %v10276_v46, %v9544_v43 }
 0x4de   :  { %v10301_v12 = vld [vmem:[%s17695_s10 + $0x2f4] sm:$0xf0]  ;;  %v10288_v17 = vld [vmem:[%s17695_s10 + $0x294] sm:$0xf] }
 0x4df   :  { %18125 = vst [vmem:[#allocation107_spill] sm:$0xff] %v13585_v61  ;;  %v13626_v61 = vor.u32 %v10269_v20, %v9520_v14  ;;  %v9610_v23 = vld [vmem:[%s17695_s10 + $0x2b0] sm:$0xf0]  ;;  %v10261_v43 = vld [vmem:[%s17695_s10 + $0x1b4] sm:$0xf0]  ;;  %v13641_v46 = vor.u32 %v10301_v12, %v9648_v40  ;;  %v13649_v14 = vpop.f32.mrf.mxu1 }
 0x4e0   :  { %3577 = vmatpush.bf16.msrb.mxu2 %v13560_v52  ;;  %18128 = vst [vmem:[#allocation110_spill] sm:$0xff] %v13612_v31  ;;  %v13624_v52 = vor.u32 %v10296_v54, %v9642_v38  ;;  %v9616_v54 = vld [vmem:[%s17695_s10 + $0x298] sm:$0xf]  ;;  %v13654_v20 = vor.u32 %v10288_v17, %v9610_v23  ;;  %v10280_v40 = vld [vmem:[%s17695_s10 + $0x254] sm:$0xf] }
 0x4e1   :  { %3603 = vmatpush.bf16.msrb.mxu1 %v13577_v59  ;;  %3555 = vmatpush.bf16.msra.mxu3 %v13588_v41  ;;  %18129 = vst [vmem:[#allocation111_spill] sm:$0xff] %v13621_v62  ;;  %v9488_v59 = vld [vmem:[%s17695_s10 + $0x198] sm:$0xf] }
 0x4e2   :  { %18130 = vst [vmem:[#allocation112_spill] sm:$0xff] %v13624_v52  ;;  %v10293_v38 = vld [vmem:[%s17695_s10 + $0x2b4] sm:$0xf0]  ;;  %v13656_v12 = vor.u32 %v10261_v43, %v9488_v59  ;;  %v13680_v43 = vpop.f32.mrf.mxu2 }
 0x4e3   :  { %18131 = vst [vmem:[#allocation113_spill] sm:$0xff] %v13626_v61  ;;  %v10253_v41 = vld [vmem:[%s17695_s10 + $0x174] sm:$0xf0]  ;;  %v13671_v59 = vor.u32 %v10293_v38, %v9616_v54  ;;  %v10272_v38 = vld [vmem:[%s17695_s10 + $0x214] sm:$0xf] }
 0x4e4   :  { %3578 = vmatpush.bf16.msrb.mxu2 %v13591_v6  ;;  %18132 = vst [vmem:[#allocation114_spill] sm:$0xff] %v13641_v46  ;;  %v9584_v17 = vld [vmem:[%s17695_s10 + $0x258] sm:$0xf] }
 0x4e5   :  { %3604 = vmatpush.bf16.msrb.mxu1 %v13612_v31  ;;  %18133 = vst [vmem:[#allocation115_spill] sm:$0xff] %v13649_v14  ;;  %3556 = vmatpush.bf16.msra.mxu3 %v13621_v62  ;;  %v9578_v31 = vld [vmem:[%s17695_s10 + $0x270] sm:$0xf0]  ;;  %v9456_v62 = vld [vmem:[%s17695_s10 + $0x158] sm:$0xf] }
 0x4e6   :  { %18134 = vst [vmem:[#allocation116_spill] sm:$0xff] %v13654_v20  ;;  %v10285_v23 = vld [vmem:[%s17695_s10 + $0x274] sm:$0xf0]  ;;  %v13686_v54 = vor.u32 %v10253_v41, %v9456_v62  ;;  %v10265_v62 = vld [vmem:[%s17695_s10 + $0x1dc] sm:$0xf] }
 0x4e7   :  { %18135 = vst [vmem:[#allocation117_spill] sm:$0xff] %v13656_v12  ;;  %v9424_v6 = vld [vmem:[%s17695_s10 + $0x118] sm:$0xf]  ;;  %v13704_v41 = vor.u32 %v10285_v23, %v9584_v17 }
 0x4e8   :  { %3579 = vmatpush.bf16.msrb.mxu2 %v13624_v52  ;;  %18136 = vst [vmem:[#allocation118_spill] sm:$0xff] %v13671_v59  ;;  %3557 = vmatmul.bf16.vlgmr.msra.gmra.mxu3 %v18080_v22  ;;  %v13684_v52 = vor.u32 %v10280_v40, %v9578_v31  ;;  %v9522_v31 = vld [vmem:[%s17695_s10 + $0x1f8] sm:$0xf0]  ;;  %v9552_v40 = vld [vmem:[%s17695_s10 + $0x218] sm:$0xf] }
 0x4e9   :  { %3588 = vmatpush.bf16.msrb.mxu3 %v13626_v61  ;;  %3605 = vmatpush.bf16.msrb.mxu1 %v13641_v46  ;;  %18137 = vst [vmem:[#allocation119_spill] sm:$0xff] %v13680_v43  ;;  %v9546_v46 = vld [vmem:[%s17695_s10 + $0x230] sm:$0xf0]  ;;  %v13715_v61 = vpop.f32.mrf.mxu1  ;;  %v9392_v14 = vld [vmem:[%s17695_s10 + $0xd8] sm:$0xf]  ;;  %v13731_v0 = vor.u32 %v10265_v62, %v9522_v31 }
 0x4ea   :  { %18138 = vst [vmem:[#allocation120_spill] sm:$0xff] %v13684_v52  ;;  %v13719_v17 = vor.u32 %v10272_v38, %v9546_v46  ;;  %v10237_v43 = vld [vmem:[%s17695_s10 + $0xf4] sm:$0xf0]  ;;  %v9490_v46 = vld [vmem:[%s17695_s10 + $0x1b8] sm:$0xf0]  ;;  %v2617_v38 = vpop.f32.mrf.mxu2 }
 0x4eb   :  { %18139 = vst [vmem:[#allocation121_spill] sm:$0xff] %v13686_v54  ;;  %v13745_v62 = vor.u32 %v10237_v43, %v9392_v14  ;;  %v10229_v31 = vld [vmem:[%s17695_s10 + $0xb4] sm:$0xf0]  ;;  %v9458_v14 = vld [vmem:[%s17695_s10 + $0x178] sm:$0xf0]  ;;  %v18147_v43 = vperm.slane %v13013_v33, 6 }
 0x4ec   :  { %3580 = vmatpush.bf16.msrb.mxu2 %v13654_v20  ;;  %v10245_v20 = vld [vmem:[%s17695_s10 + $0x134] sm:$0xf0]  ;;  %18140 = vst [vmem:[#allocation122_spill] sm:$0xff] %v13704_v41 }
 0x4ed   :  { %3589 = vmatpush.bf16.msrb.mxu3 %v13656_v12  ;;  %3606 = vmatpush.bf16.msrb.mxu1 %v13671_v59  ;;  %v10277_v12 = vld [vmem:[%s17695_s10 + $0x234] sm:$0xf0]  ;;  %18141 = vst [vmem:[#allocation123_spill] sm:$0xff] %v13719_v17  ;;  %v13721_v23 = vor.u32 %v10245_v20, %v9424_v6  ;;  %v13723_v59 = vpop.f32.mrf.mxu3  ;;  %v10257_v6 = vld [vmem:[%s17695_s10 + $0x19c] sm:$0xf] }
 0x4ee   :  { %18143 = vst [vmem:[#allocation125_spill] sm:$0xff] %v13731_v0  ;;  %v10249_v20 = vld [vmem:[%s17695_s10 + $0x15c] sm:$0xf] }
 0x4ef   :  { %18142 = vst [vmem:[#allocation124_spill] sm:$0xff] %v13721_v23 }
 0x4f0   :  { %3581 = vmatpush.bf16.msrb.mxu2 %v13684_v52  ;;  %v13734_v52 = vor.u32 %v10277_v12, %v9552_v40  ;;  %18145 = vst [vmem:[#allocation127_spill] sm:$0xff] %v13745_v62  ;;  %v9360_v12 = vld [vmem:[%s17695_s10 + $0x98] sm:$0xf]  ;;  %v13754_v40 = vor.u32 %v10257_v6, %v9490_v46 }
 0x4f1   :  { %3590 = vmatpush.bf16.msrb.mxu3 %v13686_v54  ;;  %3607 = vmatpush.bf16.msrb.mxu1 %v13704_v41  ;;  %v2618_v41 = vadd.f32 %v2617_v38, %v18147_v43  ;;  %v13768_v6 = vor.u32 %v10229_v31, %v9360_v12  ;;  %v13771_v46 = vpop.f32.mrf.mxu1  ;;  %v13780_v38 = vor.u32 %v10249_v20, %v9458_v14  ;;  %v10241_v12 = vld [vmem:[%s17695_s10 + $0x11c] sm:$0xf]  ;;  %v9296_v20 = vld [vmem:[%s17695_s10 + $0x18] sm:$0xf] }
 0x4f2   :  { %18144 = vst [vmem:[#allocation126_spill] sm:$0xff] %v13734_v52  ;;  %v9426_v31 = vld [vmem:[%s17695_s10 + $0x138] sm:$0xf0] }
 0x4f3   :  { %18146 = vst [vmem:[#allocation128_spill] sm:$0xff] %v13754_v40  ;;  %v13804_v14 = vor.u32 %v10241_v12, %v9426_v31  ;;  %v17864_v31 = vperm.slane %v13013_v33, 7 }
 0x4f4   :  { %3582 = vmatpush.bf16.msrb.mxu2 %v13719_v17  ;;  %18148 = vst [vmem:[#allocation129_spill] sm:$0xff] %v13768_v6  ;;  %v9328_v17 = vld [vmem:[%s17695_s10 + $0x58] sm:$0xf] }
 0x4f5   :  { %3591 = vmatpush.bf16.msrb.mxu3 %v13721_v23  ;;  %3608 = vmatpush.bf16.msrb.mxu1 %v13734_v52  ;;  %v2631_v52 = vpop.f32.mrf.mxu3  ;;  %18149 = vst [vmem:[#allocation130_spill] sm:$0xff] %v13780_v38 }
 0x4f6   :  { %v13782_v43 = vadd.f32 %v2631_v52, %v2618_v41  ;;  %v10213_v52 = vld [vmem:[%s17695_s10 + $0x34] sm:$0xf0]  ;;  %v10329_v41 = vld [vmem:[%s17695_s10 + $0x3dc] sm:$0xf]  ;;  %18151 = vst [vmem:[#allocation132_spill] sm:$0xff] %v13804_v14 }
 0x4f7   :  { %3583 = vmatmul.bf16.vlgmr.msrb.gmra.mxu2 %v18080_v22  ;;  %v13819_v12 = vor.u32 %v10213_v52, %v9296_v20  ;;  %v10225_v20 = vld [vmem:[%s17695_s10 + $0x9c] sm:$0xf] }
 0x4f8   :  { %3614 = vmatpush.bf16.msra.mxu2 %v13731_v0  ;;  %3609 = vmatmul.bf16.vlgmr.msrb.gmra.mxu1 %v18080_v22  ;;  %v9362_v52 = vld [vmem:[%s17695_s10 + $0xb8] sm:$0xf0] }
 0x4f9   :  { %3983 = vmatpush.bf16.msra.mxu1 %v12710_v21  ;;  %3592 = vmatpush.bf16.msrb.mxu3 %v13745_v62  ;;  %v10221_v21 = vld [vmem:[%s17695_s10 + $0x74] sm:$0xf0]  ;;  %18152 = vst [vmem:[#allocation133_spill] sm:$0xff] %v13819_v12 }
 0x4fa   :  { %v13792_v62 = vor.u32 %v10221_v21, %v9328_v17  ;;  %v9778_v21 = vld [vmem:[%s17695_s10 + $0x3f8] sm:$0xf0] }
 0x4fb   :  { %v10233_v17 = vld [vmem:[%s17695_s10 + $0xdc] sm:$0xf]  ;;  %v13822_v23 = vor.u32 %v10329_v41, %v9778_v21 }
 0x4fc   :  { %3615 = vmatpush.bf16.msra.mxu2 %v13754_v40  ;;  %18150 = vst [vmem:[#allocation131_spill] sm:$0xff] %v13792_v62  ;;  %v3454_v40 = vpop.f32.mrf.mxu1  ;;  %v10313_v21 = vld [vmem:[%s17695_s10 + $0x35c] sm:$0xf] }
 0x4fd   :  { %3984 = vmatpush.bf16.msra.mxu1 %v12734_v32  ;;  %3593 = vmatpush.bf16.msrb.mxu3 %v13768_v6  ;;  %v13806_v32 = vpop.f32.mrf.mxu2  ;;  %v9394_v6 = vld [vmem:[%s17695_s10 + $0xf8] sm:$0xf0]  ;;  %18153 = vst [vmem:[#allocation134_spill] sm:$0xff] %v13822_v23 }
 0x4fe   :  { %v13828_v54 = vor.u32 %v10233_v17, %v9394_v6  ;;  %v2646_v6 = vadd.f32 %v13715_v61, %v17864_v31  ;;  %v13851_v17 = vor.u32 %v10225_v20, %v9362_v52  ;;  %v10217_v61 = vld [vmem:[%s17695_s10 + $0x5c] sm:$0xf] }
 0x4ff   :  { %v10305_v52 = vld [vmem:[%s17695_s10 + $0x31c] sm:$0xf] }
 0x500   :  { %3616 = vmatpush.bf16.msra.mxu2 %v13780_v38  ;;  %v10321_v38 = vld [vmem:[%s17695_s10 + $0x39c] sm:$0xf]  ;;  %18154 = vst [vmem:[#allocation135_spill] sm:$0xff] %v13828_v54 }
 0x501   :  { %3985 = vmatpush.bf16.msra.mxu1 %v12765_v44  ;;  %3594 = vmatpush.bf16.msrb.mxu3 %v13792_v62  ;;  %v9746_v44 = vld [vmem:[%s17695_s10 + $0x3b8] sm:$0xf0]  ;;  %18156 = vst [vmem:[#allocation137_spill] sm:$0xff] %v13851_v17 }
 0x502   :  { %v13845_v41 = vor.u32 %v10321_v38, %v9746_v44  ;;  %v9330_v44 = vld [vmem:[%s17695_s10 + $0x78] sm:$0xf0] }
 0x503   :  { %v13873_v31 = vor.u32 %v10217_v61, %v9330_v44  ;;  %v13891_v61 = vpop.f32.mrf.mxu3  ;;  %v10297_v44 = vld [vmem:[%s17695_s10 + $0x2dc] sm:$0xf] }
 0x504   :  { %3617 = vmatpush.bf16.msra.mxu2 %v13804_v14  ;;  %18155 = vst [vmem:[#allocation136_spill] sm:$0xff] %v13845_v41 }
 0x505   :  { %3986 = vmatpush.bf16.msra.mxu1 %v12810_v57  ;;  %3595 = vmatpush.bf16.msrb.mxu3 %v13819_v12  ;;  %v2659_v62 = vpop.f32.mrf.mxu2  ;;  %v9714_v57 = vld [vmem:[%s17695_s10 + $0x378] sm:$0xf0]  ;;  %18158 = vst [vmem:[#allocation139_spill] sm:$0xff] %v13873_v31 }
 0x506   :  { %v13863_v38 = vadd.f32 %v2659_v62, %v2646_v6  ;;  %v13867_v20 = vor.u32 %v10313_v21, %v9714_v57  ;;  %v9682_v62 = vld [vmem:[%s17695_s10 + $0x338] sm:$0xf0] }
 0x507   :  { %v10209_v6 = vld [vmem:[%s17695_s10 + $0x1c] sm:$0xf]  ;;  %v13886_v21 = vor.u32 %v10305_v52, %v9682_v62 }
 0x508   :  { %3618 = vmatpush.bf16.msra.mxu2 %v13828_v54  ;;  %3596 = vmatmul.bf16.vlgmr.msrb.gmra.mxu3 %v18080_v22  ;;  %18157 = vst [vmem:[#allocation138_spill] sm:$0xff] %v13867_v20  ;;  %v9298_v57 = vld [vmem:[%s17695_s10 + $0x38] sm:$0xf0] }
 0x509   :  { %3627 = vmatpush.bf16.msra.mxu3 %v13822_v23  ;;  %3987 = vmatpush.bf16.msra.mxu1 %v12847_v10  ;;  %v3456_v23 = vpop.f32.mrf.mxu1  ;;  %18159 = vst [vmem:[#allocation140_spill] sm:$0xff] %v13886_v21  ;;  %v9650_v10 = vld [vmem:[%s17695_s10 + $0x2f8] sm:$0xf0] }
 0x50a   :  { %v13889_v23 = vor.u32 %v10209_v6, %v9298_v57  ;;  %v13901_v52 = vor.u32 %v10297_v44, %v9650_v10  ;;  %v10289_v62 = vld [vmem:[%s17695_s10 + $0x29c] sm:$0xf] }
 0x50b   :  { %v9618_v6 = vld [vmem:[%s17695_s10 + $0x2b8] sm:$0xf0]  ;;  %v3441_v57 = vpop.f32.mrf.mxu3 }
 0x50c   :  { %3619 = vmatpush.bf16.msra.mxu2 %v13851_v17  ;;  %18160 = vst [vmem:[#allocation141_spill] sm:$0xff] %v13889_v23  ;;  %v13915_v10 = vor.u32 %v10289_v62, %v9618_v6  ;;  %v10281_v44 = vld [vmem:[%s17695_s10 + $0x25c] sm:$0xf] }
 0x50d   :  { %3628 = vmatpush.bf16.msra.mxu3 %v13845_v41  ;;  %3988 = vmatpush.bf16.msra.mxu1 %v12885_v29  ;;  %18161 = vst [vmem:[#allocation142_spill] sm:$0xff] %v13901_v52  ;;  %v10273_v62 = vld [vmem:[%s17695_s10 + $0x21c] sm:$0xf] }
 0x50e   :  { %18162 = vst [vmem:[#allocation143_spill] sm:$0xff] %v13915_v10  ;;  %v9554_v6 = vld [vmem:[%s17695_s10 + $0x238] sm:$0xf0] }
 0x510   :  { %3620 = vmatpush.bf16.msra.mxu2 %v13873_v31 }
 0x511   :  { %3629 = vmatpush.bf16.msra.mxu3 %v13867_v20  ;;  %3989 = vmatpush.bf16.msra.mxu1 %v12922_v45  ;;  %v9586_v45 = vld [vmem:[%s17695_s10 + $0x278] sm:$0xf0] }
 0x514   :  { %3621 = vmatpush.bf16.msra.mxu2 %v13889_v23 }
 0x515   :  { %3630 = vmatpush.bf16.msra.mxu3 %v13886_v21  ;;  %3990 = vmatpush.bf16.msra.mxu1 %v12958_v56  ;;  %v13924_v56 = vadd.f32 %v3454_v40, %v3441_v57  ;;  %v13941_v40 = vor.u32 %v10273_v62, %v9554_v6  ;;  %v3493_v57 = vpop.f32.mrf.mxu1 }
 0x517   :  { %3622 = vmatmul.bf16.vlgmr.msra.gmra.mxu2 %v18080_v22  ;;  %18164 = vst [vmem:[#allocation145_spill] sm:$0xff] %v13941_v40 }
 0x518   :  { %3996 = vmatpush.bf16.msrb.mxu2 %v12631_v49  ;;  %v13937_v49 = vpop.f32.mrf.mxu2 }
 0x519   :  { %4035 = vmatpush.bf16.msrb.mxu1 %v12831_v4  ;;  %3631 = vmatpush.bf16.msra.mxu3 %v13901_v52  ;;  %v13928_v4 = vor.u32 %v10281_v44, %v9586_v45  ;;  %v3443_v45 = vpop.f32.mrf.mxu3 }
 0x51b   :  { %18163 = vst [vmem:[#allocation144_spill] sm:$0xff] %v13928_v4 }
 0x51c   :  { %3997 = vmatpush.bf16.msrb.mxu2 %v12652_v55 }
 0x51d   :  { %4036 = vmatpush.bf16.msrb.mxu1 %v12868_v19  ;;  %3632 = vmatpush.bf16.msra.mxu3 %v13915_v10  ;;  %v3495_v62 = vpop.f32.mrf.mxu1 }
 0x520   :  { %3998 = vmatpush.bf16.msrb.mxu2 %v12675_v1  ;;  %v3467_v44 = vpop.f32.mrf.mxu2 }
 0x521   :  { %4037 = vmatpush.bf16.msrb.mxu1 %v12906_v27  ;;  %3633 = vmatpush.bf16.msra.mxu3 %v13928_v4 }
 0x524   :  { %3999 = vmatpush.bf16.msrb.mxu2 %v12702_v15  ;;  %v18192_v15 = vld [vmem:[#allocation119_spill] sm:$0xff] }
 0x525   :  { %4038 = vmatpush.bf16.msrb.mxu1 %v12942_v51  ;;  %3634 = vmatpush.bf16.msra.mxu3 %v13941_v40 }
 0x528   :  { %4000 = vmatpush.bf16.msrb.mxu2 %v12725_v28  ;;  %3635 = vmatmul.bf16.vlgmr.msra.gmra.mxu3 %v18080_v22  ;;  %v3469_v6 = vpop.f32.mrf.mxu2 }
 0x529   :  { %4009 = vmatpush.bf16.msrb.mxu3 %v12812_v58  ;;  %4039 = vmatpush.bf16.msrb.mxu1 %v12972_v7 }
 0x52b   :  { %v3480_v22 = vpop.f32.mrf.mxu3 }
 0x52c   :  { %4001 = vmatpush.bf16.msrb.mxu2 %v12749_v37  ;;  %v3481_v45 = vadd.f32 %v3480_v22, %v3467_v44 }
 0x52d   :  { %4010 = vmatpush.bf16.msrb.mxu3 %v12850_v11  ;;  %4040 = vmatpush.bf16.msrb.mxu1 %v12993_v18 }
 0x530   :  { %4002 = vmatpush.bf16.msrb.mxu2 %v12786_v50 }
 0x531   :  { %4011 = vmatpush.bf16.msrb.mxu3 %v12889_v47  ;;  %4041 = vmatpush.bf16.msrb.mxu1 %v13031_v42 }
 0x533   :  { %v3482_v62 = vpop.f32.mrf.mxu3 }
 0x534   :  { %4003 = vmatpush.bf16.msrb.mxu2 %v12821_v63  ;;  %v18169_v63 = vld [vmem:[#allocation65_spill] sm:$0xff] }
 0x535   :  { %4012 = vmatpush.bf16.msrb.mxu3 %v12925_v26  ;;  %4042 = vmatpush.bf16.msrb.mxu1 %v13060_v9  ;;  %v3532_v6 = vpop.f32.mrf.mxu1  ;;  %v18165_v9 = vperm.slane %v13013_v33, 2 }
 0x537   :  { %v2508_v42 = vadd.f32 %v13258_v36, %v18165_v9  ;;  %v18167_v9 = vperm.slane %v13013_v33, 0  ;;  %v18168_v36 = vld [vmem:[#allocation42_spill] sm:$0xff] }
 0x538   :  { %4048 = vmatpush.bf16.msra.mxu2 %v13057_v8 }
 0x539   :  { %4013 = vmatpush.bf16.msrb.mxu3 %v12961_v60  ;;  %v13975_v62 = vadd.f32 %v13318_v2, %v2508_v42  ;;  %v2452_v8 = vadd.f32 %v18168_v36, %v18167_v9  ;;  %v18172_v42 = vld [vmem:[#allocation67_spill] sm:$0xff]  ;;  %v18174_v9 = vld [vmem:[#allocation70_spill] sm:$0xff] }
 0x53a   :  { %v3506_v44 = vpop.f32.mrf.mxu2 }
 0x53b   :  { %v3507_v22 = vadd.f32 %v3506_v44, %v3493_v57  ;;  %18166 = vst [vmem:[#allocation146_spill] sm:$0xff] %v13975_v62 }
 0x53c   :  { %4049 = vmatpush.bf16.msra.mxu2 %v13084_v39 }
 0x53d   :  { %4014 = vmatpush.bf16.msrb.mxu3 %v12984_v13  ;;  %v3650_v39 = vrot.slane %v3507_v22, 1  ;;  %v3674_v57 = vadd.f32 %v3507_v22, %v18169_v63  ;;  %v18180_v63 = vperm.slane %v13013_v33, 1 }
 0x53f   :  { %v3682_v44 = vadd.f32 %v3650_v39, %v13975_v62  ;;  %v9786_v50 = vmul.f32 -1.442695, %v3674_v57  ;;  %v18179_v57 = vld [vmem:[#allocation82_spill] sm:$0xff]  ;;  %v18181_v62 = vld [vmem:[#allocation55_spill] sm:$0xff] }
 0x540   :  { %4050 = vmatpush.bf16.msra.mxu2 %v13111_v16  ;;  %v3672_v16 = vadd.f32 %v13924_v56, %v13093_v48  ;;  %v18170_v48 = vld [vmem:[#allocation56_spill] sm:$0xff] }
 0x541   :  { %4015 = vmatpush.bf16.msrb.mxu3 %v13017_v35  ;;  %v13986_v18 = vadd.f32 %v18170_v48, %v2452_v8  ;;  %v9788_v37 = vmul.f32 -1.442695, %v3682_v44  ;;  %v18176_v8 = vld [vmem:[#allocation73_spill] sm:$0xff]  ;;  %v18177_v48 = vld [vmem:[#allocation51_spill] sm:$0xff] }
 0x542   :  { %v9782_v2 = vmul.f32 -1.442695, %v3672_v16  ;;  %v3508_v7 = vpop.f32.mrf.mxu2  ;;  %v3673_v16 = vadd.f32 %v3481_v45, %v18177_v48  ;;  %v18183_v48 = vld [vmem:[#allocation78_spill] sm:$0xff] }
 0x543   :  { %18171 = vst [vmem:[#allocation42_spill] sm:$0xff] %v13986_v18 }
 0x544   :  { %4051 = vmatpush.bf16.msra.mxu2 %v13135_v5  ;;  %v3534_v5 = vpop.f32.mrf.mxu1  ;;  %10354 = vpow2.f32 %v9782_v2 }
 0x545   :  { %4016 = vmatpush.bf16.msrb.mxu3 %v13055_v3  ;;  %v18173_v5 = vld [vmem:[#allocation66_spill] sm:$0xff]  ;;  %10356 = vpow2.f32 %v9786_v50 }
 0x546   :  { %10358 = vpow2.f32 %v9788_v37 }
 0x548   :  { %4052 = vmatpush.bf16.msra.mxu2 %v13162_v30  ;;  %v3648_v30 = vrot.slane %v13924_v56, 1  ;;  %v18175_v56 = vld [vmem:[#allocation69_spill] sm:$0xff] }
 0x549   :  { %4061 = vmatpush.bf16.msra.mxu3 %v13164_v53 }
 0x54a   :  { %v10355_v39 = vpop.eup %10354 }
 0x54b   :  { %v3519_v36 = vpop.f32.mrf.mxu3  ;;  %v10357_v2 = vpop.eup %10356 }
 0x54c   :  { %4053 = vmatpush.bf16.msra.mxu2 %v13189_v24  ;;  %v3680_v24 = vadd.f32 %v3648_v30, %v13986_v18  ;;  %v18178_v30 = vperm.slane %v13013_v33, 3  ;;  %v3533_v44 = vadd.f32 %v3532_v6, %v3519_v36  ;;  %v2480_v18 = vadd.f32 %v18181_v62, %v18180_v63  ;;  %v10359_v50 = vpop.eup %10358 }
 0x54d   :  { %4062 = vmatpush.bf16.msra.mxu3 %v13191_v25  ;;  %v9783_v6 = vmul.f32 -1.442695, %v3673_v16  ;;  %v14011_v36 = vadd.f32 1.0, %v10357_v2  ;;  %v18188_v16 = vld [vmem:[#allocation84_spill] sm:$0xff] }
 0x54e   :  { %v9784_v22 = vmul.f32 -1.442695, %v3680_v24  ;;  %v2536_v7 = vadd.f32 %v18179_v57, %v18178_v30  ;;  %v3649_v24 = vrot.slane %v3481_v45, 1  ;;  %v18187_v57 = vld [vmem:[#allocation80_spill] sm:$0xff] }
 0x54f   :  { %vm3785_vm10 = vweird.f32 %v14011_v36  ;;  %v3789_v35 = vand.u32 2147483647, %v14011_v36 }
 0x550   :  { %4054 = vmatpush.bf16.msra.mxu2 %v18173_v5  ;;  %10360 = vpow2.f32 %v9784_v22  ;;  %v14002_v37 = vadd.f32 %v13495_v34, %v2536_v7  ;;  %v3651_v22 = vrot.slane %v3533_v44, 1  ;;  %v3675_v5 = vadd.f32 %v3533_v44, %v18183_v48 }
 0x551   :  { %4063 = vmatpush.bf16.msra.mxu3 %v18172_v42  ;;  %v14015_v34 = vadd.f32 1.0, %v10359_v50  ;;  %v18189_v42 = vperm.slane %v13013_v33, 5  ;;  %vm3790_vm0 = vcmp.eq.f32.partialorder %v3789_v35, 8.507059e+37 }
 0x552   :  { %18182 = vst [vmem:[#allocation56_spill] sm:$0xff] %v14002_v37  ;;  %v3683_v63 = vadd.f32 %v3651_v22, %v14002_v37 }
 0x553   :  { %v3521_v44 = vpop.f32.mrf.mxu3  ;;  %vm3815_vm13 = vweird.f32 %v14015_v34 }
 0x554   :  { %4055 = vmatpush.bf16.msra.mxu2 %v18175_v56  ;;  %v14004_v56 = vadd.f32 1.0, %v10355_v39  ;;  %v9787_v39 = vmul.f32 -1.442695, %v3675_v5  ;;  %v9789_v7 = vmul.f32 -1.442695, %v3683_v63 }
 0x555   :  { %4064 = vmatpush.bf16.msra.mxu3 %v18174_v9  ;;  %v18185_v9 = vld [vmem:[#allocation64_spill] sm:$0xff]  ;;  %v14024_v2 = vpop.f32.mrf.mxu1 }
 0x556   :  { %v14009_v30 = vadd.f32 %v18185_v9, %v2480_v18  ;;  %v10361_v45 = vpop.eup %10360  ;;  %10362 = vrcp.f32 %v14004_v56  ;;  %vm3709_vm5 = vweird.f32 %v14004_v56 }
 0x557   :  { %10364 = vpow2.f32 %v9783_v6  ;;  %v14019_v18 = vadd.f32 1.0, %v10361_v45 }
 0x558   :  { %18186 = vst [vmem:[#allocation82_spill] sm:$0xff] %v14009_v30  ;;  %v3681_v62 = vadd.f32 %v3649_v24, %v14009_v30  ;;  %10366 = vrcp.f32 %v14011_v36 }
 0x559   :  { %4065 = vmatpush.bf16.msra.mxu3 %v18176_v8  ;;  %v18184_v8 = vld [vmem:[#allocation76_spill] sm:$0xff]  ;;  %10368 = vrcp.f32 %v14015_v34  ;;  %vm3739_vm6 = vweird.f32 %v14019_v18 }
 0x55a   :  { %v9785_v9 = vmul.f32 -1.442695, %v3681_v62  ;;  %10370 = vpow2.f32 %v9787_v39  ;;  %v3545_v5 = vpop.f32.mrf.mxu2 }
 0x55b   :  { %10372 = vpow2.f32 %v9789_v7 }
 0x55c   :  { %v14026_v24 = vpop.eup %10362  ;;  %10374 = vrcp.f32 %v14019_v18 }
 0x55d   :  { %4066 = vmatpush.bf16.msra.mxu3 %v18184_v8  ;;  %v10365_v50 = vpop.eup %10364  ;;  %10376 = vpow2.f32 %v9785_v9  ;;  %v3705_v62 = vmul.f32 %v14026_v24, %v14004_v56  ;;  %v3573_v9 = vpop.f32.mrf.mxu1  ;;  %vm3710_vm7 = vweird.f32 %v14026_v24 }
 0x55e   :  { %v14029_v22 = vpop.eup %10366  ;;  %v14035_v39 = vadd.f32 1.0, %v10365_v50  ;;  %v18190_v9 = vperm.slane %v13013_v33, 4  ;;  %vm14113_vm14 = vmor %vm3709_vm5, %vm3710_vm7 }
 0x55f   :  { %v14031_v6 = vpop.eup %10368  ;;  %v3781_v44 = vmul.f32 %v14029_v22, %v14011_v36  ;;  %v3706_v8 = vsub.f32 1.0, %v3705_v62  ;;  %vm3786_vm9 = vweird.f32 %v14029_v22 }
 0x560   :  { %v10371_v63 = vpop.eup %10370  ;;  %v3811_v30 = vmul.f32 %v14031_v6, %v14015_v34  ;;  %10378 = vrcp.f32 %v14035_v39  ;;  %vm3816_vm11 = vweird.f32 %v14031_v6  ;;  %vm14104_vm12 = vmor %vm3785_vm10, %vm3786_vm9 }
 0x561   :  { %4067 = vmatpush.bf16.msra.mxu3 %v18187_v57  ;;  %v10373_v45 = vpop.eup %10372  ;;  %v14041_v37 = vadd.f32 1.0, %v10371_v63  ;;  %v3782_v28 = vsub.f32 1.0, %v3781_v44  ;;  %v2592_v63 = vadd.f32 %v13723_v59, %v18189_v42  ;;  %v3707_v62 = vmul.f32 %v14026_v24, %v3706_v8  ;;  %v18194_v42 = vld [vmem:[#allocation115_spill] sm:$0xff]  ;;  %vm14124_vm15 = vmor %vm3815_vm13, %vm3816_vm11 }
 0x562   :  { %v14037_v7 = vpop.eup %10374  ;;  %v3547_v57 = vpop.f32.mrf.mxu2 }
 0x563   :  { %v10377_v48 = vpop.eup %10376  ;;  %v3735_v50 = vmul.f32 %v14037_v7, %v14019_v18  ;;  %10380 = vrcp.f32 %v14041_v37  ;;  %v3812_v57 = vsub.f32 1.0, %v3811_v30  ;;  %v3783_v44 = vmul.f32 %v14029_v22, %v3782_v28 }
 0x564   :  { %v14050_v51 = vadd.f32 1.0, %v10377_v48  ;;  %v14069_v19 = vadd.f32 %v18194_v42, %v2592_v63  ;;  %v3713_v30 = vand.u32 2147483647, %v14004_v56  ;;  %v3745_v28 = vand.u32 2147483648, %v14019_v18 }
 0x565   :  { %4068 = vmatpush.bf16.msra.mxu3 %v18188_v16  ;;  %v14045_v16 = vadd.f32 1.0, %v10373_v45  ;;  %v18191_v45 = vld [vmem:[#allocation99_spill] sm:$0xff]  ;;  %v3736_v48 = vsub.f32 1.0, %v3735_v50  ;;  %v3813_v8 = vmul.f32 %v14031_v6, %v3812_v57  ;;  %v3708_v63 = vadd.f32 %v14026_v24, %v3707_v62 }
 0x566   :  { %v2564_v27 = vadd.f32 %v18191_v45, %v18190_v9  ;;  %v14066_v59 = vpop.eup %10378  ;;  %18195 = vst [vmem:[#allocation64_spill] sm:$0xff] %v14069_v19  ;;  %v3715_v9 = vand.u32 2147483648, %v14004_v56  ;;  %vm3740_vm8 = vweird.f32 %v14037_v7  ;;  %v3784_v53 = vadd.f32 %v14029_v22, %v3783_v44 }
 0x567   :  { %10382 = vrcp.f32 %v14045_v16  ;;  %v3720_v57 = vmul.f32 %v14066_v59, %v14035_v39  ;;  %v3737_v1 = vmul.f32 %v14037_v7, %v3736_v48  ;;  %v3814_v48 = vadd.f32 %v14031_v6, %v3813_v8  ;;  %vm14140_vm1 = vmor %vm3739_vm6, %vm3740_vm8 }
 0x568   :  { %v14062_v25 = vadd.f32 %v18192_v15, %v2564_v27  ;;  %10384 = vrcp.f32 %v14050_v51  ;;  %v3743_v27 = vand.u32 2147483647, %v14019_v18  ;;  %v3821_v44 = vand.u32 2147483648, %v14015_v34 }
 0x569   :  { %v14078_v50 = vpop.eup %10380  ;;  %v3738_v8 = vadd.f32 %v14037_v7, %v3737_v1  ;;  %v3712_v1 = vsel %vm14113_vm14, %v14026_v24, %v3708_v63  ;;  %vm3714_vm2 = vcmp.eq.f32.partialorder %v3713_v30, 8.507059e+37  ;;  %v3746_v10 = vor.u32 1.1754944e-38, %v3745_v28 }
 0x56a   :  { %18193 = vst [vmem:[#allocation55_spill] sm:$0xff] %v14062_v25  ;;  %v3796_v40 = vmul.f32 %v14078_v50, %v14041_v37  ;;  %vm3744_vm5 = vcmp.eq.f32.partialorder %v3743_v27, 8.507059e+37  ;;  %vm3724_vm6 = vweird.f32 %v14035_v39  ;;  %vm3725_vm7 = vweird.f32 %v14066_v59 }
 0x56b   :  { %v3558_v15 = vpop.f32.mrf.mxu3  ;;  %v3742_v35 = vsel %vm14140_vm1, %v14037_v7, %v3738_v8  ;;  %vm3801_vm9 = vweird.f32 %v14078_v50  ;;  %vm3800_vm11 = vweird.f32 %v14041_v37 }
 0x56c   :  { %v3559_v45 = vadd.f32 %v3558_v15, %v3545_v5  ;;  %v3791_v5 = vand.u32 2147483648, %v14011_v36  ;;  %v18196_v15 = vld [vmem:[#allocation91_spill] sm:$0xff]  ;;  %v3797_v56 = vsub.f32 1.0, %v3796_v40  ;;  %v3747_v30 = vsel %vm3744_vm5, %v3746_v10, %v3742_v35  ;;  %vm14173_vm13 = vmor %vm3800_vm11, %vm3801_vm9 }
 0x56d   :  { %v14083_v42 = vpop.eup %10382  ;;  %v3804_v35 = vand.u32 2147483647, %v14041_v37 }
 0x56e   :  { %v3652_v62 = vrot.slane %v3559_v45, 1  ;;  %v3676_v55 = vadd.f32 %v3559_v45, %v18196_v15  ;;  %v14093_v3 = vpop.eup %10384  ;;  %v3826_v4 = vmul.f32 %v14083_v42, %v14045_v16  ;;  %v3721_v15 = vsub.f32 1.0, %v3720_v57 }
 0x56f   :  { %v3792_v29 = vor.u32 1.1754944e-38, %v3791_v5  ;;  %v3822_v57 = vor.u32 1.1754944e-38, %v3821_v44  ;;  %v3716_v45 = vor.u32 1.1754944e-38, %v3715_v9  ;;  %v3798_v18 = vmul.f32 %v14078_v50, %v3797_v56 }
 0x570   :  { %v3684_v13 = vadd.f32 %v3652_v62, %v14062_v25  ;;  %10386 = vtanh.f32 %v3676_v55  ;;  %v3788_v62 = vsel %vm14104_vm12, %v14029_v22, %v3784_v53  ;;  %v3819_v25 = vand.u32 2147483647, %v14015_v34 }
 0x571   :  { %v3750_v55 = vmul.f32 %v14093_v3, %v14050_v51  ;;  %v3818_v53 = vsel %vm14124_vm15, %v14031_v6, %v3814_v48  ;;  %v3827_v5 = vsub.f32 1.0, %v3826_v4  ;;  %v3793_v40 = vsel %vm3790_vm0, %v3792_v29, %v3788_v62  ;;  %vm14191_vm15 = vmor %vm3724_vm6, %vm3725_vm7 }
 0x572   :  { %10388 = vtanh.f32 %v3684_v13  ;;  %vm3820_vm4 = vcmp.eq.f32.partialorder %v3819_v25, 8.507059e+37  ;;  %v3717_v4 = vsel %vm3714_vm2, %v3716_v45, %v3712_v1  ;;  %v3722_v63 = vmul.f32 %v14066_v59, %v3721_v15 }
 0x573   :  { %v3560_v34 = vpop.f32.mrf.mxu3  ;;  %v3751_v6 = vsub.f32 1.0, %v3750_v55  ;;  %v3823_v9 = vsel %vm3820_vm4, %v3822_v57, %v3818_v53  ;;  %v3920_v48 = vmul.f32 0.0, %v3793_v40  ;;  %v3828_v29 = vmul.f32 %v14083_v42, %v3827_v5  ;;  %v18205_v5 = vld [vmem:[#allocation107_spill] sm:$0xff] }
 0x574   :  { %v3730_v25 = vand.u32 2147483648, %v14035_v39  ;;  %v3922_v7 = vmul.f32 0.0, %v3823_v9  ;;  %v3723_v55 = vadd.f32 %v14066_v59, %v3722_v63  ;;  %vm3755_vm8 = vweird.f32 %v14093_v3 }
 0x575   :  { %v14134_v22 = vpop.f32.mrf.mxu1  ;;  %v3752_v27 = vmul.f32 %v14093_v3, %v3751_v6  ;;  %v3799_v53 = vadd.f32 %v14078_v50, %v3798_v18  ;;  %v3806_v57 = vand.u32 2147483648, %v14041_v37  ;;  %v3829_v45 = vadd.f32 %v14083_v42, %v3828_v29 }
 0x576   :  { %v10387_v24 = vpop.eup %10386  ;;  %vm3831_vm10 = vweird.f32 %v14083_v42  ;;  %v3836_v13 = vand.u32 2147483648, %v14045_v16  ;;  %vm3830_vm12 = vweird.f32 %v14045_v16  ;;  %v3834_v6 = vand.u32 2147483647, %v14045_v16 }
 0x577   :  { %v3924_v44 = vmul.f32 %v10387_v24, %v3717_v4  ;;  %v3753_v10 = vadd.f32 %v14093_v3, %v3752_v27  ;;  %v3728_v4 = vand.u32 2147483647, %v14035_v39  ;;  %v3760_v9 = vand.u32 2147483648, %v14050_v51  ;;  %vm14183_vm14 = vmor %vm3830_vm12, %vm3831_vm10 }
 0x578   :  { %v10389_v36 = vpop.eup %10388  ;;  %v3803_v63 = vsel %vm14173_vm13, %v14078_v50, %v3799_v53  ;;  %v3807_v18 = vor.u32 1.1754944e-38, %v3806_v57  ;;  %vm3754_vm0 = vweird.f32 %v14050_v51  ;;  %v3833_v50 = vsel %vm14183_vm14, %v14083_v42, %v3829_v45 }
 0x579   :  { %v3926_v28 = vmul.f32 %v10389_v36, %v3747_v30  ;;  %v14152_v8 = vadd.f32 %v3924_v44, %v3920_v48  ;;  %v3758_v48 = vand.u32 2147483647, %v14050_v51  ;;  %v3837_v36 = vor.u32 1.1754944e-38, %v3836_v13  ;;  %vm3756_vm1 = vmor %vm3754_vm0, %vm3755_vm8 }
 0x57a   :  { %v3584_v62 = vpop.f32.mrf.mxu2  ;;  %v3727_v29 = vsel %vm14191_vm15, %v14066_v59, %v3723_v55  ;;  %vm3805_vm2 = vcmp.eq.f32.partialorder %v3804_v35, 8.507059e+37  ;;  %v3731_v39 = vor.u32 1.1754944e-38, %v3730_v25  ;;  %v3757_v30 = vsel %vm3756_vm1, %v14093_v3, %v3753_v10 }
 0x57b   :  { %v3585_v15 = vadd.f32 %v3584_v62, %v14024_v2  ;;  %v14159_v56 = vadd.f32 %v3926_v28, %v3922_v7  ;;  %v3808_v62 = vsel %vm3805_vm2, %v3807_v18, %v3803_v63  ;;  %vm3835_vm4 = vcmp.eq.f32.partialorder %v3834_v6, 8.507059e+37 }
 0x57c   :  { %vm3729_vm5 = vcmp.eq.f32.partialorder %v3728_v4, 8.507059e+37  ;;  %v3761_v51 = vor.u32 1.1754944e-38, %v3760_v9  ;;  %v3838_v7 = vsel %vm3835_vm4, %v3837_v36, %v3833_v50  ;;  %vm3759_vm6 = vcmp.eq.f32.partialorder %v3758_v48, 8.507059e+37 }
 0x57d   :  { %v3653_v1 = vrot.slane %v3585_v15, 1  ;;  %v3612_v34 = vpop.f32.mrf.mxu1  ;;  %v3677_v2 = vadd.f32 %v3585_v15, %v18205_v5  ;;  %v3732_v42 = vsel %vm3729_vm5, %v3731_v39, %v3727_v29  ;;  %v3923_v59 = vmul.f32 0.0, %v3838_v7 }
 0x57e   :  { %v3762_v27 = vsel %vm3759_vm6, %v3761_v51, %v3757_v30  ;;  %v18212_v3 = vperm.slane %v13013_v33, 6 }
 0x57f   :  { %v3685_v40 = vadd.f32 %v3653_v1, %v14069_v19  ;;  %10390 = vtanh.f32 %v3677_v2  ;;  %v3921_v1 = vmul.f32 0.0, %v3808_v62  ;;  %v18214_v62 = vperm.slane %v13013_v33, 7 }
 0x580   :  { %v2620_v2 = vadd.f32 %v13806_v32, %v18212_v3 }
 0x581   :  { %10392 = vtanh.f32 %v3685_v40  ;;  %v2648_v51 = vadd.f32 %v13771_v46, %v18214_v62 }
 0x582   :  { %v3586_v44 = vpop.f32.mrf.mxu2  ;;  %v14215_v13 = vadd.f32 %v13891_v61, %v2620_v2 }
 0x584   :  { %18213 = vst [vmem:[#allocation99_spill] sm:$0xff] %v14215_v13 }
 0x585   :  { %v10391_v28 = vpop.eup %10390 }
 0x586   :  { %v3925_v53 = vmul.f32 %v10391_v28, %v3732_v42 }
 0x587   :  { %v10393_v15 = vpop.eup %10392 }
 0x588   :  { %v3927_v55 = vmul.f32 %v10393_v15, %v3762_v27  ;;  %v14206_v34 = vadd.f32 %v3925_v53, %v3921_v1  ;;  %v14225_v1 = vadd.f32 %v13937_v49, %v2648_v51  ;;  %v18218_v51 = vld [vmem:[#allocation74_spill] sm:$0xff] }
 0x58a   :  { %v14208_v57 = vadd.f32 %v3927_v55, %v3923_v59  ;;  %18215 = vst [vmem:[#allocation119_spill] sm:$0xff] %v14225_v1 }
 0x58b   :  { %v3597_v25 = vpop.f32.mrf.mxu3 }
 0x58c   :  { %v3611_v45 = vadd.f32 %v14134_v22, %v3597_v25 }
 0x58e   :  { %v3654_v40 = vrot.slane %v3611_v45, 1  ;;  %v3678_v35 = vadd.f32 %v3611_v45, %v13782_v43 }
 0x590   :  { %v3686_v10 = vadd.f32 %v3654_v40, %v14215_v13  ;;  %v9790_v24 = vmul.f32 -1.442695, %v3678_v35 }
 0x592   :  { %10394 = vpow2.f32 %v9790_v24  ;;  %v9792_v6 = vmul.f32 -1.442695, %v3686_v10 }
 0x593   :  { %v3599_v4 = vpop.f32.mrf.mxu3 }
 0x594   :  { %10396 = vpow2.f32 %v9792_v6 }
 0x598   :  { %v10395_v9 = vpop.eup %10394 }
 0x599   :  { %v3856_v37 = vadd.f32 1.0, %v10395_v9 }
 0x59a   :  { %v3623_v63 = vpop.f32.mrf.mxu2  ;;  %v10397_v18 = vpop.eup %10396 }
 0x59b   :  { %v3858_v32 = vadd.f32 1.0, %v10397_v18  ;;  %10398 = vrcp.f32 %v3856_v37  ;;  %v3871_v36 = vand.u32 2147483648, %v3856_v37  ;;  %v3869_v39 = vand.u32 2147483647, %v3856_v37 }
 0x59c   :  { %vm3865_vm8 = vweird.f32 %v3856_v37 }
 0x59d   :  { %10400 = vrcp.f32 %v3858_v32  ;;  %v3901_v7 = vand.u32 2147483648, %v3858_v32  ;;  %v3899_v15 = vand.u32 2147483647, %v3858_v32  ;;  %v3872_v53 = vor.u32 1.1754944e-38, %v3871_v36 }
 0x59e   :  { %10402 = vtanh.f32 %v14152_v8  ;;  %vm3870_vm11 = vcmp.eq.f32.partialorder %v3869_v39, 8.507059e+37  ;;  %vm3895_vm12 = vweird.f32 %v3858_v32  ;;  %v18216_v39 = vld [vmem:[#allocation71_spill] sm:$0xff] }
 0x59f   :  { %10404 = vtanh.f32 %v14159_v56  ;;  %v3902_v3 = vor.u32 1.1754944e-38, %v3901_v7  ;;  %vm3900_vm14 = vcmp.eq.f32.partialorder %v3899_v15, 8.507059e+37  ;;  %v18219_v7 = vld [vmem:[#allocation75_spill] sm:$0xff] }
 0x5a1   :  { %v10399_v61 = vpop.eup %10398 }
 0x5a2   :  { %v3625_v22 = vpop.f32.mrf.mxu2  ;;  %v3861_v16 = vmul.f32 %v10399_v61, %v3856_v37  ;;  %vm3866_vm7 = vweird.f32 %v10399_v61 }
 0x5a3   :  { %v10401_v48 = vpop.eup %10400  ;;  %vm3867_vm10 = vmor %vm3865_vm8, %vm3866_vm7  ;;  %vm3946_vm8 = vcmask 1041408  }
 0x5a4   :  { %v3862_v50 = vsub.f32 1.0, %v3861_v16  ;;  %v3891_v44 = vmul.f32 %v10401_v48, %v3858_v32  ;;  %vm3896_vm9 = vweird.f32 %v10401_v48  ;;  %v10403_v46 = vpop.eup %10402 }
 0x5a5   :  { %vm3897_vm13 = vmor %vm3895_vm12, %vm3896_vm9  ;;  %v10405_v49 = vpop.eup %10404  ;;  %vm17995_vm9 = vcmask 1043459  }
 0x5a6   :  { %v3863_v29 = vmul.f32 %v10399_v61, %v3862_v50  ;;  %v3892_v30 = vsub.f32 1.0, %v3891_v44 }
 0x5a8   :  { %v3864_v28 = vadd.f32 %v10399_v61, %v3863_v29  ;;  %v3893_v42 = vmul.f32 %v10401_v48, %v3892_v30  ;;  %v18217_v30 = vld [vmem:[#allocation72_spill] sm:$0xff] }
 0x5aa   :  { %v3868_v55 = vsel %vm3867_vm10, %v10399_v61, %v3864_v28  ;;  %v3894_v33 = vadd.f32 %v10401_v48, %v3893_v42  ;;  %vm17992_vm10 = vcmask 1045509  }
 0x5ab   :  { %v3636_v27 = vpop.f32.mrf.mxu3  ;;  %v3873_v25 = vsel %vm3870_vm11, %v3872_v53, %v3868_v55  ;;  %v18221_v55 = vld [vmem:[#allocation79_spill] sm:$0xff]  ;;  %vm17982_vm11 = vcmask 1047559  }
 0x5ac   :  { %v3637_v59 = vadd.f32 %v3636_v27, %v3623_v63  ;;  %v3898_v40 = vsel %vm3897_vm13, %v10401_v48, %v3894_v33  ;;  %v14228_v35 = vmul.f32 %v10403_v46, %v3873_v25 }
 0x5ad   :  { %v3903_v10 = vsel %vm3900_vm14, %v3902_v3, %v3898_v40 }
 0x5ae   :  { %v3655_v2 = vrot.slane %v3637_v59, 1  ;;  %v3679_v45 = vadd.f32 %v3637_v59, %v13863_v38  ;;  %v14231_v4 = vmul.f32 %v10405_v49, %v3903_v10  ;;  %v3963_v63 = vpack.c.bf16 %v14228_v35, %v14228_v35  ;;  %v18220_v59 = vld [vmem:[#allocation77_spill] sm:$0xff] }
 0x5af   :  { %v18222_v10 = vld [vmem:[#allocation81_spill] sm:$0xff] }
 0x5b0   :  { %v3687_v24 = vadd.f32 %v3655_v2, %v14225_v1  ;;  %v9791_v6 = vmul.f32 -1.442695, %v3679_v45  ;;  %v3965_v37 = vpack.c.bf16 %v14231_v4, %v14231_v4  ;;  %v3971_v22 = vunpack.c.l.b16 %v3963_v63 }
 0x5b2   :  { %10406 = vpow2.f32 %v9791_v6  ;;  %v9793_v9 = vmul.f32 -1.442695, %v3687_v24  ;;  %v3973_v32 = vunpack.c.l.b16 %v3965_v37  ;;  %v18223_v24 = vld [vmem:[#allocation83_spill] sm:$0xff] }
 0x5b3   :  { %v3638_v18 = vpop.f32.mrf.mxu3 }
 0x5b4   :  { %10408 = vpow2.f32 %v9793_v9  ;;  %v3975_v61 = vrot.slane %v3973_v32, 7 }
 0x5b6   :  { %v3976_v48 = vsel %vm17996_vm3, %v3975_v61, %v3971_v22 }
 0x5b7   :  { %v14238_v36 = vpack.c.b16 %v3976_v48, %v3976_v48  ;;  %v18224_v48 = vld [vmem:[#allocation85_spill] sm:$0xff] }
 0x5b8   :  { %v10407_v16 = vpop.eup %10406 }
 0x5b9   :  { %v3857_v50 = vadd.f32 1.0, %v10407_v16  ;;  %3991 = vmatmul.bf16.vlgmr.msra.gmra.mxu1 %v14238_v36  ;;  %4017 = vmatmul.bf16.vlgmr.msrb.gmra.mxu3 %v14238_v36 }
 0x5ba   :  { %v10409_v44 = vpop.eup %10408  ;;  %4087 = vmatpush.bf16.msra.mxu1 %v18216_v39  ;;  %4113 = vmatpush.bf16.msrb.mxu3 %v18217_v30 }
 0x5bb   :  { %v3859_v29 = vadd.f32 1.0, %v10409_v44  ;;  %10410 = vrcp.f32 %v3857_v50  ;;  %v3886_v53 = vand.u32 2147483648, %v3857_v50  ;;  %v3884_v46 = vand.u32 2147483647, %v3857_v50 }
 0x5bc   :  { %vm3880_vm0 = vweird.f32 %v3857_v50 }
 0x5bd   :  { %10412 = vrcp.f32 %v3859_v29  ;;  %v3916_v3 = vand.u32 2147483648, %v3859_v29  ;;  %v3914_v40 = vand.u32 2147483647, %v3859_v29  ;;  %v3887_v49 = vor.u32 1.1754944e-38, %v3886_v53  ;;  %v18227_v53 = vld [vmem:[#allocation90_spill] sm:$0xff] }
 0x5be   :  { %4088 = vmatpush.bf16.msra.mxu1 %v18218_v51  ;;  %4114 = vmatpush.bf16.msrb.mxu3 %v18219_v7  ;;  %10414 = vtanh.f32 %v14206_v34  ;;  %vm3885_vm4 = vcmp.eq.f32.partialorder %v3884_v46, 8.507059e+37  ;;  %vm3910_vm5 = vweird.f32 %v3859_v29 }
 0x5bf   :  { %10416 = vtanh.f32 %v14208_v57  ;;  %v3917_v18 = vor.u32 1.1754944e-38, %v3916_v3  ;;  %vm3915_vm7 = vcmp.eq.f32.partialorder %v3914_v40, 8.507059e+37  ;;  %v18228_v40 = vld [vmem:[#allocation92_spill] sm:$0xff] }
 0x5c1   :  { %v10411_v62 = vpop.eup %10410 }
 0x5c2   :  { %v3876_v28 = vmul.f32 %v10411_v62, %v3857_v50  ;;  %4089 = vmatpush.bf16.msra.mxu1 %v18220_v59  ;;  %4115 = vmatpush.bf16.msrb.mxu3 %v18221_v55  ;;  %vm3881_vm15 = vweird.f32 %v10411_v62  ;;  %v18225_v50 = vld [vmem:[#allocation87_spill] sm:$0xff] }
 0x5c3   :  { %v10413_v42 = vpop.eup %10412  ;;  %vm3882_vm2 = vmor %vm3880_vm0, %vm3881_vm15 }
 0x5c4   :  { %v3877_v15 = vsub.f32 1.0, %v3876_v28  ;;  %v3906_v27 = vmul.f32 %v10413_v42, %v3859_v29  ;;  %vm3911_vm1 = vweird.f32 %v10413_v42  ;;  %v10415_v63 = vpop.eup %10414 }
 0x5c5   :  { %vm3912_vm6 = vmor %vm3910_vm5, %vm3911_vm1  ;;  %v10417_v61 = vpop.eup %10416 }
 0x5c6   :  { %v3878_v33 = vmul.f32 %v10411_v62, %v3877_v15  ;;  %v3907_v25 = vsub.f32 1.0, %v3906_v27  ;;  %4090 = vmatpush.bf16.msra.mxu1 %v18222_v10  ;;  %4116 = vmatpush.bf16.msrb.mxu3 %v18223_v24  ;;  %v18226_v27 = vld [vmem:[#allocation88_spill] sm:$0xff] }
 0x5c8   :  { %v3879_v2 = vadd.f32 %v10411_v62, %v3878_v33  ;;  %v3908_v45 = vmul.f32 %v10413_v42, %v3907_v25 }
 0x5c9   :  { %4043 = vmatmul.bf16.vlgmr.msrb.gmra.mxu1 %v14238_v36  ;;  %4069 = vmatmul.bf16.vlgmr.msra.gmra.mxu3 %v14238_v36 }
 0x5ca   :  { %v3883_v6 = vsel %vm3882_vm2, %v10411_v62, %v3879_v2  ;;  %v3909_v9 = vadd.f32 %v10413_v42, %v3908_v45  ;;  %4091 = vmatpush.bf16.msra.mxu1 %v18224_v48  ;;  %4117 = vmatpush.bf16.msrb.mxu3 %v18225_v50 }
 0x5cb   :  { %v3888_v37 = vsel %vm3885_vm4, %v3887_v49, %v3883_v6 }
 0x5cc   :  { %v3913_v32 = vsel %vm3912_vm6, %v10413_v42, %v3909_v9  ;;  %v3937_v22 = vmul.f32 %v10415_v63, %v3888_v37  ;;  %v18230_v37 = vld [vmem:[#allocation95_spill] sm:$0xff] }
 0x5cd   :  { %v3918_v16 = vsel %vm3915_vm7, %v3917_v18, %v3913_v32  ;;  %v18231_v18 = vld [vmem:[#allocation98_spill] sm:$0xff] }
 0x5ce   :  { %v3939_v44 = vmul.f32 %v10417_v61, %v3918_v16  ;;  %v3944_v29 = vrot.slane %v3937_v22, 6  ;;  %v3964_v42 = vpack.c.bf16 %v3937_v22, %v3937_v22  ;;  %4092 = vmatpush.bf16.msra.mxu1 %v18226_v27  ;;  %4118 = vmatpush.bf16.msrb.mxu3 %v18227_v53  ;;  %v18232_v32 = vld [vmem:[#allocation86_spill] sm:$0xff]  ;;  %v18233_v22 = vld [vmem:[#allocation97_spill] sm:$0xff] }
 0x5cf   :  { %v18234_v61 = vld [vmem:[#allocation113_spill] sm:$0xff] }
 0x5d0   :  { %v3945_v62 = vrot.slane %v3939_v44, 6  ;;  %v3947_v28 = vsel %vm3946_vm8, %v14228_v35, %v3944_v29  ;;  %v3966_v15 = vpack.c.bf16 %v3939_v44, %v3939_v44  ;;  %v3972_v3 = vunpack.c.l.b16 %v3964_v42  ;;  %v18229_v35 = vld [vmem:[#allocation94_spill] sm:$0xff]  ;;  %v18235_v16 = vld [vmem:[#allocation89_spill] sm:$0xff] }
 0x5d1   :  { %v18236_v44 = vld [vmem:[#allocation102_spill] sm:$0xff]  ;;  %v18237_v29 = vld [vmem:[#allocation117_spill] sm:$0xff] }
 0x5d2   :  { %v3948_v33 = vsel %vm3946_vm8, %v14231_v4, %v3945_v62  ;;  %v3974_v46 = vunpack.c.l.b16 %v3966_v15  ;;  %4093 = vmatpush.bf16.msra.mxu1 %v18228_v40  ;;  %4119 = vmatpush.bf16.msrb.mxu3 %v18229_v35  ;;  %v18238_v62 = vld [vmem:[#allocation128_spill] sm:$0xff]  ;;  %v18240_v42 = vld [vmem:[#allocation105_spill] sm:$0xff] }
 0x5d3   :  { %v3953_v25 = vrot.slane %v3948_v33, 7  ;;  %v18241_v15 = vld [vmem:[#allocation121_spill] sm:$0xff]  ;;  %v18242_v33 = vld [vmem:[#allocation130_spill] sm:$0xff] }
 0x5d4   :  { %v3977_v2 = vrot.slane %v3974_v46, 7  ;;  %v18243_v46 = vld [vmem:[#allocation96_spill] sm:$0xff] }
 0x5d5   :  { %v3954_v45 = vsel %vm17996_vm3, %v3953_v25, %v3947_v28  ;;  %v18239_v28 = vld [vmem:[#allocation93_spill] sm:$0xff] }
 0x5d6   :  { %v3956_v49 = vsel %vm17995_vm9, %v3953_v25, %v3954_v45  ;;  %v3978_v6 = vsel %vm17996_vm3, %v3977_v2, %v3972_v3  ;;  %4094 = vmatpush.bf16.msra.mxu1 %v18230_v37  ;;  %4120 = vmatpush.bf16.msrb.mxu3 %v18231_v18  ;;  %v18245_v3 = vld [vmem:[#allocation124_spill] sm:$0xff]  ;;  %v18246_v2 = vld [vmem:[#allocation101_spill] sm:$0xff] }
 0x5d7   :  { %v3958_v9 = vsel %vm17992_vm10, %v3953_v25, %v3956_v49  ;;  %v14268_v4 = vpack.c.b16 %v3978_v6, %v3978_v6  ;;  %v18247_v45 = vld [vmem:[#allocation112_spill] sm:$0xff]  ;;  %v18248_v49 = vld [vmem:[#allocation127_spill] sm:$0xff] }
 0x5d8   :  { %v3960_v63 = vsel %vm17982_vm11, %v3953_v25, %v3958_v9  ;;  %v18244_v25 = vld [vmem:[#allocation109_spill] sm:$0xff]  ;;  %v18249_v6 = vld [vmem:[#allocation104_spill] sm:$0xff] }
 0x5d9   :  { %3962 = vst [vmem:[#allocation2] sm:$0xf] %v3960_v63  ;;  %4004 = vmatmul.bf16.vlgmr.msrb.gmra.mxu2 %v14268_v4  ;;  %4030 = vmatmul.bf16.vlgmr.msrb.gmra.mxu0 %v14268_v4  ;;  %v18250_v9 = vld [vmem:[#allocation116_spill] sm:$0xff]  ;;  %v18251_v63 = vld [vmem:[#allocation129_spill] sm:$0xff] }
 0x5da   :  { %4100 = vmatpush.bf16.msrb.mxu2 %v18232_v32  ;;  %4126 = vmatpush.bf16.msrb.mxu0 %v18233_v22 }
 0x5db   :  { %4139 = vmatpush.bf16.msrb.mxu1 %v18234_v61  ;;  %4165 = vmatpush.bf16.msra.mxu3 %v13731_v0 }
 0x5dc   :  { %4095 = vmatmul.bf16.vlgmr.msra.gmra.mxu1 %v14238_v36  ;;  %4121 = vmatmul.bf16.vlgmr.msrb.gmra.mxu3 %v14238_v36 }
 0x5de   :  { %4101 = vmatpush.bf16.msrb.mxu2 %v18235_v16  ;;  %4127 = vmatpush.bf16.msrb.mxu0 %v18236_v44 }
 0x5df   :  { %4140 = vmatpush.bf16.msrb.mxu1 %v18237_v29  ;;  %4166 = vmatpush.bf16.msra.mxu3 %v18238_v62  ;;  %v18322_v62 = vld [vmem:[#allocation61_spill] sm:$0xff]  ;;  %v18324_v29 = vld [vmem:[#allocation66_spill] sm:$0xff] }
 0x5e2   :  { %4102 = vmatpush.bf16.msrb.mxu2 %v18239_v28  ;;  %4128 = vmatpush.bf16.msrb.mxu0 %v18240_v42 }
 0x5e3   :  { %4141 = vmatpush.bf16.msrb.mxu1 %v18241_v15  ;;  %4167 = vmatpush.bf16.msra.mxu3 %v18242_v33  ;;  %v18254_v33 = vld [vmem:[#allocation131_spill] sm:$0xff] }
 0x5e4   :  { %v18255_v15 = vld [vmem:[#allocation111_spill] sm:$0xff] }
 0x5e6   :  { %4103 = vmatpush.bf16.msrb.mxu2 %v18243_v46  ;;  %4129 = vmatpush.bf16.msrb.mxu0 %v18244_v25 }
 0x5e7   :  { %4142 = vmatpush.bf16.msrb.mxu1 %v18245_v3  ;;  %4168 = vmatpush.bf16.msra.mxu3 %v13804_v14  ;;  %v18252_v14 = vld [vmem:[#allocation108_spill] sm:$0xff] }
 0x5e8   :  { %v18253_v3 = vld [vmem:[#allocation120_spill] sm:$0xff] }
 0x5e9   :  { %4056 = vmatmul.bf16.vlgmr.msra.gmra.mxu2 %v14268_v4  ;;  %4082 = vmatmul.bf16.vlgmr.msra.gmra.mxu0 %v14268_v4 }
 0x5ea   :  { %4104 = vmatpush.bf16.msrb.mxu2 %v18246_v2  ;;  %4130 = vmatpush.bf16.msrb.mxu0 %v18247_v45 }
 0x5eb   :  { %4143 = vmatpush.bf16.msrb.mxu1 %v18248_v49  ;;  %4169 = vmatpush.bf16.msra.mxu3 %v13828_v54  ;;  %v18256_v49 = vld [vmem:[#allocation123_spill] sm:$0xff]  ;;  %v18257_v54 = vld [vmem:[#allocation100_spill] sm:$0xff] }
 0x5ee   :  { %4105 = vmatpush.bf16.msrb.mxu2 %v18249_v6  ;;  %4131 = vmatpush.bf16.msrb.mxu0 %v18250_v9  ;;  %v18351_v6 = vld [vmem:[#allocation55_spill] sm:$0xff] }
 0x5ef   :  { %4144 = vmatpush.bf16.msrb.mxu1 %v18251_v63  ;;  %4170 = vmatpush.bf16.msra.mxu3 %v13851_v17  ;;  %v18258_v63 = vld [vmem:[#allocation134_spill] sm:$0xff] }
 0x5f0   :  { %v18263_v17 = vld [vmem:[#allocation14_spill] sm:$0xff] }
 0x5f2   :  { %4106 = vmatpush.bf16.msrb.mxu2 %v18252_v14  ;;  %4132 = vmatpush.bf16.msrb.mxu0 %v18253_v3 }
 0x5f3   :  { %4145 = vmatpush.bf16.msrb.mxu1 %v18254_v33  ;;  %4171 = vmatpush.bf16.msra.mxu3 %v13873_v31  ;;  %v18259_v31 = vld [vmem:[#allocation10_spill] sm:$0xff]  ;;  %v18260_v33 = vld [vmem:[#allocation103_spill] sm:$0xff] }
 0x5f6   :  { %4107 = vmatpush.bf16.msrb.mxu2 %v18255_v15  ;;  %4133 = vmatpush.bf16.msrb.mxu0 %v18256_v49 }
 0x5f7   :  { %4146 = vmatpush.bf16.msrb.mxu1 %v13819_v12  ;;  %4172 = vmatpush.bf16.msra.mxu3 %v13889_v23  ;;  %v18261_v23 = vld [vmem:[#allocation12_spill] sm:$0xff]  ;;  %v18262_v12 = vld [vmem:[#allocation106_spill] sm:$0xff] }
 0x5f9   :  { %4108 = vmatmul.bf16.vlgmr.msrb.gmra.mxu2 %v14268_v4  ;;  %4134 = vmatmul.bf16.vlgmr.msrb.gmra.mxu0 %v14268_v4 }
 0x5fa   :  { %4152 = vmatpush.bf16.msra.mxu2 %v18257_v54  ;;  %4178 = vmatpush.bf16.msra.mxu0 %v18258_v63 }
 0x5fb   :  { %4147 = vmatmul.bf16.vlgmr.msrb.gmra.mxu1 %v14238_v36  ;;  %4173 = vmatmul.bf16.vlgmr.msra.gmra.mxu3 %v14238_v36  ;;  %v18264_v36 = vld [vmem:[#allocation110_spill] sm:$0xff] }
 0x5fc   :  { %4541 = vmatpush.bf16.msra.mxu1 %v18259_v31  ;;  %4567 = vmatpush.bf16.msrb.mxu3 %v12812_v58  ;;  %v18265_v58 = vld [vmem:[#allocation17_spill] sm:$0xff]  ;;  %v18266_v31 = vld [vmem:[#allocation114_spill] sm:$0xff] }
 0x5fe   :  { %4153 = vmatpush.bf16.msra.mxu2 %v18260_v33  ;;  %4179 = vmatpush.bf16.msra.mxu0 %v13845_v41 }
 0x600   :  { %4542 = vmatpush.bf16.msra.mxu1 %v18261_v23  ;;  %4568 = vmatpush.bf16.msrb.mxu3 %v12850_v11  ;;  %v18267_v11 = vld [vmem:[#allocation22_spill] sm:$0xff] }
 0x601   :  { %v18268_v23 = vld [vmem:[#allocation118_spill] sm:$0xff] }
 0x602   :  { %4154 = vmatpush.bf16.msra.mxu2 %v18262_v12  ;;  %4180 = vmatpush.bf16.msra.mxu0 %v13867_v20  ;;  %v18326_v20 = vld [vmem:[#allocation69_spill] sm:$0xff] }
 0x604   :  { %4543 = vmatpush.bf16.msra.mxu1 %v18263_v17  ;;  %4569 = vmatpush.bf16.msrb.mxu3 %v12889_v47  ;;  %v18269_v17 = vld [vmem:[#allocation143_spill] sm:$0xff]  ;;  %v18270_v47 = vld [vmem:[#allocation26_spill] sm:$0xff] }
 0x606   :  { %4155 = vmatpush.bf16.msra.mxu2 %v18264_v36  ;;  %4181 = vmatpush.bf16.msra.mxu0 %v13886_v21  ;;  %v18271_v36 = vld [vmem:[#allocation38_spill] sm:$0xff] }
 0x607   :  { %v18272_v21 = vld [vmem:[#allocation122_spill] sm:$0xff] }
 0x608   :  { %4544 = vmatpush.bf16.msra.mxu1 %v18265_v58  ;;  %4570 = vmatpush.bf16.msrb.mxu3 %v12925_v26  ;;  %v18273_v58 = vld [vmem:[#allocation144_spill] sm:$0xff]  ;;  %v18274_v26 = vld [vmem:[#allocation30_spill] sm:$0xff] }
 0x60a   :  { %4156 = vmatpush.bf16.msra.mxu2 %v18266_v31  ;;  %4182 = vmatpush.bf16.msra.mxu0 %v13901_v52  ;;  %v18275_v31 = vld [vmem:[#allocation41_spill] sm:$0xff]  ;;  %v18276_v52 = vld [vmem:[#allocation126_spill] sm:$0xff] }
 0x60c   :  { %4545 = vmatpush.bf16.msra.mxu1 %v18267_v11  ;;  %4571 = vmatpush.bf16.msrb.mxu3 %v12961_v60  ;;  %v18277_v11 = vld [vmem:[#allocation145_spill] sm:$0xff]  ;;  %v18278_v60 = vld [vmem:[#allocation6_spill] sm:$0xff] }
 0x60e   :  { %4157 = vmatpush.bf16.msra.mxu2 %v18268_v23  ;;  %4183 = vmatpush.bf16.msra.mxu0 %v18269_v17  ;;  %v18279_v23 = vld [vmem:[#allocation4_spill] sm:$0xff]  ;;  %v18318_v17 = vld [vmem:[#allocation57_spill] sm:$0xff] }
 0x610   :  { %4546 = vmatpush.bf16.msra.mxu1 %v18270_v47  ;;  %4572 = vmatpush.bf16.msrb.mxu3 %v18271_v36  ;;  %v18280_v36 = vld [vmem:[#allocation34_spill] sm:$0xff]  ;;  %v18281_v47 = vld [vmem:[#allocation45_spill] sm:$0xff] }
 0x612   :  { %4158 = vmatpush.bf16.msra.mxu2 %v18272_v21  ;;  %4184 = vmatpush.bf16.msra.mxu0 %v18273_v58  ;;  %v18282_v58 = vld [vmem:[#allocation7_spill] sm:$0xff]  ;;  %v18289_v21 = vld [vmem:[#allocation62_spill] sm:$0xff] }
 0x614   :  { %4547 = vmatpush.bf16.msra.mxu1 %v18274_v26  ;;  %4573 = vmatpush.bf16.msrb.mxu3 %v18275_v31  ;;  %v18283_v26 = vld [vmem:[#allocation5_spill] sm:$0xff] }
 0x615   :  { %v18284_v31 = vld [vmem:[#allocation21_spill] sm:$0xff] }
 0x616   :  { %4159 = vmatpush.bf16.msra.mxu2 %v18276_v52  ;;  %4185 = vmatpush.bf16.msra.mxu0 %v18277_v11  ;;  %v18285_v52 = vld [vmem:[#allocation60_spill] sm:$0xff] }
 0x617   :  { %v18286_v11 = vld [vmem:[#allocation8_spill] sm:$0xff] }
 0x618   :  { %4548 = vmatpush.bf16.msra.mxu1 %v18280_v36  ;;  %4574 = vmatpush.bf16.msrb.mxu3 %v18281_v47  ;;  %v18291_v36 = vld [vmem:[#allocation20_spill] sm:$0xff]  ;;  %v18292_v47 = vld [vmem:[#allocation29_spill] sm:$0xff] }
 0x619   :  { %4160 = vmatmul.bf16.vlgmr.msra.gmra.mxu2 %v14268_v4  ;;  %4186 = vmatmul.bf16.vlgmr.msra.gmra.mxu0 %v14268_v4  ;;  %v18290_v4 = vld [vmem:[#allocation9_spill] sm:$0xff] }
 0x61a   :  { %4554 = vmatpush.bf16.msrb.mxu2 %v18278_v60  ;;  %4580 = vmatpush.bf16.msrb.mxu0 %v18279_v23  ;;  %v18287_v60 = vld [vmem:[#allocation16_spill] sm:$0xff]  ;;  %v18288_v23 = vld [vmem:[#allocation25_spill] sm:$0xff] }
 0x61c   :  { %4593 = vmatpush.bf16.msrb.mxu1 %v18284_v31  ;;  %4619 = vmatpush.bf16.msra.mxu3 %v18285_v52  ;;  %v18295_v31 = vld [vmem:[#allocation24_spill] sm:$0xff]  ;;  %v18296_v52 = vld [vmem:[#allocation33_spill] sm:$0xff] }
 0x61e   :  { %4555 = vmatpush.bf16.msrb.mxu2 %v18282_v58  ;;  %4581 = vmatpush.bf16.msrb.mxu0 %v18283_v26  ;;  %v18293_v58 = vld [vmem:[#allocation67_spill] sm:$0xff] }
 0x61f   :  { %v18294_v26 = vld [vmem:[#allocation11_spill] sm:$0xff] }
 0x620   :  { %4594 = vmatpush.bf16.msrb.mxu1 %v18288_v23  ;;  %4620 = vmatpush.bf16.msra.mxu3 %v18289_v21  ;;  %v18299_v23 = vld [vmem:[#allocation28_spill] sm:$0xff]  ;;  %v18300_v21 = vld [vmem:[#allocation37_spill] sm:$0xff] }
 0x622   :  { %4556 = vmatpush.bf16.msrb.mxu2 %v18286_v11  ;;  %4582 = vmatpush.bf16.msrb.mxu0 %v18287_v60  ;;  %v18297_v11 = vld [vmem:[#allocation70_spill] sm:$0xff]  ;;  %v18298_v60 = vld [vmem:[#allocation13_spill] sm:$0xff] }
 0x624   :  { %4595 = vmatpush.bf16.msrb.mxu1 %v18292_v47  ;;  %4621 = vmatpush.bf16.msra.mxu3 %v18293_v58  ;;  %v18303_v47 = vld [vmem:[#allocation32_spill] sm:$0xff]  ;;  %v18304_v58 = vld [vmem:[#allocation39_spill] sm:$0xff] }
 0x626   :  { %4557 = vmatpush.bf16.msrb.mxu2 %v18290_v4  ;;  %4583 = vmatpush.bf16.msrb.mxu0 %v18291_v36  ;;  %v18301_v4 = vld [vmem:[#allocation73_spill] sm:$0xff]  ;;  %v18302_v36 = vld [vmem:[#allocation15_spill] sm:$0xff] }
 0x628   :  { %4596 = vmatpush.bf16.msrb.mxu1 %v18296_v52  ;;  %4622 = vmatpush.bf16.msra.mxu3 %v18297_v11  ;;  %v18307_v52 = vld [vmem:[#allocation36_spill] sm:$0xff]  ;;  %v18308_v11 = vld [vmem:[#allocation46_spill] sm:$0xff] }
 0x62a   :  { %4558 = vmatpush.bf16.msrb.mxu2 %v18294_v26  ;;  %4584 = vmatpush.bf16.msrb.mxu0 %v18295_v31  ;;  %v18305_v26 = vld [vmem:[#allocation76_spill] sm:$0xff]  ;;  %v18306_v31 = vld [vmem:[#allocation19_spill] sm:$0xff] }
 0x62c   :  { %4597 = vmatpush.bf16.msrb.mxu1 %v18300_v21  ;;  %4623 = vmatpush.bf16.msra.mxu3 %v18301_v4  ;;  %v18311_v21 = vld [vmem:[#allocation80_spill] sm:$0xff]  ;;  %v18312_v4 = vld [vmem:[#allocation49_spill] sm:$0xff] }
 0x62e   :  { %4559 = vmatpush.bf16.msrb.mxu2 %v18298_v60  ;;  %4585 = vmatpush.bf16.msrb.mxu0 %v18299_v23  ;;  %v18309_v60 = vld [vmem:[#allocation40_spill] sm:$0xff]  ;;  %v18310_v23 = vld [vmem:[#allocation43_spill] sm:$0xff] }
 0x630   :  { %4598 = vmatpush.bf16.msrb.mxu1 %v18304_v58  ;;  %4624 = vmatpush.bf16.msra.mxu3 %v18305_v26  ;;  %v18315_v58 = vld [vmem:[#allocation84_spill] sm:$0xff] }
 0x632   :  { %4560 = vmatpush.bf16.msrb.mxu2 %v18302_v36  ;;  %4586 = vmatpush.bf16.msrb.mxu0 %v18303_v47  ;;  %v18313_v36 = vld [vmem:[#allocation44_spill] sm:$0xff]  ;;  %v18314_v47 = vld [vmem:[#allocation47_spill] sm:$0xff] }
 0x634   :  { %4599 = vmatpush.bf16.msrb.mxu1 %v18310_v23  ;;  %4625 = vmatpush.bf16.msra.mxu3 %v18311_v21  ;;  %v18320_v21 = vld [vmem:[#allocation59_spill] sm:$0xff] }
 0x636   :  { %4561 = vmatpush.bf16.msrb.mxu2 %v18306_v31  ;;  %4587 = vmatpush.bf16.msrb.mxu0 %v18307_v52  ;;  %v3992_v26 = vpop.f32.mrf.mxu1  ;;  %v18316_v31 = vld [vmem:[#allocation53_spill] sm:$0xff]  ;;  %v18317_v52 = vld [vmem:[#allocation48_spill] sm:$0xff] }
 0x638   :  { %4600 = vmatpush.bf16.msrb.mxu1 %v18314_v47  ;;  %4626 = vmatpush.bf16.msra.mxu3 %v18315_v58  ;;  %v18323_v47 = vld [vmem:[#allocation58_spill] sm:$0xff] }
 0x63a   :  { %4606 = vmatpush.bf16.msra.mxu2 %v18308_v11  ;;  %4632 = vmatpush.bf16.msra.mxu0 %v18309_v60  ;;  %v18319_v60 = vld [vmem:[#allocation52_spill] sm:$0xff] }
 0x63c   :  { %v4018_v11 = vpop.f32.mrf.mxu3 }
 0x63e   :  { %4607 = vmatpush.bf16.msra.mxu2 %v18312_v4  ;;  %4633 = vmatpush.bf16.msra.mxu0 %v18313_v36  ;;  %v3994_v23 = vpop.f32.mrf.mxu1  ;;  %v18321_v4 = vld [vmem:[#allocation54_spill] sm:$0xff] }
 0x642   :  { %4608 = vmatpush.bf16.msra.mxu2 %v18316_v31  ;;  %4634 = vmatpush.bf16.msra.mxu0 %v18317_v52  ;;  %v18325_v31 = vld [vmem:[#allocation63_spill] sm:$0xff] }
 0x644   :  { %v4020_v36 = vpop.f32.mrf.mxu3 }
 0x645   :  { %v18328_v36 = vld [vmem:[#allocation82_spill] sm:$0xff] }
 0x646   :  { %4609 = vmatpush.bf16.msra.mxu2 %v18318_v17  ;;  %4635 = vmatpush.bf16.msra.mxu0 %v18319_v60  ;;  %v4044_v58 = vpop.f32.mrf.mxu1  ;;  %v18327_v17 = vld [vmem:[#allocation68_spill] sm:$0xff] }
 0x64a   :  { %4610 = vmatpush.bf16.msra.mxu2 %v18320_v21  ;;  %4636 = vmatpush.bf16.msra.mxu0 %v18321_v4 }
 0x64c   :  { %v4070_v52 = vpop.f32.mrf.mxu3 }
 0x64e   :  { %4611 = vmatpush.bf16.msra.mxu2 %v18322_v62  ;;  %4637 = vmatpush.bf16.msra.mxu0 %v18323_v47  ;;  %v4046_v23 = vpop.f32.mrf.mxu1  ;;  %v18329_v47 = vld [vmem:[#allocation51_spill] sm:$0xff] }
 0x652   :  { %4612 = vmatpush.bf16.msra.mxu2 %v18324_v29  ;;  %4638 = vmatpush.bf16.msra.mxu0 %v18325_v31 }
 0x654   :  { %v4072_v21 = vpop.f32.mrf.mxu3 }
 0x656   :  { %4613 = vmatpush.bf16.msra.mxu2 %v18326_v20  ;;  %4639 = vmatpush.bf16.msra.mxu0 %v18327_v17  ;;  %v4031_v60 = vpop.f32.mrf.mxu0  ;;  %v18330_v17 = vld [vmem:[#allocation42_spill] sm:$0xff] }
 0x657   :  { %v4032_v12 = vadd.f32 %v4031_v60, %v4018_v11  ;;  %v18331_v11 = vld [vmem:[#allocation50_spill] sm:$0xff] }
 0x659   :  { %v4200_v4 = vrot.slane %v4032_v12, 7  ;;  %v4232_v0 = vadd.f32 %v4032_v12, %v18328_v36  ;;  %v14398_v62 = vpop.f32.mrf.mxu1 }
 0x65b   :  { %v4224_v61 = vadd.f32 %v4200_v4, %v18329_v47  ;;  %v9797_v18 = vmul.f32 -1.442695, %v4232_v0 }
 0x65c   :  { %v4005_v29 = vpop.f32.mrf.mxu2 }
 0x65d   :  { %v9795_v37 = vmul.f32 -1.442695, %v4224_v61  ;;  %10418 = vpow2.f32 %v9797_v18  ;;  %v4006_v31 = vadd.f32 %v4005_v29, %v3992_v26  ;;  %v18332_v29 = vld [vmem:[#allocation56_spill] sm:$0xff] }
 0x65e   :  { %v4033_v41 = vpop.f32.mrf.mxu0 }
 0x65f   :  { %10420 = vpow2.f32 %v9795_v37  ;;  %v4199_v20 = vrot.slane %v4006_v31, 7  ;;  %v4231_v23 = vadd.f32 %v4006_v31, %v18330_v17  ;;  %v14402_v33 = vpop.f32.mrf.mxu3  ;;  %v18334_v17 = vld [vmem:[#allocation146_spill] sm:$0xff] }
 0x661   :  { %v4223_v60 = vadd.f32 %v4199_v20, %v18331_v11  ;;  %v9796_v21 = vmul.f32 -1.442695, %v4231_v23  ;;  %v4098_v12 = vpop.f32.mrf.mxu1 }
 0x663   :  { %v10419_v36 = vpop.eup %10418  ;;  %v9794_v35 = vmul.f32 -1.442695, %v4223_v60  ;;  %10422 = vpow2.f32 %v9796_v21  ;;  %v18333_v21 = vld [vmem:[#allocation78_spill] sm:$0xff] }
 0x664   :  { %v14405_v4 = vadd.f32 1.0, %v10419_v36  ;;  %v4007_v0 = vpop.f32.mrf.mxu2 }
 0x665   :  { %v10421_v61 = vpop.eup %10420  ;;  %10424 = vpow2.f32 %v9794_v35 }
 0x666   :  { %v14407_v26 = vadd.f32 1.0, %v10421_v61  ;;  %10426 = vrcp.f32 %v14405_v4  ;;  %v4083_v41 = vpop.f32.mrf.mxu0  ;;  %vm4305_vm12 = vweird.f32 %v14405_v4 }
 0x667   :  { %v4084_v31 = vadd.f32 %v4083_v41, %v4070_v52  ;;  %v4124_v37 = vpop.f32.mrf.mxu3 }
 0x668   :  { %10428 = vrcp.f32 %v14407_v26  ;;  %vm4275_vm13 = vweird.f32 %v14407_v26 }
 0x669   :  { %v10423_v20 = vpop.eup %10422  ;;  %v4202_v18 = vrot.slane %v4084_v31, 7  ;;  %v4234_v23 = vadd.f32 %v4084_v31, %v18332_v29 }
 0x66a   :  { %v14412_v60 = vadd.f32 1.0, %v10423_v20 }
 0x66b   :  { %v10425_v36 = vpop.eup %10424  ;;  %v4226_v12 = vadd.f32 %v4202_v18, %v18333_v21  ;;  %v9801_v0 = vmul.f32 -1.442695, %v4234_v23 }
 0x66c   :  { %v14415_v35 = vpop.eup %10426  ;;  %v14417_v61 = vadd.f32 1.0, %v10425_v36  ;;  %10430 = vrcp.f32 %v14412_v60  ;;  %v4057_v52 = vpop.f32.mrf.mxu2 }
 0x66d   :  { %v4301_v41 = vmul.f32 %v14415_v35, %v14405_v4  ;;  %v9799_v37 = vmul.f32 -1.442695, %v4226_v12  ;;  %10432 = vpow2.f32 %v9801_v0  ;;  %v4058_v47 = vadd.f32 %v4057_v52, %v4044_v58  ;;  %v18335_v0 = vld [vmem:[#allocation65_spill] sm:$0xff] }
 0x66e   :  { %v14422_v31 = vpop.eup %10428  ;;  %10434 = vrcp.f32 %v14417_v61  ;;  %v4085_v20 = vpop.f32.mrf.mxu0  ;;  %vm4306_vm14 = vweird.f32 %v14415_v35 }
 0x66f   :  { %v4271_v18 = vmul.f32 %v14422_v31, %v14407_v26  ;;  %v4302_v23 = vsub.f32 1.0, %v4301_v41  ;;  %10436 = vpow2.f32 %v9799_v37  ;;  %v4201_v36 = vrot.slane %v4058_v47, 7  ;;  %vm14476_vm2 = vmor %vm4305_vm12, %vm4306_vm14 }
 0x670   :  { %v4233_v11 = vadd.f32 %v4058_v47, %v18334_v17  ;;  %v4309_v20 = vand.u32 2147483647, %v14405_v4  ;;  %v4311_v37 = vand.u32 2147483648, %v14405_v4  ;;  %vm4276_vm15 = vweird.f32 %v14422_v31 }
 0x671   :  { %v4272_v58 = vsub.f32 1.0, %v4271_v18  ;;  %v4225_v52 = vadd.f32 %v4201_v36, %v18335_v0  ;;  %v4303_v40 = vmul.f32 %v14415_v35, %v4302_v23  ;;  %v4279_v18 = vand.u32 2147483647, %v14407_v26  ;;  %vm14489_vm4 = vmor %vm4275_vm13, %vm4276_vm15 }
 0x672   :  { %v14434_v63 = vpop.eup %10430  ;;  %v9800_v41 = vmul.f32 -1.442695, %v4233_v11  ;;  %v4281_v36 = vand.u32 2147483648, %v14407_v26  ;;  %vm14454_vm0 = vcmp.eq.f32.partialorder %v4309_v20, 8.507059e+37  ;;  %v4312_v15 = vor.u32 1.1754944e-38, %v4311_v37 }
 0x673   :  { %v10433_v21 = vpop.eup %10432  ;;  %v9798_v47 = vmul.f32 -1.442695, %v4225_v52  ;;  %v4273_v12 = vmul.f32 %v14422_v31, %v4272_v58  ;;  %v14450_v52 = vmul.f32 %v14434_v63, %v14412_v60  ;;  %v4304_v58 = vadd.f32 %v14415_v35, %v4303_v40 }
 0x674   :  { %v14442_v23 = vpop.eup %10434  ;;  %v14444_v17 = vadd.f32 1.0, %v10433_v21  ;;  %10438 = vpow2.f32 %v9800_v41  ;;  %v4059_v11 = vpop.f32.mrf.mxu2  ;;  %vm14467_vm1 = vcmp.eq.f32.partialorder %v4279_v18, 8.507059e+37  ;;  %v4282_v20 = vor.u32 1.1754944e-38, %v4281_v36 }
 0x675   :  { %v10437_v0 = vpop.eup %10436  ;;  %10440 = vpow2.f32 %v9798_v47  ;;  %v4256_v21 = vmul.f32 %v14442_v23, %v14417_v61  ;;  %v4274_v54 = vadd.f32 %v14422_v31, %v4273_v12  ;;  %vm4291_vm7 = vweird.f32 %v14434_v63 }
 0x676   :  { %v14460_v41 = vadd.f32 1.0, %v10437_v0  ;;  %10442 = vrcp.f32 %v14444_v17  ;;  %v4135_v11 = vpop.f32.mrf.mxu0  ;;  %vm4381_vm5 = vweird.f32 %v14444_v17  ;;  %vm4261_vm14 = vweird.f32 %v14442_v23 }
 0x677   :  { %v4136_v47 = vadd.f32 %v4135_v11, %v14402_v33  ;;  %v4387_v11 = vand.u32 2147483648, %v14444_v17  ;;  %v4257_v27 = vsub.f32 1.0, %v4256_v21  ;;  %v4287_v33 = vsub.f32 1.0, %v14450_v52 }
 0x678   :  { %v14464_v49 = vpop.f32.mrf.mxu1  ;;  %10444 = vrcp.f32 %v14460_v41  ;;  %v4278_v18 = vsel %vm14489_vm4, %v14422_v31, %v4274_v54  ;;  %v4357_v26 = vand.u32 2147483648, %v14460_v41  ;;  %v4355_v21 = vand.u32 2147483647, %v14460_v41 }
 0x679   :  { %v4204_v36 = vrot.slane %v4136_v47, 7  ;;  %v4236_v37 = vadd.f32 %v4136_v47, %v14069_v19  ;;  %v4308_v47 = vsel %vm14476_vm2, %v14415_v35, %v4304_v58  ;;  %v4385_v54 = vand.u32 2147483647, %v14444_v17 }
 0x67a   :  { %v10439_v12 = vpop.eup %10438  ;;  %vm4351_vm6 = vweird.f32 %v14460_v41  ;;  %v4388_v58 = vor.u32 1.1754944e-38, %v4387_v11  ;;  %vm14523_vm12 = vcmp.eq.f32.partialorder %v4355_v21, 8.507059e+37  ;;  %vm4290_vm15 = vweird.f32 %v14412_v60 }
 0x67b   :  { %v10441_v19 = vpop.eup %10440  ;;  %v14502_v3 = vadd.f32 1.0, %v10439_v12  ;;  %v4228_v14 = vadd.f32 %v4204_v36, %v18205_v5  ;;  %10446 = vtanh.f32 %v4236_v37  ;;  %v4313_v36 = vsel %vm14454_vm0, %v4312_v15, %v4308_v47 }
 0x67c   :  { %v10443_v53 = vpop.eup %10442  ;;  %v14506_v52 = vadd.f32 1.0, %v10441_v19  ;;  %v4109_v31 = vpop.f32.mrf.mxu2  ;;  %v4283_v19 = vsel %vm14467_vm1, %v4282_v20, %v4278_v18  ;;  %v4258_v37 = vmul.f32 %v14442_v23, %v4257_v27  ;;  %v4358_v5 = vor.u32 1.1754944e-38, %v4357_v26 }
 0x67d   :  { %v4377_v35 = vmul.f32 %v10443_v53, %v14444_v17  ;;  %10448 = vrcp.f32 %v14502_v3  ;;  %vm14527_vm13 = vcmp.eq.f32.partialorder %v4385_v54, 8.507059e+37  ;;  %v4110_v15 = vadd.f32 %v4109_v31, %v14398_v62 }
 0x67e   :  { %v14513_v0 = vpop.f32.mrf.mxu3  ;;  %v10445_v12 = vpop.eup %10444  ;;  %10450 = vrcp.f32 %v14506_v52  ;;  %vm4382_vm0 = vweird.f32 %v10443_v53  ;;  %vm4260_vm1 = vweird.f32 %v14417_v61  ;;  %v4372_v18 = vand.u32 2147483648, %v14502_v3 }
 0x67f   :  { %v4137_v4 = vpop.f32.mrf.mxu0  ;;  %v4347_v11 = vmul.f32 %v10445_v12, %v14460_v41  ;;  %v4378_v50 = vsub.f32 1.0, %v4377_v35  ;;  %10452 = vtanh.f32 %v4228_v14  ;;  %v4288_v14 = vmul.f32 %v14434_v63, %v4287_v33  ;;  %vm14541_vm4 = vmor %vm4381_vm5, %vm4382_vm0 }
 0x680   :  { %v4150_v48 = vpop.f32.mrf.mxu1  ;;  %v4203_v47 = vrot.slane %v4110_v15, 7  ;;  %v4259_v26 = vadd.f32 %v14442_v23, %v4258_v37  ;;  %vm4352_vm2 = vweird.f32 %v10445_v12  ;;  %v18350_v4 = vld [vmem:[#allocation91_spill] sm:$0xff]  ;;  %v4235_v24 = vadd.f32 %v4110_v15, %v18351_v6 }
 0x681   :  { %v10447_v27 = vpop.eup %10446  ;;  %v4348_v29 = vsub.f32 1.0, %v4347_v11  ;;  %v4379_v20 = vmul.f32 %v10443_v53, %v4378_v50  ;;  %v4342_v48 = vand.u32 2147483648, %v14506_v52  ;;  %v4340_v37 = vand.u32 2147483647, %v14506_v52  ;;  %vm4353_vm0 = vmor %vm4351_vm6, %vm4352_vm2 }
 0x682   :  { %v4490_v31 = vmul.f32 %v10447_v27, %v4313_v36  ;;  %v4227_v11 = vadd.f32 %v4203_v47, %v18350_v4  ;;  %v18352_v27 = vand.u32 2147483647, %v14417_v61  ;;  %v4289_v47 = vadd.f32 %v14434_v63, %v4288_v14  ;;  %vm14577_vm6 = vmor %vm4290_vm15, %vm4291_vm7 }
 0x683   :  { %v10449_v62 = vpop.eup %10448  ;;  %v4349_v21 = vmul.f32 %v10445_v12, %v4348_v29  ;;  %v4380_v54 = vadd.f32 %v10443_v53, %v4379_v20  ;;  %v18355_v50 = vrot.slane %v14208_v57, 7  ;;  %vm14587_vm2 = vmor %vm4260_vm1, %vm4261_vm14 }
 0x684   :  { %v10451_v35 = vpop.eup %10450  ;;  %v4362_v33 = vmul.f32 %v10449_v62, %v14502_v3  ;;  %v4111_v10 = vpop.f32.mrf.mxu2  ;;  %vm14554_vm5 = vcmp.eq.f32.partialorder %v18352_v27, 8.507059e+37  ;;  %vm4367_vm11 = vweird.f32 %v10449_v62  ;;  %10454 = vtanh.f32 %v4227_v11 }
 0x685   :  { %v10453_v29 = vpop.eup %10452  ;;  %v4332_v20 = vmul.f32 %v10451_v35, %v14506_v52  ;;  %v4350_v36 = vadd.f32 %v10445_v12, %v4349_v21  ;;  %v4384_v17 = vsel %vm14541_vm4, %v10443_v53, %v4380_v54  ;;  %v4370_v53 = vand.u32 2147483647, %v14502_v3 }
 0x686   :  { %v4176_v4 = vpop.f32.mrf.mxu3  ;;  %v4363_v10 = vsub.f32 1.0, %v4362_v33  ;;  %v4389_v15 = vsel %vm14527_vm13, %v4388_v58, %v4384_v17  ;;  %vm4337_vm4 = vweird.f32 %v10451_v35  ;;  %v18356_v33 = vrot.slane %v14206_v34, 7 }
 0x687   :  { %v4333_v21 = vsub.f32 1.0, %v4332_v20  ;;  %v4354_v54 = vsel %vm4353_vm0, %v10445_v12, %v4350_v36  ;;  %v4486_v27 = vmul.f32 %v18355_v50, %v4389_v15  ;;  %v4488_v4 = vmul.f32 %v10453_v29, %v4283_v19 }
 0x688   :  { %v4364_v6 = vmul.f32 %v10449_v62, %v4363_v10  ;;  %v4359_v14 = vsel %vm14523_vm12, %v4358_v5, %v4354_v54  ;;  %10456 = vtanh.f32 %v4235_v24  ;;  %vm4336_vm13 = vweird.f32 %v14506_v52 }
 0x689   :  { %v4334_v41 = vmul.f32 %v10451_v35, %v4333_v21  ;;  %v4484_v2 = vmul.f32 %v18356_v33, %v4359_v14  ;;  %v14571_v40 = vadd.f32 %v4490_v31, %v4486_v27  ;;  %vm4366_vm12 = vweird.f32 %v14502_v3  ;;  %vm4338_vm15 = vmor %vm4336_vm13, %vm4337_vm4 }
 0x68a   :  { %v18361_v34 = vand.u32 2147483648, %v14417_v61  ;;  %v4365_v9 = vadd.f32 %v10449_v62, %v4364_v6  ;;  %vm4368_vm7 = vmor %vm4366_vm12, %vm4367_vm11  ;;  %v4373_v12 = vor.u32 1.1754944e-38, %v4372_v18  ;;  %v4263_v3 = vsel %vm14587_vm2, %v14442_v23, %v4259_v26  ;;  %v10455_v29 = vpop.eup %10454 }
 0x68b   :  { %v14594_v24 = vadd.f32 %v4488_v4, %v4484_v2  ;;  %v4335_v52 = vadd.f32 %v10451_v35, %v4334_v41  ;;  %v4343_v19 = vor.u32 1.1754944e-38, %v4342_v48  ;;  %v4293_v31 = vsel %vm14577_vm6, %v14434_v63, %v4289_v47 }
 0x68c   :  { %v4267_v57 = vor.u32 1.1754944e-38, %v18361_v34  ;;  %v4369_v61 = vsel %vm4368_vm7, %v10449_v62, %v4365_v9  ;;  %vm4371_vm14 = vcmp.eq.f32.partialorder %v4370_v53, 8.507059e+37  ;;  %v18362_v6 = vand.u32 2147483648, %v14412_v60 }
 0x68d   :  { %v4339_v18 = vsel %vm4338_vm15, %v10451_v35, %v4335_v52  ;;  %vm4341_vm11 = vcmp.eq.f32.partialorder %v4340_v37, 8.507059e+37  ;;  %v4374_v2 = vsel %vm4371_vm14, %v4373_v12, %v4369_v61  ;;  %v18363_v26 = vand.u32 2147483647, %v14412_v60 }
 0x68e   :  { %v4297_v11 = vor.u32 1.1754944e-38, %v18362_v6  ;;  %v4268_v23 = vsel %vm14554_vm5, %v4267_v57, %v4263_v3  ;;  %v4344_v48 = vsel %vm4341_vm11, %v4343_v19, %v4339_v18  ;;  %v18364_v20 = vrot.slane %v14159_v56, 7  ;;  %v10457_v63 = vpop.eup %10456 }
 0x68f   :  { %vm4295_vm1 = vcmp.eq.f32.partialorder %v18363_v26, 8.507059e+37  ;;  %v18365_v17 = vrot.slane %v14152_v8, 7  ;;  %v4487_v10 = vmul.f32 %v10455_v29, %v4268_v23 }
 0x690   :  { %v4485_v36 = vmul.f32 %v18364_v20, %v4374_v2  ;;  %v4298_v62 = vsel %vm4295_vm1, %v4297_v11, %v4293_v31 }
 0x691   :  { %v4483_v47 = vmul.f32 %v18365_v17, %v4344_v48  ;;  %v4489_v35 = vmul.f32 %v10457_v63, %v4298_v62 }
 0x693   :  { %v14613_v37 = vadd.f32 %v4487_v10, %v4483_v47  ;;  %v14615_v15 = vadd.f32 %v4489_v35, %v4485_v36 }
 0x696   :  { %v4187_v45 = vpop.f32.mrf.mxu0 }
 0x697   :  { %v4188_v53 = vadd.f32 %v4187_v45, %v14513_v0 }
 0x699   :  { %v4206_v60 = vrot.slane %v4188_v53, 7  ;;  %v4238_v21 = vadd.f32 %v4188_v53, %v14225_v1 }
 0x69b   :  { %v4230_v56 = vadd.f32 %v4206_v60, %v13863_v38  ;;  %v9805_v54 = vmul.f32 -1.442695, %v4238_v21 }
 0x69c   :  { %v4161_v50 = vpop.f32.mrf.mxu2 }
 0x69d   :  { %v9803_v27 = vmul.f32 -1.442695, %v4230_v56  ;;  %10458 = vpow2.f32 %v9805_v54  ;;  %v4162_v8 = vadd.f32 %v4161_v50, %v14464_v49 }
 0x69e   :  { %v4189_v14 = vpop.f32.mrf.mxu0 }
 0x69f   :  { %10460 = vpow2.f32 %v9803_v27  ;;  %v4205_v4 = vrot.slane %v4162_v8, 7  ;;  %v4237_v41 = vadd.f32 %v4162_v8, %v14215_v13 }
 0x6a1   :  { %v4229_v33 = vadd.f32 %v4205_v4, %v13782_v43  ;;  %v9804_v58 = vmul.f32 -1.442695, %v4237_v41 }
 0x6a3   :  { %v10459_v0 = vpop.eup %10458  ;;  %v9802_v5 = vmul.f32 -1.442695, %v4229_v33  ;;  %10462 = vpow2.f32 %v9804_v58 }
 0x6a4   :  { %v4410_v34 = vadd.f32 1.0, %v10459_v0  ;;  %v4163_v57 = vpop.f32.mrf.mxu2 }
 0x6a5   :  { %v10461_v9 = vpop.eup %10460  ;;  %10464 = vpow2.f32 %v9802_v5 }
 0x6a6   :  { %v4408_v12 = vadd.f32 1.0, %v10461_v9  ;;  %10466 = vrcp.f32 %v4410_v34  ;;  %v4465_v2 = vand.u32 2147483647, %v4410_v34  ;;  %v4467_v29 = vand.u32 2147483648, %v4410_v34 }
 0x6a7   :  { %vm4461_vm0 = vweird.f32 %v4410_v34 }
 0x6a8   :  { %10468 = vrcp.f32 %v4408_v12  ;;  %v4435_v26 = vand.u32 2147483647, %v4408_v12  ;;  %v4437_v36 = vand.u32 2147483648, %v4408_v12  ;;  %vm4431_vm6 = vweird.f32 %v4408_v12 }
 0x6a9   :  { %v10463_v3 = vpop.eup %10462  ;;  %vm4466_vm12 = vcmp.eq.f32.partialorder %v4465_v2, 8.507059e+37  ;;  %v4468_v10 = vor.u32 1.1754944e-38, %v4467_v29 }
 0x6aa   :  { %v14623_v49 = vadd.f32 1.0, %v10463_v3  ;;  %vm4436_vm2 = vcmp.eq.f32.partialorder %v4435_v26, 8.507059e+37  ;;  %v4438_v56 = vor.u32 1.1754944e-38, %v4437_v36 }
 0x6ab   :  { %v10465_v52 = vpop.eup %10464 }
 0x6ac   :  { %v10467_v19 = vpop.eup %10466  ;;  %v14625_v31 = vadd.f32 1.0, %v10465_v52  ;;  %10470 = vrcp.f32 %v14623_v49  ;;  %v4450_v27 = vand.u32 2147483647, %v14623_v49  ;;  %v4452_v41 = vand.u32 2147483648, %v14623_v49 }
 0x6ad   :  { %v4457_v61 = vmul.f32 %v10467_v19, %v4410_v34  ;;  %vm4462_vm5 = vweird.f32 %v10467_v19  ;;  %vm4446_vm1 = vweird.f32 %v14623_v49 }
 0x6ae   :  { %v10469_v6 = vpop.eup %10468  ;;  %10472 = vrcp.f32 %v14625_v31  ;;  %vm4463_vm13 = vmor %vm4461_vm0, %vm4462_vm5  ;;  %v4422_v0 = vand.u32 2147483648, %v14625_v31  ;;  %v4420_v9 = vand.u32 2147483647, %v14625_v31  ;;  %vm4416_vm11 = vweird.f32 %v14625_v31 }
 0x6af   :  { %10474 = vtanh.f32 %v14571_v40  ;;  %v4427_v11 = vmul.f32 %v10469_v6, %v4408_v12  ;;  %v4458_v18 = vsub.f32 1.0, %v4457_v61  ;;  %vm4432_vm4 = vweird.f32 %v10469_v6 }
 0x6b0   :  { %10476 = vtanh.f32 %v14594_v24  ;;  %vm4433_vm7 = vmor %vm4431_vm6, %vm4432_vm4  ;;  %vm4451_vm4 = vcmp.eq.f32.partialorder %v4450_v27, 8.507059e+37  ;;  %vm4421_vm6 = vcmp.eq.f32.partialorder %v4420_v9, 8.507059e+37  ;;  %v18374_v9 = vld [vmem:[#allocation87_spill] sm:$0xff] }
 0x6b1   :  { %v4428_v23 = vsub.f32 1.0, %v4427_v11  ;;  %v4459_v48 = vmul.f32 %v10467_v19, %v4458_v18  ;;  %10478 = vtanh.f32 %v14613_v37  ;;  %v4423_v11 = vor.u32 1.1754944e-38, %v4422_v0  ;;  %v18370_v0 = vld [vmem:[#allocation83_spill] sm:$0xff] }
 0x6b2   :  { %v10471_v20 = vpop.eup %10470  ;;  %10480 = vtanh.f32 %v14615_v15 }
 0x6b3   :  { %v4429_v63 = vmul.f32 %v10469_v6, %v4428_v23  ;;  %v4460_v62 = vadd.f32 %v10467_v19, %v4459_v48  ;;  %v4442_v17 = vmul.f32 %v10471_v20, %v14623_v49  ;;  %vm4447_vm15 = vweird.f32 %v10471_v20 }
 0x6b4   :  { %v10473_v47 = vpop.eup %10472  ;;  %vm4448_vm5 = vmor %vm4446_vm1, %vm4447_vm15 }
 0x6b5   :  { %v10475_v35 = vpop.eup %10474  ;;  %v4430_v45 = vadd.f32 %v10469_v6, %v4429_v63  ;;  %v4464_v53 = vsel %vm4463_vm13, %v10467_v19, %v4460_v62  ;;  %v4412_v60 = vmul.f32 %v10473_v47, %v14625_v31  ;;  %v4443_v50 = vsub.f32 1.0, %v4442_v17 }
 0x6b6   :  { %v10477_v21 = vpop.eup %10476  ;;  %v4469_v54 = vsel %vm4466_vm12, %v4468_v10, %v4464_v53  ;;  %vm4417_vm14 = vweird.f32 %v10473_v47 }
 0x6b7   :  { %v4434_v8 = vsel %vm4433_vm7, %v10469_v6, %v4430_v45  ;;  %v4502_v14 = vmul.f32 %v10475_v35, %v4469_v54  ;;  %v4413_v4 = vsub.f32 1.0, %v4412_v60  ;;  %v10479_v33 = vpop.eup %10478  ;;  %v4444_v5 = vmul.f32 %v10471_v20, %v4443_v50  ;;  %vm4418_vm0 = vmor %vm4416_vm11, %vm4417_vm14 }
 0x6b8   :  { %v4439_v58 = vsel %vm4436_vm2, %v4438_v56, %v4434_v8  ;;  %v10481_v12 = vpop.eup %10480  ;;  %v4453_v6 = vor.u32 1.1754944e-38, %v4452_v41  ;;  %v18367_v41 = vld [vmem:[#allocation101_spill] sm:$0xff] }
 0x6b9   :  { %v4500_v34 = vmul.f32 %v10477_v21, %v4439_v58  ;;  %v4414_v57 = vmul.f32 %v10473_v47, %v4413_v4  ;;  %v4445_v3 = vadd.f32 %v10471_v20, %v4444_v5  ;;  %v4524_v19 = vpack.c.bf16 %v4502_v14, %v4502_v14  ;;  %v18369_v58 = vld [vmem:[#allocation81_spill] sm:$0xff]  ;;  %v18371_v5 = vld [vmem:[#allocation104_spill] sm:$0xff] }
 0x6ba   :  { %v4508_v26 = vrot.slane %v4502_v14, 6 }
 0x6bb   :  { %v4522_v52 = vpack.c.bf16 %v4500_v34, %v4500_v34  ;;  %v4415_v61 = vadd.f32 %v10473_v47, %v4414_v57  ;;  %v4449_v18 = vsel %vm4448_vm5, %v10471_v20, %v4445_v3  ;;  %v4507_v31 = vrot.slane %v4500_v34, 6  ;;  %v18372_v34 = vld [vmem:[#allocation116_spill] sm:$0xff]  ;;  %v18373_v57 = vld [vmem:[#allocation85_spill] sm:$0xff] }
 0x6bc   :  { %v4454_v23 = vsel %vm4451_vm4, %v4453_v6, %v4449_v18  ;;  %v4532_v63 = vunpack.c.l.b16 %v4524_v19  ;;  %v18376_v3 = vld [vmem:[#allocation120_spill] sm:$0xff]  ;;  %v18378_v19 = vld [vmem:[#allocation90_spill] sm:$0xff]  ;;  %v18380_v6 = vld [vmem:[#allocation123_spill] sm:$0xff] }
 0x6bd   :  { %v4530_v2 = vunpack.c.l.b16 %v4522_v52  ;;  %v4419_v29 = vsel %vm4418_vm0, %v10473_v47, %v4415_v61  ;;  %v4501_v36 = vmul.f32 %v10481_v12, %v4454_v23  ;;  %v18375_v12 = vld [vmem:[#allocation108_spill] sm:$0xff]  ;;  %v18379_v61 = vld [vmem:[#allocation111_spill] sm:$0xff]  ;;  %v18382_v18 = vld [vmem:[#allocation134_spill] sm:$0xff] }
 0x6be   :  { %v4424_v48 = vsel %vm4421_vm6, %v4423_v11, %v4419_v29  ;;  %v18377_v52 = vld [vmem:[#allocation88_spill] sm:$0xff]  ;;  %v18384_v29 = vld [vmem:[#allocation94_spill] sm:$0xff]  ;;  %v18385_v23 = vld [vmem:[#allocation103_spill] sm:$0xff] }
 0x6bf   :  { %v4535_v62 = vrot.slane %v4530_v2, 1  ;;  %v4499_v49 = vmul.f32 %v10479_v33, %v4424_v48  ;;  %v4510_v17 = vsel %vm3946_vm8, %v4501_v36, %v4508_v26  ;;  %v4523_v20 = vpack.c.bf16 %v4501_v36, %v4501_v36  ;;  %v18368_v33 = vld [vmem:[#allocation112_spill] sm:$0xff]  ;;  %v18387_v48 = vld [vmem:[#allocation95_spill] sm:$0xff]  ;;  %v18388_v36 = vld [vmem:[#allocation98_spill] sm:$0xff] }
 0x6c0   :  { %v18381_v11 = vld [vmem:[#allocation100_spill] sm:$0xff] }
 0x6c1   :  { %v4536_v10 = vsel %vm17996_vm3, %v4532_v63, %v4535_v62  ;;  %v4509_v35 = vsel %vm3946_vm8, %v4499_v49, %v4507_v31  ;;  %v4521_v45 = vpack.c.bf16 %v4499_v49, %v4499_v49  ;;  %v4531_v54 = vunpack.c.l.b16 %v4523_v20  ;;  %v18383_v2 = vld [vmem:[#allocation92_spill] sm:$0xff]  ;;  %v18389_v31 = vld [vmem:[#allocation113_spill] sm:$0xff]  ;;  %v18391_v62 = vld [vmem:[#allocation106_spill] sm:$0xff] }
 0x6c2   :  { %v14645_v53 = vpack.c.b16 %v4536_v10, %v4536_v10  ;;  %v4511_v47 = vrot.slane %v4509_v35, 1  ;;  %vm18366_vm8 = vcmask 1047559   ;;  %v18386_v26 = vld [vmem:[#allocation136_spill] sm:$0xff]  ;;  %v18390_v63 = vld [vmem:[#allocation125_spill] sm:$0xff]  ;;  %v18392_v49 = vld [vmem:[#allocation138_spill] sm:$0xff] }
 0x6c3   :  { %v4529_v60 = vunpack.c.l.b16 %v4521_v45  ;;  %v18394_v10 = vld [vmem:[#allocation128_spill] sm:$0xff]  ;;  %v18395_v35 = vld [vmem:[#allocation110_spill] sm:$0xff]  ;;  %v18397_v20 = vld [vmem:[#allocation121_spill] sm:$0xff] }
 0x6c4   :  { %v4514_v21 = vsel %vm17996_vm3, %v4510_v17, %v4511_v47  ;;  %4562 = vmatmul.bf16.vlgmr.msrb.gmra.mxu2 %v14645_v53  ;;  %4588 = vmatmul.bf16.vlgmr.msrb.gmra.mxu0 %v14645_v53  ;;  %v18396_v45 = vld [vmem:[#allocation140_spill] sm:$0xff]  ;;  %v18398_v47 = vld [vmem:[#allocation130_spill] sm:$0xff] }
 0x6c5   :  { %v4515_v56 = vsel %vm17995_vm9, %v4510_v17, %v4514_v21  ;;  %v4533_v50 = vrot.slane %v4529_v60, 1  ;;  %4658 = vmatpush.bf16.msrb.mxu2 %v18232_v32  ;;  %4684 = vmatpush.bf16.msrb.mxu0 %v18233_v22  ;;  %v18399_v60 = vld [vmem:[#allocation114_spill] sm:$0xff] }
 0x6c6   :  { %v4516_v27 = vsel %vm17992_vm10, %v4510_v17, %v4515_v56  ;;  %v18400_v21 = vld [vmem:[#allocation142_spill] sm:$0xff]  ;;  %v18401_v56 = vld [vmem:[#allocation124_spill] sm:$0xff] }
 0x6c7   :  { %v4517_v8 = vsel %vm18366_vm8, %v4510_v17, %v4516_v27  ;;  %v4534_v14 = vsel %vm17996_vm3, %v4531_v54, %v4533_v50  ;;  %v18393_v17 = vld [vmem:[#allocation117_spill] sm:$0xff]  ;;  %v18402_v54 = vld [vmem:[#allocation132_spill] sm:$0xff]  ;;  %v18403_v50 = vld [vmem:[#allocation118_spill] sm:$0xff] }
 0x6c8   :  { %4520 = vst [vmem:[#allocation2 + $0x4] sm:$0xf] %v4517_v8  ;;  %v14656_v4 = vpack.c.b16 %v4534_v14, %v4534_v14  ;;  %v18404_v27 = vld [vmem:[#allocation143_spill] sm:$0xff] }
 0x6c9   :  { %4659 = vmatpush.bf16.msrb.mxu2 %v18235_v16  ;;  %4685 = vmatpush.bf16.msrb.mxu0 %v18236_v44  ;;  %v18405_v8 = vld [vmem:[#allocation127_spill] sm:$0xff] }
 0x6ca   :  { %4549 = vmatmul.bf16.vlgmr.msra.gmra.mxu1 %v14656_v4  ;;  %4575 = vmatmul.bf16.vlgmr.msrb.gmra.mxu3 %v14656_v4  ;;  %v18406_v14 = vld [vmem:[#allocation135_spill] sm:$0xff] }
 0x6cb   :  { %4645 = vmatpush.bf16.msra.mxu1 %v18216_v39  ;;  %4671 = vmatpush.bf16.msrb.mxu3 %v18217_v30 }
 0x6cd   :  { %4660 = vmatpush.bf16.msrb.mxu2 %v18239_v28  ;;  %4686 = vmatpush.bf16.msrb.mxu0 %v18240_v42 }
 0x6cf   :  { %4646 = vmatpush.bf16.msra.mxu1 %v18218_v51  ;;  %4672 = vmatpush.bf16.msrb.mxu3 %v18219_v7 }
 0x6d1   :  { %4661 = vmatpush.bf16.msrb.mxu2 %v18243_v46  ;;  %4687 = vmatpush.bf16.msrb.mxu0 %v18244_v25 }
 0x6d3   :  { %4647 = vmatpush.bf16.msra.mxu1 %v18220_v59  ;;  %4673 = vmatpush.bf16.msrb.mxu3 %v18221_v55 }
 0x6d4   :  { %4614 = vmatmul.bf16.vlgmr.msra.gmra.mxu2 %v14645_v53  ;;  %4640 = vmatmul.bf16.vlgmr.msra.gmra.mxu0 %v14645_v53 }
 0x6d5   :  { %4662 = vmatpush.bf16.msrb.mxu2 %v18367_v41  ;;  %4688 = vmatpush.bf16.msrb.mxu0 %v18368_v33 }
 0x6d7   :  { %4648 = vmatpush.bf16.msra.mxu1 %v18369_v58  ;;  %4674 = vmatpush.bf16.msrb.mxu3 %v18370_v0 }
 0x6d9   :  { %4663 = vmatpush.bf16.msrb.mxu2 %v18371_v5  ;;  %4689 = vmatpush.bf16.msrb.mxu0 %v18372_v34 }
 0x6da   :  { %4601 = vmatmul.bf16.vlgmr.msrb.gmra.mxu1 %v14656_v4  ;;  %4627 = vmatmul.bf16.vlgmr.msra.gmra.mxu3 %v14656_v4 }
 0x6db   :  { %4649 = vmatpush.bf16.msra.mxu1 %v18373_v57  ;;  %4675 = vmatpush.bf16.msrb.mxu3 %v18374_v9 }
 0x6dd   :  { %4664 = vmatpush.bf16.msrb.mxu2 %v18375_v12  ;;  %4690 = vmatpush.bf16.msrb.mxu0 %v18376_v3 }
 0x6df   :  { %4650 = vmatpush.bf16.msra.mxu1 %v18377_v52  ;;  %4676 = vmatpush.bf16.msrb.mxu3 %v18378_v19 }
 0x6e1   :  { %4665 = vmatpush.bf16.msrb.mxu2 %v18379_v61  ;;  %4691 = vmatpush.bf16.msrb.mxu0 %v18380_v6 }
 0x6e3   :  { %4651 = vmatpush.bf16.msra.mxu1 %v18383_v2  ;;  %4677 = vmatpush.bf16.msrb.mxu3 %v18384_v29 }
 0x6e4   :  { %4666 = vmatmul.bf16.vlgmr.msrb.gmra.mxu2 %v14645_v53  ;;  %4692 = vmatmul.bf16.vlgmr.msrb.gmra.mxu0 %v14645_v53 }
 0x6e5   :  { %4710 = vmatpush.bf16.msra.mxu2 %v18381_v11  ;;  %4736 = vmatpush.bf16.msra.mxu0 %v18382_v18 }
 0x6e7   :  { %4652 = vmatpush.bf16.msra.mxu1 %v18387_v48  ;;  %4678 = vmatpush.bf16.msrb.mxu3 %v18388_v36 }
 0x6e9   :  { %4711 = vmatpush.bf16.msra.mxu2 %v18385_v23  ;;  %4737 = vmatpush.bf16.msra.mxu0 %v18386_v26 }
 0x6ea   :  { %4653 = vmatmul.bf16.vlgmr.msra.gmra.mxu1 %v14656_v4  ;;  %4679 = vmatmul.bf16.vlgmr.msrb.gmra.mxu3 %v14656_v4 }
 0x6eb   :  { %4697 = vmatpush.bf16.msrb.mxu1 %v18389_v31  ;;  %4723 = vmatpush.bf16.msra.mxu3 %v18390_v63 }
 0x6ed   :  { %4712 = vmatpush.bf16.msra.mxu2 %v18391_v62  ;;  %4738 = vmatpush.bf16.msra.mxu0 %v18392_v49  ;;  %v18409_v49 = vld [vmem:[#allocation129_spill] sm:$0xff] }
 0x6ee   :  { %v18412_v62 = vld [vmem:[#allocation145_spill] sm:$0xff] }
 0x6ef   :  { %4698 = vmatpush.bf16.msrb.mxu1 %v18393_v17  ;;  %4724 = vmatpush.bf16.msra.mxu3 %v18394_v10 }
 0x6f1   :  { %4713 = vmatpush.bf16.msra.mxu2 %v18395_v35  ;;  %4739 = vmatpush.bf16.msra.mxu0 %v18396_v45  ;;  %v18407_v45 = vld [vmem:[#allocation122_spill] sm:$0xff]  ;;  %v18408_v35 = vld [vmem:[#allocation144_spill] sm:$0xff] }
 0x6f3   :  { %4699 = vmatpush.bf16.msrb.mxu1 %v18397_v20  ;;  %4725 = vmatpush.bf16.msra.mxu3 %v18398_v47  ;;  %v18482_v20 = vld [vmem:[#allocation42_spill] sm:$0xff] }
 0x6f5   :  { %4714 = vmatpush.bf16.msra.mxu2 %v18399_v60  ;;  %4740 = vmatpush.bf16.msra.mxu0 %v18400_v21  ;;  %v18410_v60 = vld [vmem:[#allocation137_spill] sm:$0xff]  ;;  %v18411_v21 = vld [vmem:[#allocation126_spill] sm:$0xff] }
 0x6f7   :  { %4700 = vmatpush.bf16.msrb.mxu1 %v18401_v56  ;;  %4726 = vmatpush.bf16.msra.mxu3 %v18402_v54  ;;  %v18413_v54 = vld [vmem:[#allocation6_spill] sm:$0xff] }
 0x6f9   :  { %4715 = vmatpush.bf16.msra.mxu2 %v18403_v50  ;;  %4741 = vmatpush.bf16.msra.mxu0 %v18404_v27  ;;  %v18414_v50 = vld [vmem:[#allocation4_spill] sm:$0xff]  ;;  %v18415_v27 = vld [vmem:[#allocation131_spill] sm:$0xff] }
 0x6fb   :  { %4701 = vmatpush.bf16.msrb.mxu1 %v18405_v8  ;;  %4727 = vmatpush.bf16.msra.mxu3 %v18406_v14  ;;  %v18416_v8 = vld [vmem:[#allocation139_spill] sm:$0xff] }
 0x6fd   :  { %4716 = vmatpush.bf16.msra.mxu2 %v18407_v45  ;;  %4742 = vmatpush.bf16.msra.mxu0 %v18408_v35  ;;  %v18417_v35 = vld [vmem:[#allocation7_spill] sm:$0xff]  ;;  %v18418_v45 = vld [vmem:[#allocation5_spill] sm:$0xff] }
 0x6ff   :  { %4702 = vmatpush.bf16.msrb.mxu1 %v18409_v49  ;;  %4728 = vmatpush.bf16.msra.mxu3 %v18410_v60  ;;  %v18419_v60 = vld [vmem:[#allocation133_spill] sm:$0xff] }
 0x701   :  { %4717 = vmatpush.bf16.msra.mxu2 %v18411_v21  ;;  %4743 = vmatpush.bf16.msra.mxu0 %v18412_v62  ;;  %v18420_v21 = vld [vmem:[#allocation141_spill] sm:$0xff]  ;;  %v18421_v62 = vld [vmem:[#allocation10_spill] sm:$0xff] }
 0x703   :  { %4703 = vmatpush.bf16.msrb.mxu1 %v18415_v27  ;;  %4729 = vmatpush.bf16.msra.mxu3 %v18416_v8  ;;  %v18424_v8 = vld [vmem:[#allocation16_spill] sm:$0xff] }
 0x704   :  { %4718 = vmatmul.bf16.vlgmr.msra.gmra.mxu2 %v14645_v53  ;;  %4744 = vmatmul.bf16.vlgmr.msra.gmra.mxu0 %v14645_v53  ;;  %v18425_v53 = vld [vmem:[#allocation12_spill] sm:$0xff] }
 0x705   :  { %5126 = vmatpush.bf16.msrb.mxu2 %v18413_v54  ;;  %5152 = vmatpush.bf16.msrb.mxu0 %v18414_v50  ;;  %v18422_v54 = vld [vmem:[#allocation18_spill] sm:$0xff]  ;;  %v18423_v50 = vld [vmem:[#allocation8_spill] sm:$0xff] }
 0x706   :  { %v18432_v27 = vld [vmem:[#allocation24_spill] sm:$0xff] }
 0x707   :  { %4704 = vmatpush.bf16.msrb.mxu1 %v18419_v60  ;;  %4730 = vmatpush.bf16.msra.mxu3 %v18420_v21  ;;  %v18428_v60 = vld [vmem:[#allocation20_spill] sm:$0xff]  ;;  %v18429_v21 = vld [vmem:[#allocation14_spill] sm:$0xff] }
 0x709   :  { %5127 = vmatpush.bf16.msrb.mxu2 %v18417_v35  ;;  %5153 = vmatpush.bf16.msrb.mxu0 %v18418_v45  ;;  %v18426_v35 = vld [vmem:[#allocation23_spill] sm:$0xff]  ;;  %v18427_v45 = vld [vmem:[#allocation9_spill] sm:$0xff] }
 0x70a   :  { %4705 = vmatmul.bf16.vlgmr.msrb.gmra.mxu1 %v14656_v4  ;;  %4731 = vmatmul.bf16.vlgmr.msra.gmra.mxu3 %v14656_v4  ;;  %v18433_v4 = vld [vmem:[#allocation17_spill] sm:$0xff] }
 0x70b   :  { %5113 = vmatpush.bf16.msra.mxu1 %v18421_v62  ;;  %5139 = vmatpush.bf16.msrb.mxu3 %v18422_v54  ;;  %v18430_v62 = vld [vmem:[#allocation27_spill] sm:$0xff] }
 0x70c   :  { %v18431_v54 = vld [vmem:[#allocation11_spill] sm:$0xff] }
 0x70d   :  { %5128 = vmatpush.bf16.msrb.mxu2 %v18423_v50  ;;  %5154 = vmatpush.bf16.msrb.mxu0 %v18424_v8  ;;  %v18434_v50 = vld [vmem:[#allocation31_spill] sm:$0xff]  ;;  %v18435_v8 = vld [vmem:[#allocation13_spill] sm:$0xff] }
 0x70f   :  { %5114 = vmatpush.bf16.msra.mxu1 %v18425_v53  ;;  %5140 = vmatpush.bf16.msrb.mxu3 %v18426_v35  ;;  %v18436_v53 = vld [vmem:[#allocation28_spill] sm:$0xff]  ;;  %v18437_v35 = vld [vmem:[#allocation22_spill] sm:$0xff] }
 0x711   :  { %5129 = vmatpush.bf16.msrb.mxu2 %v18427_v45  ;;  %5155 = vmatpush.bf16.msrb.mxu0 %v18428_v60  ;;  %v18438_v45 = vld [vmem:[#allocation35_spill] sm:$0xff] }
 0x712   :  { %v18439_v60 = vld [vmem:[#allocation15_spill] sm:$0xff] }
 0x713   :  { %5115 = vmatpush.bf16.msra.mxu1 %v18429_v21  ;;  %5141 = vmatpush.bf16.msrb.mxu3 %v18430_v62  ;;  %v18440_v21 = vld [vmem:[#allocation32_spill] sm:$0xff]  ;;  %v18441_v62 = vld [vmem:[#allocation26_spill] sm:$0xff] }
 0x715   :  { %5130 = vmatpush.bf16.msrb.mxu2 %v18431_v54  ;;  %5156 = vmatpush.bf16.msrb.mxu0 %v18432_v27  ;;  %v18442_v54 = vld [vmem:[#allocation38_spill] sm:$0xff]  ;;  %v18443_v27 = vld [vmem:[#allocation19_spill] sm:$0xff] }
 0x717   :  { %5116 = vmatpush.bf16.msra.mxu1 %v18433_v4  ;;  %5142 = vmatpush.bf16.msrb.mxu3 %v18434_v50  ;;  %v18444_v4 = vld [vmem:[#allocation36_spill] sm:$0xff]  ;;  %v18445_v50 = vld [vmem:[#allocation30_spill] sm:$0xff] }
 0x719   :  { %5131 = vmatpush.bf16.msrb.mxu2 %v18435_v8  ;;  %5157 = vmatpush.bf16.msrb.mxu0 %v18436_v53  ;;  %v18446_v8 = vld [vmem:[#allocation41_spill] sm:$0xff]  ;;  %v18447_v53 = vld [vmem:[#allocation46_spill] sm:$0xff] }
 0x71b   :  { %5117 = vmatpush.bf16.msra.mxu1 %v18437_v35  ;;  %5143 = vmatpush.bf16.msrb.mxu3 %v18438_v45  ;;  %v18448_v35 = vld [vmem:[#allocation40_spill] sm:$0xff]  ;;  %v18449_v45 = vld [vmem:[#allocation34_spill] sm:$0xff] }
 0x71d   :  { %5132 = vmatpush.bf16.msrb.mxu2 %v18439_v60  ;;  %5158 = vmatpush.bf16.msrb.mxu0 %v18440_v21  ;;  %v18450_v60 = vld [vmem:[#allocation45_spill] sm:$0xff] }
 0x71e   :  { %v18451_v21 = vld [vmem:[#allocation21_spill] sm:$0xff] }
 0x71f   :  { %5118 = vmatpush.bf16.msra.mxu1 %v18441_v62  ;;  %5144 = vmatpush.bf16.msrb.mxu3 %v18442_v54  ;;  %v18452_v62 = vld [vmem:[#allocation60_spill] sm:$0xff]  ;;  %v18453_v54 = vld [vmem:[#allocation49_spill] sm:$0xff] }
 0x721   :  { %5133 = vmatpush.bf16.msrb.mxu2 %v18443_v27  ;;  %5159 = vmatpush.bf16.msrb.mxu0 %v18444_v4  ;;  %v18454_v27 = vld [vmem:[#allocation44_spill] sm:$0xff]  ;;  %v18455_v4 = vld [vmem:[#allocation25_spill] sm:$0xff] }
 0x723   :  { %5119 = vmatpush.bf16.msra.mxu1 %v18445_v50  ;;  %5145 = vmatpush.bf16.msrb.mxu3 %v18446_v8  ;;  %v18456_v50 = vld [vmem:[#allocation62_spill] sm:$0xff]  ;;  %v18457_v8 = vld [vmem:[#allocation53_spill] sm:$0xff] }
 0x725   :  { %5178 = vmatpush.bf16.msra.mxu2 %v18447_v53  ;;  %5204 = vmatpush.bf16.msra.mxu0 %v18448_v35  ;;  %v18458_v53 = vld [vmem:[#allocation48_spill] sm:$0xff]  ;;  %v18459_v35 = vld [vmem:[#allocation29_spill] sm:$0xff] }
 0x727   :  { %5120 = vmatpush.bf16.msra.mxu1 %v18449_v45  ;;  %5146 = vmatpush.bf16.msrb.mxu3 %v18450_v60  ;;  %v18460_v45 = vld [vmem:[#allocation67_spill] sm:$0xff]  ;;  %v18461_v60 = vld [vmem:[#allocation57_spill] sm:$0xff] }
 0x729   :  { %5179 = vmatpush.bf16.msra.mxu2 %v18453_v54  ;;  %5205 = vmatpush.bf16.msra.mxu0 %v18454_v27  ;;  %v18464_v54 = vld [vmem:[#allocation70_spill] sm:$0xff]  ;;  %v18465_v27 = vld [vmem:[#allocation59_spill] sm:$0xff] }
 0x72b   :  { %5165 = vmatpush.bf16.msrb.mxu1 %v18451_v21  ;;  %5191 = vmatpush.bf16.msra.mxu3 %v18452_v62  ;;  %v18462_v21 = vld [vmem:[#allocation52_spill] sm:$0xff]  ;;  %v18463_v62 = vld [vmem:[#allocation33_spill] sm:$0xff] }
 0x72d   :  { %5180 = vmatpush.bf16.msra.mxu2 %v18457_v8  ;;  %5206 = vmatpush.bf16.msra.mxu0 %v18458_v53  ;;  %v18468_v8 = vld [vmem:[#allocation73_spill] sm:$0xff] }
 0x72e   :  { %v18469_v53 = vld [vmem:[#allocation61_spill] sm:$0xff] }
 0x72f   :  { %5166 = vmatpush.bf16.msrb.mxu1 %v18455_v4  ;;  %5192 = vmatpush.bf16.msra.mxu3 %v18456_v50  ;;  %v18466_v4 = vld [vmem:[#allocation54_spill] sm:$0xff]  ;;  %v18467_v50 = vld [vmem:[#allocation37_spill] sm:$0xff] }
 0x731   :  { %5181 = vmatpush.bf16.msra.mxu2 %v18461_v60  ;;  %5207 = vmatpush.bf16.msra.mxu0 %v18462_v21  ;;  %v18472_v60 = vld [vmem:[#allocation76_spill] sm:$0xff]  ;;  %v18473_v21 = vld [vmem:[#allocation66_spill] sm:$0xff] }
 0x733   :  { %5167 = vmatpush.bf16.msrb.mxu1 %v18459_v35  ;;  %5193 = vmatpush.bf16.msra.mxu3 %v18460_v45  ;;  %v18470_v35 = vld [vmem:[#allocation58_spill] sm:$0xff]  ;;  %v18471_v45 = vld [vmem:[#allocation39_spill] sm:$0xff] }
 0x735   :  { %5182 = vmatpush.bf16.msra.mxu2 %v18465_v27  ;;  %5208 = vmatpush.bf16.msra.mxu0 %v18466_v4  ;;  %v18476_v27 = vld [vmem:[#allocation80_spill] sm:$0xff]  ;;  %v18477_v4 = vld [vmem:[#allocation69_spill] sm:$0xff] }
 0x737   :  { %5168 = vmatpush.bf16.msrb.mxu1 %v18463_v62  ;;  %5194 = vmatpush.bf16.msra.mxu3 %v18464_v54  ;;  %v18474_v62 = vld [vmem:[#allocation63_spill] sm:$0xff] }
 0x738   :  { %v18475_v54 = vld [vmem:[#allocation43_spill] sm:$0xff] }
 0x739   :  { %5183 = vmatpush.bf16.msra.mxu2 %v18469_v53  ;;  %5209 = vmatpush.bf16.msra.mxu0 %v18470_v35  ;;  %v18480_v53 = vld [vmem:[#allocation84_spill] sm:$0xff] }
 0x73b   :  { %5169 = vmatpush.bf16.msrb.mxu1 %v18467_v50  ;;  %5195 = vmatpush.bf16.msra.mxu3 %v18468_v8  ;;  %v18478_v50 = vld [vmem:[#allocation68_spill] sm:$0xff]  ;;  %v18479_v8 = vld [vmem:[#allocation47_spill] sm:$0xff] }
 0x73d   :  { %5184 = vmatpush.bf16.msra.mxu2 %v18473_v21  ;;  %5210 = vmatpush.bf16.msra.mxu0 %v18474_v62 }
 0x73f   :  { %5170 = vmatpush.bf16.msrb.mxu1 %v18471_v45  ;;  %5196 = vmatpush.bf16.msra.mxu3 %v18472_v60 }
 0x741   :  { %5185 = vmatpush.bf16.msra.mxu2 %v18477_v4  ;;  %5211 = vmatpush.bf16.msra.mxu0 %v18478_v50  ;;  %v4589_v35 = vpop.f32.mrf.mxu0 }
 0x743   :  { %5171 = vmatpush.bf16.msrb.mxu1 %v18475_v54  ;;  %5197 = vmatpush.bf16.msra.mxu3 %v18476_v27  ;;  %v18481_v27 = vld [vmem:[#allocation50_spill] sm:$0xff] }
 0x747   :  { %5172 = vmatpush.bf16.msrb.mxu1 %v18479_v8  ;;  %5198 = vmatpush.bf16.msra.mxu3 %v18480_v53  ;;  %v4550_v45 = vpop.f32.mrf.mxu1  ;;  %v4563_v49 = vpop.f32.mrf.mxu2 }
 0x748   :  { %v4564_v14 = vadd.f32 %v4563_v49, %v4550_v45 }
 0x749   :  { %v4591_v60 = vpop.f32.mrf.mxu0 }
 0x74a   :  { %v4757_v56 = vrot.slane %v4564_v14, 6  ;;  %v4765_v23 = vrot.slane %v4564_v14, 7 }
 0x74c   :  { %v4789_v47 = vadd.f32 %v4757_v56, %v18481_v27  ;;  %v4797_v50 = vadd.f32 %v4765_v23, %v18482_v20  ;;  %v18485_v20 = vld [vmem:[#allocation65_spill] sm:$0xff] }
 0x74d   :  { %v4576_v21 = vpop.f32.mrf.mxu3 }
 0x74e   :  { %v4590_v18 = vadd.f32 %v4589_v35, %v4576_v21  ;;  %v9806_v8 = vmul.f32 -1.442695, %v4789_v47  ;;  %v9808_v10 = vmul.f32 -1.442695, %v4797_v50 }
 0x74f   :  { %v4552_v62 = vpop.f32.mrf.mxu1  ;;  %v4565_v26 = vpop.f32.mrf.mxu2 }
 0x750   :  { %v4758_v60 = vrot.slane %v4590_v18, 6  ;;  %10482 = vpow2.f32 %v9806_v8  ;;  %v4766_v49 = vrot.slane %v4590_v18, 7  ;;  %v18483_v26 = vld [vmem:[#allocation51_spill] sm:$0xff]  ;;  %v18486_v18 = vld [vmem:[#allocation146_spill] sm:$0xff] }
 0x751   :  { %v4641_v54 = vpop.f32.mrf.mxu0  ;;  %10484 = vpow2.f32 %v9808_v10 }
 0x752   :  { %v4790_v14 = vadd.f32 %v4758_v60, %v18483_v26 }
 0x754   :  { %v9807_v8 = vmul.f32 -1.442695, %v4790_v14 }
 0x755   :  { %v4578_v4 = vpop.f32.mrf.mxu3 }
 0x756   :  { %v18484_v4 = vld [vmem:[#allocation82_spill] sm:$0xff]  ;;  %v10483_v21 = vpop.eup %10482  ;;  %10486 = vpow2.f32 %v9807_v8 }
 0x757   :  { %v4602_v11 = vpop.f32.mrf.mxu1  ;;  %v4615_v53 = vpop.f32.mrf.mxu2  ;;  %v4798_v27 = vadd.f32 %v4766_v49, %v18484_v4  ;;  %v14806_v12 = vadd.f32 1.0, %v10483_v21  ;;  %v18488_v49 = vld [vmem:[#allocation56_spill] sm:$0xff] }
 0x758   :  { %v4616_v6 = vadd.f32 %v4615_v53, %v4602_v11  ;;  %v10485_v10 = vpop.eup %10484 }
 0x759   :  { %v4643_v61 = vpop.f32.mrf.mxu0  ;;  %v9809_v3 = vmul.f32 -1.442695, %v4798_v27  ;;  %v14810_v4 = vadd.f32 1.0, %v10485_v10  ;;  %vm4826_vm13 = vweird.f32 %v14806_v12 }
 0x75a   :  { %v4759_v45 = vrot.slane %v4616_v6, 6  ;;  %v4767_v17 = vrot.slane %v4616_v6, 7  ;;  %v18487_v6 = vld [vmem:[#allocation78_spill] sm:$0xff] }
 0x75b   :  { %10488 = vpow2.f32 %v9809_v3  ;;  %vm4856_vm6 = vweird.f32 %v14810_v4 }
 0x75c   :  { %v4791_v11 = vadd.f32 %v4759_v45, %v18485_v20  ;;  %v4799_v53 = vadd.f32 %v4767_v17, %v18486_v18  ;;  %10490 = vrcp.f32 %v14806_v12  ;;  %v4862_v20 = vand.u32 2147483648, %v14810_v4 }
 0x75d   :  { %v4628_v62 = vpop.f32.mrf.mxu3 }
 0x75e   :  { %v4642_v56 = vadd.f32 %v4641_v54, %v4628_v62  ;;  %v9810_v60 = vmul.f32 -1.442695, %v4791_v11 }
 0x75f   :  { %v4604_v23 = vpop.f32.mrf.mxu1  ;;  %v4617_v35 = vpop.f32.mrf.mxu2 }
 0x760   :  { %v4760_v47 = vrot.slane %v4642_v56, 6  ;;  %v4768_v61 = vrot.slane %v4642_v56, 7  ;;  %v9812_v35 = vmul.f32 -1.442695, %v4799_v53  ;;  %10492 = vpow2.f32 %v9810_v60 }
 0x761   :  { %v14803_v50 = vpop.f32.mrf.mxu0 }
 0x762   :  { %v4792_v54 = vadd.f32 %v4760_v47, %v18487_v6  ;;  %v4800_v62 = vadd.f32 %v4768_v61, %v18488_v49  ;;  %10494 = vpow2.f32 %v9812_v35  ;;  %v10487_v47 = vpop.eup %10486 }
 0x763   :  { %10496 = vrcp.f32 %v14810_v4  ;;  %v10489_v21 = vpop.eup %10488  ;;  %v14818_v10 = vadd.f32 1.0, %v10487_v47 }
 0x764   :  { %v9811_v14 = vmul.f32 -1.442695, %v4792_v54  ;;  %v9813_v27 = vmul.f32 -1.442695, %v4800_v62  ;;  %v14814_v11 = vpop.eup %10490  ;;  %v14822_v62 = vadd.f32 1.0, %v10489_v21 }
 0x765   :  { %v4630_v23 = vpop.f32.mrf.mxu3  ;;  %v4847_v48 = vand.u32 2147483648, %v14818_v10  ;;  %vm4827_vm12 = vweird.f32 %v14814_v11 }
 0x766   :  { %10498 = vpow2.f32 %v9811_v14  ;;  %v10493_v3 = vpop.eup %10492  ;;  %vm14896_vm2 = vmor %vm4826_vm13, %vm4827_vm12 }
 0x767   :  { %v4667_v45 = vpop.f32.mrf.mxu2  ;;  %v4654_v17 = vpop.f32.mrf.mxu1  ;;  %10500 = vpow2.f32 %v9813_v27  ;;  %v14824_v35 = vadd.f32 1.0, %v10493_v3  ;;  %v4822_v27 = vmul.f32 %v14814_v11, %v14806_v12  ;;  %v14889_v33 = vor.u32 1.1754944e-38, %v4847_v48 }
 0x768   :  { %v10495_v53 = vpop.eup %10494  ;;  %10502 = vrcp.f32 %v14818_v10  ;;  %v4668_v31 = vadd.f32 %v4667_v45, %v4654_v17 }
 0x769   :  { %v4695_v56 = vpop.f32.mrf.mxu0  ;;  %v14820_v60 = vpop.eup %10496  ;;  %10504 = vrcp.f32 %v14822_v62  ;;  %vm4902_vm7 = vweird.f32 %v14824_v35 }
 0x76a   :  { %v14828_v56 = vadd.f32 1.0, %v10495_v53  ;;  %10506 = vrcp.f32 %v14824_v35  ;;  %v4761_v2 = vrot.slane %v4668_v31, 6  ;;  %v4769_v19 = vrot.slane %v4668_v31, 7 }
 0x76b   :  { %vm4857_vm5 = vweird.f32 %v14820_v60 }
 0x76c   :  { %v10499_v23 = vpop.eup %10498  ;;  %10508 = vrcp.f32 %v14828_v56  ;;  %v4938_v29 = vand.u32 2147483648, %v14828_v56  ;;  %vm4932_vm15 = vweird.f32 %v14828_v56  ;;  %v4936_v16 = vand.u32 2147483647, %v14828_v56 }
 0x76d   :  { %v14816_v61 = vpop.f32.mrf.mxu3  ;;  %v10501_v14 = vpop.eup %10500  ;;  %v14832_v47 = vadd.f32 1.0, %v10499_v23  ;;  %v4832_v23 = vand.u32 2147483648, %v14806_v12 }
 0x76e   :  { %v14837_v21 = vadd.f32 1.0, %v10501_v14  ;;  %v14841_v53 = vpop.eup %10502  ;;  %v4694_v58 = vadd.f32 %v14803_v50, %v14816_v61  ;;  %vm14946_vm8 = vcmp.eq.f32.partialorder %v4936_v16, 8.507059e+37 }
 0x76f   :  { %v4669_v8 = vpop.f32.mrf.mxu2  ;;  %v4656_v54 = vpop.f32.mrf.mxu1  ;;  %10510 = vrcp.f32 %v14832_v47  ;;  %v4837_v45 = vmul.f32 %v14841_v53, %v14818_v10  ;;  %vm4917_vm14 = vweird.f32 %v14832_v47  ;;  %vm4842_vm4 = vweird.f32 %v14841_v53 }
 0x770   :  { %v4852_v8 = vmul.f32 %v14820_v60, %v14810_v4  ;;  %v4823_v54 = vsub.f32 1.0, %v4822_v27  ;;  %10512 = vrcp.f32 %v14837_v21  ;;  %v14846_v49 = vpop.eup %10504  ;;  %v4908_v27 = vand.u32 2147483648, %v14824_v35 }
 0x771   :  { %v14849_v6 = vpop.eup %10506  ;;  %v14874_v17 = vmul.f32 %v14846_v49, %v14822_v62  ;;  %v4838_v46 = vsub.f32 1.0, %v4837_v45  ;;  %v14915_v45 = vor.u32 1.1754944e-38, %v4938_v29  ;;  %vm4947_vm1 = vweird.f32 %v14837_v21 }
 0x772   :  { %v4853_v18 = vsub.f32 1.0, %v4852_v8  ;;  %v4824_v14 = vmul.f32 %v14814_v11, %v4823_v54  ;;  %v14855_v63 = vpop.eup %10508  ;;  %v14860_v54 = vor.u32 1.1754944e-38, %v4832_v23  ;;  %v14911_v57 = vor.u32 1.1754944e-38, %v4908_v27 }
 0x773   :  { %v4928_v36 = vmul.f32 %v14855_v63, %v14828_v56  ;;  %v4868_v48 = vsub.f32 1.0, %v14874_v17  ;;  %v18491_v17 = vld [vmem:[#allocation91_spill] sm:$0xff]  ;;  %v4923_v27 = vand.u32 2147483648, %v14832_v47  ;;  %v14925_v29 = vmul.f32 %v14841_v53, %v4838_v46 }
 0x774   :  { %v4854_v34 = vmul.f32 %v14820_v60, %v4853_v18  ;;  %v14877_v23 = vadd.f32 %v14814_v11, %v4824_v14  ;;  %v4793_v5 = vadd.f32 %v4761_v2, %v18491_v17  ;;  %vm4903_vm11 = vweird.f32 %v14849_v6 }
 0x775   :  { %v4682_v3 = vpop.f32.mrf.mxu3  ;;  %v14868_v8 = vpop.eup %10510  ;;  %v4929_v42 = vsub.f32 1.0, %v4928_v36  ;;  %v18492_v36 = vld [vmem:[#allocation55_spill] sm:$0xff]  ;;  %vm4933_vm12 = vweird.f32 %v14855_v63  ;;  %vm14963_vm3 = vmor %vm4902_vm7, %vm4903_vm11 }
 0x776   :  { %v14864_v3 = vor.u32 1.1754944e-38, %v4862_v20  ;;  %v14880_v18 = vpop.eup %10512  ;;  %v4898_v20 = vmul.f32 %v14849_v6, %v14824_v35  ;;  %v4913_v41 = vmul.f32 %v14868_v8, %v14832_v47  ;;  %v14901_v25 = vadd.f32 %v14820_v60, %v4854_v34  ;;  %vm14980_vm7 = vmor %vm4932_vm15, %vm4933_vm12 }
 0x777   :  { %v4943_v14 = vmul.f32 %v14880_v18, %v14837_v21  ;;  %v4906_v34 = vand.u32 2147483647, %v14824_v35  ;;  %v4801_v31 = vadd.f32 %v4769_v19, %v18492_v36  ;;  %10514 = vtanh.f32 %v4793_v5 }
 0x778   :  { %v4899_v9 = vsub.f32 1.0, %v4898_v20  ;;  %v4914_v20 = vsub.f32 1.0, %v4913_v41  ;;  %v4953_v41 = vand.u32 2147483648, %v14837_v21  ;;  %v4770_v19 = vrot.slane %v4694_v58, 7 }
 0x779   :  { %v4944_v59 = vsub.f32 1.0, %v4943_v14  ;;  %vm14939_vm0 = vcmp.eq.f32.partialorder %v4906_v34, 8.507059e+37  ;;  %vm4918_vm13 = vweird.f32 %v14868_v8  ;;  %vm4948_vm11 = vweird.f32 %v14880_v18 }
 0x77a   :  { %v4900_v17 = vmul.f32 %v14849_v6, %v4899_v9  ;;  %v14937_v9 = vor.u32 1.1754944e-38, %v4923_v27  ;;  %vm15011_vm12 = vmor %vm4917_vm14, %vm4918_vm13 }
 0x77b   :  { %v4945_v61 = vmul.f32 %v14880_v18, %v4944_v59  ;;  %v4869_v59 = vmul.f32 %v14846_v49, %v4868_v48  ;;  %v18500_v48 = vand.u32 2147483647, %v14806_v12  ;;  %v18506_v12 = vand.u32 2147483647, %v14810_v4  ;;  %vm15040_vm14 = vmor %vm4856_vm6, %vm4857_vm5 }
 0x77c   :  { %vm18518_vm5 = vweird.f32 %v14818_v10 }
 0x77d   :  { %vm14970_vm10 = vcmp.eq.f32.partialorder %v18500_v48, 8.507059e+37  ;;  %vm14987_vm9 = vcmp.eq.f32.partialorder %v18506_v12, 8.507059e+37 }
 0x781   :  { %v14866_v26 = vpop.f32.mrf.mxu0 }
 0x787   :  { %v4706_v28 = vpop.f32.mrf.mxu1  ;;  %v4719_v0 = vpop.f32.mrf.mxu2 }
 0x788   :  { %v4720_v44 = vadd.f32 %v4719_v0, %v4706_v28  ;;  %v4930_v28 = vmul.f32 %v14855_v63, %v4929_v42 }
 0x789   :  { %v4747_v55 = vpop.f32.mrf.mxu0 }
 0x78a   :  { %v4763_v22 = vrot.slane %v4720_v44, 6  ;;  %v4771_v2 = vrot.slane %v4720_v44, 7  ;;  %v4762_v55 = vrot.slane %v4694_v58, 6  ;;  %v4915_v44 = vmul.f32 %v14868_v8, %v4914_v20 }
 0x78b   :  { %v4901_v58 = vadd.f32 %v14849_v6, %v4900_v17  ;;  %v4931_v5 = vadd.f32 %v14855_v63, %v4930_v28  ;;  %v18503_v28 = vld [vmem:[#allocation64_spill] sm:$0xff] }
 0x78c   :  { %v4795_v46 = vadd.f32 %v4763_v22, %v13782_v43  ;;  %v4803_v0 = vadd.f32 %v4771_v2, %v14215_v13  ;;  %v18497_v2 = vld [vmem:[#allocation107_spill] sm:$0xff] }
 0x78d   :  { %v4732_v50 = vpop.f32.mrf.mxu3  ;;  %v4794_v13 = vadd.f32 %v4762_v55, %v18497_v2  ;;  %v4802_v55 = vadd.f32 %v4770_v19, %v18503_v28  ;;  %v4946_v19 = vadd.f32 %v14880_v18, %v4945_v61  ;;  %v4905_v56 = vsel %vm14963_vm3, %v14849_v6, %v4901_v58  ;;  %vm15020_vm3 = vmor %vm4947_vm1, %vm4948_vm11 }
 0x78e   :  { %v9814_v14 = vmul.f32 -1.442695, %v4795_v46  ;;  %v9816_v34 = vmul.f32 -1.442695, %v4803_v0  ;;  %v4746_v20 = vadd.f32 %v14866_v26, %v4732_v50  ;;  %v4916_v50 = vadd.f32 %v14868_v8, %v4915_v44 }
 0x78f   :  { %v4708_v16 = vpop.f32.mrf.mxu1  ;;  %v4721_v27 = vpop.f32.mrf.mxu2  ;;  %v4921_v61 = vand.u32 2147483647, %v14832_v47  ;;  %v4951_v6 = vand.u32 2147483647, %v14837_v21  ;;  %v4840_v47 = vadd.f32 %v14841_v53, %v14925_v29  ;;  %v4910_v35 = vsel %vm14939_vm0, %v14911_v57, %v4905_v56  ;;  %vm15057_vm0 = vmor %vm18518_vm5, %vm4842_vm4 }
 0x790   :  { %10516 = vpow2.f32 %v9814_v14  ;;  %v4764_v46 = vrot.slane %v4746_v20, 6  ;;  %v4772_v0 = vrot.slane %v4746_v20, 7  ;;  %v10515_v20 = vpop.eup %10514  ;;  %v4935_v16 = vsel %vm14980_vm7, %v14855_v63, %v4931_v5 }
 0x791   :  { %10518 = vpow2.f32 %v9816_v34  ;;  %v18509_v27 = vand.u32 2147483647, %v14818_v10  ;;  %v4954_v5 = vor.u32 1.1754944e-38, %v4953_v41  ;;  %v4870_v21 = vadd.f32 %v14846_v49, %v4869_v59 }
 0x792   :  { %v4796_v44 = vadd.f32 %v4764_v46, %v13863_v38  ;;  %v4804_v34 = vadd.f32 %v4772_v0, %v14225_v1  ;;  %10520 = vtanh.f32 %v4801_v31  ;;  %v4920_v0 = vsel %vm15011_vm12, %v14868_v8, %v4916_v50 }
 0x793   :  { %vm15002_vm15 = vcmp.eq.f32.partialorder %v18509_v27, 8.507059e+37  ;;  %10522 = vtanh.f32 %v4794_v13  ;;  %v4950_v41 = vsel %vm15020_vm3, %v14880_v18, %v4946_v19  ;;  %v4940_v57 = vsel %vm14946_vm8, %v14915_v45, %v4935_v16 }
 0x794   :  { %v9815_v63 = vmul.f32 -1.442695, %v4796_v44  ;;  %v9817_v31 = vmul.f32 -1.442695, %v4804_v34  ;;  %10524 = vtanh.f32 %v4802_v55  ;;  %vm4922_vm1 = vcmp.eq.f32.partialorder %v4921_v61, 8.507059e+37 }
 0x795   :  { %v4734_v13 = vpop.f32.mrf.mxu3  ;;  %v4859_v18 = vsel %vm15040_vm14, %v14820_v60, %v14901_v25  ;;  %v4925_v42 = vsel %vm4922_vm1, %v14937_v9, %v4920_v0  ;;  %vm4952_vm6 = vcmp.eq.f32.partialorder %v4951_v6, 8.507059e+37  ;;  %v18521_v59 = vrot.slane %v14613_v37, 7 }
 0x796   :  { %v10517_v26 = vpop.eup %10516  ;;  %10526 = vpow2.f32 %v9815_v63  ;;  %v4844_v25 = vsel %vm15057_vm0, %v14841_v53, %v4840_v47  ;;  %vm18522_vm8 = vweird.f32 %v14846_v49  ;;  %vm18523_vm4 = vweird.f32 %v14822_v62 }
 0x797   :  { %v10519_v12 = vpop.eup %10518  ;;  %v15047_v29 = vadd.f32 1.0, %v10517_v26  ;;  %10528 = vpow2.f32 %v9817_v31  ;;  %v5049_v55 = vmul.f32 %v18521_v59, %v4910_v35  ;;  %vm15073_vm13 = vmor %vm18523_vm4, %vm18522_vm8  ;;  %v4955_v60 = vsel %vm4952_vm6, %v4954_v5, %v4950_v41 }
 0x798   :  { %v15062_v45 = vadd.f32 1.0, %v10519_v12  ;;  %v10521_v22 = vpop.eup %10520  ;;  %v18526_v37 = vsel %vm14896_vm2, %v14814_v11, %v14877_v23  ;;  %v18527_v50 = vrot.slane %v14615_v15, 7  ;;  %v4874_v44 = vsel %vm15073_vm13, %v14846_v49, %v4870_v21 }
 0x799   :  { %10530 = vrcp.f32 %v15047_v29  ;;  %v10523_v9 = vpop.eup %10522  ;;  %v4834_v53 = vsel %vm14970_vm10, %v14860_v54, %v18526_v37  ;;  %v4864_v52 = vsel %vm14987_vm9, %v14864_v3, %v4859_v18  ;;  %v18528_v11 = vand.u32 2147483648, %v14822_v62 }
 0x79a   :  { %v5051_v19 = vmul.f32 %v18527_v50, %v4940_v57  ;;  %10532 = vrcp.f32 %v15062_v45  ;;  %v10525_v34 = vpop.eup %10524  ;;  %v5053_v56 = vmul.f32 %v10515_v20, %v4834_v53  ;;  %v18529_v54 = vrot.slane %v14594_v24, 7 }
 0x79b   :  { %v4878_v23 = vor.u32 1.1754944e-38, %v18528_v11  ;;  %v5055_v16 = vmul.f32 %v10521_v22, %v4864_v52  ;;  %v4849_v49 = vsel %vm15002_vm15, %v14889_v33, %v4844_v25  ;;  %v18530_v27 = vand.u32 2147483647, %v14822_v62 }
 0x79c   :  { %v5050_v17 = vmul.f32 %v18529_v54, %v4925_v42  ;;  %v10527_v15 = vpop.eup %10526  ;;  %v18531_v61 = vrot.slane %v14571_v40, 7  ;;  %v15106_v20 = vadd.f32 %v5053_v56, %v5049_v55  ;;  %v5054_v6 = vmul.f32 %v10523_v9, %v4849_v49 }
 0x79d   :  { %vm4876_vm10 = vcmp.eq.f32.partialorder %v18530_v27, 8.507059e+37  ;;  %v10529_v3 = vpop.eup %10528  ;;  %v15108_v63 = vadd.f32 1.0, %v10527_v15  ;;  %v15110_v24 = vadd.f32 %v5055_v16, %v5051_v19  ;;  %v4986_v13 = vand.u32 2147483647, %v15047_v29 }
 0x79e   :  { %v5052_v14 = vmul.f32 %v18531_v61, %v4955_v60  ;;  %v4879_v46 = vsel %vm4876_vm10, %v4878_v23, %v4874_v44  ;;  %v15112_v58 = vadd.f32 1.0, %v10529_v3  ;;  %v15114_v33 = vadd.f32 %v5054_v6, %v5050_v17 }
 0x79f   :  { %v5056_v31 = vmul.f32 %v10525_v34, %v4879_v46  ;;  %v10531_v48 = vpop.eup %10530  ;;  %10534 = vrcp.f32 %v15108_v63  ;;  %v4988_v26 = vand.u32 2147483648, %v15047_v29  ;;  %v5016_v21 = vand.u32 2147483647, %v15062_v45 }
 0x7a0   :  { %v10533_v62 = vpop.eup %10532  ;;  %v4978_v5 = vmul.f32 %v10531_v48, %v15047_v29  ;;  %10536 = vrcp.f32 %v15112_v58  ;;  %v5018_v41 = vand.u32 2147483648, %v15062_v45  ;;  %vm4983_vm9 = vweird.f32 %v10531_v48 }
 0x7a1   :  { %v15117_v40 = vadd.f32 %v5056_v31, %v5052_v14  ;;  %10538 = vtanh.f32 %v15106_v20  ;;  %v5008_v47 = vmul.f32 %v10533_v62, %v15062_v45  ;;  %vm4982_vm2 = vweird.f32 %v15047_v29 }
 0x7a2   :  { %10540 = vtanh.f32 %v15110_v24  ;;  %v4979_v0 = vsub.f32 1.0, %v4978_v5  ;;  %vm5012_vm7 = vweird.f32 %v15062_v45  ;;  %vm5013_vm11 = vweird.f32 %v10533_v62  ;;  %vm4984_vm12 = vmor %vm4982_vm2, %vm4983_vm9 }
 0x7a3   :  { %10542 = vtanh.f32 %v15114_v33  ;;  %v5009_v35 = vsub.f32 1.0, %v5008_v47  ;;  %vm15132_vm15 = vcmp.eq.f32.partialorder %v4986_v13, 8.507059e+37  ;;  %v4989_v22 = vor.u32 1.1754944e-38, %v4988_v26  ;;  %vm5014_vm14 = vmor %vm5012_vm7, %vm5013_vm11 }
 0x7a4   :  { %10544 = vtanh.f32 %v15117_v40  ;;  %v4980_v12 = vmul.f32 %v10531_v48, %v4979_v0  ;;  %vm5017_vm3 = vcmp.eq.f32.partialorder %v5016_v21, 8.507059e+37  ;;  %v5019_v10 = vor.u32 1.1754944e-38, %v5018_v41 }
 0x7a5   :  { %v10535_v8 = vpop.eup %10534  ;;  %v5010_v57 = vmul.f32 %v10533_v62, %v5009_v35  ;;  %v5001_v53 = vand.u32 2147483647, %v15108_v63  ;;  %v5003_v50 = vand.u32 2147483648, %v15108_v63  ;;  %v5033_v56 = vand.u32 2147483648, %v15112_v58 }
 0x7a6   :  { %v10537_v18 = vpop.eup %10536  ;;  %v4981_v4 = vadd.f32 %v10531_v48, %v4980_v12  ;;  %v4993_v59 = vmul.f32 %v10535_v8, %v15108_v63  ;;  %vm4998_vm1 = vweird.f32 %v10535_v8  ;;  %v5031_v16 = vand.u32 2147483647, %v15112_v58 }
 0x7a7   :  { %v10539_v55 = vpop.eup %10538  ;;  %v5011_v25 = vadd.f32 %v10533_v62, %v5010_v57  ;;  %v5023_v29 = vmul.f32 %v10537_v18, %v15112_v58  ;;  %vm5028_vm5 = vweird.f32 %v10537_v18  ;;  %vm4997_vm0 = vweird.f32 %v15108_v63 }
 0x7a8   :  { %v10541_v60 = vpop.eup %10540  ;;  %v4985_v9 = vsel %vm4984_vm12, %v10531_v48, %v4981_v4  ;;  %v4994_v37 = vsub.f32 1.0, %v4993_v59  ;;  %vm4999_vm6 = vmor %vm4997_vm0, %vm4998_vm1  ;;  %v5004_v14 = vor.u32 1.1754944e-38, %v5003_v50  ;;  %vm5027_vm8 = vweird.f32 %v15112_v58  ;;  %v18543_v50 = vld [vmem:[#allocation89_spill] sm:$0xff] }
 0x7a9   :  { %v10543_v19 = vpop.eup %10542  ;;  %v4990_v44 = vsel %vm15132_vm15, %v4989_v22, %v4985_v9  ;;  %v5015_v34 = vsel %vm5014_vm14, %v10533_v62, %v5011_v25  ;;  %v5024_v52 = vsub.f32 1.0, %v5023_v29  ;;  %vm5002_vm4 = vcmp.eq.f32.partialorder %v5001_v53, 8.507059e+37  ;;  %vm5029_vm13 = vmor %vm5027_vm8, %vm5028_vm5  ;;  %v18536_v25 = vld [vmem:[#allocation97_spill] sm:$0xff]  ;;  %v18540_v9 = vld [vmem:[#allocation79_spill] sm:$0xff] }
 0x7aa   :  { %v10545_v11 = vpop.eup %10544  ;;  %v5020_v23 = vsel %vm5017_vm3, %v5019_v10, %v5015_v34  ;;  %v5065_v54 = vmul.f32 %v10539_v55, %v4990_v44  ;;  %v4995_v17 = vmul.f32 %v10535_v8, %v4994_v37  ;;  %v5034_v31 = vor.u32 1.1754944e-38, %v5033_v56  ;;  %v18545_v44 = vld [vmem:[#allocation81_spill] sm:$0xff]  ;;  %v18546_v34 = vld [vmem:[#allocation83_spill] sm:$0xff] }
 0x7ab   :  { %v5067_v45 = vmul.f32 %v10541_v60, %v5020_v23  ;;  %v5025_v15 = vmul.f32 %v10537_v18, %v5024_v52  ;;  %vm5032_vm10 = vcmp.eq.f32.partialorder %v5031_v16, 8.507059e+37  ;;  %vm18534_vm9 = vcmask 1041409   ;;  %v18539_v60 = vld [vmem:[#allocation77_spill] sm:$0xff]  ;;  %v18550_v23 = vld [vmem:[#allocation87_spill] sm:$0xff] }
 0x7ac   :  { %5073 = vst.sshfl [vmem:[#allocation1] sm:$0xff pattern:$0x73625140] %v5065_v54  ;;  %v5091_v49 = vpack.c.bf16 %v5065_v54, %v5065_v54  ;;  %v4996_v27 = vadd.f32 %v10535_v8, %v4995_v17  ;;  %vm18535_vm2 = vmmov %vm18534_vm9  ;;  %vm18538_vm11 = vcmask 1043459   ;;  %vm18541_vm15 = vcmask 1045509   ;;  %v18547_v52 = vld [vmem:[#allocation93_spill] sm:$0xff] }
 0x7ad   :  { %5077 = vst.sshfl [vmem:[#allocation1 + $0x20] sm:$0xff pattern:$0x73625140] %v5067_v45  ;;  %v5093_v61 = vpack.c.bf16 %v5067_v45, %v5067_v45  ;;  %v5026_v3 = vadd.f32 %v10537_v18, %v5025_v15  ;;  %vm18537_vm7 = vmmov %vm18535_vm2  ;;  %vm18542_vm12 = vcmask 1047559   ;;  %v18548_v56 = vld [vmem:[#allocation105_spill] sm:$0xff]  ;;  %v18551_v54 = vld [vmem:[#allocation96_spill] sm:$0xff] }
 0x7ae   :  { %v5099_v46 = vunpack.c.l.b16 %v5091_v49  ;;  %v5000_v6 = vsel %vm4999_vm6, %v10535_v8, %v4996_v27  ;;  %v18552_v17 = vld [vmem:[#allocation109_spill] sm:$0xff]  ;;  %v18553_v45 = vld [vmem:[#allocation88_spill] sm:$0xff]  ;;  %v18554_v15 = vld [vmem:[#allocation90_spill] sm:$0xff] }
 0x7af   :  { %v5101_v48 = vunpack.c.l.b16 %v5093_v61  ;;  %v5005_v62 = vsel %vm5002_vm4, %v5004_v14, %v5000_v6  ;;  %v5030_v5 = vsel %vm5029_vm13, %v10537_v18, %v5026_v3  ;;  %v18555_v16 = vld [vmem:[#allocation101_spill] sm:$0xff]  ;;  %v18556_v49 = vld [vmem:[#allocation112_spill] sm:$0xff]  ;;  %v18558_v61 = vld [vmem:[#allocation94_spill] sm:$0xff] }
 0x7b0   :  { %v5103_v47 = vrot.slane %v5099_v46, 2  ;;  %v5035_v0 = vsel %vm5032_vm10, %v5034_v31, %v5030_v5  ;;  %v5066_v63 = vmul.f32 %v10543_v19, %v5005_v62  ;;  %v18544_v19 = vld [vmem:[#allocation102_spill] sm:$0xff]  ;;  %v18557_v27 = vld [vmem:[#allocation92_spill] sm:$0xff]  ;;  %v18561_v46 = vld [vmem:[#allocation95_spill] sm:$0xff] }
 0x7b1   :  { %v5104_v13 = vrot.slane %v5101_v48, 1  ;;  %v5068_v26 = vmul.f32 %v10545_v11, %v5035_v0  ;;  %v18549_v11 = vld [vmem:[#allocation85_spill] sm:$0xff]  ;;  %v18559_v14 = vld [vmem:[#allocation104_spill] sm:$0xff]  ;;  %v18562_v6 = vld [vmem:[#allocation98_spill] sm:$0xff] }
 0x7b2   :  { %5074 = vst.sshfl [vmem:[#allocation1 + $0x8] sm:$0xff pattern:$0x73625140] %v5066_v63  ;;  %v5092_v35 = vpack.c.bf16 %v5066_v63, %v5066_v63  ;;  %v18560_v3 = vld [vmem:[#allocation116_spill] sm:$0xff]  ;;  %v18563_v31 = vld [vmem:[#allocation113_spill] sm:$0xff]  ;;  %v18569_v63 = vld [vmem:[#allocation111_spill] sm:$0xff] }
 0x7b3   :  { %v5105_v21 = vsel %vm18534_vm9, %v5104_v13, %v5103_v47  ;;  %5078 = vst.sshfl [vmem:[#allocation1 + $0x28] sm:$0xff pattern:$0x73625140] %v5068_v26  ;;  %v5094_v58 = vpack.c.bf16 %v5068_v26, %v5068_v26  ;;  %v18564_v48 = vld [vmem:[#allocation125_spill] sm:$0xff]  ;;  %v18565_v62 = vld [vmem:[#allocation108_spill] sm:$0xff]  ;;  %v18570_v13 = vld [vmem:[#allocation123_spill] sm:$0xff] }
 0x7b4   :  { %v15150_v41 = vpack.c.b16 %v5105_v21, %v5105_v21  ;;  %v5100_v12 = vunpack.c.l.b16 %v5092_v35  ;;  %v18566_v5 = vld [vmem:[#allocation120_spill] sm:$0xff]  ;;  %v18567_v47 = vld [vmem:[#allocation117_spill] sm:$0xff]  ;;  %v18572_v35 = vld [vmem:[#allocation134_spill] sm:$0xff] }
 0x7b5   :  { %v5102_v8 = vunpack.c.l.b16 %v5094_v58  ;;  %v18568_v0 = vld [vmem:[#allocation128_spill] sm:$0xff]  ;;  %v18573_v21 = vld [vmem:[#allocation121_spill] sm:$0xff]  ;;  %v18574_v58 = vld [vmem:[#allocation130_spill] sm:$0xff] }
 0x7b6   :  { %v5106_v57 = vrot.slane %v5100_v12, 2  ;;  %5121 = vmatmul.bf16.vlgmr.msra.gmra.mxu1 %v15150_v41  ;;  %5147 = vmatmul.bf16.vlgmr.msrb.gmra.mxu3 %v15150_v41  ;;  %v18571_v26 = vld [vmem:[#allocation100_spill] sm:$0xff]  ;;  %v18575_v12 = vld [vmem:[#allocation103_spill] sm:$0xff] }
 0x7b7   :  { %v5107_v18 = vrot.slane %v5102_v8, 1  ;;  %5217 = vmatpush.bf16.msra.mxu1 %v18216_v39  ;;  %5243 = vmatpush.bf16.msrb.mxu3 %v18217_v30  ;;  %v18576_v8 = vld [vmem:[#allocation136_spill] sm:$0xff] }
 0x7b9   :  { %v5108_v4 = vsel %vm18535_vm2, %v5107_v18, %v5106_v57  ;;  %v5076_v55 = vld [vmem:[#allocation1 + $0x1] ss:$4 sm:$0xff] }
 0x7ba   :  { %v5080_v42 = vld [vmem:[#allocation1 + $0x21] ss:$4 sm:$0xff]  ;;  %v15157_v22 = vpack.c.b16 %v5108_v4, %v5108_v4 }
 0x7bb   :  { %5218 = vmatpush.bf16.msra.mxu1 %v18218_v51  ;;  %5244 = vmatpush.bf16.msrb.mxu3 %v18219_v7  ;;  %v5083_v59 = vrot.slane %v5080_v42, 7  ;;  %v18577_v57 = vld [vmem:[#allocation124_spill] sm:$0xff]  ;;  %v18579_v4 = vld [vmem:[#allocation106_spill] sm:$0xff] }
 0x7bc   :  { %5134 = vmatmul.bf16.vlgmr.msrb.gmra.mxu2 %v15157_v22  ;;  %5160 = vmatmul.bf16.vlgmr.msrb.gmra.mxu0 %v15157_v22  ;;  %v18578_v18 = vld [vmem:[#allocation132_spill] sm:$0xff]  ;;  %v18580_v42 = vld [vmem:[#allocation138_spill] sm:$0xff] }
 0x7bd   :  { %5230 = vmatpush.bf16.msrb.mxu2 %v18232_v32  ;;  %5256 = vmatpush.bf16.msrb.mxu0 %v18536_v25  ;;  %v5084_v10 = vsel %vm18537_vm7, %v5083_v59, %v5076_v55  ;;  %v18582_v55 = vld [vmem:[#allocation135_spill] sm:$0xff] }
 0x7be   :  { %v5085_v29 = vsel %vm18538_vm11, %v5083_v59, %v5084_v10  ;;  %v18583_v10 = vld [vmem:[#allocation110_spill] sm:$0xff] }
 0x7bf   :  { %5219 = vmatpush.bf16.msra.mxu1 %v18539_v60  ;;  %5245 = vmatpush.bf16.msrb.mxu3 %v18540_v9  ;;  %v5086_v37 = vsel %vm18541_vm15, %v5083_v59, %v5085_v29  ;;  %v18584_v29 = vld [vmem:[#allocation140_spill] sm:$0xff] }
 0x7c0   :  { %v5087_v53 = vsel %vm18542_vm12, %v5083_v59, %v5086_v37  ;;  %v18581_v59 = vld [vmem:[#allocation127_spill] sm:$0xff]  ;;  %v18585_v37 = vld [vmem:[#allocation129_spill] sm:$0xff] }
 0x7c1   :  { %5231 = vmatpush.bf16.msrb.mxu2 %v18543_v50  ;;  %5257 = vmatpush.bf16.msrb.mxu0 %v18544_v19  ;;  %5090 = vst [vmem:[#allocation2 + $0x8] sm:$0xf] %v5087_v53  ;;  %v18586_v53 = vld [vmem:[#allocation137_spill] sm:$0xff] }
 0x7c3   :  { %5220 = vmatpush.bf16.msra.mxu1 %v18545_v44  ;;  %5246 = vmatpush.bf16.msrb.mxu3 %v18546_v34 }
 0x7c5   :  { %5232 = vmatpush.bf16.msrb.mxu2 %v18547_v52  ;;  %5258 = vmatpush.bf16.msrb.mxu0 %v18548_v56 }
 0x7c6   :  { %5173 = vmatmul.bf16.vlgmr.msrb.gmra.mxu1 %v15150_v41  ;;  %5199 = vmatmul.bf16.vlgmr.msra.gmra.mxu3 %v15150_v41 }
 0x7c7   :  { %5221 = vmatpush.bf16.msra.mxu1 %v18549_v11  ;;  %5247 = vmatpush.bf16.msrb.mxu3 %v18550_v23 }
 0x7c9   :  { %5233 = vmatpush.bf16.msrb.mxu2 %v18551_v54  ;;  %5259 = vmatpush.bf16.msrb.mxu0 %v18552_v17 }
 0x7cb   :  { %5222 = vmatpush.bf16.msra.mxu1 %v18553_v45  ;;  %5248 = vmatpush.bf16.msrb.mxu3 %v18554_v15 }
 0x7cc   :  { %5186 = vmatmul.bf16.vlgmr.msra.gmra.mxu2 %v15157_v22  ;;  %5212 = vmatmul.bf16.vlgmr.msra.gmra.mxu0 %v15157_v22 }
 0x7cd   :  { %5234 = vmatpush.bf16.msrb.mxu2 %v18555_v16  ;;  %5260 = vmatpush.bf16.msrb.mxu0 %v18556_v49 }
 0x7cf   :  { %5223 = vmatpush.bf16.msra.mxu1 %v18557_v27  ;;  %5249 = vmatpush.bf16.msrb.mxu3 %v18558_v61 }
 0x7d1   :  { %5235 = vmatpush.bf16.msrb.mxu2 %v18559_v14  ;;  %5261 = vmatpush.bf16.msrb.mxu0 %v18560_v3 }
 0x7d3   :  { %5224 = vmatpush.bf16.msra.mxu1 %v18561_v46  ;;  %5250 = vmatpush.bf16.msrb.mxu3 %v18562_v6 }
 0x7d5   :  { %5236 = vmatpush.bf16.msrb.mxu2 %v18565_v62  ;;  %5262 = vmatpush.bf16.msrb.mxu0 %v18566_v5 }
 0x7d6   :  { %5225 = vmatmul.bf16.vlgmr.msra.gmra.mxu1 %v15150_v41  ;;  %5251 = vmatmul.bf16.vlgmr.msrb.gmra.mxu3 %v15150_v41 }
 0x7d7   :  { %5269 = vmatpush.bf16.msrb.mxu1 %v18563_v31  ;;  %5295 = vmatpush.bf16.msra.mxu3 %v18564_v48  ;;  %v18664_v31 = vld [vmem:[#allocation82_spill] sm:$0xff] }
 0x7d9   :  { %5237 = vmatpush.bf16.msrb.mxu2 %v18569_v63  ;;  %5263 = vmatpush.bf16.msrb.mxu0 %v18570_v13 }
 0x7db   :  { %5270 = vmatpush.bf16.msrb.mxu1 %v18567_v47  ;;  %5296 = vmatpush.bf16.msra.mxu3 %v18568_v0  ;;  %v18591_v0 = vld [vmem:[#allocation118_spill] sm:$0xff] }
 0x7dc   :  { %5238 = vmatmul.bf16.vlgmr.msrb.gmra.mxu2 %v15157_v22  ;;  %5264 = vmatmul.bf16.vlgmr.msrb.gmra.mxu0 %v15157_v22 }
 0x7dd   :  { %5282 = vmatpush.bf16.msra.mxu2 %v18571_v26  ;;  %5308 = vmatpush.bf16.msra.mxu0 %v18572_v35 }
 0x7df   :  { %5271 = vmatpush.bf16.msrb.mxu1 %v18573_v21  ;;  %5297 = vmatpush.bf16.msra.mxu3 %v18574_v58  ;;  %v18587_v58 = vld [vmem:[#allocation114_spill] sm:$0xff]  ;;  %v18590_v21 = vld [vmem:[#allocation139_spill] sm:$0xff] }
 0x7e1   :  { %5283 = vmatpush.bf16.msra.mxu2 %v18575_v12  ;;  %5309 = vmatpush.bf16.msra.mxu0 %v18576_v8 }
 0x7e3   :  { %5272 = vmatpush.bf16.msrb.mxu1 %v18577_v57  ;;  %5298 = vmatpush.bf16.msra.mxu3 %v18578_v18  ;;  %v18588_v57 = vld [vmem:[#allocation142_spill] sm:$0xff]  ;;  %v18589_v18 = vld [vmem:[#allocation131_spill] sm:$0xff] }
 0x7e5   :  { %5284 = vmatpush.bf16.msra.mxu2 %v18579_v4  ;;  %5310 = vmatpush.bf16.msra.mxu0 %v18580_v42 }
 0x7e7   :  { %5273 = vmatpush.bf16.msrb.mxu1 %v18581_v59  ;;  %5299 = vmatpush.bf16.msra.mxu3 %v18582_v55  ;;  %v18592_v59 = vld [vmem:[#allocation143_spill] sm:$0xff]  ;;  %v18593_v55 = vld [vmem:[#allocation133_spill] sm:$0xff] }
 0x7e9   :  { %5285 = vmatpush.bf16.msra.mxu2 %v18583_v10  ;;  %5311 = vmatpush.bf16.msra.mxu0 %v18584_v29  ;;  %v18594_v10 = vld [vmem:[#allocation141_spill] sm:$0xff]  ;;  %v18595_v29 = vld [vmem:[#allocation10_spill] sm:$0xff] }
 0x7eb   :  { %5274 = vmatpush.bf16.msrb.mxu1 %v18585_v37  ;;  %5300 = vmatpush.bf16.msra.mxu3 %v18586_v53  ;;  %v18596_v37 = vld [vmem:[#allocation18_spill] sm:$0xff] }
 0x7ec   :  { %v18597_v53 = vld [vmem:[#allocation122_spill] sm:$0xff] }
 0x7ed   :  { %5286 = vmatpush.bf16.msra.mxu2 %v18587_v58  ;;  %5312 = vmatpush.bf16.msra.mxu0 %v18588_v57  ;;  %v18598_v58 = vld [vmem:[#allocation144_spill] sm:$0xff] }
 0x7ef   :  { %5275 = vmatpush.bf16.msrb.mxu1 %v18589_v18  ;;  %5301 = vmatpush.bf16.msra.mxu3 %v18590_v21  ;;  %v18599_v21 = vld [vmem:[#allocation12_spill] sm:$0xff]  ;;  %v18600_v18 = vld [vmem:[#allocation23_spill] sm:$0xff] }
 0x7f1   :  { %5287 = vmatpush.bf16.msra.mxu2 %v18591_v0  ;;  %5313 = vmatpush.bf16.msra.mxu0 %v18592_v59  ;;  %v18601_v59 = vld [vmem:[#allocation126_spill] sm:$0xff] }
 0x7f3   :  { %5276 = vmatpush.bf16.msrb.mxu1 %v18593_v55  ;;  %5302 = vmatpush.bf16.msra.mxu3 %v18594_v10  ;;  %v18602_v55 = vld [vmem:[#allocation145_spill] sm:$0xff]  ;;  %v18603_v10 = vld [vmem:[#allocation6_spill] sm:$0xff] }
 0x7f5   :  { %5288 = vmatpush.bf16.msra.mxu2 %v18597_v53  ;;  %5314 = vmatpush.bf16.msra.mxu0 %v18598_v58  ;;  %v18606_v58 = vld [vmem:[#allocation27_spill] sm:$0xff] }
 0x7f6   :  { %5277 = vmatmul.bf16.vlgmr.msrb.gmra.mxu1 %v15150_v41  ;;  %5303 = vmatmul.bf16.vlgmr.msra.gmra.mxu3 %v15150_v41  ;;  %v18607_v41 = vld [vmem:[#allocation7_spill] sm:$0xff] }
 0x7f7   :  { %5685 = vmatpush.bf16.msra.mxu1 %v18595_v29  ;;  %5711 = vmatpush.bf16.msrb.mxu3 %v18596_v37  ;;  %v18604_v29 = vld [vmem:[#allocation4_spill] sm:$0xff]  ;;  %v18605_v37 = vld [vmem:[#allocation14_spill] sm:$0xff]  ;;  %v18614_v53 = vld [vmem:[#allocation35_spill] sm:$0xff] }
 0x7f9   :  { %5289 = vmatpush.bf16.msra.mxu2 %v18601_v59  ;;  %5315 = vmatpush.bf16.msra.mxu0 %v18602_v55  ;;  %v18610_v59 = vld [vmem:[#allocation31_spill] sm:$0xff]  ;;  %v18611_v55 = vld [vmem:[#allocation8_spill] sm:$0xff] }
 0x7fb   :  { %5686 = vmatpush.bf16.msra.mxu1 %v18599_v21  ;;  %5712 = vmatpush.bf16.msrb.mxu3 %v18600_v18  ;;  %v18608_v21 = vld [vmem:[#allocation5_spill] sm:$0xff] }
 0x7fc   :  { %5290 = vmatmul.bf16.vlgmr.msra.gmra.mxu2 %v15157_v22  ;;  %5316 = vmatmul.bf16.vlgmr.msra.gmra.mxu0 %v15157_v22  ;;  %v18609_v18 = vld [vmem:[#allocation17_spill] sm:$0xff] }
 0x7fd   :  { %5698 = vmatpush.bf16.msrb.mxu2 %v18603_v10  ;;  %5724 = vmatpush.bf16.msrb.mxu0 %v18604_v29  ;;  %v18612_v10 = vld [vmem:[#allocation16_spill] sm:$0xff]  ;;  %v18613_v29 = vld [vmem:[#allocation22_spill] sm:$0xff]  ;;  %v18615_v22 = vld [vmem:[#allocation9_spill] sm:$0xff] }
 0x7ff   :  { %5687 = vmatpush.bf16.msra.mxu1 %v18605_v37  ;;  %5713 = vmatpush.bf16.msrb.mxu3 %v18606_v58  ;;  %v18616_v37 = vld [vmem:[#allocation20_spill] sm:$0xff]  ;;  %v18617_v58 = vld [vmem:[#allocation26_spill] sm:$0xff] }
 0x801   :  { %5699 = vmatpush.bf16.msrb.mxu2 %v18607_v41  ;;  %5725 = vmatpush.bf16.msrb.mxu0 %v18608_v21  ;;  %v18618_v41 = vld [vmem:[#allocation38_spill] sm:$0xff]  ;;  %v18619_v21 = vld [vmem:[#allocation11_spill] sm:$0xff] }
 0x803   :  { %5688 = vmatpush.bf16.msra.mxu1 %v18609_v18  ;;  %5714 = vmatpush.bf16.msrb.mxu3 %v18610_v59  ;;  %v18620_v18 = vld [vmem:[#allocation24_spill] sm:$0xff]  ;;  %v18621_v59 = vld [vmem:[#allocation30_spill] sm:$0xff] }
 0x805   :  { %5700 = vmatpush.bf16.msrb.mxu2 %v18611_v55  ;;  %5726 = vmatpush.bf16.msrb.mxu0 %v18612_v10  ;;  %v18622_v55 = vld [vmem:[#allocation41_spill] sm:$0xff] }
 0x806   :  { %v18623_v10 = vld [vmem:[#allocation13_spill] sm:$0xff] }
 0x807   :  { %5689 = vmatpush.bf16.msra.mxu1 %v18613_v29  ;;  %5715 = vmatpush.bf16.msrb.mxu3 %v18614_v53  ;;  %v18624_v29 = vld [vmem:[#allocation28_spill] sm:$0xff]  ;;  %v18625_v53 = vld [vmem:[#allocation34_spill] sm:$0xff] }
 0x809   :  { %5701 = vmatpush.bf16.msrb.mxu2 %v18615_v22  ;;  %5727 = vmatpush.bf16.msrb.mxu0 %v18616_v37  ;;  %v18626_v22 = vld [vmem:[#allocation45_spill] sm:$0xff]  ;;  %v18627_v37 = vld [vmem:[#allocation15_spill] sm:$0xff] }
 0x80b   :  { %5690 = vmatpush.bf16.msra.mxu1 %v18617_v58  ;;  %5716 = vmatpush.bf16.msrb.mxu3 %v18618_v41  ;;  %v18628_v58 = vld [vmem:[#allocation32_spill] sm:$0xff]  ;;  %v18629_v41 = vld [vmem:[#allocation21_spill] sm:$0xff] }
 0x80d   :  { %5702 = vmatpush.bf16.msrb.mxu2 %v18619_v21  ;;  %5728 = vmatpush.bf16.msrb.mxu0 %v18620_v18  ;;  %v18630_v21 = vld [vmem:[#allocation60_spill] sm:$0xff]  ;;  %v18631_v18 = vld [vmem:[#allocation19_spill] sm:$0xff] }
 0x80f   :  { %5691 = vmatpush.bf16.msra.mxu1 %v18621_v59  ;;  %5717 = vmatpush.bf16.msrb.mxu3 %v18622_v55  ;;  %v18632_v59 = vld [vmem:[#allocation36_spill] sm:$0xff]  ;;  %v18633_v55 = vld [vmem:[#allocation46_spill] sm:$0xff] }
 0x811   :  { %5703 = vmatpush.bf16.msrb.mxu2 %v18623_v10  ;;  %5729 = vmatpush.bf16.msrb.mxu0 %v18624_v29  ;;  %v18634_v10 = vld [vmem:[#allocation40_spill] sm:$0xff]  ;;  %v18635_v29 = vld [vmem:[#allocation25_spill] sm:$0xff] }
 0x813   :  { %5692 = vmatpush.bf16.msra.mxu1 %v18625_v53  ;;  %5718 = vmatpush.bf16.msrb.mxu3 %v18626_v22  ;;  %v18636_v53 = vld [vmem:[#allocation62_spill] sm:$0xff]  ;;  %v18637_v22 = vld [vmem:[#allocation49_spill] sm:$0xff] }
 0x815   :  { %5704 = vmatpush.bf16.msrb.mxu2 %v18627_v37  ;;  %5730 = vmatpush.bf16.msrb.mxu0 %v18628_v58  ;;  %v18638_v37 = vld [vmem:[#allocation44_spill] sm:$0xff]  ;;  %v18639_v58 = vld [vmem:[#allocation29_spill] sm:$0xff] }
 0x817   :  { %5737 = vmatpush.bf16.msrb.mxu1 %v18629_v41  ;;  %5763 = vmatpush.bf16.msra.mxu3 %v18630_v21  ;;  %v18640_v41 = vld [vmem:[#allocation67_spill] sm:$0xff]  ;;  %v18641_v21 = vld [vmem:[#allocation53_spill] sm:$0xff] }
 0x819   :  { %5705 = vmatpush.bf16.msrb.mxu2 %v18631_v18  ;;  %5731 = vmatpush.bf16.msrb.mxu0 %v18632_v59  ;;  %v18642_v18 = vld [vmem:[#allocation48_spill] sm:$0xff]  ;;  %v18643_v59 = vld [vmem:[#allocation33_spill] sm:$0xff] }
 0x81b   :  { %5738 = vmatpush.bf16.msrb.mxu1 %v18635_v29  ;;  %5764 = vmatpush.bf16.msra.mxu3 %v18636_v53  ;;  %v18646_v29 = vld [vmem:[#allocation52_spill] sm:$0xff]  ;;  %v18647_v53 = vld [vmem:[#allocation37_spill] sm:$0xff] }
 0x81d   :  { %5750 = vmatpush.bf16.msra.mxu2 %v18633_v55  ;;  %5776 = vmatpush.bf16.msra.mxu0 %v18634_v10  ;;  %v18644_v55 = vld [vmem:[#allocation70_spill] sm:$0xff]  ;;  %v18645_v10 = vld [vmem:[#allocation57_spill] sm:$0xff] }
 0x81f   :  { %5739 = vmatpush.bf16.msrb.mxu1 %v18639_v58  ;;  %5765 = vmatpush.bf16.msra.mxu3 %v18640_v41  ;;  %v18650_v58 = vld [vmem:[#allocation54_spill] sm:$0xff]  ;;  %v18651_v41 = vld [vmem:[#allocation39_spill] sm:$0xff] }
 0x821   :  { %5751 = vmatpush.bf16.msra.mxu2 %v18637_v22  ;;  %5777 = vmatpush.bf16.msra.mxu0 %v18638_v37  ;;  %v18648_v22 = vld [vmem:[#allocation73_spill] sm:$0xff]  ;;  %v18649_v37 = vld [vmem:[#allocation59_spill] sm:$0xff] }
 0x823   :  { %5740 = vmatpush.bf16.msrb.mxu1 %v18643_v59  ;;  %5766 = vmatpush.bf16.msra.mxu3 %v18644_v55  ;;  %v18654_v59 = vld [vmem:[#allocation58_spill] sm:$0xff]  ;;  %v18655_v55 = vld [vmem:[#allocation43_spill] sm:$0xff] }
 0x825   :  { %5752 = vmatpush.bf16.msra.mxu2 %v18641_v21  ;;  %5778 = vmatpush.bf16.msra.mxu0 %v18642_v18  ;;  %v18652_v21 = vld [vmem:[#allocation76_spill] sm:$0xff]  ;;  %v18653_v18 = vld [vmem:[#allocation61_spill] sm:$0xff] }
 0x827   :  { %5741 = vmatpush.bf16.msrb.mxu1 %v18647_v53  ;;  %5767 = vmatpush.bf16.msra.mxu3 %v18648_v22  ;;  %v18658_v53 = vld [vmem:[#allocation63_spill] sm:$0xff] }
 0x828   :  { %v18659_v22 = vld [vmem:[#allocation47_spill] sm:$0xff] }
 0x829   :  { %5753 = vmatpush.bf16.msra.mxu2 %v18645_v10  ;;  %5779 = vmatpush.bf16.msra.mxu0 %v18646_v29  ;;  %v18656_v10 = vld [vmem:[#allocation80_spill] sm:$0xff]  ;;  %v18657_v29 = vld [vmem:[#allocation66_spill] sm:$0xff] }
 0x82b   :  { %5742 = vmatpush.bf16.msrb.mxu1 %v18651_v41  ;;  %5768 = vmatpush.bf16.msra.mxu3 %v18652_v21  ;;  %v18662_v41 = vld [vmem:[#allocation68_spill] sm:$0xff] }
 0x82d   :  { %5754 = vmatpush.bf16.msra.mxu2 %v18649_v37  ;;  %5780 = vmatpush.bf16.msra.mxu0 %v18650_v58  ;;  %v18660_v37 = vld [vmem:[#allocation84_spill] sm:$0xff]  ;;  %v18661_v58 = vld [vmem:[#allocation69_spill] sm:$0xff] }
 0x82f   :  { %5743 = vmatpush.bf16.msrb.mxu1 %v18655_v55  ;;  %5769 = vmatpush.bf16.msra.mxu3 %v18656_v10 }
 0x831   :  { %5755 = vmatpush.bf16.msra.mxu2 %v18653_v18  ;;  %5781 = vmatpush.bf16.msra.mxu0 %v18654_v59 }
 0x833   :  { %5744 = vmatpush.bf16.msrb.mxu1 %v18659_v22  ;;  %5770 = vmatpush.bf16.msra.mxu3 %v18660_v37  ;;  %v5122_v21 = vpop.f32.mrf.mxu1 }
 0x835   :  { %5756 = vmatpush.bf16.msra.mxu2 %v18657_v29  ;;  %5782 = vmatpush.bf16.msra.mxu0 %v18658_v53  ;;  %v18663_v53 = vld [vmem:[#allocation51_spill] sm:$0xff] }
 0x839   :  { %5757 = vmatpush.bf16.msra.mxu2 %v18661_v58  ;;  %5783 = vmatpush.bf16.msra.mxu0 %v18662_v41  ;;  %v5148_v18 = vpop.f32.mrf.mxu3  ;;  %v5161_v0 = vpop.f32.mrf.mxu0 }
 0x83a   :  { %v5162_v57 = vadd.f32 %v5161_v0, %v5148_v18 }
 0x83b   :  { %v5124_v59 = vpop.f32.mrf.mxu1 }
 0x83c   :  { %v5330_v47 = vrot.slane %v5162_v57, 5  ;;  %v5338_v4 = vrot.slane %v5162_v57, 6 }
 0x83e   :  { %v5362_v48 = vadd.f32 %v5330_v47, %v18663_v53  ;;  %v5370_v37 = vadd.f32 %v5338_v4, %v18664_v31  ;;  %v18667_v31 = vld [vmem:[#allocation78_spill] sm:$0xff] }
 0x83f   :  { %v5135_v55 = vpop.f32.mrf.mxu2 }
 0x840   :  { %v5136_v6 = vadd.f32 %v5135_v55, %v5122_v21  ;;  %v9819_v58 = vmul.f32 -1.442695, %v5362_v48  ;;  %v9821_v61 = vmul.f32 -1.442695, %v5370_v37 }
 0x841   :  { %v5150_v10 = vpop.f32.mrf.mxu3  ;;  %v5163_v42 = vpop.f32.mrf.mxu0 }
 0x842   :  { %v5329_v59 = vrot.slane %v5136_v6, 5  ;;  %10546 = vpow2.f32 %v9819_v58  ;;  %v5337_v0 = vrot.slane %v5136_v6, 6  ;;  %v18665_v42 = vld [vmem:[#allocation50_spill] sm:$0xff]  ;;  %v18668_v6 = vld [vmem:[#allocation56_spill] sm:$0xff] }
 0x843   :  { %v5174_v29 = vpop.f32.mrf.mxu1  ;;  %10548 = vpow2.f32 %v9821_v61 }
 0x844   :  { %v5361_v57 = vadd.f32 %v5329_v59, %v18665_v42 }
 0x846   :  { %v9818_v58 = vmul.f32 -1.442695, %v5361_v57 }
 0x847   :  { %v5137_v22 = vpop.f32.mrf.mxu2 }
 0x848   :  { %v18666_v22 = vld [vmem:[#allocation42_spill] sm:$0xff]  ;;  %v10547_v55 = vpop.eup %10546  ;;  %10550 = vpow2.f32 %v9818_v58 }
 0x849   :  { %v5200_v46 = vpop.f32.mrf.mxu3  ;;  %v5213_v41 = vpop.f32.mrf.mxu0  ;;  %v5369_v53 = vadd.f32 %v5337_v0, %v18666_v22  ;;  %v15311_v26 = vadd.f32 1.0, %v10547_v55  ;;  %v18670_v0 = vld [vmem:[#allocation146_spill] sm:$0xff] }
 0x84a   :  { %v5214_v8 = vadd.f32 %v5213_v41, %v5200_v46  ;;  %v10549_v61 = vpop.eup %10548 }
 0x84b   :  { %v5176_v12 = vpop.f32.mrf.mxu1  ;;  %v9820_v35 = vmul.f32 -1.442695, %v5369_v53  ;;  %v15315_v22 = vadd.f32 1.0, %v10549_v61  ;;  %vm5413_vm3 = vweird.f32 %v15311_v26 }
 0x84c   :  { %v5332_v18 = vrot.slane %v5214_v8, 5  ;;  %v5340_v27 = vrot.slane %v5214_v8, 6  ;;  %v18669_v8 = vld [vmem:[#allocation65_spill] sm:$0xff] }
 0x84d   :  { %10552 = vpow2.f32 %v9820_v35  ;;  %vm5443_vm2 = vweird.f32 %v15315_v22 }
 0x84e   :  { %v5364_v46 = vadd.f32 %v5332_v18, %v18667_v31  ;;  %v5372_v41 = vadd.f32 %v5340_v27, %v18668_v6  ;;  %10554 = vrcp.f32 %v15311_v26  ;;  %v5449_v31 = vand.u32 2147483648, %v15315_v22 }
 0x84f   :  { %v5187_v10 = vpop.f32.mrf.mxu2 }
 0x850   :  { %v5188_v47 = vadd.f32 %v5187_v10, %v5174_v29  ;;  %v9823_v59 = vmul.f32 -1.442695, %v5364_v46 }
 0x851   :  { %v5202_v4 = vpop.f32.mrf.mxu3  ;;  %v5215_v21 = vpop.f32.mrf.mxu0 }
 0x852   :  { %v5331_v48 = vrot.slane %v5188_v47, 5  ;;  %v5339_v12 = vrot.slane %v5188_v47, 6  ;;  %v9825_v21 = vmul.f32 -1.442695, %v5372_v41  ;;  %10556 = vpow2.f32 %v9823_v59 }
 0x853   :  { %v15308_v37 = vpop.f32.mrf.mxu1 }
 0x854   :  { %v5363_v29 = vadd.f32 %v5331_v48, %v18669_v8  ;;  %v5371_v10 = vadd.f32 %v5339_v12, %v18670_v0  ;;  %10558 = vpow2.f32 %v9825_v21  ;;  %v10551_v48 = vpop.eup %10550 }
 0x855   :  { %10560 = vrcp.f32 %v15315_v22  ;;  %v10553_v55 = vpop.eup %10552  ;;  %v15323_v61 = vadd.f32 1.0, %v10551_v48 }
 0x856   :  { %v9822_v57 = vmul.f32 -1.442695, %v5363_v29  ;;  %v9824_v53 = vmul.f32 -1.442695, %v5371_v10  ;;  %v15319_v46 = vpop.eup %10554  ;;  %v15327_v10 = vadd.f32 1.0, %v10553_v55 }
 0x857   :  { %v5189_v4 = vpop.f32.mrf.mxu2  ;;  %v5404_v45 = vand.u32 2147483648, %v15323_v61  ;;  %vm5414_vm14 = vweird.f32 %v15319_v46 }
 0x858   :  { %10562 = vpow2.f32 %v9822_v57  ;;  %v10557_v35 = vpop.eup %10556  ;;  %vm15401_vm1 = vmor %vm5413_vm3, %vm5414_vm14 }
 0x859   :  { %v5252_v18 = vpop.f32.mrf.mxu3  ;;  %v5265_v27 = vpop.f32.mrf.mxu0  ;;  %10564 = vpow2.f32 %v9824_v53  ;;  %v15329_v21 = vadd.f32 1.0, %v10557_v35  ;;  %v5409_v53 = vmul.f32 %v15319_v46, %v15311_v26  ;;  %v15394_v3 = vor.u32 1.1754944e-38, %v5404_v45 }
 0x85a   :  { %v10559_v41 = vpop.eup %10558  ;;  %10566 = vrcp.f32 %v15323_v61  ;;  %v5266_v63 = vadd.f32 %v5265_v27, %v5252_v18 }
 0x85b   :  { %v5228_v47 = vpop.f32.mrf.mxu1  ;;  %v15325_v59 = vpop.eup %10560  ;;  %10568 = vrcp.f32 %v15327_v10  ;;  %vm5489_vm5 = vweird.f32 %v15329_v21 }
 0x85c   :  { %v15333_v47 = vadd.f32 1.0, %v10559_v41  ;;  %10570 = vrcp.f32 %v15329_v21  ;;  %v5334_v11 = vrot.slane %v5266_v63, 5  ;;  %v5342_v34 = vrot.slane %v5266_v63, 6 }
 0x85d   :  { %vm5444_vm13 = vweird.f32 %v15325_v59 }
 0x85e   :  { %v10563_v4 = vpop.eup %10562  ;;  %10572 = vrcp.f32 %v15333_v47  ;;  %v5525_v23 = vand.u32 2147483648, %v15333_v47  ;;  %vm5519_vm0 = vweird.f32 %v15333_v47  ;;  %v5523_v63 = vand.u32 2147483647, %v15333_v47 }
 0x85f   :  { %v15321_v12 = vpop.f32.mrf.mxu2  ;;  %v10565_v57 = vpop.eup %10564  ;;  %v15337_v48 = vadd.f32 1.0, %v10563_v4  ;;  %v5419_v4 = vand.u32 2147483648, %v15311_v26 }
 0x860   :  { %v15342_v55 = vadd.f32 1.0, %v10565_v57  ;;  %v15346_v41 = vpop.eup %10566  ;;  %v5240_v62 = vadd.f32 %v15321_v12, %v15308_v37  ;;  %vm15451_vm7 = vcmp.eq.f32.partialorder %v5523_v63, 8.507059e+37 }
 0x861   :  { %v5254_v58 = vpop.f32.mrf.mxu3  ;;  %v5267_v29 = vpop.f32.mrf.mxu0  ;;  %10574 = vrcp.f32 %v15337_v48  ;;  %v5394_v18 = vmul.f32 %v15346_v41, %v15323_v61  ;;  %vm5474_vm6 = vweird.f32 %v15337_v48  ;;  %vm5399_vm9 = vweird.f32 %v15346_v41 }
 0x862   :  { %v5439_v58 = vmul.f32 %v15325_v59, %v15315_v22  ;;  %v5410_v29 = vsub.f32 1.0, %v5409_v53  ;;  %10576 = vrcp.f32 %v15342_v55  ;;  %v15351_v0 = vpop.eup %10568  ;;  %v5495_v53 = vand.u32 2147483648, %v15329_v21 }
 0x863   :  { %v15354_v8 = vpop.eup %10570  ;;  %v15379_v27 = vmul.f32 %v15351_v0, %v15327_v10  ;;  %v5395_v16 = vsub.f32 1.0, %v5394_v18  ;;  %v15420_v18 = vor.u32 1.1754944e-38, %v5525_v23  ;;  %vm5504_vm4 = vweird.f32 %v15342_v55 }
 0x864   :  { %v5440_v6 = vsub.f32 1.0, %v5439_v58  ;;  %v5411_v57 = vmul.f32 %v15319_v46, %v5410_v29  ;;  %v15360_v13 = vpop.eup %10572  ;;  %v15365_v29 = vor.u32 1.1754944e-38, %v5419_v4  ;;  %v15416_v60 = vor.u32 1.1754944e-38, %v5495_v53 }
 0x865   :  { %v5515_v15 = vmul.f32 %v15360_v13, %v15333_v47  ;;  %v5425_v45 = vsub.f32 1.0, %v15379_v27  ;;  %v5366_v27 = vadd.f32 %v5334_v11, %v18497_v2  ;;  %v5480_v53 = vand.u32 2147483648, %v15337_v48 }
 0x866   :  { %v5441_v5 = vmul.f32 %v15325_v59, %v5440_v6  ;;  %v15382_v4 = vadd.f32 %v15319_v46, %v5411_v57  ;;  %v15430_v23 = vmul.f32 %v15346_v41, %v5395_v16  ;;  %vm5490_vm8 = vweird.f32 %v15354_v8 }
 0x867   :  { %v5241_v35 = vpop.f32.mrf.mxu2  ;;  %v15373_v58 = vpop.eup %10574  ;;  %v5516_v17 = vsub.f32 1.0, %v5515_v15  ;;  %v5374_v15 = vadd.f32 %v5342_v34, %v18503_v28  ;;  %v5333_v34 = vrot.slane %v5240_v62, 5  ;;  %10578 = vtanh.f32 %v5366_v27  ;;  %vm15468_vm14 = vmor %vm5489_vm5, %vm5490_vm8 }
 0x868   :  { %v15369_v35 = vor.u32 1.1754944e-38, %v5449_v31  ;;  %v15385_v6 = vpop.eup %10576  ;;  %v5485_v31 = vmul.f32 %v15354_v8, %v15329_v21  ;;  %v5470_v14 = vmul.f32 %v15373_v58, %v15337_v48  ;;  %v15406_v49 = vadd.f32 %v15325_v59, %v5441_v5 }
 0x869   :  { %v5500_v57 = vmul.f32 %v15385_v6, %v15342_v55  ;;  %v5493_v5 = vand.u32 2147483647, %v15329_v21  ;;  %vm5520_vm15 = vweird.f32 %v15360_v13  ;;  %vm5475_vm11 = vweird.f32 %v15373_v58 }
 0x86a   :  { %v5486_v9 = vsub.f32 1.0, %v5485_v31  ;;  %v5471_v31 = vsub.f32 1.0, %v5470_v14  ;;  %v5341_v14 = vrot.slane %v5240_v62, 6  ;;  %vm15485_vm5 = vmor %vm5519_vm0, %vm5520_vm15  ;;  %vm5505_vm8 = vweird.f32 %v15385_v6 }
 0x86b   :  { %v5501_v52 = vsub.f32 1.0, %v5500_v57  ;;  %vm15444_vm10 = vcmp.eq.f32.partialorder %v5493_v5, 8.507059e+37  ;;  %vm15516_vm15 = vmor %vm5474_vm6, %vm5475_vm11 }
 0x86c   :  { %v5487_v2 = vmul.f32 %v15354_v8, %v5486_v9  ;;  %v15442_v9 = vor.u32 1.1754944e-38, %v5480_v53  ;;  %vm15545_vm6 = vmor %vm5443_vm2, %vm5444_vm13  ;;  %vm18698_vm13 = vweird.f32 %v15323_v61 }
 0x86d   :  { %v5502_v12 = vmul.f32 %v15385_v6, %v5501_v52  ;;  %v5426_v52 = vmul.f32 %v15351_v0, %v5425_v45 }
 0x86e   :  { %v5488_v62 = vadd.f32 %v15354_v8, %v5487_v2 }
 0x870   :  { %v5492_v47 = vsel %vm15468_vm14, %v15354_v8, %v5488_v62  ;;  %v5508_v8 = vand.u32 2147483647, %v15342_v55  ;;  %vm15525_vm14 = vmor %vm5504_vm4, %vm5505_vm8 }
 0x871   :  { %v5497_v21 = vsel %vm15444_vm10, %v15416_v60, %v5492_v47  ;;  %vm15562_vm10 = vmor %vm18698_vm13, %vm5399_vm9  ;;  %vm18703_vm9 = vweird.f32 %v15327_v10 }
 0x872   :  { %vm5509_vm2 = vcmp.eq.f32.partialorder %v5508_v8, 8.507059e+37 }
 0x873   :  { %v15371_v42 = vpop.f32.mrf.mxu1 }
 0x879   :  { %v5304_v54 = vpop.f32.mrf.mxu3  ;;  %v5317_v7 = vpop.f32.mrf.mxu0 }
 0x87a   :  { %v5318_v51 = vadd.f32 %v5317_v7, %v5304_v54  ;;  %v5517_v7 = vmul.f32 %v15360_v13, %v5516_v17  ;;  %v5510_v54 = vand.u32 2147483648, %v15342_v55  ;;  %v5427_v55 = vadd.f32 %v15351_v0, %v5426_v52 }
 0x87b   :  { %v5280_v56 = vpop.f32.mrf.mxu1  ;;  %v18701_v52 = vrot.slane %v15114_v33, 7  ;;  %v18706_v33 = vsel %vm15401_vm1, %v15319_v46, %v15382_v4  ;;  %v18708_v46 = vand.u32 2147483648, %v15327_v10 }
 0x87c   :  { %v5336_v30 = vrot.slane %v5318_v51, 5  ;;  %v5344_v11 = vrot.slane %v5318_v51, 6  ;;  %v5472_v51 = vmul.f32 %v15373_v58, %v5471_v31  ;;  %v5518_v27 = vadd.f32 %v15360_v13, %v5517_v7 }
 0x87d   :  { %v5373_v7 = vadd.f32 %v5341_v14, %v18492_v36  ;;  %v5503_v14 = vadd.f32 %v15385_v6, %v5502_v12  ;;  %v5478_v12 = vand.u32 2147483647, %v15337_v48  ;;  %v5397_v48 = vadd.f32 %v15346_v41, %v15430_v23 }
 0x87e   :  { %v5368_v56 = vadd.f32 %v5336_v30, %v13863_v38  ;;  %v5376_v16 = vadd.f32 %v5344_v11, %v14225_v1  ;;  %v18677_v11 = vld [vmem:[#allocation91_spill] sm:$0xff]  ;;  %v5435_v4 = vor.u32 1.1754944e-38, %v18708_v46 }
 0x87f   :  { %v5291_v37 = vpop.f32.mrf.mxu2  ;;  %v5365_v1 = vadd.f32 %v5333_v34, %v18677_v11  ;;  %v5473_v34 = vadd.f32 %v15373_v58, %v5472_v51  ;;  %vm5479_vm4 = vcmp.eq.f32.partialorder %v5478_v12, 8.507059e+37  ;;  %v18711_v12 = vrot.slane %v15110_v24, 7 }
 0x880   :  { %v9827_v57 = vmul.f32 -1.442695, %v5368_v56  ;;  %v9829_v5 = vmul.f32 -1.442695, %v5376_v16  ;;  %v5292_v31 = vadd.f32 %v5291_v37, %v15371_v42  ;;  %v18680_v42 = vand.u32 2147483647, %v15311_v26 }
 0x881   :  { %v5306_v63 = vpop.f32.mrf.mxu3  ;;  %v5319_v53 = vpop.f32.mrf.mxu0  ;;  %v18685_v26 = vand.u32 2147483647, %v15315_v22 }
 0x882   :  { %10580 = vpow2.f32 %v9827_v57  ;;  %v5335_v56 = vrot.slane %v5292_v31, 5  ;;  %v5343_v16 = vrot.slane %v5292_v31, 6  ;;  %vm15475_vm12 = vcmp.eq.f32.partialorder %v18680_v42, 8.507059e+37  ;;  %v18688_v57 = vld [vmem:[#allocation99_spill] sm:$0xff]  ;;  %v10579_v31 = vpop.eup %10578 }
 0x883   :  { %10582 = vpow2.f32 %v9829_v5  ;;  %vm15492_vm3 = vcmp.eq.f32.partialorder %v18685_v26, 8.507059e+37  ;;  %v5522_v63 = vsel %vm15485_vm5, %v15360_v13, %v5518_v27  ;;  %v18689_v53 = vand.u32 2147483647, %v15323_v61 }
 0x884   :  { %v5367_v51 = vadd.f32 %v5335_v56, %v13782_v43  ;;  %v5375_v5 = vadd.f32 %v5343_v16, %v18688_v57  ;;  %10584 = vtanh.f32 %v5374_v15  ;;  %v5511_v27 = vor.u32 1.1754944e-38, %v5510_v54 }
 0x885   :  { %vm15507_vm0 = vcmp.eq.f32.partialorder %v18689_v53, 8.507059e+37  ;;  %10586 = vtanh.f32 %v5365_v1  ;;  %v5477_v16 = vsel %vm15516_vm15, %v15373_v58, %v5473_v34  ;;  %v5507_v54 = vsel %vm15525_vm14, %v15385_v6, %v5503_v14 }
 0x886   :  { %v9826_v13 = vmul.f32 -1.442695, %v5367_v51  ;;  %v9828_v15 = vmul.f32 -1.442695, %v5375_v5  ;;  %10588 = vtanh.f32 %v5373_v7  ;;  %v5527_v60 = vsel %vm15451_vm7, %v15420_v18, %v5522_v63 }
 0x887   :  { %v5293_v1 = vpop.f32.mrf.mxu2  ;;  %v5446_v6 = vsel %vm15545_vm6, %v15325_v59, %v15406_v49  ;;  %v5482_v17 = vsel %vm5479_vm4, %v15442_v9, %v5477_v16  ;;  %v5622_v7 = vmul.f32 %v18701_v52, %v5497_v21  ;;  %v5401_v49 = vsel %vm15562_vm10, %v15346_v41, %v5397_v48 }
 0x888   :  { %v10581_v2 = vpop.eup %10580  ;;  %10590 = vpow2.f32 %v9826_v13  ;;  %vm18702_vm7 = vweird.f32 %v15351_v0  ;;  %v5512_v59 = vsel %vm5509_vm2, %v5511_v27, %v5507_v54  ;;  %v5421_v41 = vsel %vm15475_vm12, %v15365_v29, %v18706_v33 }
 0x889   :  { %v10583_v26 = vpop.eup %10582  ;;  %v15552_v23 = vadd.f32 1.0, %v10581_v2  ;;  %10592 = vpow2.f32 %v9828_v15  ;;  %vm15578_vm11 = vmor %vm18703_vm9, %vm18702_vm7  ;;  %v18707_v34 = vrot.slane %v15117_v40, 7  ;;  %v5451_v44 = vsel %vm15492_vm3, %v15369_v35, %v5446_v6 }
 0x88a   :  { %v15567_v18 = vadd.f32 1.0, %v10583_v26  ;;  %v10585_v30 = vpop.eup %10584  ;;  %v5431_v51 = vsel %vm15578_vm11, %v15351_v0, %v5427_v55  ;;  %v5626_v47 = vmul.f32 %v10579_v31, %v5421_v41  ;;  %v18709_v29 = vrot.slane %v15106_v20, 7 }
 0x88b   :  { %10594 = vrcp.f32 %v15552_v23  ;;  %v10587_v9 = vpop.eup %10586  ;;  %v5624_v14 = vmul.f32 %v18707_v34, %v5527_v60  ;;  %v5628_v63 = vmul.f32 %v10585_v30, %v5451_v44  ;;  %v5406_v0 = vsel %vm15507_vm0, %v15394_v3, %v5401_v49 }
 0x88c   :  { %10596 = vrcp.f32 %v15567_v18  ;;  %v10589_v5 = vpop.eup %10588  ;;  %v5621_v45 = vmul.f32 %v18709_v29, %v5482_v17  ;;  %v18710_v53 = vand.u32 2147483647, %v15327_v10  ;;  %v5623_v37 = vmul.f32 %v18711_v12, %v5512_v59 }
 0x88d   :  { %v15611_v31 = vadd.f32 %v5626_v47, %v5622_v7  ;;  %v5625_v8 = vmul.f32 %v10587_v9, %v5406_v0  ;;  %v15615_v20 = vadd.f32 %v5628_v63, %v5624_v14  ;;  %v5573_v1 = vand.u32 2147483647, %v15552_v23 }
 0x88e   :  { %v10591_v40 = vpop.eup %10590  ;;  %vm5433_vm1 = vcmp.eq.f32.partialorder %v18710_v53, 8.507059e+37  ;;  %v5575_v2 = vand.u32 2147483648, %v15552_v23  ;;  %v5603_v55 = vand.u32 2147483647, %v15567_v18  ;;  %v5605_v54 = vand.u32 2147483648, %v15567_v18 }
 0x88f   :  { %v10593_v35 = vpop.eup %10592  ;;  %v5436_v56 = vsel %vm5433_vm1, %v5435_v4, %v5431_v51  ;;  %v15613_v13 = vadd.f32 1.0, %v10591_v40  ;;  %v15619_v3 = vadd.f32 %v5625_v8, %v5621_v45  ;;  %vm5569_vm3 = vweird.f32 %v15552_v23 }
 0x890   :  { %v5627_v15 = vmul.f32 %v10589_v5, %v5436_v56  ;;  %v15617_v62 = vadd.f32 1.0, %v10593_v35  ;;  %vm5599_vm5 = vweird.f32 %v15567_v18  ;;  %vm15637_vm0 = vcmp.eq.f32.partialorder %v5573_v1, 8.507059e+37 }
 0x891   :  { %v10595_v42 = vpop.eup %10594  ;;  %10598 = vrcp.f32 %v15613_v13  ;;  %v5576_v30 = vor.u32 1.1754944e-38, %v5575_v2  ;;  %vm5604_vm14 = vcmp.eq.f32.partialorder %v5603_v55, 8.507059e+37  ;;  %v5606_v61 = vor.u32 1.1754944e-38, %v5605_v54 }
 0x892   :  { %v10597_v10 = vpop.eup %10596  ;;  %v15622_v24 = vadd.f32 %v5627_v15, %v5623_v37  ;;  %v5565_v27 = vmul.f32 %v10595_v42, %v15552_v23  ;;  %10600 = vrcp.f32 %v15617_v62  ;;  %vm5570_vm12 = vweird.f32 %v10595_v42 }
 0x893   :  { %10602 = vtanh.f32 %v15611_v31  ;;  %v5595_v48 = vmul.f32 %v10597_v10, %v15567_v18  ;;  %vm5600_vm8 = vweird.f32 %v10597_v10  ;;  %vm5571_vm15 = vmor %vm5569_vm3, %vm5570_vm12  ;;  %v5558_v41 = vand.u32 2147483647, %v15613_v13 }
 0x894   :  { %10604 = vtanh.f32 %v15615_v20  ;;  %v5566_v16 = vsub.f32 1.0, %v5565_v27  ;;  %vm5601_vm6 = vmor %vm5599_vm5, %vm5600_vm8  ;;  %v5560_v34 = vand.u32 2147483648, %v15613_v13  ;;  %v5590_v47 = vand.u32 2147483648, %v15617_v62 }
 0x895   :  { %10606 = vtanh.f32 %v15619_v3  ;;  %v5596_v21 = vsub.f32 1.0, %v5595_v48  ;;  %v5588_v63 = vand.u32 2147483647, %v15617_v62  ;;  %vm5554_vm10 = vweird.f32 %v15613_v13 }
 0x896   :  { %10608 = vtanh.f32 %v15622_v24  ;;  %v5567_v26 = vmul.f32 %v10595_v42, %v5566_v16  ;;  %v5561_v37 = vor.u32 1.1754944e-38, %v5560_v34  ;;  %vm5584_vm7 = vweird.f32 %v15617_v62  ;;  %v18723_v34 = vld [vmem:[#allocation74_spill] sm:$0xff] }
 0x897   :  { %v10599_v58 = vpop.eup %10598  ;;  %v5597_v60 = vmul.f32 %v10597_v10, %v5596_v21  ;;  %vm5559_vm9 = vcmp.eq.f32.partialorder %v5558_v41, 8.507059e+37  ;;  %v5591_v15 = vor.u32 1.1754944e-38, %v5590_v47  ;;  %vm5589_vm1 = vcmp.eq.f32.partialorder %v5588_v63, 8.507059e+37  ;;  %v18728_v47 = vld [vmem:[#allocation79_spill] sm:$0xff]  ;;  %v18735_v63 = vld [vmem:[#allocation85_spill] sm:$0xff] }
 0x898   :  { %v10601_v6 = vpop.eup %10600  ;;  %v5568_v22 = vadd.f32 %v10595_v42, %v5567_v26  ;;  %v5550_v52 = vmul.f32 %v10599_v58, %v15613_v13  ;;  %vm5555_vm4 = vweird.f32 %v10599_v58  ;;  %vm18714_vm12 = vcmask 1041409  }
 0x899   :  { %v10603_v7 = vpop.eup %10602  ;;  %v5598_v49 = vadd.f32 %v10597_v10, %v5597_v60  ;;  %v5580_v23 = vmul.f32 %v10601_v6, %v15617_v62  ;;  %vm5585_vm13 = vweird.f32 %v10601_v6  ;;  %vm5556_vm2 = vmor %vm5554_vm10, %vm5555_vm4  ;;  %vm18718_vm8 = vcmask 1043459  }
 0x89a   :  { %v10605_v59 = vpop.eup %10604  ;;  %v5572_v9 = vsel %vm5571_vm15, %v10595_v42, %v5568_v22  ;;  %v5551_v33 = vsub.f32 1.0, %v5550_v52  ;;  %vm5586_vm11 = vmor %vm5584_vm7, %vm5585_vm13  ;;  %vm18722_vm15 = vcmask 1047559  }
 0x89b   :  { %v10607_v14 = vpop.eup %10606  ;;  %v5577_v51 = vsel %vm15637_vm0, %v5576_v30, %v5572_v9  ;;  %v5602_v5 = vsel %vm5601_vm6, %v10597_v10, %v5598_v49  ;;  %v5581_v44 = vsub.f32 1.0, %v5580_v23  ;;  %vm18715_vm3 = vmmov %vm18714_vm12  ;;  %vm18719_vm0 = vcmask 1045509   ;;  %v18720_v9 = vld [vmem:[#allocation93_spill] sm:$0xff] }
 0x89c   :  { %v10609_v46 = vpop.eup %10608  ;;  %v5607_v4 = vsel %vm5604_vm14, %v5606_v61, %v5602_v5  ;;  %v5638_v29 = vmul.f32 %v10603_v7, %v5577_v51  ;;  %v5552_v45 = vmul.f32 %v10599_v58, %v5551_v33  ;;  %vm18716_vm5 = vmmov %vm18715_vm3  ;;  %v18717_v61 = vld [vmem:[#allocation72_spill] sm:$0xff]  ;;  %v18721_v33 = vld [vmem:[#allocation105_spill] sm:$0xff] }
 0x89d   :  { %v5640_v18 = vmul.f32 %v10605_v59, %v5607_v4  ;;  %v5582_v40 = vmul.f32 %v10601_v6, %v5581_v44  ;;  %v18725_v51 = vld [vmem:[#allocation96_spill] sm:$0xff]  ;;  %v18726_v5 = vld [vmem:[#allocation109_spill] sm:$0xff] }
 0x89e   :  { %5646 = vst.sshfl [vmem:[#allocation1 + $0x8] sm:$0xff pattern:$0x73625140] %v5638_v29  ;;  %v5664_v0 = vpack.c.bf16 %v5638_v29, %v5638_v29  ;;  %v5553_v53 = vadd.f32 %v10599_v58, %v5552_v45  ;;  %v18727_v44 = vld [vmem:[#allocation77_spill] sm:$0xff]  ;;  %v18730_v4 = vld [vmem:[#allocation112_spill] sm:$0xff]  ;;  %v18732_v45 = vld [vmem:[#allocation83_spill] sm:$0xff] }
 0x89f   :  { %5650 = vst.sshfl [vmem:[#allocation1 + $0x28] sm:$0xff pattern:$0x73625140] %v5640_v18  ;;  %v5666_v12 = vpack.c.bf16 %v5640_v18, %v5640_v18  ;;  %v5583_v35 = vadd.f32 %v10601_v6, %v5582_v40  ;;  %v18731_v29 = vld [vmem:[#allocation81_spill] sm:$0xff]  ;;  %v18733_v18 = vld [vmem:[#allocation104_spill] sm:$0xff] }
 0x8a0   :  { %v5672_v56 = vunpack.c.l.b16 %v5664_v0  ;;  %v5557_v8 = vsel %vm5556_vm2, %v10599_v58, %v5553_v53  ;;  %v18734_v40 = vld [vmem:[#allocation116_spill] sm:$0xff]  ;;  %v18736_v0 = vld [vmem:[#allocation87_spill] sm:$0xff] }
 0x8a1   :  { %v5674_v42 = vunpack.c.l.b16 %v5666_v12  ;;  %v5562_v10 = vsel %vm5559_vm9, %v5561_v37, %v5557_v8  ;;  %v5587_v27 = vsel %vm5586_vm11, %v10601_v6, %v5583_v35  ;;  %v18737_v53 = vld [vmem:[#allocation108_spill] sm:$0xff]  ;;  %v18740_v35 = vld [vmem:[#allocation90_spill] sm:$0xff]  ;;  %v18742_v8 = vld [vmem:[#allocation123_spill] sm:$0xff] }
 0x8a2   :  { %v5678_v48 = vrot.slane %v5672_v56, 3  ;;  %v5592_v16 = vsel %vm5589_vm1, %v5591_v15, %v5587_v27  ;;  %v5637_v13 = vmul.f32 %v10607_v14, %v5562_v10  ;;  %v18724_v14 = vld [vmem:[#allocation75_spill] sm:$0xff]  ;;  %v18738_v12 = vld [vmem:[#allocation120_spill] sm:$0xff]  ;;  %v18746_v27 = vld [vmem:[#allocation94_spill] sm:$0xff] }
 0x8a3   :  { %v5679_v1 = vrot.slane %v5674_v42, 2  ;;  %v5639_v2 = vmul.f32 %v10609_v46, %v5592_v16  ;;  %v18729_v46 = vld [vmem:[#allocation101_spill] sm:$0xff]  ;;  %v18739_v37 = vld [vmem:[#allocation88_spill] sm:$0xff]  ;;  %v18741_v56 = vld [vmem:[#allocation111_spill] sm:$0xff] }
 0x8a4   :  { %5645 = vst.sshfl [vmem:[#allocation1] sm:$0xff pattern:$0x73625140] %v5637_v13  ;;  %v5663_v21 = vpack.c.bf16 %v5637_v13, %v5637_v13  ;;  %v18743_v15 = vld [vmem:[#allocation100_spill] sm:$0xff]  ;;  %v18744_v42 = vld [vmem:[#allocation134_spill] sm:$0xff]  ;;  %v18749_v13 = vld [vmem:[#allocation95_spill] sm:$0xff] }
 0x8a5   :  { %v5680_v55 = vsel %vm18714_vm12, %v5679_v1, %v5678_v48  ;;  %5649 = vst.sshfl [vmem:[#allocation1 + $0x20] sm:$0xff pattern:$0x73625140] %v5639_v2  ;;  %v5665_v62 = vpack.c.bf16 %v5639_v2, %v5639_v2  ;;  %v18745_v10 = vld [vmem:[#allocation92_spill] sm:$0xff]  ;;  %v18747_v48 = vld [vmem:[#allocation103_spill] sm:$0xff]  ;;  %v18750_v1 = vld [vmem:[#allocation98_spill] sm:$0xff] }
 0x8a6   :  { %v15655_v54 = vpack.c.b16 %v5680_v55, %v5680_v55  ;;  %v5671_v26 = vunpack.c.l.b16 %v5663_v21  ;;  %v18748_v16 = vld [vmem:[#allocation136_spill] sm:$0xff]  ;;  %v18751_v2 = vld [vmem:[#allocation113_spill] sm:$0xff]  ;;  %v18753_v55 = vld [vmem:[#allocation106_spill] sm:$0xff] }
 0x8a7   :  { %v5673_v58 = vunpack.c.l.b16 %v5665_v62  ;;  %v18752_v21 = vld [vmem:[#allocation125_spill] sm:$0xff]  ;;  %v18754_v62 = vld [vmem:[#allocation138_spill] sm:$0xff] }
 0x8a8   :  { %v5675_v60 = vrot.slane %v5671_v26, 3  ;;  %5706 = vmatmul.bf16.vlgmr.msrb.gmra.mxu2 %v15655_v54  ;;  %5732 = vmatmul.bf16.vlgmr.msrb.gmra.mxu0 %v15655_v54  ;;  %v18755_v26 = vld [vmem:[#allocation117_spill] sm:$0xff] }
 0x8a9   :  { %v5676_v6 = vrot.slane %v5673_v58, 2  ;;  %5802 = vmatpush.bf16.msrb.mxu2 %v18232_v32  ;;  %5828 = vmatpush.bf16.msrb.mxu0 %v18536_v25  ;;  %v18756_v58 = vld [vmem:[#allocation128_spill] sm:$0xff] }
 0x8ab   :  { %v5677_v22 = vsel %vm18715_vm3, %v5676_v6, %v5675_v60  ;;  %v5648_v17 = vld [vmem:[#allocation1 + $0x1] ss:$4 sm:$0xff] }
 0x8ac   :  { %v15662_v30 = vpack.c.b16 %v5677_v22, %v5677_v22  ;;  %v5653_v52 = vrot.slane %v5648_v17, 1  ;;  %v5652_v7 = vld [vmem:[#allocation1 + $0x21] ss:$4 sm:$0xff] }
 0x8ad   :  { %5803 = vmatpush.bf16.msrb.mxu2 %v18543_v50  ;;  %5829 = vmatpush.bf16.msrb.mxu0 %v18544_v19  ;;  %v18757_v60 = vld [vmem:[#allocation110_spill] sm:$0xff]  ;;  %v18758_v6 = vld [vmem:[#allocation140_spill] sm:$0xff]  ;;  %v18759_v22 = vld [vmem:[#allocation121_spill] sm:$0xff] }
 0x8ae   :  { %5693 = vmatmul.bf16.vlgmr.msra.gmra.mxu1 %v15662_v30  ;;  %5719 = vmatmul.bf16.vlgmr.msrb.gmra.mxu3 %v15662_v30  ;;  %v5656_v49 = vsel %vm18716_vm5, %v5652_v7, %v5653_v52  ;;  %v18760_v17 = vld [vmem:[#allocation130_spill] sm:$0xff] }
 0x8af   :  { %5789 = vmatpush.bf16.msra.mxu1 %v18216_v39  ;;  %5815 = vmatpush.bf16.msrb.mxu3 %v18717_v61  ;;  %v5657_v23 = vsel %vm18718_vm8, %v5652_v7, %v5656_v49  ;;  %v18761_v52 = vld [vmem:[#allocation114_spill] sm:$0xff]  ;;  %v18763_v49 = vld [vmem:[#allocation124_spill] sm:$0xff] }
 0x8b0   :  { %v5658_v59 = vsel %vm18719_vm0, %v5652_v7, %v5657_v23  ;;  %v18764_v23 = vld [vmem:[#allocation132_spill] sm:$0xff] }
 0x8b1   :  { %5804 = vmatpush.bf16.msrb.mxu2 %v18720_v9  ;;  %5830 = vmatpush.bf16.msrb.mxu0 %v18721_v33  ;;  %v5659_v41 = vsel %vm18722_vm15, %v5652_v7, %v5658_v59  ;;  %v18762_v7 = vld [vmem:[#allocation142_spill] sm:$0xff] }
 0x8b2   :  { %5662 = vst [vmem:[#allocation2 + $0xc] sm:$0xf] %v5659_v41  ;;  %v18765_v59 = vld [vmem:[#allocation118_spill] sm:$0xff]  ;;  %v18766_v41 = vld [vmem:[#allocation143_spill] sm:$0xff] }
 0x8b3   :  { %5790 = vmatpush.bf16.msra.mxu1 %v18723_v34  ;;  %5816 = vmatpush.bf16.msrb.mxu3 %v18724_v14 }
 0x8b5   :  { %5805 = vmatpush.bf16.msrb.mxu2 %v18725_v51  ;;  %5831 = vmatpush.bf16.msrb.mxu0 %v18726_v5 }
 0x8b7   :  { %5791 = vmatpush.bf16.msra.mxu1 %v18727_v44  ;;  %5817 = vmatpush.bf16.msrb.mxu3 %v18728_v47 }
 0x8b8   :  { %5758 = vmatmul.bf16.vlgmr.msra.gmra.mxu2 %v15655_v54  ;;  %5784 = vmatmul.bf16.vlgmr.msra.gmra.mxu0 %v15655_v54 }
 0x8b9   :  { %5806 = vmatpush.bf16.msrb.mxu2 %v18729_v46  ;;  %5832 = vmatpush.bf16.msrb.mxu0 %v18730_v4 }
 0x8bb   :  { %5792 = vmatpush.bf16.msra.mxu1 %v18731_v29  ;;  %5818 = vmatpush.bf16.msrb.mxu3 %v18732_v45 }
 0x8bd   :  { %5807 = vmatpush.bf16.msrb.mxu2 %v18733_v18  ;;  %5833 = vmatpush.bf16.msrb.mxu0 %v18734_v40 }
 0x8be   :  { %5745 = vmatmul.bf16.vlgmr.msrb.gmra.mxu1 %v15662_v30  ;;  %5771 = vmatmul.bf16.vlgmr.msra.gmra.mxu3 %v15662_v30 }
 0x8bf   :  { %5793 = vmatpush.bf16.msra.mxu1 %v18735_v63  ;;  %5819 = vmatpush.bf16.msrb.mxu3 %v18736_v0 }
 0x8c1   :  { %5808 = vmatpush.bf16.msrb.mxu2 %v18737_v53  ;;  %5834 = vmatpush.bf16.msrb.mxu0 %v18738_v12 }
 0x8c3   :  { %5794 = vmatpush.bf16.msra.mxu1 %v18739_v37  ;;  %5820 = vmatpush.bf16.msrb.mxu3 %v18740_v35 }
 0x8c5   :  { %5809 = vmatpush.bf16.msrb.mxu2 %v18741_v56  ;;  %5835 = vmatpush.bf16.msrb.mxu0 %v18742_v8 }
 0x8c7   :  { %5795 = vmatpush.bf16.msra.mxu1 %v18745_v10  ;;  %5821 = vmatpush.bf16.msrb.mxu3 %v18746_v27 }
 0x8c8   :  { %5810 = vmatmul.bf16.vlgmr.msrb.gmra.mxu2 %v15655_v54  ;;  %5836 = vmatmul.bf16.vlgmr.msrb.gmra.mxu0 %v15655_v54 }
 0x8c9   :  { %5854 = vmatpush.bf16.msra.mxu2 %v18743_v15  ;;  %5880 = vmatpush.bf16.msra.mxu0 %v18744_v42  ;;  %v18844_v15 = vld [vmem:[#allocation42_spill] sm:$0xff] }
 0x8cb   :  { %5796 = vmatpush.bf16.msra.mxu1 %v18749_v13  ;;  %5822 = vmatpush.bf16.msrb.mxu3 %v18750_v1 }
 0x8cd   :  { %5855 = vmatpush.bf16.msra.mxu2 %v18747_v48  ;;  %5881 = vmatpush.bf16.msra.mxu0 %v18748_v16  ;;  %v18771_v16 = vld [vmem:[#allocation129_spill] sm:$0xff] }
 0x8ce   :  { %5797 = vmatmul.bf16.vlgmr.msra.gmra.mxu1 %v15662_v30  ;;  %5823 = vmatmul.bf16.vlgmr.msrb.gmra.mxu3 %v15662_v30 }
 0x8cf   :  { %5841 = vmatpush.bf16.msrb.mxu1 %v18751_v2  ;;  %5867 = vmatpush.bf16.msra.mxu3 %v18752_v21 }
 0x8d1   :  { %5856 = vmatpush.bf16.msra.mxu2 %v18753_v55  ;;  %5882 = vmatpush.bf16.msra.mxu0 %v18754_v62  ;;  %v18767_v62 = vld [vmem:[#allocation127_spill] sm:$0xff]  ;;  %v18770_v55 = vld [vmem:[#allocation144_spill] sm:$0xff] }
 0x8d3   :  { %5842 = vmatpush.bf16.msrb.mxu1 %v18755_v26  ;;  %5868 = vmatpush.bf16.msra.mxu3 %v18756_v58 }
 0x8d5   :  { %5857 = vmatpush.bf16.msra.mxu2 %v18757_v60  ;;  %5883 = vmatpush.bf16.msra.mxu0 %v18758_v6  ;;  %v18768_v60 = vld [vmem:[#allocation135_spill] sm:$0xff]  ;;  %v18769_v6 = vld [vmem:[#allocation122_spill] sm:$0xff] }
 0x8d7   :  { %5843 = vmatpush.bf16.msrb.mxu1 %v18759_v22  ;;  %5869 = vmatpush.bf16.msra.mxu3 %v18760_v17 }
 0x8d9   :  { %5858 = vmatpush.bf16.msra.mxu2 %v18761_v52  ;;  %5884 = vmatpush.bf16.msra.mxu0 %v18762_v7  ;;  %v18772_v52 = vld [vmem:[#allocation137_spill] sm:$0xff]  ;;  %v18773_v7 = vld [vmem:[#allocation126_spill] sm:$0xff] }
 0x8db   :  { %5844 = vmatpush.bf16.msrb.mxu1 %v18763_v49  ;;  %5870 = vmatpush.bf16.msra.mxu3 %v18764_v23  ;;  %v18774_v49 = vld [vmem:[#allocation145_spill] sm:$0xff]  ;;  %v18775_v23 = vld [vmem:[#allocation6_spill] sm:$0xff] }
 0x8dd   :  { %5859 = vmatpush.bf16.msra.mxu2 %v18765_v59  ;;  %5885 = vmatpush.bf16.msra.mxu0 %v18766_v41  ;;  %v18776_v59 = vld [vmem:[#allocation4_spill] sm:$0xff]  ;;  %v18777_v41 = vld [vmem:[#allocation131_spill] sm:$0xff] }
 0x8df   :  { %5845 = vmatpush.bf16.msrb.mxu1 %v18767_v62  ;;  %5871 = vmatpush.bf16.msra.mxu3 %v18768_v60  ;;  %v18778_v62 = vld [vmem:[#allocation139_spill] sm:$0xff] }
 0x8e1   :  { %5860 = vmatpush.bf16.msra.mxu2 %v18769_v6  ;;  %5886 = vmatpush.bf16.msra.mxu0 %v18770_v55  ;;  %v18779_v55 = vld [vmem:[#allocation7_spill] sm:$0xff]  ;;  %v18780_v6 = vld [vmem:[#allocation5_spill] sm:$0xff] }
 0x8e3   :  { %5846 = vmatpush.bf16.msrb.mxu1 %v18771_v16  ;;  %5872 = vmatpush.bf16.msra.mxu3 %v18772_v52  ;;  %v18781_v52 = vld [vmem:[#allocation133_spill] sm:$0xff] }
 0x8e5   :  { %5861 = vmatpush.bf16.msra.mxu2 %v18773_v7  ;;  %5887 = vmatpush.bf16.msra.mxu0 %v18774_v49  ;;  %v18782_v7 = vld [vmem:[#allocation141_spill] sm:$0xff]  ;;  %v18783_v49 = vld [vmem:[#allocation10_spill] sm:$0xff] }
 0x8e7   :  { %5847 = vmatpush.bf16.msrb.mxu1 %v18777_v41  ;;  %5873 = vmatpush.bf16.msra.mxu3 %v18778_v62  ;;  %v18786_v62 = vld [vmem:[#allocation16_spill] sm:$0xff] }
 0x8e8   :  { %5862 = vmatmul.bf16.vlgmr.msra.gmra.mxu2 %v15655_v54  ;;  %5888 = vmatmul.bf16.vlgmr.msra.gmra.mxu0 %v15655_v54  ;;  %v18787_v54 = vld [vmem:[#allocation12_spill] sm:$0xff] }
 0x8e9   :  { %6270 = vmatpush.bf16.msrb.mxu2 %v18775_v23  ;;  %6296 = vmatpush.bf16.msrb.mxu0 %v18776_v59  ;;  %v18784_v23 = vld [vmem:[#allocation18_spill] sm:$0xff]  ;;  %v18785_v59 = vld [vmem:[#allocation8_spill] sm:$0xff] }
 0x8ea   :  { %v18794_v41 = vld [vmem:[#allocation24_spill] sm:$0xff] }
 0x8eb   :  { %5848 = vmatpush.bf16.msrb.mxu1 %v18781_v52  ;;  %5874 = vmatpush.bf16.msra.mxu3 %v18782_v7  ;;  %v18790_v52 = vld [vmem:[#allocation20_spill] sm:$0xff]  ;;  %v18791_v7 = vld [vmem:[#allocation14_spill] sm:$0xff] }
 0x8ed   :  { %6271 = vmatpush.bf16.msrb.mxu2 %v18779_v55  ;;  %6297 = vmatpush.bf16.msrb.mxu0 %v18780_v6  ;;  %v18788_v55 = vld [vmem:[#allocation23_spill] sm:$0xff]  ;;  %v18789_v6 = vld [vmem:[#allocation9_spill] sm:$0xff] }
 0x8ee   :  { %5849 = vmatmul.bf16.vlgmr.msrb.gmra.mxu1 %v15662_v30  ;;  %5875 = vmatmul.bf16.vlgmr.msra.gmra.mxu3 %v15662_v30  ;;  %v18795_v30 = vld [vmem:[#allocation17_spill] sm:$0xff] }
 0x8ef   :  { %6257 = vmatpush.bf16.msra.mxu1 %v18783_v49  ;;  %6283 = vmatpush.bf16.msrb.mxu3 %v18784_v23  ;;  %v18792_v49 = vld [vmem:[#allocation27_spill] sm:$0xff] }
 0x8f0   :  { %v18793_v23 = vld [vmem:[#allocation11_spill] sm:$0xff] }
 0x8f1   :  { %6272 = vmatpush.bf16.msrb.mxu2 %v18785_v59  ;;  %6298 = vmatpush.bf16.msrb.mxu0 %v18786_v62  ;;  %v18796_v59 = vld [vmem:[#allocation31_spill] sm:$0xff]  ;;  %v18797_v62 = vld [vmem:[#allocation13_spill] sm:$0xff] }
 0x8f3   :  { %6258 = vmatpush.bf16.msra.mxu1 %v18787_v54  ;;  %6284 = vmatpush.bf16.msrb.mxu3 %v18788_v55  ;;  %v18798_v54 = vld [vmem:[#allocation28_spill] sm:$0xff]  ;;  %v18799_v55 = vld [vmem:[#allocation22_spill] sm:$0xff] }
 0x8f5   :  { %6273 = vmatpush.bf16.msrb.mxu2 %v18789_v6  ;;  %6299 = vmatpush.bf16.msrb.mxu0 %v18790_v52  ;;  %v18800_v6 = vld [vmem:[#allocation35_spill] sm:$0xff] }
 0x8f6   :  { %v18801_v52 = vld [vmem:[#allocation15_spill] sm:$0xff] }
 0x8f7   :  { %6259 = vmatpush.bf16.msra.mxu1 %v18791_v7  ;;  %6285 = vmatpush.bf16.msrb.mxu3 %v18792_v49  ;;  %v18802_v7 = vld [vmem:[#allocation32_spill] sm:$0xff]  ;;  %v18803_v49 = vld [vmem:[#allocation26_spill] sm:$0xff] }
 0x8f9   :  { %6274 = vmatpush.bf16.msrb.mxu2 %v18793_v23  ;;  %6300 = vmatpush.bf16.msrb.mxu0 %v18794_v41  ;;  %v18804_v23 = vld [vmem:[#allocation38_spill] sm:$0xff]  ;;  %v18805_v41 = vld [vmem:[#allocation19_spill] sm:$0xff] }
 0x8fb   :  { %6260 = vmatpush.bf16.msra.mxu1 %v18795_v30  ;;  %6286 = vmatpush.bf16.msrb.mxu3 %v18796_v59  ;;  %v18806_v30 = vld [vmem:[#allocation36_spill] sm:$0xff]  ;;  %v18807_v59 = vld [vmem:[#allocation30_spill] sm:$0xff] }
 0x8fd   :  { %6275 = vmatpush.bf16.msrb.mxu2 %v18797_v62  ;;  %6301 = vmatpush.bf16.msrb.mxu0 %v18798_v54  ;;  %v18808_v62 = vld [vmem:[#allocation41_spill] sm:$0xff]  ;;  %v18809_v54 = vld [vmem:[#allocation46_spill] sm:$0xff] }
 0x8ff   :  { %6261 = vmatpush.bf16.msra.mxu1 %v18799_v55  ;;  %6287 = vmatpush.bf16.msrb.mxu3 %v18800_v6  ;;  %v18810_v55 = vld [vmem:[#allocation40_spill] sm:$0xff]  ;;  %v18811_v6 = vld [vmem:[#allocation34_spill] sm:$0xff] }
 0x901   :  { %6276 = vmatpush.bf16.msrb.mxu2 %v18801_v52  ;;  %6302 = vmatpush.bf16.msrb.mxu0 %v18802_v7  ;;  %v18812_v52 = vld [vmem:[#allocation45_spill] sm:$0xff] }
 0x902   :  { %v18813_v7 = vld [vmem:[#allocation21_spill] sm:$0xff] }
 0x903   :  { %6262 = vmatpush.bf16.msra.mxu1 %v18803_v49  ;;  %6288 = vmatpush.bf16.msrb.mxu3 %v18804_v23  ;;  %v18814_v49 = vld [vmem:[#allocation60_spill] sm:$0xff]  ;;  %v18815_v23 = vld [vmem:[#allocation49_spill] sm:$0xff] }
 0x905   :  { %6277 = vmatpush.bf16.msrb.mxu2 %v18805_v41  ;;  %6303 = vmatpush.bf16.msrb.mxu0 %v18806_v30  ;;  %v18816_v41 = vld [vmem:[#allocation44_spill] sm:$0xff]  ;;  %v18817_v30 = vld [vmem:[#allocation25_spill] sm:$0xff] }
 0x907   :  { %6263 = vmatpush.bf16.msra.mxu1 %v18807_v59  ;;  %6289 = vmatpush.bf16.msrb.mxu3 %v18808_v62  ;;  %v18818_v59 = vld [vmem:[#allocation62_spill] sm:$0xff]  ;;  %v18819_v62 = vld [vmem:[#allocation53_spill] sm:$0xff] }
 0x909   :  { %6322 = vmatpush.bf16.msra.mxu2 %v18809_v54  ;;  %6348 = vmatpush.bf16.msra.mxu0 %v18810_v55  ;;  %v18820_v54 = vld [vmem:[#allocation48_spill] sm:$0xff]  ;;  %v18821_v55 = vld [vmem:[#allocation29_spill] sm:$0xff] }
 0x90b   :  { %6264 = vmatpush.bf16.msra.mxu1 %v18811_v6  ;;  %6290 = vmatpush.bf16.msrb.mxu3 %v18812_v52  ;;  %v18822_v6 = vld [vmem:[#allocation67_spill] sm:$0xff]  ;;  %v18823_v52 = vld [vmem:[#allocation57_spill] sm:$0xff] }
 0x90d   :  { %6323 = vmatpush.bf16.msra.mxu2 %v18815_v23  ;;  %6349 = vmatpush.bf16.msra.mxu0 %v18816_v41  ;;  %v18826_v23 = vld [vmem:[#allocation70_spill] sm:$0xff]  ;;  %v18827_v41 = vld [vmem:[#allocation59_spill] sm:$0xff] }
 0x90f   :  { %6309 = vmatpush.bf16.msrb.mxu1 %v18813_v7  ;;  %6335 = vmatpush.bf16.msra.mxu3 %v18814_v49  ;;  %v18824_v7 = vld [vmem:[#allocation52_spill] sm:$0xff]  ;;  %v18825_v49 = vld [vmem:[#allocation33_spill] sm:$0xff] }
 0x911   :  { %6324 = vmatpush.bf16.msra.mxu2 %v18819_v62  ;;  %6350 = vmatpush.bf16.msra.mxu0 %v18820_v54  ;;  %v18830_v62 = vld [vmem:[#allocation73_spill] sm:$0xff] }
 0x912   :  { %v18831_v54 = vld [vmem:[#allocation61_spill] sm:$0xff] }
 0x913   :  { %6310 = vmatpush.bf16.msrb.mxu1 %v18817_v30  ;;  %6336 = vmatpush.bf16.msra.mxu3 %v18818_v59  ;;  %v18828_v30 = vld [vmem:[#allocation54_spill] sm:$0xff]  ;;  %v18829_v59 = vld [vmem:[#allocation37_spill] sm:$0xff] }
 0x915   :  { %6325 = vmatpush.bf16.msra.mxu2 %v18823_v52  ;;  %6351 = vmatpush.bf16.msra.mxu0 %v18824_v7  ;;  %v18834_v52 = vld [vmem:[#allocation76_spill] sm:$0xff]  ;;  %v18835_v7 = vld [vmem:[#allocation66_spill] sm:$0xff] }
 0x917   :  { %6311 = vmatpush.bf16.msrb.mxu1 %v18821_v55  ;;  %6337 = vmatpush.bf16.msra.mxu3 %v18822_v6  ;;  %v18832_v55 = vld [vmem:[#allocation58_spill] sm:$0xff]  ;;  %v18833_v6 = vld [vmem:[#allocation39_spill] sm:$0xff] }
 0x919   :  { %6326 = vmatpush.bf16.msra.mxu2 %v18827_v41  ;;  %6352 = vmatpush.bf16.msra.mxu0 %v18828_v30  ;;  %v18838_v41 = vld [vmem:[#allocation80_spill] sm:$0xff]  ;;  %v18839_v30 = vld [vmem:[#allocation69_spill] sm:$0xff] }
 0x91b   :  { %6312 = vmatpush.bf16.msrb.mxu1 %v18825_v49  ;;  %6338 = vmatpush.bf16.msra.mxu3 %v18826_v23  ;;  %v18836_v49 = vld [vmem:[#allocation63_spill] sm:$0xff] }
 0x91c   :  { %v18837_v23 = vld [vmem:[#allocation43_spill] sm:$0xff] }
 0x91d   :  { %6327 = vmatpush.bf16.msra.mxu2 %v18831_v54  ;;  %6353 = vmatpush.bf16.msra.mxu0 %v18832_v55  ;;  %v18842_v54 = vld [vmem:[#allocation84_spill] sm:$0xff] }
 0x91f   :  { %6313 = vmatpush.bf16.msrb.mxu1 %v18829_v59  ;;  %6339 = vmatpush.bf16.msra.mxu3 %v18830_v62  ;;  %v18840_v59 = vld [vmem:[#allocation68_spill] sm:$0xff]  ;;  %v18841_v62 = vld [vmem:[#allocation47_spill] sm:$0xff] }
 0x921   :  { %6328 = vmatpush.bf16.msra.mxu2 %v18835_v7  ;;  %6354 = vmatpush.bf16.msra.mxu0 %v18836_v49 }
 0x923   :  { %6314 = vmatpush.bf16.msrb.mxu1 %v18833_v6  ;;  %6340 = vmatpush.bf16.msra.mxu3 %v18834_v52 }
 0x925   :  { %6329 = vmatpush.bf16.msra.mxu2 %v18839_v30  ;;  %6355 = vmatpush.bf16.msra.mxu0 %v18840_v59  ;;  %v5733_v55 = vpop.f32.mrf.mxu0 }
 0x927   :  { %6315 = vmatpush.bf16.msrb.mxu1 %v18837_v23  ;;  %6341 = vmatpush.bf16.msra.mxu3 %v18838_v41  ;;  %v18843_v41 = vld [vmem:[#allocation50_spill] sm:$0xff] }
 0x92b   :  { %6316 = vmatpush.bf16.msrb.mxu1 %v18841_v62  ;;  %6342 = vmatpush.bf16.msra.mxu3 %v18842_v54  ;;  %v5694_v6 = vpop.f32.mrf.mxu1  ;;  %v5707_v16 = vpop.f32.mrf.mxu2 }
 0x92c   :  { %v5708_v60 = vadd.f32 %v5707_v16, %v5694_v6 }
 0x92d   :  { %v5735_v52 = vpop.f32.mrf.mxu0 }
 0x92e   :  { %v5901_v48 = vrot.slane %v5708_v60, 4  ;;  %v5909_v22 = vrot.slane %v5708_v60, 5 }
 0x930   :  { %v5933_v42 = vadd.f32 %v5901_v48, %v18843_v41  ;;  %v5941_v59 = vadd.f32 %v5909_v22, %v18844_v15  ;;  %v18847_v15 = vld [vmem:[#allocation65_spill] sm:$0xff] }
 0x931   :  { %v5720_v7 = vpop.f32.mrf.mxu3 }
 0x932   :  { %v5734_v8 = vadd.f32 %v5733_v55, %v5720_v7  ;;  %v9830_v62 = vmul.f32 -1.442695, %v5933_v42  ;;  %v9832_v12 = vmul.f32 -1.442695, %v5941_v59 }
 0x933   :  { %v5696_v49 = vpop.f32.mrf.mxu1  ;;  %v5709_v17 = vpop.f32.mrf.mxu2 }
 0x934   :  { %v5902_v52 = vrot.slane %v5734_v8, 4  ;;  %10610 = vpow2.f32 %v9830_v62  ;;  %v5910_v16 = vrot.slane %v5734_v8, 5  ;;  %v18845_v17 = vld [vmem:[#allocation51_spill] sm:$0xff]  ;;  %v18848_v8 = vld [vmem:[#allocation146_spill] sm:$0xff] }
 0x935   :  { %v5785_v23 = vpop.f32.mrf.mxu0  ;;  %10612 = vpow2.f32 %v9832_v12 }
 0x936   :  { %v5934_v60 = vadd.f32 %v5902_v52, %v18845_v17 }
 0x938   :  { %v9831_v62 = vmul.f32 -1.442695, %v5934_v60 }
 0x939   :  { %v5722_v30 = vpop.f32.mrf.mxu3 }
 0x93a   :  { %v18846_v30 = vld [vmem:[#allocation82_spill] sm:$0xff]  ;;  %v10611_v7 = vpop.eup %10610  ;;  %10614 = vpow2.f32 %v9831_v62 }
 0x93b   :  { %v5746_v56 = vpop.f32.mrf.mxu1  ;;  %v5759_v54 = vpop.f32.mrf.mxu2  ;;  %v5942_v41 = vadd.f32 %v5910_v16, %v18846_v30  ;;  %v15816_v2 = vadd.f32 1.0, %v10611_v7  ;;  %v18850_v16 = vld [vmem:[#allocation56_spill] sm:$0xff] }
 0x93c   :  { %v5760_v58 = vadd.f32 %v5759_v54, %v5746_v56  ;;  %v10613_v12 = vpop.eup %10612 }
 0x93d   :  { %v5787_v26 = vpop.f32.mrf.mxu0  ;;  %v9833_v21 = vmul.f32 -1.442695, %v5942_v41  ;;  %v15820_v30 = vadd.f32 1.0, %v10613_v12  ;;  %vm5970_vm14 = vweird.f32 %v15816_v2 }
 0x93e   :  { %v5903_v6 = vrot.slane %v5760_v58, 4  ;;  %v5911_v53 = vrot.slane %v5760_v58, 5  ;;  %v18849_v58 = vld [vmem:[#allocation78_spill] sm:$0xff] }
 0x93f   :  { %10616 = vpow2.f32 %v9833_v21  ;;  %vm6000_vm3 = vweird.f32 %v15820_v30 }
 0x940   :  { %v5935_v56 = vadd.f32 %v5903_v6, %v18847_v15  ;;  %v5943_v54 = vadd.f32 %v5911_v53, %v18848_v8  ;;  %10618 = vrcp.f32 %v15816_v2  ;;  %v6006_v15 = vand.u32 2147483648, %v15820_v30 }
 0x941   :  { %v5772_v49 = vpop.f32.mrf.mxu3 }
 0x942   :  { %v5786_v48 = vadd.f32 %v5785_v23, %v5772_v49  ;;  %v9834_v52 = vmul.f32 -1.442695, %v5935_v56 }
 0x943   :  { %v5748_v22 = vpop.f32.mrf.mxu1  ;;  %v5761_v55 = vpop.f32.mrf.mxu2 }
 0x944   :  { %v5904_v42 = vrot.slane %v5786_v48, 4  ;;  %v5912_v26 = vrot.slane %v5786_v48, 5  ;;  %v9836_v55 = vmul.f32 -1.442695, %v5943_v54  ;;  %10620 = vpow2.f32 %v9834_v52 }
 0x945   :  { %v15813_v59 = vpop.f32.mrf.mxu0 }
 0x946   :  { %v5936_v23 = vadd.f32 %v5904_v42, %v18849_v58  ;;  %v5944_v49 = vadd.f32 %v5912_v26, %v18850_v16  ;;  %10622 = vpow2.f32 %v9836_v55  ;;  %v10615_v42 = vpop.eup %10614 }
 0x947   :  { %10624 = vrcp.f32 %v15820_v30  ;;  %v10617_v7 = vpop.eup %10616  ;;  %v15828_v12 = vadd.f32 1.0, %v10615_v42 }
 0x948   :  { %v9835_v60 = vmul.f32 -1.442695, %v5936_v23  ;;  %v9837_v41 = vmul.f32 -1.442695, %v5944_v49  ;;  %v15824_v56 = vpop.eup %10618  ;;  %v15832_v49 = vadd.f32 1.0, %v10617_v7 }
 0x949   :  { %v5774_v22 = vpop.f32.mrf.mxu3  ;;  %v5991_v18 = vand.u32 2147483648, %v15828_v12  ;;  %vm5971_vm6 = vweird.f32 %v15824_v56 }
 0x94a   :  { %10626 = vpow2.f32 %v9835_v60  ;;  %v10621_v21 = vpop.eup %10620  ;;  %vm15906_vm4 = vmor %vm5970_vm14, %vm5971_vm6 }
 0x94b   :  { %v5811_v6 = vpop.f32.mrf.mxu2  ;;  %v5798_v53 = vpop.f32.mrf.mxu1  ;;  %10628 = vpow2.f32 %v9837_v41  ;;  %v15834_v55 = vadd.f32 1.0, %v10621_v21  ;;  %v5966_v41 = vmul.f32 %v15824_v56, %v15816_v2  ;;  %v15899_v35 = vor.u32 1.1754944e-38, %v5991_v18 }
 0x94c   :  { %v10623_v54 = vpop.eup %10622  ;;  %10630 = vrcp.f32 %v15828_v12  ;;  %v5812_v13 = vadd.f32 %v5811_v6, %v5798_v53 }
 0x94d   :  { %v5839_v48 = vpop.f32.mrf.mxu0  ;;  %v15830_v52 = vpop.eup %10624  ;;  %10632 = vrcp.f32 %v15832_v49  ;;  %vm6046_vm13 = vweird.f32 %v15834_v55 }
 0x94e   :  { %v15838_v48 = vadd.f32 1.0, %v10623_v54  ;;  %10634 = vrcp.f32 %v15834_v55  ;;  %v5905_v46 = vrot.slane %v5812_v13, 4  ;;  %v5913_v5 = vrot.slane %v5812_v13, 5 }
 0x94f   :  { %vm6001_vm11 = vweird.f32 %v15830_v52 }
 0x950   :  { %v10627_v22 = vpop.eup %10626  ;;  %10636 = vrcp.f32 %v15838_v48  ;;  %v6082_v4 = vand.u32 2147483648, %v15838_v48  ;;  %vm6076_vm10 = vweird.f32 %v15838_v48  ;;  %v6080_v13 = vand.u32 2147483647, %v15838_v48 }
 0x951   :  { %v15826_v26 = vpop.f32.mrf.mxu3  ;;  %v10629_v60 = vpop.eup %10628  ;;  %v15842_v42 = vadd.f32 1.0, %v10627_v22  ;;  %v5976_v22 = vand.u32 2147483648, %v15816_v2 }
 0x952   :  { %v15847_v7 = vadd.f32 1.0, %v10629_v60  ;;  %v15851_v54 = vpop.eup %10630  ;;  %v5838_v10 = vadd.f32 %v15813_v59, %v15826_v26  ;;  %vm15956_vm5 = vcmp.eq.f32.partialorder %v6080_v13, 8.507059e+37 }
 0x953   :  { %v5813_v62 = vpop.f32.mrf.mxu2  ;;  %v5800_v23 = vpop.f32.mrf.mxu1  ;;  %10638 = vrcp.f32 %v15842_v42  ;;  %v5981_v6 = vmul.f32 %v15851_v54, %v15828_v12  ;;  %vm6061_vm2 = vweird.f32 %v15842_v42  ;;  %vm5986_vm12 = vweird.f32 %v15851_v54 }
 0x954   :  { %v5996_v62 = vmul.f32 %v15830_v52, %v15820_v30  ;;  %v5967_v23 = vsub.f32 1.0, %v5966_v41  ;;  %10640 = vrcp.f32 %v15847_v7  ;;  %v15856_v16 = vpop.eup %10632  ;;  %v6052_v41 = vand.u32 2147483648, %v15834_v55 }
 0x955   :  { %v15859_v58 = vpop.eup %10634  ;;  %v15884_v53 = vmul.f32 %v15856_v16, %v15832_v49  ;;  %v5982_v63 = vsub.f32 1.0, %v5981_v6  ;;  %v15925_v6 = vor.u32 1.1754944e-38, %v6082_v4  ;;  %vm6091_vm9 = vweird.f32 %v15847_v7 }
 0x956   :  { %v5997_v8 = vsub.f32 1.0, %v5996_v62  ;;  %v5968_v60 = vmul.f32 %v15824_v56, %v5967_v23  ;;  %v15865_v1 = vpop.eup %10636  ;;  %v15870_v23 = vor.u32 1.1754944e-38, %v5976_v22  ;;  %v15921_v9 = vor.u32 1.1754944e-38, %v6052_v41 }
 0x957   :  { %v6072_v40 = vmul.f32 %v15865_v1, %v15838_v48  ;;  %v6012_v18 = vsub.f32 1.0, %v15884_v53  ;;  %v5937_v53 = vadd.f32 %v5905_v46, %v18677_v11  ;;  %v6067_v41 = vand.u32 2147483648, %v15842_v42 }
 0x958   :  { %v5998_v27 = vmul.f32 %v15830_v52, %v5997_v8  ;;  %v15887_v22 = vadd.f32 %v15824_v56, %v5968_v60  ;;  %v15935_v4 = vmul.f32 %v15851_v54, %v5982_v63  ;;  %vm6047_vm7 = vweird.f32 %v15859_v58 }
 0x959   :  { %v5826_v21 = vpop.f32.mrf.mxu3  ;;  %v15878_v62 = vpop.eup %10638  ;;  %v6073_v45 = vsub.f32 1.0, %v6072_v40  ;;  %v5945_v40 = vadd.f32 %v5913_v5, %v18492_v36  ;;  %v5906_v5 = vrot.slane %v5838_v10, 4  ;;  %10642 = vtanh.f32 %v5937_v53  ;;  %vm15973_vm6 = vmor %vm6046_vm13, %vm6047_vm7 }
 0x95a   :  { %v15874_v21 = vor.u32 1.1754944e-38, %v6006_v15  ;;  %v15890_v8 = vpop.eup %10640  ;;  %v6042_v15 = vmul.f32 %v15859_v58, %v15834_v55  ;;  %v6057_v37 = vmul.f32 %v15878_v62, %v15842_v42  ;;  %v15911_v0 = vadd.f32 %v15830_v52, %v5998_v27 }
 0x95b   :  { %v6087_v60 = vmul.f32 %v15890_v8, %v15847_v7  ;;  %v6050_v27 = vand.u32 2147483647, %v15834_v55  ;;  %vm6077_vm0 = vweird.f32 %v15865_v1  ;;  %vm6062_vm8 = vweird.f32 %v15878_v62 }
 0x95c   :  { %v6043_v33 = vsub.f32 1.0, %v6042_v15  ;;  %v6058_v15 = vsub.f32 1.0, %v6057_v37  ;;  %v5914_v37 = vrot.slane %v5838_v10, 5  ;;  %vm15990_vm13 = vmor %vm6076_vm10, %vm6077_vm0  ;;  %vm6092_vm7 = vweird.f32 %v15890_v8 }
 0x95d   :  { %v6088_v44 = vsub.f32 1.0, %v6087_v60  ;;  %vm15949_vm1 = vcmp.eq.f32.partialorder %v6050_v27, 8.507059e+37  ;;  %vm16021_vm0 = vmor %vm6061_vm2, %vm6062_vm8 }
 0x95e   :  { %v6044_v11 = vmul.f32 %v15859_v58, %v6043_v33  ;;  %v15947_v33 = vor.u32 1.1754944e-38, %v6067_v41  ;;  %vm16050_vm2 = vmor %vm6000_vm3, %vm6001_vm11  ;;  %vm18878_vm11 = vweird.f32 %v15828_v12 }
 0x95f   :  { %v6089_v26 = vmul.f32 %v15890_v8, %v6088_v44  ;;  %v6013_v44 = vmul.f32 %v15856_v16, %v6012_v18 }
 0x960   :  { %v6045_v10 = vadd.f32 %v15859_v58, %v6044_v11 }
 0x962   :  { %v6049_v48 = vsel %vm15973_vm6, %v15859_v58, %v6045_v10  ;;  %v6095_v58 = vand.u32 2147483647, %v15847_v7  ;;  %vm16030_vm6 = vmor %vm6091_vm9, %vm6092_vm7 }
 0x963   :  { %v6054_v55 = vsel %vm15949_vm1, %v15921_v9, %v6049_v48  ;;  %vm16067_vm1 = vmor %vm18878_vm11, %vm5986_vm12  ;;  %vm18883_vm12 = vweird.f32 %v15832_v49 }
 0x964   :  { %vm6096_vm3 = vcmp.eq.f32.partialorder %v6095_v58, 8.507059e+37 }
 0x965   :  { %v15876_v17 = vpop.f32.mrf.mxu0 }
 0x96b   :  { %v5850_v29 = vpop.f32.mrf.mxu1  ;;  %v5863_v19 = vpop.f32.mrf.mxu2 }
 0x96c   :  { %v5864_v50 = vadd.f32 %v5863_v19, %v5850_v29  ;;  %v6074_v19 = vmul.f32 %v15865_v1, %v6073_v45  ;;  %v6097_v29 = vand.u32 2147483648, %v15847_v7  ;;  %v6014_v7 = vadd.f32 %v15856_v16, %v6013_v44 }
 0x96d   :  { %v5891_v47 = vpop.f32.mrf.mxu0  ;;  %v18881_v44 = vrot.slane %v15619_v3, 7  ;;  %v18886_v3 = vsel %vm15906_vm4, %v15824_v56, %v15887_v22  ;;  %v18888_v56 = vand.u32 2147483648, %v15832_v49 }
 0x96e   :  { %v5907_v25 = vrot.slane %v5864_v50, 4  ;;  %v5915_v46 = vrot.slane %v5864_v50, 5  ;;  %v6059_v50 = vmul.f32 %v15878_v62, %v6058_v15  ;;  %v6075_v53 = vadd.f32 %v15865_v1, %v6074_v19 }
 0x96f   :  { %v5946_v19 = vadd.f32 %v5914_v37, %v18503_v28  ;;  %v6090_v37 = vadd.f32 %v15890_v8, %v6089_v26  ;;  %v6065_v26 = vand.u32 2147483647, %v15842_v42  ;;  %v5984_v42 = vadd.f32 %v15851_v54, %v15935_v4 }
 0x970   :  { %v5939_v47 = vadd.f32 %v5907_v25, %v13782_v43  ;;  %v5947_v63 = vadd.f32 %v5915_v46, %v18688_v57  ;;  %v18857_v46 = vld [vmem:[#allocation107_spill] sm:$0xff]  ;;  %v6022_v22 = vor.u32 1.1754944e-38, %v18888_v56 }
 0x971   :  { %v5876_v59 = vpop.f32.mrf.mxu3  ;;  %v5938_v57 = vadd.f32 %v5906_v5, %v18857_v46  ;;  %v6060_v5 = vadd.f32 %v15878_v62, %v6059_v50  ;;  %vm6066_vm9 = vcmp.eq.f32.partialorder %v6065_v26, 8.507059e+37  ;;  %v18891_v26 = vrot.slane %v15615_v20, 7 }
 0x972   :  { %v9838_v60 = vmul.f32 -1.442695, %v5939_v47  ;;  %v9840_v27 = vmul.f32 -1.442695, %v5947_v63  ;;  %v5890_v15 = vadd.f32 %v15876_v17, %v5876_v59  ;;  %v18860_v17 = vand.u32 2147483647, %v15816_v2 }
 0x973   :  { %v5852_v13 = vpop.f32.mrf.mxu1  ;;  %v5865_v41 = vpop.f32.mrf.mxu2  ;;  %v18865_v2 = vand.u32 2147483647, %v15820_v30 }
 0x974   :  { %10644 = vpow2.f32 %v9838_v60  ;;  %v5908_v47 = vrot.slane %v5890_v15, 4  ;;  %v5916_v63 = vrot.slane %v5890_v15, 5  ;;  %vm15980_vm15 = vcmp.eq.f32.partialorder %v18860_v17, 8.507059e+37  ;;  %v18868_v60 = vld [vmem:[#allocation119_spill] sm:$0xff]  ;;  %v10643_v15 = vpop.eup %10642 }
 0x975   :  { %10646 = vpow2.f32 %v9840_v27  ;;  %vm15997_vm14 = vcmp.eq.f32.partialorder %v18865_v2, 8.507059e+37  ;;  %v6079_v13 = vsel %vm15990_vm13, %v15865_v1, %v6075_v53  ;;  %v18869_v41 = vand.u32 2147483647, %v15828_v12 }
 0x976   :  { %v5940_v50 = vadd.f32 %v5908_v47, %v13863_v38  ;;  %v5948_v27 = vadd.f32 %v5916_v63, %v18868_v60  ;;  %10648 = vtanh.f32 %v5945_v40  ;;  %v6098_v53 = vor.u32 1.1754944e-38, %v6097_v29 }
 0x977   :  { %vm16012_vm10 = vcmp.eq.f32.partialorder %v18869_v41, 8.507059e+37  ;;  %10650 = vtanh.f32 %v5938_v57  ;;  %v6064_v63 = vsel %vm16021_vm0, %v15878_v62, %v6060_v5  ;;  %v6094_v29 = vsel %vm16030_vm6, %v15890_v8, %v6090_v37 }
 0x978   :  { %v9839_v1 = vmul.f32 -1.442695, %v5940_v50  ;;  %v9841_v40 = vmul.f32 -1.442695, %v5948_v27  ;;  %10652 = vtanh.f32 %v5946_v19  ;;  %v6084_v9 = vsel %vm15956_vm5, %v15925_v6, %v6079_v13 }
 0x979   :  { %v5878_v57 = vpop.f32.mrf.mxu3  ;;  %v6003_v8 = vsel %vm16050_vm2, %v15830_v52, %v15911_v0  ;;  %v6069_v45 = vsel %vm6066_vm9, %v15947_v33, %v6064_v63  ;;  %v6193_v19 = vmul.f32 %v18881_v44, %v6054_v55  ;;  %v5988_v0 = vsel %vm16067_vm1, %v15851_v54, %v5984_v42 }
 0x97a   :  { %v10645_v11 = vpop.eup %10644  ;;  %10654 = vpow2.f32 %v9839_v1  ;;  %vm18882_vm5 = vweird.f32 %v15856_v16  ;;  %v6099_v52 = vsel %vm6096_vm3, %v6098_v53, %v6094_v29  ;;  %v5978_v54 = vsel %vm15980_vm15, %v15870_v23, %v18886_v3 }
 0x97b   :  { %v10647_v2 = vpop.eup %10646  ;;  %v16057_v4 = vadd.f32 1.0, %v10645_v11  ;;  %10656 = vpow2.f32 %v9841_v40  ;;  %vm16083_vm8 = vmor %vm18883_vm12, %vm18882_vm5  ;;  %v18887_v5 = vrot.slane %v15622_v24, 7  ;;  %v6008_v51 = vsel %vm15997_vm14, %v15874_v21, %v6003_v8 }
 0x97c   :  { %v16072_v6 = vadd.f32 1.0, %v10647_v2  ;;  %v10649_v25 = vpop.eup %10648  ;;  %v6018_v50 = vsel %vm16083_vm8, %v15856_v16, %v6014_v7  ;;  %v6197_v48 = vmul.f32 %v10643_v15, %v5978_v54  ;;  %v18889_v23 = vrot.slane %v15611_v31, 7 }
 0x97d   :  { %10658 = vrcp.f32 %v16057_v4  ;;  %v10651_v33 = vpop.eup %10650  ;;  %v6195_v37 = vmul.f32 %v18887_v5, %v6084_v9  ;;  %v6199_v13 = vmul.f32 %v10649_v25, %v6008_v51  ;;  %v5993_v16 = vsel %vm16012_vm10, %v15899_v35, %v5988_v0 }
 0x97e   :  { %10660 = vrcp.f32 %v16072_v6  ;;  %v10653_v27 = vpop.eup %10652  ;;  %v6194_v18 = vmul.f32 %v18889_v23, %v6069_v45  ;;  %v18890_v41 = vand.u32 2147483647, %v15832_v49  ;;  %v6196_v59 = vmul.f32 %v18891_v26, %v6099_v52 }
 0x97f   :  { %v16116_v15 = vadd.f32 %v6197_v48, %v6193_v19  ;;  %v6198_v58 = vmul.f32 %v10651_v33, %v5993_v16  ;;  %v16120_v31 = vadd.f32 %v6199_v13, %v6195_v37  ;;  %v6130_v57 = vand.u32 2147483647, %v16057_v4 }
 0x980   :  { %v10655_v24 = vpop.eup %10654  ;;  %vm6020_vm4 = vcmp.eq.f32.partialorder %v18890_v41, 8.507059e+37  ;;  %v6132_v11 = vand.u32 2147483648, %v16057_v4  ;;  %v6160_v7 = vand.u32 2147483647, %v16072_v6  ;;  %v6162_v29 = vand.u32 2147483648, %v16072_v6 }
 0x981   :  { %v10657_v21 = vpop.eup %10656  ;;  %v6023_v47 = vsel %vm6020_vm4, %v6022_v22, %v6018_v50  ;;  %v16118_v1 = vadd.f32 1.0, %v10655_v24  ;;  %v16124_v35 = vadd.f32 %v6198_v58, %v6194_v18  ;;  %vm6126_vm14 = vweird.f32 %v16057_v4 }
 0x982   :  { %v6200_v40 = vmul.f32 %v10653_v27, %v6023_v47  ;;  %v16122_v10 = vadd.f32 1.0, %v10657_v21  ;;  %vm6156_vm13 = vweird.f32 %v16072_v6  ;;  %vm16142_vm10 = vcmp.eq.f32.partialorder %v6130_v57, 8.507059e+37 }
 0x983   :  { %v10659_v17 = vpop.eup %10658  ;;  %10662 = vrcp.f32 %v16118_v1  ;;  %v6133_v25 = vor.u32 1.1754944e-38, %v6132_v11  ;;  %vm6161_vm6 = vcmp.eq.f32.partialorder %v6160_v7, 8.507059e+37  ;;  %v6163_v12 = vor.u32 1.1754944e-38, %v6162_v29 }
 0x984   :  { %v10661_v49 = vpop.eup %10660  ;;  %v16127_v20 = vadd.f32 %v6200_v40, %v6196_v59  ;;  %v6122_v53 = vmul.f32 %v10659_v17, %v16057_v4  ;;  %10664 = vrcp.f32 %v16122_v10  ;;  %vm6127_vm15 = vweird.f32 %v10659_v17 }
 0x985   :  { %10666 = vtanh.f32 %v16116_v15  ;;  %v6152_v42 = vmul.f32 %v10661_v49, %v16072_v6  ;;  %vm6157_vm7 = vweird.f32 %v10661_v49  ;;  %vm6128_vm0 = vmor %vm6126_vm14, %vm6127_vm15  ;;  %v6145_v54 = vand.u32 2147483647, %v16118_v1 }
 0x986   :  { %10668 = vtanh.f32 %v16120_v31  ;;  %v6123_v63 = vsub.f32 1.0, %v6122_v53  ;;  %vm6158_vm2 = vmor %vm6156_vm13, %vm6157_vm7  ;;  %v6147_v5 = vand.u32 2147483648, %v16118_v1  ;;  %v6177_v48 = vand.u32 2147483648, %v16122_v10 }
 0x987   :  { %10670 = vtanh.f32 %v16124_v35  ;;  %v6153_v55 = vsub.f32 1.0, %v6152_v42  ;;  %v6175_v13 = vand.u32 2147483647, %v16122_v10  ;;  %vm6141_vm1 = vweird.f32 %v16118_v1 }
 0x988   :  { %10672 = vtanh.f32 %v16127_v20  ;;  %v6124_v2 = vmul.f32 %v10659_v17, %v6123_v63  ;;  %v6148_v59 = vor.u32 1.1754944e-38, %v6147_v5  ;;  %vm6171_vm5 = vweird.f32 %v16122_v10  ;;  %v18903_v5 = vld [vmem:[#allocation89_spill] sm:$0xff] }
 0x989   :  { %v10663_v62 = vpop.eup %10662  ;;  %v6154_v9 = vmul.f32 %v10661_v49, %v6153_v55  ;;  %vm6146_vm12 = vcmp.eq.f32.partialorder %v6145_v54, 8.507059e+37  ;;  %v6178_v40 = vor.u32 1.1754944e-38, %v6177_v48  ;;  %vm6176_vm4 = vcmp.eq.f32.partialorder %v6175_v13, 8.507059e+37  ;;  %v18908_v48 = vld [vmem:[#allocation105_spill] sm:$0xff] }
 0x98a   :  { %v10665_v8 = vpop.eup %10664  ;;  %v6125_v30 = vadd.f32 %v10659_v17, %v6124_v2  ;;  %v6137_v44 = vmul.f32 %v10663_v62, %v16118_v1  ;;  %vm6142_vm9 = vweird.f32 %v10663_v62  ;;  %vm18894_vm15 = vcmask 1041409   ;;  %v18915_v13 = vld [vmem:[#allocation101_spill] sm:$0xff] }
 0x98b   :  { %v10667_v19 = vpop.eup %10666  ;;  %v6155_v0 = vadd.f32 %v10661_v49, %v6154_v9  ;;  %v6167_v4 = vmul.f32 %v10665_v8, %v16122_v10  ;;  %vm6172_vm11 = vweird.f32 %v10665_v8  ;;  %vm6143_vm3 = vmor %vm6141_vm1, %vm6142_vm9  ;;  %vm18898_vm7 = vcmask 1043459  }
 0x98c   :  { %v10669_v52 = vpop.eup %10668  ;;  %v6129_v33 = vsel %vm6128_vm0, %v10659_v17, %v6125_v30  ;;  %v6138_v3 = vsub.f32 1.0, %v6137_v44  ;;  %vm6173_vm8 = vmor %vm6171_vm5, %vm6172_vm11  ;;  %vm18902_vm0 = vcmask 1047559  }
 0x98d   :  { %v10671_v37 = vpop.eup %10670  ;;  %v6134_v50 = vsel %vm16142_vm10, %v6133_v25, %v6129_v33  ;;  %v6159_v27 = vsel %vm6158_vm2, %v10661_v49, %v6155_v0  ;;  %v6168_v51 = vsub.f32 1.0, %v6167_v4  ;;  %vm18895_vm14 = vmmov %vm18894_vm15  ;;  %v18896_v0 = vld [vmem:[#allocation97_spill] sm:$0xff]  ;;  %v18900_v33 = vld [vmem:[#allocation79_spill] sm:$0xff]  ;;  %vm18901_vm10 = vcmask 1045509  }
 0x98e   :  { %v10673_v56 = vpop.eup %10672  ;;  %v6164_v22 = vsel %vm6161_vm6, %v6163_v12, %v6159_v27  ;;  %v6209_v23 = vmul.f32 %v10667_v19, %v6134_v50  ;;  %v6139_v18 = vmul.f32 %v10663_v62, %v6138_v3  ;;  %vm18897_vm13 = vmmov %vm18895_vm14  ;;  %v18905_v50 = vld [vmem:[#allocation81_spill] sm:$0xff]  ;;  %v18906_v27 = vld [vmem:[#allocation83_spill] sm:$0xff] }
 0x98f   :  { %v6211_v6 = vmul.f32 %v10669_v52, %v6164_v22  ;;  %v6169_v24 = vmul.f32 %v10665_v8, %v6168_v51  ;;  %v18899_v52 = vld [vmem:[#allocation77_spill] sm:$0xff]  ;;  %v18910_v22 = vld [vmem:[#allocation87_spill] sm:$0xff] }
 0x990   :  { %6217 = vst.sshfl [vmem:[#allocation1] sm:$0xff pattern:$0x73625140] %v6209_v23  ;;  %v6235_v16 = vpack.c.bf16 %v6209_v23, %v6209_v23  ;;  %v6140_v41 = vadd.f32 %v10663_v62, %v6139_v18  ;;  %v18907_v51 = vld [vmem:[#allocation93_spill] sm:$0xff]  ;;  %v18911_v23 = vld [vmem:[#allocation96_spill] sm:$0xff] }
 0x991   :  { %6221 = vst.sshfl [vmem:[#allocation1 + $0x20] sm:$0xff pattern:$0x73625140] %v6211_v6  ;;  %v6237_v26 = vpack.c.bf16 %v6211_v6, %v6211_v6  ;;  %v6170_v21 = vadd.f32 %v10665_v8, %v6169_v24  ;;  %v18912_v18 = vld [vmem:[#allocation109_spill] sm:$0xff]  ;;  %v18913_v6 = vld [vmem:[#allocation88_spill] sm:$0xff]  ;;  %v18914_v24 = vld [vmem:[#allocation90_spill] sm:$0xff] }
 0x992   :  { %v6243_v47 = vunpack.c.l.b16 %v6235_v16  ;;  %v6144_v58 = vsel %vm6143_vm3, %v10663_v62, %v6140_v41  ;;  %v18916_v16 = vld [vmem:[#allocation112_spill] sm:$0xff] }
 0x993   :  { %v6245_v17 = vunpack.c.l.b16 %v6237_v26  ;;  %v6149_v49 = vsel %vm6146_vm12, %v6148_v59, %v6144_v58  ;;  %v6174_v53 = vsel %vm6173_vm8, %v10665_v8, %v6170_v21  ;;  %v18917_v41 = vld [vmem:[#allocation92_spill] sm:$0xff]  ;;  %v18918_v26 = vld [vmem:[#allocation94_spill] sm:$0xff] }
 0x994   :  { %v6247_v42 = vrot.slane %v6243_v47, 4  ;;  %v6179_v63 = vsel %vm6176_vm4, %v6178_v40, %v6174_v53  ;;  %v6210_v1 = vmul.f32 %v10671_v37, %v6149_v49  ;;  %v18904_v37 = vld [vmem:[#allocation102_spill] sm:$0xff]  ;;  %v18919_v59 = vld [vmem:[#allocation104_spill] sm:$0xff]  ;;  %v18921_v47 = vld [vmem:[#allocation95_spill] sm:$0xff] }
 0x995   :  { %v6248_v57 = vrot.slane %v6245_v17, 3  ;;  %v6212_v11 = vmul.f32 %v10673_v56, %v6179_v63  ;;  %v18909_v56 = vld [vmem:[#allocation85_spill] sm:$0xff]  ;;  %v18920_v21 = vld [vmem:[#allocation116_spill] sm:$0xff]  ;;  %v18922_v58 = vld [vmem:[#allocation98_spill] sm:$0xff] }
 0x996   :  { %6218 = vst.sshfl [vmem:[#allocation1 + $0x8] sm:$0xff pattern:$0x73625140] %v6210_v1  ;;  %v6236_v55 = vpack.c.bf16 %v6210_v1, %v6210_v1  ;;  %v18923_v40 = vld [vmem:[#allocation113_spill] sm:$0xff]  ;;  %v18925_v49 = vld [vmem:[#allocation108_spill] sm:$0xff]  ;;  %v18929_v1 = vld [vmem:[#allocation111_spill] sm:$0xff] }
 0x997   :  { %v6249_v7 = vsel %vm18894_vm15, %v6248_v57, %v6247_v42  ;;  %6222 = vst.sshfl [vmem:[#allocation1 + $0x28] sm:$0xff pattern:$0x73625140] %v6212_v11  ;;  %v6238_v10 = vpack.c.bf16 %v6212_v11, %v6212_v11  ;;  %v18924_v17 = vld [vmem:[#allocation125_spill] sm:$0xff]  ;;  %v18926_v53 = vld [vmem:[#allocation120_spill] sm:$0xff]  ;;  %v18930_v57 = vld [vmem:[#allocation123_spill] sm:$0xff] }
 0x998   :  { %v16160_v29 = vpack.c.b16 %v6249_v7, %v6249_v7  ;;  %v6244_v2 = vunpack.c.l.b16 %v6236_v55  ;;  %v18927_v42 = vld [vmem:[#allocation117_spill] sm:$0xff]  ;;  %v18928_v63 = vld [vmem:[#allocation128_spill] sm:$0xff]  ;;  %v18932_v55 = vld [vmem:[#allocation134_spill] sm:$0xff] }
 0x999   :  { %v6246_v62 = vunpack.c.l.b16 %v6238_v10  ;;  %v18931_v11 = vld [vmem:[#allocation100_spill] sm:$0xff]  ;;  %v18933_v7 = vld [vmem:[#allocation121_spill] sm:$0xff]  ;;  %v18934_v10 = vld [vmem:[#allocation130_spill] sm:$0xff] }
 0x99a   :  { %v6250_v9 = vrot.slane %v6244_v2, 4  ;;  %6265 = vmatmul.bf16.vlgmr.msra.gmra.mxu1 %v16160_v29  ;;  %6291 = vmatmul.bf16.vlgmr.msrb.gmra.mxu3 %v16160_v29  ;;  %v18935_v2 = vld [vmem:[#allocation103_spill] sm:$0xff] }
 0x99b   :  { %v6251_v8 = vrot.slane %v6246_v62, 3  ;;  %6361 = vmatpush.bf16.msra.mxu1 %v18216_v39  ;;  %6387 = vmatpush.bf16.msrb.mxu3 %v18717_v61  ;;  %v18936_v62 = vld [vmem:[#allocation136_spill] sm:$0xff] }
 0x99d   :  { %v6252_v30 = vsel %vm18895_vm14, %v6251_v8, %v6250_v9  ;;  %v6220_v19 = vld [vmem:[#allocation1 + $0x2] ss:$4 sm:$0xff] }
 0x99e   :  { %v16167_v45 = vpack.c.b16 %v6252_v30, %v6252_v30  ;;  %v6224_v25 = vld [vmem:[#allocation1 + $0x22] ss:$4 sm:$0xff] }
 0x99f   :  { %6362 = vmatpush.bf16.msra.mxu1 %v18723_v34  ;;  %6388 = vmatpush.bf16.msrb.mxu3 %v18724_v14  ;;  %v6227_v44 = vrot.slane %v6224_v25, 7  ;;  %v18937_v9 = vld [vmem:[#allocation124_spill] sm:$0xff]  ;;  %v18939_v30 = vld [vmem:[#allocation106_spill] sm:$0xff] }
 0x9a0   :  { %6278 = vmatmul.bf16.vlgmr.msrb.gmra.mxu2 %v16167_v45  ;;  %6304 = vmatmul.bf16.vlgmr.msrb.gmra.mxu0 %v16167_v45  ;;  %v18938_v8 = vld [vmem:[#allocation132_spill] sm:$0xff]  ;;  %v18940_v25 = vld [vmem:[#allocation138_spill] sm:$0xff] }
 0x9a1   :  { %6374 = vmatpush.bf16.msrb.mxu2 %v18232_v32  ;;  %6400 = vmatpush.bf16.msrb.mxu0 %v18896_v0  ;;  %v6228_v12 = vsel %vm18897_vm13, %v6227_v44, %v6220_v19  ;;  %v18942_v19 = vld [vmem:[#allocation135_spill] sm:$0xff] }
 0x9a2   :  { %v6229_v4 = vsel %vm18898_vm7, %v6227_v44, %v6228_v12  ;;  %v18943_v12 = vld [vmem:[#allocation110_spill] sm:$0xff] }
 0x9a3   :  { %6363 = vmatpush.bf16.msra.mxu1 %v18899_v52  ;;  %6389 = vmatpush.bf16.msrb.mxu3 %v18900_v33  ;;  %v6230_v3 = vsel %vm18901_vm10, %v6227_v44, %v6229_v4  ;;  %v18944_v4 = vld [vmem:[#allocation140_spill] sm:$0xff] }
 0x9a4   :  { %v6231_v54 = vsel %vm18902_vm0, %v6227_v44, %v6230_v3  ;;  %v18941_v44 = vld [vmem:[#allocation127_spill] sm:$0xff]  ;;  %v18945_v3 = vld [vmem:[#allocation129_spill] sm:$0xff] }
 0x9a5   :  { %6375 = vmatpush.bf16.msrb.mxu2 %v18903_v5  ;;  %6401 = vmatpush.bf16.msrb.mxu0 %v18904_v37  ;;  %6234 = vst [vmem:[#allocation2 + $0x10] sm:$0xf] %v6231_v54  ;;  %v18946_v54 = vld [vmem:[#allocation137_spill] sm:$0xff] }
 0x9a7   :  { %6364 = vmatpush.bf16.msra.mxu1 %v18905_v50  ;;  %6390 = vmatpush.bf16.msrb.mxu3 %v18906_v27 }
 0x9a9   :  { %6376 = vmatpush.bf16.msrb.mxu2 %v18907_v51  ;;  %6402 = vmatpush.bf16.msrb.mxu0 %v18908_v48 }
 0x9aa   :  { %6317 = vmatmul.bf16.vlgmr.msrb.gmra.mxu1 %v16160_v29  ;;  %6343 = vmatmul.bf16.vlgmr.msra.gmra.mxu3 %v16160_v29 }
 0x9ab   :  { %6365 = vmatpush.bf16.msra.mxu1 %v18909_v56  ;;  %6391 = vmatpush.bf16.msrb.mxu3 %v18910_v22 }
 0x9ad   :  { %6377 = vmatpush.bf16.msrb.mxu2 %v18911_v23  ;;  %6403 = vmatpush.bf16.msrb.mxu0 %v18912_v18 }
 0x9af   :  { %6366 = vmatpush.bf16.msra.mxu1 %v18913_v6  ;;  %6392 = vmatpush.bf16.msrb.mxu3 %v18914_v24 }
 0x9b0   :  { %6330 = vmatmul.bf16.vlgmr.msra.gmra.mxu2 %v16167_v45  ;;  %6356 = vmatmul.bf16.vlgmr.msra.gmra.mxu0 %v16167_v45 }
 0x9b1   :  { %6378 = vmatpush.bf16.msrb.mxu2 %v18915_v13  ;;  %6404 = vmatpush.bf16.msrb.mxu0 %v18916_v16 }
 0x9b3   :  { %6367 = vmatpush.bf16.msra.mxu1 %v18917_v41  ;;  %6393 = vmatpush.bf16.msrb.mxu3 %v18918_v26 }
 0x9b5   :  { %6379 = vmatpush.bf16.msrb.mxu2 %v18919_v59  ;;  %6405 = vmatpush.bf16.msrb.mxu0 %v18920_v21 }
 0x9b7   :  { %6368 = vmatpush.bf16.msra.mxu1 %v18921_v47  ;;  %6394 = vmatpush.bf16.msrb.mxu3 %v18922_v58 }
 0x9b9   :  { %6380 = vmatpush.bf16.msrb.mxu2 %v18925_v49  ;;  %6406 = vmatpush.bf16.msrb.mxu0 %v18926_v53 }
 0x9ba   :  { %6369 = vmatmul.bf16.vlgmr.msra.gmra.mxu1 %v16160_v29  ;;  %6395 = vmatmul.bf16.vlgmr.msrb.gmra.mxu3 %v16160_v29 }
 0x9bb   :  { %6413 = vmatpush.bf16.msrb.mxu1 %v18923_v40  ;;  %6439 = vmatpush.bf16.msra.mxu3 %v18924_v17  ;;  %v19024_v40 = vld [vmem:[#allocation82_spill] sm:$0xff] }
 0x9bd   :  { %6381 = vmatpush.bf16.msrb.mxu2 %v18929_v1  ;;  %6407 = vmatpush.bf16.msrb.mxu0 %v18930_v57 }
 0x9bf   :  { %6414 = vmatpush.bf16.msrb.mxu1 %v18927_v42  ;;  %6440 = vmatpush.bf16.msra.mxu3 %v18928_v63  ;;  %v18951_v63 = vld [vmem:[#allocation118_spill] sm:$0xff] }
 0x9c0   :  { %6382 = vmatmul.bf16.vlgmr.msrb.gmra.mxu2 %v16167_v45  ;;  %6408 = vmatmul.bf16.vlgmr.msrb.gmra.mxu0 %v16167_v45 }
 0x9c1   :  { %6426 = vmatpush.bf16.msra.mxu2 %v18931_v11  ;;  %6452 = vmatpush.bf16.msra.mxu0 %v18932_v55 }
 0x9c3   :  { %6415 = vmatpush.bf16.msrb.mxu1 %v18933_v7  ;;  %6441 = vmatpush.bf16.msra.mxu3 %v18934_v10  ;;  %v18947_v10 = vld [vmem:[#allocation114_spill] sm:$0xff]  ;;  %v18950_v7 = vld [vmem:[#allocation139_spill] sm:$0xff] }
 0x9c5   :  { %6427 = vmatpush.bf16.msra.mxu2 %v18935_v2  ;;  %6453 = vmatpush.bf16.msra.mxu0 %v18936_v62 }
 0x9c7   :  { %6416 = vmatpush.bf16.msrb.mxu1 %v18937_v9  ;;  %6442 = vmatpush.bf16.msra.mxu3 %v18938_v8  ;;  %v18948_v9 = vld [vmem:[#allocation142_spill] sm:$0xff]  ;;  %v18949_v8 = vld [vmem:[#allocation131_spill] sm:$0xff] }
 0x9c9   :  { %6428 = vmatpush.bf16.msra.mxu2 %v18939_v30  ;;  %6454 = vmatpush.bf16.msra.mxu0 %v18940_v25 }
 0x9cb   :  { %6417 = vmatpush.bf16.msrb.mxu1 %v18941_v44  ;;  %6443 = vmatpush.bf16.msra.mxu3 %v18942_v19  ;;  %v18952_v44 = vld [vmem:[#allocation143_spill] sm:$0xff]  ;;  %v18953_v19 = vld [vmem:[#allocation133_spill] sm:$0xff] }
 0x9cd   :  { %6429 = vmatpush.bf16.msra.mxu2 %v18943_v12  ;;  %6455 = vmatpush.bf16.msra.mxu0 %v18944_v4  ;;  %v18954_v12 = vld [vmem:[#allocation141_spill] sm:$0xff]  ;;  %v18955_v4 = vld [vmem:[#allocation10_spill] sm:$0xff] }
 0x9cf   :  { %6418 = vmatpush.bf16.msrb.mxu1 %v18945_v3  ;;  %6444 = vmatpush.bf16.msra.mxu3 %v18946_v54  ;;  %v18956_v3 = vld [vmem:[#allocation18_spill] sm:$0xff] }
 0x9d0   :  { %v18957_v54 = vld [vmem:[#allocation122_spill] sm:$0xff] }
 0x9d1   :  { %6430 = vmatpush.bf16.msra.mxu2 %v18947_v10  ;;  %6456 = vmatpush.bf16.msra.mxu0 %v18948_v9  ;;  %v18958_v10 = vld [vmem:[#allocation144_spill] sm:$0xff] }
 0x9d3   :  { %6419 = vmatpush.bf16.msrb.mxu1 %v18949_v8  ;;  %6445 = vmatpush.bf16.msra.mxu3 %v18950_v7  ;;  %v18959_v7 = vld [vmem:[#allocation12_spill] sm:$0xff]  ;;  %v18960_v8 = vld [vmem:[#allocation23_spill] sm:$0xff] }
 0x9d5   :  { %6431 = vmatpush.bf16.msra.mxu2 %v18951_v63  ;;  %6457 = vmatpush.bf16.msra.mxu0 %v18952_v44  ;;  %v18961_v44 = vld [vmem:[#allocation126_spill] sm:$0xff] }
 0x9d7   :  { %6420 = vmatpush.bf16.msrb.mxu1 %v18953_v19  ;;  %6446 = vmatpush.bf16.msra.mxu3 %v18954_v12  ;;  %v18962_v19 = vld [vmem:[#allocation145_spill] sm:$0xff]  ;;  %v18963_v12 = vld [vmem:[#allocation6_spill] sm:$0xff] }
 0x9d9   :  { %6432 = vmatpush.bf16.msra.mxu2 %v18957_v54  ;;  %6458 = vmatpush.bf16.msra.mxu0 %v18958_v10  ;;  %v18966_v10 = vld [vmem:[#allocation27_spill] sm:$0xff] }
 0x9da   :  { %6421 = vmatmul.bf16.vlgmr.msrb.gmra.mxu1 %v16160_v29  ;;  %6447 = vmatmul.bf16.vlgmr.msra.gmra.mxu3 %v16160_v29  ;;  %v18967_v29 = vld [vmem:[#allocation7_spill] sm:$0xff] }
 0x9db   :  { %6829 = vmatpush.bf16.msra.mxu1 %v18955_v4  ;;  %6855 = vmatpush.bf16.msrb.mxu3 %v18956_v3  ;;  %v18964_v4 = vld [vmem:[#allocation4_spill] sm:$0xff]  ;;  %v18965_v3 = vld [vmem:[#allocation14_spill] sm:$0xff]  ;;  %v18974_v54 = vld [vmem:[#allocation35_spill] sm:$0xff] }
 0x9dd   :  { %6433 = vmatpush.bf16.msra.mxu2 %v18961_v44  ;;  %6459 = vmatpush.bf16.msra.mxu0 %v18962_v19  ;;  %v18970_v44 = vld [vmem:[#allocation31_spill] sm:$0xff]  ;;  %v18971_v19 = vld [vmem:[#allocation8_spill] sm:$0xff] }
 0x9df   :  { %6830 = vmatpush.bf16.msra.mxu1 %v18959_v7  ;;  %6856 = vmatpush.bf16.msrb.mxu3 %v18960_v8  ;;  %v18968_v7 = vld [vmem:[#allocation5_spill] sm:$0xff] }
 0x9e0   :  { %6434 = vmatmul.bf16.vlgmr.msra.gmra.mxu2 %v16167_v45  ;;  %6460 = vmatmul.bf16.vlgmr.msra.gmra.mxu0 %v16167_v45  ;;  %v18969_v8 = vld [vmem:[#allocation17_spill] sm:$0xff] }
 0x9e1   :  { %6842 = vmatpush.bf16.msrb.mxu2 %v18963_v12  ;;  %6868 = vmatpush.bf16.msrb.mxu0 %v18964_v4  ;;  %v18972_v12 = vld [vmem:[#allocation16_spill] sm:$0xff]  ;;  %v18973_v4 = vld [vmem:[#allocation22_spill] sm:$0xff]  ;;  %v18975_v45 = vld [vmem:[#allocation9_spill] sm:$0xff] }
 0x9e3   :  { %6831 = vmatpush.bf16.msra.mxu1 %v18965_v3  ;;  %6857 = vmatpush.bf16.msrb.mxu3 %v18966_v10  ;;  %v18976_v3 = vld [vmem:[#allocation20_spill] sm:$0xff]  ;;  %v18977_v10 = vld [vmem:[#allocation26_spill] sm:$0xff] }
 0x9e5   :  { %6843 = vmatpush.bf16.msrb.mxu2 %v18967_v29  ;;  %6869 = vmatpush.bf16.msrb.mxu0 %v18968_v7  ;;  %v18978_v29 = vld [vmem:[#allocation38_spill] sm:$0xff]  ;;  %v18979_v7 = vld [vmem:[#allocation11_spill] sm:$0xff] }
 0x9e7   :  { %6832 = vmatpush.bf16.msra.mxu1 %v18969_v8  ;;  %6858 = vmatpush.bf16.msrb.mxu3 %v18970_v44  ;;  %v18980_v8 = vld [vmem:[#allocation24_spill] sm:$0xff]  ;;  %v18981_v44 = vld [vmem:[#allocation30_spill] sm:$0xff] }
 0x9e9   :  { %6844 = vmatpush.bf16.msrb.mxu2 %v18971_v19  ;;  %6870 = vmatpush.bf16.msrb.mxu0 %v18972_v12  ;;  %v18982_v19 = vld [vmem:[#allocation41_spill] sm:$0xff] }
 0x9ea   :  { %v18983_v12 = vld [vmem:[#allocation13_spill] sm:$0xff] }
 0x9eb   :  { %6833 = vmatpush.bf16.msra.mxu1 %v18973_v4  ;;  %6859 = vmatpush.bf16.msrb.mxu3 %v18974_v54  ;;  %v18984_v4 = vld [vmem:[#allocation28_spill] sm:$0xff]  ;;  %v18985_v54 = vld [vmem:[#allocation34_spill] sm:$0xff] }
 0x9ed   :  { %6845 = vmatpush.bf16.msrb.mxu2 %v18975_v45  ;;  %6871 = vmatpush.bf16.msrb.mxu0 %v18976_v3  ;;  %v18986_v45 = vld [vmem:[#allocation45_spill] sm:$0xff]  ;;  %v18987_v3 = vld [vmem:[#allocation15_spill] sm:$0xff] }
 0x9ef   :  { %6834 = vmatpush.bf16.msra.mxu1 %v18977_v10  ;;  %6860 = vmatpush.bf16.msrb.mxu3 %v18978_v29  ;;  %v18988_v10 = vld [vmem:[#allocation32_spill] sm:$0xff]  ;;  %v18989_v29 = vld [vmem:[#allocation21_spill] sm:$0xff] }
 0x9f1   :  { %6846 = vmatpush.bf16.msrb.mxu2 %v18979_v7  ;;  %6872 = vmatpush.bf16.msrb.mxu0 %v18980_v8  ;;  %v18990_v7 = vld [vmem:[#allocation60_spill] sm:$0xff]  ;;  %v18991_v8 = vld [vmem:[#allocation19_spill] sm:$0xff] }
 0x9f3   :  { %6835 = vmatpush.bf16.msra.mxu1 %v18981_v44  ;;  %6861 = vmatpush.bf16.msrb.mxu3 %v18982_v19  ;;  %v18992_v44 = vld [vmem:[#allocation36_spill] sm:$0xff]  ;;  %v18993_v19 = vld [vmem:[#allocation46_spill] sm:$0xff] }
 0x9f5   :  { %6847 = vmatpush.bf16.msrb.mxu2 %v18983_v12  ;;  %6873 = vmatpush.bf16.msrb.mxu0 %v18984_v4  ;;  %v18994_v12 = vld [vmem:[#allocation40_spill] sm:$0xff]  ;;  %v18995_v4 = vld [vmem:[#allocation25_spill] sm:$0xff] }
 0x9f7   :  { %6836 = vmatpush.bf16.msra.mxu1 %v18985_v54  ;;  %6862 = vmatpush.bf16.msrb.mxu3 %v18986_v45  ;;  %v18996_v54 = vld [vmem:[#allocation62_spill] sm:$0xff]  ;;  %v18997_v45 = vld [vmem:[#allocation49_spill] sm:$0xff] }
 0x9f9   :  { %6848 = vmatpush.bf16.msrb.mxu2 %v18987_v3  ;;  %6874 = vmatpush.bf16.msrb.mxu0 %v18988_v10  ;;  %v18998_v3 = vld [vmem:[#allocation44_spill] sm:$0xff]  ;;  %v18999_v10 = vld [vmem:[#allocation29_spill] sm:$0xff] }
 0x9fb   :  { %6881 = vmatpush.bf16.msrb.mxu1 %v18989_v29  ;;  %6907 = vmatpush.bf16.msra.mxu3 %v18990_v7  ;;  %v19000_v29 = vld [vmem:[#allocation67_spill] sm:$0xff]  ;;  %v19001_v7 = vld [vmem:[#allocation53_spill] sm:$0xff] }
 0x9fd   :  { %6849 = vmatpush.bf16.msrb.mxu2 %v18991_v8  ;;  %6875 = vmatpush.bf16.msrb.mxu0 %v18992_v44  ;;  %v19002_v8 = vld [vmem:[#allocation48_spill] sm:$0xff]  ;;  %v19003_v44 = vld [vmem:[#allocation33_spill] sm:$0xff] }
 0x9ff   :  { %6882 = vmatpush.bf16.msrb.mxu1 %v18995_v4  ;;  %6908 = vmatpush.bf16.msra.mxu3 %v18996_v54  ;;  %v19006_v4 = vld [vmem:[#allocation52_spill] sm:$0xff]  ;;  %v19007_v54 = vld [vmem:[#allocation37_spill] sm:$0xff] }
 0xa01   :  { %6894 = vmatpush.bf16.msra.mxu2 %v18993_v19  ;;  %6920 = vmatpush.bf16.msra.mxu0 %v18994_v12  ;;  %v19004_v19 = vld [vmem:[#allocation70_spill] sm:$0xff]  ;;  %v19005_v12 = vld [vmem:[#allocation57_spill] sm:$0xff] }
 0xa03   :  { %6883 = vmatpush.bf16.msrb.mxu1 %v18999_v10  ;;  %6909 = vmatpush.bf16.msra.mxu3 %v19000_v29  ;;  %v19010_v10 = vld [vmem:[#allocation54_spill] sm:$0xff]  ;;  %v19011_v29 = vld [vmem:[#allocation39_spill] sm:$0xff] }
 0xa05   :  { %6895 = vmatpush.bf16.msra.mxu2 %v18997_v45  ;;  %6921 = vmatpush.bf16.msra.mxu0 %v18998_v3  ;;  %v19008_v45 = vld [vmem:[#allocation73_spill] sm:$0xff]  ;;  %v19009_v3 = vld [vmem:[#allocation59_spill] sm:$0xff] }
 0xa07   :  { %6884 = vmatpush.bf16.msrb.mxu1 %v19003_v44  ;;  %6910 = vmatpush.bf16.msra.mxu3 %v19004_v19  ;;  %v19014_v44 = vld [vmem:[#allocation58_spill] sm:$0xff]  ;;  %v19015_v19 = vld [vmem:[#allocation43_spill] sm:$0xff] }
 0xa09   :  { %6896 = vmatpush.bf16.msra.mxu2 %v19001_v7  ;;  %6922 = vmatpush.bf16.msra.mxu0 %v19002_v8  ;;  %v19012_v7 = vld [vmem:[#allocation76_spill] sm:$0xff]  ;;  %v19013_v8 = vld [vmem:[#allocation61_spill] sm:$0xff] }
 0xa0b   :  { %6885 = vmatpush.bf16.msrb.mxu1 %v19007_v54  ;;  %6911 = vmatpush.bf16.msra.mxu3 %v19008_v45  ;;  %v19018_v54 = vld [vmem:[#allocation63_spill] sm:$0xff] }
 0xa0c   :  { %v19019_v45 = vld [vmem:[#allocation47_spill] sm:$0xff] }
 0xa0d   :  { %6897 = vmatpush.bf16.msra.mxu2 %v19005_v12  ;;  %6923 = vmatpush.bf16.msra.mxu0 %v19006_v4  ;;  %v19016_v12 = vld [vmem:[#allocation80_spill] sm:$0xff]  ;;  %v19017_v4 = vld [vmem:[#allocation66_spill] sm:$0xff] }
 0xa0f   :  { %6886 = vmatpush.bf16.msrb.mxu1 %v19011_v29  ;;  %6912 = vmatpush.bf16.msra.mxu3 %v19012_v7  ;;  %v19022_v29 = vld [vmem:[#allocation68_spill] sm:$0xff] }
 0xa11   :  { %6898 = vmatpush.bf16.msra.mxu2 %v19009_v3  ;;  %6924 = vmatpush.bf16.msra.mxu0 %v19010_v10  ;;  %v19020_v3 = vld [vmem:[#allocation84_spill] sm:$0xff]  ;;  %v19021_v10 = vld [vmem:[#allocation69_spill] sm:$0xff] }
 0xa13   :  { %6887 = vmatpush.bf16.msrb.mxu1 %v19015_v19  ;;  %6913 = vmatpush.bf16.msra.mxu3 %v19016_v12 }
 0xa15   :  { %6899 = vmatpush.bf16.msra.mxu2 %v19013_v8  ;;  %6925 = vmatpush.bf16.msra.mxu0 %v19014_v44 }
 0xa17   :  { %6888 = vmatpush.bf16.msrb.mxu1 %v19019_v45  ;;  %6914 = vmatpush.bf16.msra.mxu3 %v19020_v3  ;;  %v6266_v7 = vpop.f32.mrf.mxu1 }
 0xa19   :  { %6900 = vmatpush.bf16.msra.mxu2 %v19017_v4  ;;  %6926 = vmatpush.bf16.msra.mxu0 %v19018_v54  ;;  %v19023_v54 = vld [vmem:[#allocation51_spill] sm:$0xff] }
 0xa1d   :  { %6901 = vmatpush.bf16.msra.mxu2 %v19021_v10  ;;  %6927 = vmatpush.bf16.msra.mxu0 %v19022_v29  ;;  %v6292_v8 = vpop.f32.mrf.mxu3  ;;  %v6305_v63 = vpop.f32.mrf.mxu0 }
 0xa1e   :  { %v6306_v9 = vadd.f32 %v6305_v63, %v6292_v8 }
 0xa1f   :  { %v6268_v44 = vpop.f32.mrf.mxu1 }
 0xa20   :  { %v6474_v42 = vrot.slane %v6306_v9, 3  ;;  %v6482_v30 = vrot.slane %v6306_v9, 4 }
 0xa22   :  { %v6506_v17 = vadd.f32 %v6474_v42, %v19023_v54  ;;  %v6514_v3 = vadd.f32 %v6482_v30, %v19024_v40  ;;  %v19027_v40 = vld [vmem:[#allocation78_spill] sm:$0xff] }
 0xa23   :  { %v6279_v19 = vpop.f32.mrf.mxu2 }
 0xa24   :  { %v6280_v58 = vadd.f32 %v6279_v19, %v6266_v7  ;;  %v9843_v10 = vmul.f32 -1.442695, %v6506_v17  ;;  %v9845_v26 = vmul.f32 -1.442695, %v6514_v3 }
 0xa25   :  { %v6294_v12 = vpop.f32.mrf.mxu3  ;;  %v6307_v25 = vpop.f32.mrf.mxu0 }
 0xa26   :  { %v6473_v44 = vrot.slane %v6280_v58, 3  ;;  %10674 = vpow2.f32 %v9843_v10  ;;  %v6481_v63 = vrot.slane %v6280_v58, 4  ;;  %v19025_v25 = vld [vmem:[#allocation50_spill] sm:$0xff]  ;;  %v19028_v58 = vld [vmem:[#allocation56_spill] sm:$0xff] }
 0xa27   :  { %v6318_v4 = vpop.f32.mrf.mxu1  ;;  %10676 = vpow2.f32 %v9845_v26 }
 0xa28   :  { %v6505_v9 = vadd.f32 %v6473_v44, %v19025_v25 }
 0xa2a   :  { %v9842_v10 = vmul.f32 -1.442695, %v6505_v9 }
 0xa2b   :  { %v6281_v45 = vpop.f32.mrf.mxu2 }
 0xa2c   :  { %v19026_v45 = vld [vmem:[#allocation42_spill] sm:$0xff]  ;;  %v10675_v19 = vpop.eup %10674  ;;  %10678 = vpow2.f32 %v9842_v10 }
 0xa2d   :  { %v6344_v47 = vpop.f32.mrf.mxu3  ;;  %v6357_v29 = vpop.f32.mrf.mxu0  ;;  %v6513_v54 = vadd.f32 %v6481_v63, %v19026_v45  ;;  %v16321_v11 = vadd.f32 1.0, %v10675_v19  ;;  %v19030_v63 = vld [vmem:[#allocation146_spill] sm:$0xff] }
 0xa2e   :  { %v6358_v62 = vadd.f32 %v6357_v29, %v6344_v47  ;;  %v10677_v26 = vpop.eup %10676 }
 0xa2f   :  { %v6320_v2 = vpop.f32.mrf.mxu1  ;;  %v9844_v55 = vmul.f32 -1.442695, %v6513_v54  ;;  %v16325_v45 = vadd.f32 1.0, %v10677_v26  ;;  %vm6557_vm6 = vweird.f32 %v16321_v11 }
 0xa30   :  { %v6476_v8 = vrot.slane %v6358_v62, 3  ;;  %v6484_v41 = vrot.slane %v6358_v62, 4  ;;  %v19029_v62 = vld [vmem:[#allocation65_spill] sm:$0xff] }
 0xa31   :  { %10680 = vpow2.f32 %v9844_v55  ;;  %vm6587_vm14 = vweird.f32 %v16325_v45 }
 0xa32   :  { %v6508_v47 = vadd.f32 %v6476_v8, %v19027_v40  ;;  %v6516_v29 = vadd.f32 %v6484_v41, %v19028_v58  ;;  %10682 = vrcp.f32 %v16321_v11  ;;  %v6593_v40 = vand.u32 2147483648, %v16325_v45 }
 0xa33   :  { %v6331_v12 = vpop.f32.mrf.mxu2 }
 0xa34   :  { %v6332_v42 = vadd.f32 %v6331_v12, %v6318_v4  ;;  %v9847_v44 = vmul.f32 -1.442695, %v6508_v47 }
 0xa35   :  { %v6346_v30 = vpop.f32.mrf.mxu3  ;;  %v6359_v7 = vpop.f32.mrf.mxu0 }
 0xa36   :  { %v6475_v17 = vrot.slane %v6332_v42, 3  ;;  %v6483_v2 = vrot.slane %v6332_v42, 4  ;;  %v9849_v7 = vmul.f32 -1.442695, %v6516_v29  ;;  %10684 = vpow2.f32 %v9847_v44 }
 0xa37   :  { %v16318_v3 = vpop.f32.mrf.mxu1 }
 0xa38   :  { %v6507_v4 = vadd.f32 %v6475_v17, %v19029_v62  ;;  %v6515_v12 = vadd.f32 %v6483_v2, %v19030_v63  ;;  %10686 = vpow2.f32 %v9849_v7  ;;  %v10679_v17 = vpop.eup %10678 }
 0xa39   :  { %10688 = vrcp.f32 %v16325_v45  ;;  %v10681_v19 = vpop.eup %10680  ;;  %v16333_v26 = vadd.f32 1.0, %v10679_v17 }
 0xa3a   :  { %v9846_v9 = vmul.f32 -1.442695, %v6507_v4  ;;  %v9848_v54 = vmul.f32 -1.442695, %v6515_v12  ;;  %v16329_v47 = vpop.eup %10682  ;;  %v16337_v12 = vadd.f32 1.0, %v10681_v19 }
 0xa3b   :  { %v6333_v30 = vpop.f32.mrf.mxu2  ;;  %v6548_v6 = vand.u32 2147483648, %v16333_v26  ;;  %vm6558_vm2 = vweird.f32 %v16329_v47 }
 0xa3c   :  { %10690 = vpow2.f32 %v9846_v9  ;;  %v10685_v55 = vpop.eup %10684  ;;  %vm16411_vm9 = vmor %vm6557_vm6, %vm6558_vm2 }
 0xa3d   :  { %v6396_v8 = vpop.f32.mrf.mxu3  ;;  %v6409_v41 = vpop.f32.mrf.mxu0  ;;  %10692 = vpow2.f32 %v9848_v54  ;;  %v16339_v7 = vadd.f32 1.0, %v10685_v55  ;;  %v6553_v54 = vmul.f32 %v16329_v47, %v16321_v11  ;;  %v16404_v21 = vor.u32 1.1754944e-38, %v6548_v6 }
 0xa3e   :  { %v10687_v29 = vpop.eup %10686  ;;  %10694 = vrcp.f32 %v16333_v26  ;;  %v6410_v1 = vadd.f32 %v6409_v41, %v6396_v8 }
 0xa3f   :  { %v6372_v42 = vpop.f32.mrf.mxu1  ;;  %v16335_v44 = vpop.eup %10688  ;;  %10696 = vrcp.f32 %v16337_v12  ;;  %vm6633_vm11 = vweird.f32 %v16339_v7 }
 0xa40   :  { %v16343_v42 = vadd.f32 1.0, %v10687_v29  ;;  %10698 = vrcp.f32 %v16339_v7  ;;  %v6478_v56 = vrot.slane %v6410_v1, 3  ;;  %v6486_v27 = vrot.slane %v6410_v1, 4 }
 0xa41   :  { %vm6588_vm8 = vweird.f32 %v16335_v44 }
 0xa42   :  { %v10691_v30 = vpop.eup %10690  ;;  %10700 = vrcp.f32 %v16343_v42  ;;  %v6669_v22 = vand.u32 2147483648, %v16343_v42  ;;  %vm6663_vm1 = vweird.f32 %v16343_v42  ;;  %v6667_v1 = vand.u32 2147483647, %v16343_v42 }
 0xa43   :  { %v16331_v2 = vpop.f32.mrf.mxu2  ;;  %v10693_v9 = vpop.eup %10692  ;;  %v16347_v17 = vadd.f32 1.0, %v10691_v30  ;;  %v6563_v30 = vand.u32 2147483648, %v16321_v11 }
 0xa44   :  { %v16352_v19 = vadd.f32 1.0, %v10693_v9  ;;  %v16356_v29 = vpop.eup %10694  ;;  %v6384_v49 = vadd.f32 %v16331_v2, %v16318_v3  ;;  %vm16461_vm13 = vcmp.eq.f32.partialorder %v6667_v1, 8.507059e+37 }
 0xa45   :  { %v6398_v10 = vpop.f32.mrf.mxu3  ;;  %v6411_v4 = vpop.f32.mrf.mxu0  ;;  %10702 = vrcp.f32 %v16347_v17  ;;  %v6538_v8 = vmul.f32 %v16356_v29, %v16333_v26  ;;  %vm6618_vm3 = vweird.f32 %v16347_v17  ;;  %vm6543_vm15 = vweird.f32 %v16356_v29 }
 0xa46   :  { %v6583_v10 = vmul.f32 %v16335_v44, %v16325_v45  ;;  %v6554_v4 = vsub.f32 1.0, %v6553_v54  ;;  %10704 = vrcp.f32 %v16352_v19  ;;  %v16361_v63 = vpop.eup %10696  ;;  %v6639_v54 = vand.u32 2147483648, %v16339_v7 }
 0xa47   :  { %v16364_v62 = vpop.eup %10698  ;;  %v16389_v41 = vmul.f32 %v16361_v63, %v16337_v12  ;;  %v6539_v13 = vsub.f32 1.0, %v6538_v8  ;;  %v16430_v8 = vor.u32 1.1754944e-38, %v6669_v22  ;;  %vm6648_vm12 = vweird.f32 %v16352_v19 }
 0xa48   :  { %v6584_v58 = vsub.f32 1.0, %v6583_v10  ;;  %v6555_v9 = vmul.f32 %v16329_v47, %v6554_v4  ;;  %v16370_v57 = vpop.eup %10700  ;;  %v16375_v4 = vor.u32 1.1754944e-38, %v6563_v30  ;;  %v16426_v52 = vor.u32 1.1754944e-38, %v6639_v54 }
 0xa49   :  { %v6659_v24 = vmul.f32 %v16370_v57, %v16343_v42  ;;  %v6569_v6 = vsub.f32 1.0, %v16389_v41  ;;  %v6510_v41 = vadd.f32 %v6478_v56, %v18857_v46  ;;  %v6624_v54 = vand.u32 2147483648, %v16347_v17 }
 0xa4a   :  { %v6585_v53 = vmul.f32 %v16335_v44, %v6584_v58  ;;  %v16392_v30 = vadd.f32 %v16329_v47, %v6555_v9  ;;  %v16440_v22 = vmul.f32 %v16356_v29, %v6539_v13  ;;  %vm6634_vm5 = vweird.f32 %v16364_v62 }
 0xa4b   :  { %v6385_v55 = vpop.f32.mrf.mxu2  ;;  %v16383_v10 = vpop.eup %10702  ;;  %v6660_v18 = vsub.f32 1.0, %v6659_v24  ;;  %v6518_v24 = vadd.f32 %v6486_v27, %v18503_v28  ;;  %v6477_v27 = vrot.slane %v6384_v49, 3  ;;  %10706 = vtanh.f32 %v6510_v41  ;;  %vm16478_vm2 = vmor %vm6633_vm11, %vm6634_vm5 }
 0xa4c   :  { %v16379_v55 = vor.u32 1.1754944e-38, %v6593_v40  ;;  %v16395_v58 = vpop.eup %10704  ;;  %v6629_v40 = vmul.f32 %v16364_v62, %v16339_v7  ;;  %v6614_v59 = vmul.f32 %v16383_v10, %v16347_v17  ;;  %v16416_v16 = vadd.f32 %v16335_v44, %v6585_v53 }
 0xa4d   :  { %v6644_v9 = vmul.f32 %v16395_v58, %v16352_v19  ;;  %v6637_v53 = vand.u32 2147483647, %v16339_v7  ;;  %vm6664_vm10 = vweird.f32 %v16370_v57  ;;  %vm6619_vm7 = vweird.f32 %v16383_v10 }
 0xa4e   :  { %v6630_v33 = vsub.f32 1.0, %v6629_v40  ;;  %v6615_v40 = vsub.f32 1.0, %v6614_v59  ;;  %v6485_v59 = vrot.slane %v6384_v49, 4  ;;  %vm16495_vm11 = vmor %vm6663_vm1, %vm6664_vm10  ;;  %vm6649_vm5 = vweird.f32 %v16395_v58 }
 0xa4f   :  { %v6645_v51 = vsub.f32 1.0, %v6644_v9  ;;  %vm16454_vm4 = vcmp.eq.f32.partialorder %v6637_v53, 8.507059e+37  ;;  %vm16526_vm10 = vmor %vm6618_vm3, %vm6619_vm7 }
 0xa50   :  { %v6631_v46 = vmul.f32 %v16364_v62, %v6630_v33  ;;  %v16452_v33 = vor.u32 1.1754944e-38, %v6624_v54  ;;  %vm16555_vm3 = vmor %vm6587_vm14, %vm6588_vm8  ;;  %vm19058_vm8 = vweird.f32 %v16333_v26 }
 0xa51   :  { %v6646_v2 = vmul.f32 %v16395_v58, %v6645_v51  ;;  %v6570_v51 = vmul.f32 %v16361_v63, %v6569_v6 }
 0xa52   :  { %v6632_v49 = vadd.f32 %v16364_v62, %v6631_v46 }
 0xa54   :  { %v6636_v42 = vsel %vm16478_vm2, %v16364_v62, %v6632_v49  ;;  %v6652_v62 = vand.u32 2147483647, %v16352_v19  ;;  %vm16535_vm2 = vmor %vm6648_vm12, %vm6649_vm5 }
 0xa55   :  { %v6641_v7 = vsel %vm16454_vm4, %v16426_v52, %v6636_v42  ;;  %vm16572_vm4 = vmor %vm19058_vm8, %vm6543_vm15  ;;  %vm19063_vm15 = vweird.f32 %v16337_v12 }
 0xa56   :  { %vm6653_vm14 = vcmp.eq.f32.partialorder %v6652_v62, 8.507059e+37 }
 0xa57   :  { %v16381_v25 = vpop.f32.mrf.mxu1 }
 0xa5d   :  { %v6448_v23 = vpop.f32.mrf.mxu3  ;;  %v6461_v14 = vpop.f32.mrf.mxu0 }
 0xa5e   :  { %v6462_v34 = vadd.f32 %v6461_v14, %v6448_v23  ;;  %v6661_v14 = vmul.f32 %v16370_v57, %v6660_v18  ;;  %v6654_v23 = vand.u32 2147483648, %v16352_v19  ;;  %v6571_v19 = vadd.f32 %v16361_v63, %v6570_v51 }
 0xa5f   :  { %v6424_v48 = vpop.f32.mrf.mxu1  ;;  %v19061_v51 = vrot.slane %v16124_v35, 7  ;;  %v19066_v35 = vsel %vm16411_vm9, %v16329_v47, %v16392_v30  ;;  %v19068_v47 = vand.u32 2147483648, %v16337_v12 }
 0xa60   :  { %v6480_v61 = vrot.slane %v6462_v34, 3  ;;  %v6488_v56 = vrot.slane %v6462_v34, 4  ;;  %v6616_v34 = vmul.f32 %v16383_v10, %v6615_v40  ;;  %v6662_v41 = vadd.f32 %v16370_v57, %v6661_v14 }
 0xa61   :  { %v6517_v14 = vadd.f32 %v6485_v59, %v18492_v36  ;;  %v6647_v59 = vadd.f32 %v16395_v58, %v6646_v2  ;;  %v6622_v2 = vand.u32 2147483647, %v16347_v17  ;;  %v6541_v17 = vadd.f32 %v16356_v29, %v16440_v22 }
 0xa62   :  { %v6512_v48 = vadd.f32 %v6480_v61, %v13863_v38  ;;  %v6520_v13 = vadd.f32 %v6488_v56, %v18868_v60  ;;  %v19037_v56 = vld [vmem:[#allocation91_spill] sm:$0xff]  ;;  %v6579_v30 = vor.u32 1.1754944e-38, %v19068_v47 }
 0xa63   :  { %v6435_v3 = vpop.f32.mrf.mxu2  ;;  %v6509_v60 = vadd.f32 %v6477_v27, %v19037_v56  ;;  %v6617_v27 = vadd.f32 %v16383_v10, %v6616_v34  ;;  %vm6623_vm12 = vcmp.eq.f32.partialorder %v6622_v2, 8.507059e+37  ;;  %v19071_v2 = vrot.slane %v16120_v31, 7 }
 0xa64   :  { %v9851_v9 = vmul.f32 -1.442695, %v6512_v48  ;;  %v9853_v53 = vmul.f32 -1.442695, %v6520_v13  ;;  %v6436_v40 = vadd.f32 %v6435_v3, %v16381_v25  ;;  %v19040_v25 = vand.u32 2147483647, %v16321_v11 }
 0xa65   :  { %v6450_v1 = vpop.f32.mrf.mxu3  ;;  %v6463_v54 = vpop.f32.mrf.mxu0  ;;  %v19045_v11 = vand.u32 2147483647, %v16325_v45 }
 0xa66   :  { %10708 = vpow2.f32 %v9851_v9  ;;  %v6479_v48 = vrot.slane %v6436_v40, 3  ;;  %v6487_v13 = vrot.slane %v6436_v40, 4  ;;  %vm16485_vm0 = vcmp.eq.f32.partialorder %v19040_v25, 8.507059e+37  ;;  %v19048_v9 = vld [vmem:[#allocation99_spill] sm:$0xff]  ;;  %v10707_v40 = vpop.eup %10706 }
 0xa67   :  { %10710 = vpow2.f32 %v9853_v53  ;;  %vm16502_vm6 = vcmp.eq.f32.partialorder %v19045_v11, 8.507059e+37  ;;  %v6666_v1 = vsel %vm16495_vm11, %v16370_v57, %v6662_v41  ;;  %v19049_v54 = vand.u32 2147483647, %v16333_v26 }
 0xa68   :  { %v6511_v34 = vadd.f32 %v6479_v48, %v13782_v43  ;;  %v6519_v53 = vadd.f32 %v6487_v13, %v19048_v9  ;;  %10712 = vtanh.f32 %v6518_v24  ;;  %v6655_v41 = vor.u32 1.1754944e-38, %v6654_v23 }
 0xa69   :  { %vm16517_vm1 = vcmp.eq.f32.partialorder %v19049_v54, 8.507059e+37  ;;  %10714 = vtanh.f32 %v6509_v60  ;;  %v6621_v13 = vsel %vm16526_vm10, %v16383_v10, %v6617_v27  ;;  %v6651_v23 = vsel %vm16535_vm2, %v16395_v58, %v6647_v59 }
 0xa6a   :  { %v9850_v57 = vmul.f32 -1.442695, %v6511_v34  ;;  %v9852_v24 = vmul.f32 -1.442695, %v6519_v53  ;;  %10716 = vtanh.f32 %v6517_v14  ;;  %v6671_v52 = vsel %vm16461_vm13, %v16430_v8, %v6666_v1 }
 0xa6b   :  { %v6437_v60 = vpop.f32.mrf.mxu2  ;;  %v6590_v58 = vsel %vm16555_vm3, %v16335_v44, %v16416_v16  ;;  %v6626_v18 = vsel %vm6623_vm12, %v16452_v33, %v6621_v13  ;;  %v6766_v14 = vmul.f32 %v19061_v51, %v6641_v7  ;;  %v6545_v16 = vsel %vm16572_vm4, %v16356_v29, %v6541_v17 }
 0xa6c   :  { %v10709_v46 = vpop.eup %10708  ;;  %10718 = vpow2.f32 %v9850_v57  ;;  %vm19062_vm13 = vweird.f32 %v16361_v63  ;;  %v6656_v44 = vsel %vm6653_vm14, %v6655_v41, %v6651_v23  ;;  %v6565_v29 = vsel %vm16485_vm0, %v16375_v4, %v19066_v35 }
 0xa6d   :  { %v10711_v11 = vpop.eup %10710  ;;  %v16562_v22 = vadd.f32 1.0, %v10709_v46  ;;  %10720 = vpow2.f32 %v9852_v24  ;;  %vm16588_vm7 = vmor %vm19063_vm15, %vm19062_vm13  ;;  %v19067_v27 = vrot.slane %v16127_v20, 7  ;;  %v6595_v50 = vsel %vm16502_vm6, %v16379_v55, %v6590_v58 }
 0xa6e   :  { %v16577_v8 = vadd.f32 1.0, %v10711_v11  ;;  %v10713_v61 = vpop.eup %10712  ;;  %v6575_v34 = vsel %vm16588_vm7, %v16361_v63, %v6571_v19  ;;  %v6770_v42 = vmul.f32 %v10707_v40, %v6565_v29  ;;  %v19069_v4 = vrot.slane %v16116_v15, 7 }
 0xa6f   :  { %10722 = vrcp.f32 %v16562_v22  ;;  %v10715_v33 = vpop.eup %10714  ;;  %v6768_v59 = vmul.f32 %v19067_v27, %v6671_v52  ;;  %v6772_v1 = vmul.f32 %v10713_v61, %v6595_v50  ;;  %v6550_v63 = vsel %vm16517_vm1, %v16404_v21, %v6545_v16 }
 0xa70   :  { %10724 = vrcp.f32 %v16577_v8  ;;  %v10717_v53 = vpop.eup %10716  ;;  %v6765_v6 = vmul.f32 %v19069_v4, %v6626_v18  ;;  %v19070_v54 = vand.u32 2147483647, %v16337_v12  ;;  %v6767_v3 = vmul.f32 %v19071_v2, %v6656_v44 }
 0xa71   :  { %v16621_v40 = vadd.f32 %v6770_v42, %v6766_v14  ;;  %v6769_v62 = vmul.f32 %v10715_v33, %v6550_v63  ;;  %v16625_v15 = vadd.f32 %v6772_v1, %v6768_v59  ;;  %v6717_v60 = vand.u32 2147483647, %v16562_v22 }
 0xa72   :  { %v10719_v20 = vpop.eup %10718  ;;  %vm6577_vm9 = vcmp.eq.f32.partialorder %v19070_v54, 8.507059e+37  ;;  %v6719_v46 = vand.u32 2147483648, %v16562_v22  ;;  %v6747_v19 = vand.u32 2147483647, %v16577_v8  ;;  %v6749_v23 = vand.u32 2147483648, %v16577_v8 }
 0xa73   :  { %v10721_v55 = vpop.eup %10720  ;;  %v6580_v48 = vsel %vm6577_vm9, %v6579_v30, %v6575_v34  ;;  %v16623_v57 = vadd.f32 1.0, %v10719_v20  ;;  %v16629_v21 = vadd.f32 %v6769_v62, %v6765_v6  ;;  %vm6713_vm6 = vweird.f32 %v16562_v22 }
 0xa74   :  { %v6771_v24 = vmul.f32 %v10717_v53, %v6580_v48  ;;  %v16627_v49 = vadd.f32 1.0, %v10721_v55  ;;  %vm6743_vm11 = vweird.f32 %v16577_v8  ;;  %vm16647_vm1 = vcmp.eq.f32.partialorder %v6717_v60, 8.507059e+37 }
 0xa75   :  { %v10723_v25 = vpop.eup %10722  ;;  %10726 = vrcp.f32 %v16623_v57  ;;  %v6720_v61 = vor.u32 1.1754944e-38, %v6719_v46  ;;  %vm6748_vm2 = vcmp.eq.f32.partialorder %v6747_v19, 8.507059e+37  ;;  %v6750_v26 = vor.u32 1.1754944e-38, %v6749_v23 }
 0xa76   :  { %v10725_v12 = vpop.eup %10724  ;;  %v16632_v31 = vadd.f32 %v6771_v24, %v6767_v3  ;;  %v6709_v41 = vmul.f32 %v10723_v25, %v16562_v22  ;;  %10728 = vrcp.f32 %v16627_v49  ;;  %vm6714_vm0 = vweird.f32 %v10723_v25 }
 0xa77   :  { %10730 = vtanh.f32 %v16621_v40  ;;  %v6739_v17 = vmul.f32 %v10725_v12, %v16577_v8  ;;  %vm6744_vm5 = vweird.f32 %v10725_v12  ;;  %vm6715_vm10 = vmor %vm6713_vm6, %vm6714_vm0  ;;  %v6702_v29 = vand.u32 2147483647, %v16623_v57 }
 0xa78   :  { %10732 = vtanh.f32 %v16625_v15  ;;  %v6710_v13 = vsub.f32 1.0, %v6709_v41  ;;  %vm6745_vm3 = vmor %vm6743_vm11, %vm6744_vm5  ;;  %v6704_v27 = vand.u32 2147483648, %v16623_v57  ;;  %v6734_v42 = vand.u32 2147483648, %v16627_v49 }
 0xa79   :  { %10734 = vtanh.f32 %v16629_v21  ;;  %v6740_v7 = vsub.f32 1.0, %v6739_v17  ;;  %v6732_v1 = vand.u32 2147483647, %v16627_v49  ;;  %vm6698_vm4 = vweird.f32 %v16623_v57 }
 0xa7a   :  { %10736 = vtanh.f32 %v16632_v31  ;;  %v6711_v11 = vmul.f32 %v10723_v25, %v6710_v13  ;;  %v6705_v3 = vor.u32 1.1754944e-38, %v6704_v27  ;;  %vm6728_vm13 = vweird.f32 %v16627_v49  ;;  %v19083_v27 = vld [vmem:[#allocation74_spill] sm:$0xff] }
 0xa7b   :  { %v10727_v10 = vpop.eup %10726  ;;  %v6741_v52 = vmul.f32 %v10725_v12, %v6740_v7  ;;  %vm6703_vm15 = vcmp.eq.f32.partialorder %v6702_v29, 8.507059e+37  ;;  %v6735_v24 = vor.u32 1.1754944e-38, %v6734_v42  ;;  %vm6733_vm9 = vcmp.eq.f32.partialorder %v6732_v1, 8.507059e+37  ;;  %v19088_v42 = vld [vmem:[#allocation79_spill] sm:$0xff]  ;;  %v19095_v1 = vld [vmem:[#allocation85_spill] sm:$0xff] }
 0xa7c   :  { %v10729_v58 = vpop.eup %10728  ;;  %v6712_v45 = vadd.f32 %v10723_v25, %v6711_v11  ;;  %v6694_v51 = vmul.f32 %v10727_v10, %v16623_v57  ;;  %vm6699_vm12 = vweird.f32 %v10727_v10  ;;  %vm19074_vm0 = vcmask 1041409  }
 0xa7d   :  { %v10731_v14 = vpop.eup %10730  ;;  %v6742_v16 = vadd.f32 %v10725_v12, %v6741_v52  ;;  %v6724_v22 = vmul.f32 %v10729_v58, %v16627_v49  ;;  %vm6729_vm8 = vweird.f32 %v10729_v58  ;;  %vm6700_vm14 = vmor %vm6698_vm4, %vm6699_vm12  ;;  %vm19078_vm5 = vcmask 1043459  }
 0xa7e   :  { %v10733_v44 = vpop.eup %10732  ;;  %v6716_v33 = vsel %vm6715_vm10, %v10723_v25, %v6712_v45  ;;  %v6695_v35 = vsub.f32 1.0, %v6694_v51  ;;  %vm6730_vm7 = vmor %vm6728_vm13, %vm6729_vm8  ;;  %vm19082_vm10 = vcmask 1047559  }
 0xa7f   :  { %v10735_v59 = vpop.eup %10734  ;;  %v6721_v34 = vsel %vm16647_vm1, %v6720_v61, %v6716_v33  ;;  %v6746_v53 = vsel %vm6745_vm3, %v10725_v12, %v6742_v16  ;;  %v6725_v50 = vsub.f32 1.0, %v6724_v22  ;;  %vm19075_vm6 = vmmov %vm19074_vm0  ;;  %vm19079_vm1 = vcmask 1045509   ;;  %v19080_v33 = vld [vmem:[#allocation93_spill] sm:$0xff] }
 0xa80   :  { %v10737_v47 = vpop.eup %10736  ;;  %v6751_v30 = vsel %vm6748_vm2, %v6750_v26, %v6746_v53  ;;  %v6782_v4 = vmul.f32 %v10731_v14, %v6721_v34  ;;  %v6696_v6 = vmul.f32 %v10727_v10, %v6695_v35  ;;  %vm19076_vm11 = vmmov %vm19074_vm0  ;;  %v19077_v26 = vld [vmem:[#allocation72_spill] sm:$0xff]  ;;  %v19081_v35 = vld [vmem:[#allocation105_spill] sm:$0xff] }
 0xa81   :  { %v6784_v8 = vmul.f32 %v10733_v44, %v6751_v30  ;;  %v6726_v20 = vmul.f32 %v10729_v58, %v6725_v50  ;;  %v19085_v34 = vld [vmem:[#allocation96_spill] sm:$0xff]  ;;  %v19086_v53 = vld [vmem:[#allocation109_spill] sm:$0xff] }
 0xa82   :  { %6790 = vst.sshfl [vmem:[#allocation1 + $0x8] sm:$0xff pattern:$0x73625140] %v6782_v4  ;;  %v6808_v63 = vpack.c.bf16 %v6782_v4, %v6782_v4  ;;  %v6697_v54 = vadd.f32 %v10727_v10, %v6696_v6  ;;  %v19087_v50 = vld [vmem:[#allocation77_spill] sm:$0xff]  ;;  %v19090_v30 = vld [vmem:[#allocation112_spill] sm:$0xff]  ;;  %v19092_v6 = vld [vmem:[#allocation83_spill] sm:$0xff] }
 0xa83   :  { %6794 = vst.sshfl [vmem:[#allocation1 + $0x28] sm:$0xff pattern:$0x73625140] %v6784_v8  ;;  %v6810_v2 = vpack.c.bf16 %v6784_v8, %v6784_v8  ;;  %v6727_v55 = vadd.f32 %v10729_v58, %v6726_v20  ;;  %v19091_v4 = vld [vmem:[#allocation81_spill] sm:$0xff]  ;;  %v19093_v8 = vld [vmem:[#allocation104_spill] sm:$0xff] }
 0xa84   :  { %v6816_v48 = vunpack.c.l.b16 %v6808_v63  ;;  %v6701_v62 = vsel %vm6700_vm14, %v10727_v10, %v6697_v54  ;;  %v19094_v20 = vld [vmem:[#allocation116_spill] sm:$0xff]  ;;  %v19096_v63 = vld [vmem:[#allocation87_spill] sm:$0xff] }
 0xa85   :  { %v6818_v25 = vunpack.c.l.b16 %v6810_v2  ;;  %v6706_v12 = vsel %vm6703_vm15, %v6705_v3, %v6701_v62  ;;  %v6731_v41 = vsel %vm6730_vm7, %v10729_v58, %v6727_v55  ;;  %v19097_v54 = vld [vmem:[#allocation108_spill] sm:$0xff]  ;;  %v19100_v55 = vld [vmem:[#allocation90_spill] sm:$0xff]  ;;  %v19102_v62 = vld [vmem:[#allocation123_spill] sm:$0xff] }
 0xa86   :  { %v6822_v17 = vrot.slane %v6816_v48, 5  ;;  %v6736_v13 = vsel %vm6733_vm9, %v6735_v24, %v6731_v41  ;;  %v6781_v57 = vmul.f32 %v10735_v59, %v6706_v12  ;;  %v19084_v59 = vld [vmem:[#allocation75_spill] sm:$0xff]  ;;  %v19098_v2 = vld [vmem:[#allocation120_spill] sm:$0xff]  ;;  %v19106_v41 = vld [vmem:[#allocation94_spill] sm:$0xff] }
 0xa87   :  { %v6823_v60 = vrot.slane %v6818_v25, 4  ;;  %v6783_v46 = vmul.f32 %v10737_v47, %v6736_v13  ;;  %v19089_v47 = vld [vmem:[#allocation101_spill] sm:$0xff]  ;;  %v19099_v3 = vld [vmem:[#allocation88_spill] sm:$0xff]  ;;  %v19101_v48 = vld [vmem:[#allocation111_spill] sm:$0xff] }
 0xa88   :  { %6789 = vst.sshfl [vmem:[#allocation1] sm:$0xff pattern:$0x73625140] %v6781_v57  ;;  %v6807_v7 = vpack.c.bf16 %v6781_v57, %v6781_v57  ;;  %v19103_v24 = vld [vmem:[#allocation100_spill] sm:$0xff]  ;;  %v19104_v25 = vld [vmem:[#allocation134_spill] sm:$0xff]  ;;  %v19109_v57 = vld [vmem:[#allocation95_spill] sm:$0xff] }
 0xa89   :  { %v6824_v19 = vsel %vm19074_vm0, %v6823_v60, %v6822_v17  ;;  %6793 = vst.sshfl [vmem:[#allocation1 + $0x20] sm:$0xff pattern:$0x73625140] %v6783_v46  ;;  %v6809_v49 = vpack.c.bf16 %v6783_v46, %v6783_v46  ;;  %v19105_v12 = vld [vmem:[#allocation92_spill] sm:$0xff]  ;;  %v19107_v17 = vld [vmem:[#allocation103_spill] sm:$0xff]  ;;  %v19110_v60 = vld [vmem:[#allocation98_spill] sm:$0xff] }
 0xa8a   :  { %v16665_v23 = vpack.c.b16 %v6824_v19, %v6824_v19  ;;  %v6815_v11 = vunpack.c.l.b16 %v6807_v7  ;;  %v19108_v13 = vld [vmem:[#allocation136_spill] sm:$0xff]  ;;  %v19111_v46 = vld [vmem:[#allocation113_spill] sm:$0xff]  ;;  %v19113_v19 = vld [vmem:[#allocation106_spill] sm:$0xff] }
 0xa8b   :  { %v6817_v10 = vunpack.c.l.b16 %v6809_v49  ;;  %v19112_v7 = vld [vmem:[#allocation125_spill] sm:$0xff]  ;;  %v19114_v49 = vld [vmem:[#allocation138_spill] sm:$0xff] }
 0xa8c   :  { %v6819_v52 = vrot.slane %v6815_v11, 5  ;;  %6850 = vmatmul.bf16.vlgmr.msrb.gmra.mxu2 %v16665_v23  ;;  %6876 = vmatmul.bf16.vlgmr.msrb.gmra.mxu0 %v16665_v23  ;;  %v19115_v11 = vld [vmem:[#allocation117_spill] sm:$0xff] }
 0xa8d   :  { %v6820_v58 = vrot.slane %v6817_v10, 4  ;;  %6946 = vmatpush.bf16.msrb.mxu2 %v18232_v32  ;;  %6972 = vmatpush.bf16.msrb.mxu0 %v18896_v0  ;;  %v19116_v10 = vld [vmem:[#allocation128_spill] sm:$0xff] }
 0xa8f   :  { %v6821_v45 = vsel %vm19075_vm6, %v6820_v58, %v6819_v52  ;;  %v6792_v18 = vld [vmem:[#allocation1 + $0x2] ss:$4 sm:$0xff] }
 0xa90   :  { %v16672_v61 = vpack.c.b16 %v6821_v45, %v6821_v45  ;;  %v6797_v51 = vrot.slane %v6792_v18, 1  ;;  %v6796_v14 = vld [vmem:[#allocation1 + $0x22] ss:$4 sm:$0xff] }
 0xa91   :  { %6947 = vmatpush.bf16.msrb.mxu2 %v18903_v5  ;;  %6973 = vmatpush.bf16.msrb.mxu0 %v18904_v37  ;;  %v19117_v52 = vld [vmem:[#allocation110_spill] sm:$0xff]  ;;  %v19118_v58 = vld [vmem:[#allocation140_spill] sm:$0xff]  ;;  %v19119_v45 = vld [vmem:[#allocation121_spill] sm:$0xff] }
 0xa92   :  { %6837 = vmatmul.bf16.vlgmr.msra.gmra.mxu1 %v16672_v61  ;;  %6863 = vmatmul.bf16.vlgmr.msrb.gmra.mxu3 %v16672_v61  ;;  %v6800_v16 = vsel %vm19076_vm11, %v6796_v14, %v6797_v51  ;;  %v19120_v18 = vld [vmem:[#allocation130_spill] sm:$0xff] }
 0xa93   :  { %6933 = vmatpush.bf16.msra.mxu1 %v18216_v39  ;;  %6959 = vmatpush.bf16.msrb.mxu3 %v19077_v26  ;;  %v6801_v22 = vsel %vm19078_vm5, %v6796_v14, %v6800_v16  ;;  %v19121_v51 = vld [vmem:[#allocation114_spill] sm:$0xff]  ;;  %v19123_v16 = vld [vmem:[#allocation124_spill] sm:$0xff] }
 0xa94   :  { %v6802_v44 = vsel %vm19079_vm1, %v6796_v14, %v6801_v22  ;;  %v19124_v22 = vld [vmem:[#allocation132_spill] sm:$0xff] }
 0xa95   :  { %6948 = vmatpush.bf16.msrb.mxu2 %v19080_v33  ;;  %6974 = vmatpush.bf16.msrb.mxu0 %v19081_v35  ;;  %v6803_v29 = vsel %vm19082_vm10, %v6796_v14, %v6802_v44  ;;  %v19122_v14 = vld [vmem:[#allocation142_spill] sm:$0xff] }
 0xa96   :  { %6806 = vst [vmem:[#allocation2 + $0x14] sm:$0xf] %v6803_v29  ;;  %v19125_v44 = vld [vmem:[#allocation118_spill] sm:$0xff]  ;;  %v19126_v29 = vld [vmem:[#allocation143_spill] sm:$0xff] }
 0xa97   :  { %6934 = vmatpush.bf16.msra.mxu1 %v19083_v27  ;;  %6960 = vmatpush.bf16.msrb.mxu3 %v19084_v59 }
 0xa99   :  { %6949 = vmatpush.bf16.msrb.mxu2 %v19085_v34  ;;  %6975 = vmatpush.bf16.msrb.mxu0 %v19086_v53 }
 0xa9b   :  { %6935 = vmatpush.bf16.msra.mxu1 %v19087_v50  ;;  %6961 = vmatpush.bf16.msrb.mxu3 %v19088_v42 }
 0xa9c   :  { %6902 = vmatmul.bf16.vlgmr.msra.gmra.mxu2 %v16665_v23  ;;  %6928 = vmatmul.bf16.vlgmr.msra.gmra.mxu0 %v16665_v23 }
 0xa9d   :  { %6950 = vmatpush.bf16.msrb.mxu2 %v19089_v47  ;;  %6976 = vmatpush.bf16.msrb.mxu0 %v19090_v30 }
 0xa9f   :  { %6936 = vmatpush.bf16.msra.mxu1 %v19091_v4  ;;  %6962 = vmatpush.bf16.msrb.mxu3 %v19092_v6 }
 0xaa1   :  { %6951 = vmatpush.bf16.msrb.mxu2 %v19093_v8  ;;  %6977 = vmatpush.bf16.msrb.mxu0 %v19094_v20 }
 0xaa2   :  { %6889 = vmatmul.bf16.vlgmr.msrb.gmra.mxu1 %v16672_v61  ;;  %6915 = vmatmul.bf16.vlgmr.msra.gmra.mxu3 %v16672_v61 }
 0xaa3   :  { %6937 = vmatpush.bf16.msra.mxu1 %v19095_v1  ;;  %6963 = vmatpush.bf16.msrb.mxu3 %v19096_v63 }
 0xaa5   :  { %6952 = vmatpush.bf16.msrb.mxu2 %v19097_v54  ;;  %6978 = vmatpush.bf16.msrb.mxu0 %v19098_v2 }
 0xaa7   :  { %6938 = vmatpush.bf16.msra.mxu1 %v19099_v3  ;;  %6964 = vmatpush.bf16.msrb.mxu3 %v19100_v55 }
 0xaa9   :  { %6953 = vmatpush.bf16.msrb.mxu2 %v19101_v48  ;;  %6979 = vmatpush.bf16.msrb.mxu0 %v19102_v62 }
 0xaab   :  { %6939 = vmatpush.bf16.msra.mxu1 %v19105_v12  ;;  %6965 = vmatpush.bf16.msrb.mxu3 %v19106_v41 }
 0xaac   :  { %6954 = vmatmul.bf16.vlgmr.msrb.gmra.mxu2 %v16665_v23  ;;  %6980 = vmatmul.bf16.vlgmr.msrb.gmra.mxu0 %v16665_v23 }
 0xaad   :  { %6998 = vmatpush.bf16.msra.mxu2 %v19103_v24  ;;  %7024 = vmatpush.bf16.msra.mxu0 %v19104_v25  ;;  %v19204_v24 = vld [vmem:[#allocation42_spill] sm:$0xff] }
 0xaaf   :  { %6940 = vmatpush.bf16.msra.mxu1 %v19109_v57  ;;  %6966 = vmatpush.bf16.msrb.mxu3 %v19110_v60 }
 0xab1   :  { %6999 = vmatpush.bf16.msra.mxu2 %v19107_v17  ;;  %7025 = vmatpush.bf16.msra.mxu0 %v19108_v13  ;;  %v19131_v13 = vld [vmem:[#allocation129_spill] sm:$0xff] }
 0xab2   :  { %6941 = vmatmul.bf16.vlgmr.msra.gmra.mxu1 %v16672_v61  ;;  %6967 = vmatmul.bf16.vlgmr.msrb.gmra.mxu3 %v16672_v61 }
 0xab3   :  { %6985 = vmatpush.bf16.msrb.mxu1 %v19111_v46  ;;  %7011 = vmatpush.bf16.msra.mxu3 %v19112_v7 }
 0xab5   :  { %7000 = vmatpush.bf16.msra.mxu2 %v19113_v19  ;;  %7026 = vmatpush.bf16.msra.mxu0 %v19114_v49  ;;  %v19127_v49 = vld [vmem:[#allocation127_spill] sm:$0xff]  ;;  %v19130_v19 = vld [vmem:[#allocation144_spill] sm:$0xff] }
 0xab7   :  { %6986 = vmatpush.bf16.msrb.mxu1 %v19115_v11  ;;  %7012 = vmatpush.bf16.msra.mxu3 %v19116_v10 }
 0xab9   :  { %7001 = vmatpush.bf16.msra.mxu2 %v19117_v52  ;;  %7027 = vmatpush.bf16.msra.mxu0 %v19118_v58  ;;  %v19128_v52 = vld [vmem:[#allocation135_spill] sm:$0xff]  ;;  %v19129_v58 = vld [vmem:[#allocation122_spill] sm:$0xff] }
 0xabb   :  { %6987 = vmatpush.bf16.msrb.mxu1 %v19119_v45  ;;  %7013 = vmatpush.bf16.msra.mxu3 %v19120_v18 }
 0xabd   :  { %7002 = vmatpush.bf16.msra.mxu2 %v19121_v51  ;;  %7028 = vmatpush.bf16.msra.mxu0 %v19122_v14  ;;  %v19132_v51 = vld [vmem:[#allocation137_spill] sm:$0xff]  ;;  %v19133_v14 = vld [vmem:[#allocation126_spill] sm:$0xff] }
 0xabf   :  { %6988 = vmatpush.bf16.msrb.mxu1 %v19123_v16  ;;  %7014 = vmatpush.bf16.msra.mxu3 %v19124_v22  ;;  %v19134_v16 = vld [vmem:[#allocation145_spill] sm:$0xff]  ;;  %v19135_v22 = vld [vmem:[#allocation6_spill] sm:$0xff] }
 0xac1   :  { %7003 = vmatpush.bf16.msra.mxu2 %v19125_v44  ;;  %7029 = vmatpush.bf16.msra.mxu0 %v19126_v29  ;;  %v19136_v44 = vld [vmem:[#allocation4_spill] sm:$0xff]  ;;  %v19137_v29 = vld [vmem:[#allocation131_spill] sm:$0xff] }
 0xac3   :  { %6989 = vmatpush.bf16.msrb.mxu1 %v19127_v49  ;;  %7015 = vmatpush.bf16.msra.mxu3 %v19128_v52  ;;  %v19138_v49 = vld [vmem:[#allocation139_spill] sm:$0xff] }
 0xac5   :  { %7004 = vmatpush.bf16.msra.mxu2 %v19129_v58  ;;  %7030 = vmatpush.bf16.msra.mxu0 %v19130_v19  ;;  %v19139_v19 = vld [vmem:[#allocation7_spill] sm:$0xff]  ;;  %v19140_v58 = vld [vmem:[#allocation5_spill] sm:$0xff] }
 0xac7   :  { %6990 = vmatpush.bf16.msrb.mxu1 %v19131_v13  ;;  %7016 = vmatpush.bf16.msra.mxu3 %v19132_v51  ;;  %v19141_v51 = vld [vmem:[#allocation133_spill] sm:$0xff] }
 0xac9   :  { %7005 = vmatpush.bf16.msra.mxu2 %v19133_v14  ;;  %7031 = vmatpush.bf16.msra.mxu0 %v19134_v16  ;;  %v19142_v14 = vld [vmem:[#allocation141_spill] sm:$0xff]  ;;  %v19143_v16 = vld [vmem:[#allocation10_spill] sm:$0xff] }
 0xacb   :  { %6991 = vmatpush.bf16.msrb.mxu1 %v19137_v29  ;;  %7017 = vmatpush.bf16.msra.mxu3 %v19138_v49  ;;  %v19146_v49 = vld [vmem:[#allocation16_spill] sm:$0xff] }
 0xacc   :  { %7006 = vmatmul.bf16.vlgmr.msra.gmra.mxu2 %v16665_v23  ;;  %7032 = vmatmul.bf16.vlgmr.msra.gmra.mxu0 %v16665_v23  ;;  %v19147_v23 = vld [vmem:[#allocation12_spill] sm:$0xff] }
 0xacd   :  { %7414 = vmatpush.bf16.msrb.mxu2 %v19135_v22  ;;  %7440 = vmatpush.bf16.msrb.mxu0 %v19136_v44  ;;  %v19144_v22 = vld [vmem:[#allocation18_spill] sm:$0xff]  ;;  %v19145_v44 = vld [vmem:[#allocation8_spill] sm:$0xff] }
 0xace   :  { %v19154_v29 = vld [vmem:[#allocation24_spill] sm:$0xff] }
 0xacf   :  { %6992 = vmatpush.bf16.msrb.mxu1 %v19141_v51  ;;  %7018 = vmatpush.bf16.msra.mxu3 %v19142_v14  ;;  %v19150_v51 = vld [vmem:[#allocation20_spill] sm:$0xff]  ;;  %v19151_v14 = vld [vmem:[#allocation14_spill] sm:$0xff] }
 0xad1   :  { %7415 = vmatpush.bf16.msrb.mxu2 %v19139_v19  ;;  %7441 = vmatpush.bf16.msrb.mxu0 %v19140_v58  ;;  %v19148_v19 = vld [vmem:[#allocation23_spill] sm:$0xff]  ;;  %v19149_v58 = vld [vmem:[#allocation9_spill] sm:$0xff] }
 0xad2   :  { %6993 = vmatmul.bf16.vlgmr.msrb.gmra.mxu1 %v16672_v61  ;;  %7019 = vmatmul.bf16.vlgmr.msra.gmra.mxu3 %v16672_v61  ;;  %v19155_v61 = vld [vmem:[#allocation17_spill] sm:$0xff] }
 0xad3   :  { %7401 = vmatpush.bf16.msra.mxu1 %v19143_v16  ;;  %7427 = vmatpush.bf16.msrb.mxu3 %v19144_v22  ;;  %v19152_v16 = vld [vmem:[#allocation27_spill] sm:$0xff] }
 0xad4   :  { %v19153_v22 = vld [vmem:[#allocation11_spill] sm:$0xff] }
 0xad5   :  { %7416 = vmatpush.bf16.msrb.mxu2 %v19145_v44  ;;  %7442 = vmatpush.bf16.msrb.mxu0 %v19146_v49  ;;  %v19156_v44 = vld [vmem:[#allocation31_spill] sm:$0xff]  ;;  %v19157_v49 = vld [vmem:[#allocation13_spill] sm:$0xff] }
 0xad7   :  { %7402 = vmatpush.bf16.msra.mxu1 %v19147_v23  ;;  %7428 = vmatpush.bf16.msrb.mxu3 %v19148_v19  ;;  %v19158_v23 = vld [vmem:[#allocation28_spill] sm:$0xff]  ;;  %v19159_v19 = vld [vmem:[#allocation22_spill] sm:$0xff] }
 0xad9   :  { %7417 = vmatpush.bf16.msrb.mxu2 %v19149_v58  ;;  %7443 = vmatpush.bf16.msrb.mxu0 %v19150_v51  ;;  %v19160_v58 = vld [vmem:[#allocation35_spill] sm:$0xff] }
 0xada   :  { %v19161_v51 = vld [vmem:[#allocation15_spill] sm:$0xff] }
 0xadb   :  { %7403 = vmatpush.bf16.msra.mxu1 %v19151_v14  ;;  %7429 = vmatpush.bf16.msrb.mxu3 %v19152_v16  ;;  %v19162_v14 = vld [vmem:[#allocation32_spill] sm:$0xff]  ;;  %v19163_v16 = vld [vmem:[#allocation26_spill] sm:$0xff] }
 0xadd   :  { %7418 = vmatpush.bf16.msrb.mxu2 %v19153_v22  ;;  %7444 = vmatpush.bf16.msrb.mxu0 %v19154_v29  ;;  %v19164_v22 = vld [vmem:[#allocation38_spill] sm:$0xff]  ;;  %v19165_v29 = vld [vmem:[#allocation19_spill] sm:$0xff] }
 0xadf   :  { %7404 = vmatpush.bf16.msra.mxu1 %v19155_v61  ;;  %7430 = vmatpush.bf16.msrb.mxu3 %v19156_v44  ;;  %v19166_v61 = vld [vmem:[#allocation36_spill] sm:$0xff]  ;;  %v19167_v44 = vld [vmem:[#allocation30_spill] sm:$0xff] }
 0xae1   :  { %7419 = vmatpush.bf16.msrb.mxu2 %v19157_v49  ;;  %7445 = vmatpush.bf16.msrb.mxu0 %v19158_v23  ;;  %v19168_v49 = vld [vmem:[#allocation41_spill] sm:$0xff]  ;;  %v19169_v23 = vld [vmem:[#allocation46_spill] sm:$0xff] }
 0xae3   :  { %7405 = vmatpush.bf16.msra.mxu1 %v19159_v19  ;;  %7431 = vmatpush.bf16.msrb.mxu3 %v19160_v58  ;;  %v19170_v19 = vld [vmem:[#allocation40_spill] sm:$0xff]  ;;  %v19171_v58 = vld [vmem:[#allocation34_spill] sm:$0xff] }
 0xae5   :  { %7420 = vmatpush.bf16.msrb.mxu2 %v19161_v51  ;;  %7446 = vmatpush.bf16.msrb.mxu0 %v19162_v14  ;;  %v19172_v51 = vld [vmem:[#allocation45_spill] sm:$0xff] }
 0xae6   :  { %v19173_v14 = vld [vmem:[#allocation21_spill] sm:$0xff] }
 0xae7   :  { %7406 = vmatpush.bf16.msra.mxu1 %v19163_v16  ;;  %7432 = vmatpush.bf16.msrb.mxu3 %v19164_v22  ;;  %v19174_v16 = vld [vmem:[#allocation60_spill] sm:$0xff]  ;;  %v19175_v22 = vld [vmem:[#allocation49_spill] sm:$0xff] }
 0xae9   :  { %7421 = vmatpush.bf16.msrb.mxu2 %v19165_v29  ;;  %7447 = vmatpush.bf16.msrb.mxu0 %v19166_v61  ;;  %v19176_v29 = vld [vmem:[#allocation44_spill] sm:$0xff]  ;;  %v19177_v61 = vld [vmem:[#allocation25_spill] sm:$0xff] }
 0xaeb   :  { %7407 = vmatpush.bf16.msra.mxu1 %v19167_v44  ;;  %7433 = vmatpush.bf16.msrb.mxu3 %v19168_v49  ;;  %v19178_v44 = vld [vmem:[#allocation62_spill] sm:$0xff]  ;;  %v19179_v49 = vld [vmem:[#allocation53_spill] sm:$0xff] }
 0xaed   :  { %7466 = vmatpush.bf16.msra.mxu2 %v19169_v23  ;;  %7492 = vmatpush.bf16.msra.mxu0 %v19170_v19  ;;  %v19180_v23 = vld [vmem:[#allocation48_spill] sm:$0xff]  ;;  %v19181_v19 = vld [vmem:[#allocation29_spill] sm:$0xff] }
 0xaef   :  { %7408 = vmatpush.bf16.msra.mxu1 %v19171_v58  ;;  %7434 = vmatpush.bf16.msrb.mxu3 %v19172_v51  ;;  %v19182_v58 = vld [vmem:[#allocation67_spill] sm:$0xff]  ;;  %v19183_v51 = vld [vmem:[#allocation57_spill] sm:$0xff] }
 0xaf1   :  { %7467 = vmatpush.bf16.msra.mxu2 %v19175_v22  ;;  %7493 = vmatpush.bf16.msra.mxu0 %v19176_v29  ;;  %v19186_v22 = vld [vmem:[#allocation70_spill] sm:$0xff]  ;;  %v19187_v29 = vld [vmem:[#allocation59_spill] sm:$0xff] }
 0xaf3   :  { %7453 = vmatpush.bf16.msrb.mxu1 %v19173_v14  ;;  %7479 = vmatpush.bf16.msra.mxu3 %v19174_v16  ;;  %v19184_v14 = vld [vmem:[#allocation52_spill] sm:$0xff]  ;;  %v19185_v16 = vld [vmem:[#allocation33_spill] sm:$0xff] }
 0xaf5   :  { %7468 = vmatpush.bf16.msra.mxu2 %v19179_v49  ;;  %7494 = vmatpush.bf16.msra.mxu0 %v19180_v23  ;;  %v19190_v49 = vld [vmem:[#allocation73_spill] sm:$0xff] }
 0xaf6   :  { %v19191_v23 = vld [vmem:[#allocation61_spill] sm:$0xff] }
 0xaf7   :  { %7454 = vmatpush.bf16.msrb.mxu1 %v19177_v61  ;;  %7480 = vmatpush.bf16.msra.mxu3 %v19178_v44  ;;  %v19188_v61 = vld [vmem:[#allocation54_spill] sm:$0xff]  ;;  %v19189_v44 = vld [vmem:[#allocation37_spill] sm:$0xff] }
 0xaf9   :  { %7469 = vmatpush.bf16.msra.mxu2 %v19183_v51  ;;  %7495 = vmatpush.bf16.msra.mxu0 %v19184_v14  ;;  %v19194_v51 = vld [vmem:[#allocation76_spill] sm:$0xff]  ;;  %v19195_v14 = vld [vmem:[#allocation66_spill] sm:$0xff] }
 0xafb   :  { %7455 = vmatpush.bf16.msrb.mxu1 %v19181_v19  ;;  %7481 = vmatpush.bf16.msra.mxu3 %v19182_v58  ;;  %v19192_v19 = vld [vmem:[#allocation58_spill] sm:$0xff]  ;;  %v19193_v58 = vld [vmem:[#allocation39_spill] sm:$0xff] }
 0xafd   :  { %7470 = vmatpush.bf16.msra.mxu2 %v19187_v29  ;;  %7496 = vmatpush.bf16.msra.mxu0 %v19188_v61  ;;  %v19198_v29 = vld [vmem:[#allocation80_spill] sm:$0xff]  ;;  %v19199_v61 = vld [vmem:[#allocation69_spill] sm:$0xff] }
 0xaff   :  { %7456 = vmatpush.bf16.msrb.mxu1 %v19185_v16  ;;  %7482 = vmatpush.bf16.msra.mxu3 %v19186_v22  ;;  %v19196_v16 = vld [vmem:[#allocation63_spill] sm:$0xff] }
 0xb00   :  { %v19197_v22 = vld [vmem:[#allocation43_spill] sm:$0xff] }
 0xb01   :  { %7471 = vmatpush.bf16.msra.mxu2 %v19191_v23  ;;  %7497 = vmatpush.bf16.msra.mxu0 %v19192_v19  ;;  %v19202_v23 = vld [vmem:[#allocation84_spill] sm:$0xff] }
 0xb03   :  { %7457 = vmatpush.bf16.msrb.mxu1 %v19189_v44  ;;  %7483 = vmatpush.bf16.msra.mxu3 %v19190_v49  ;;  %v19200_v44 = vld [vmem:[#allocation68_spill] sm:$0xff]  ;;  %v19201_v49 = vld [vmem:[#allocation47_spill] sm:$0xff] }
 0xb05   :  { %7472 = vmatpush.bf16.msra.mxu2 %v19195_v14  ;;  %7498 = vmatpush.bf16.msra.mxu0 %v19196_v16 }
 0xb07   :  { %7458 = vmatpush.bf16.msrb.mxu1 %v19193_v58  ;;  %7484 = vmatpush.bf16.msra.mxu3 %v19194_v51 }
 0xb09   :  { %7473 = vmatpush.bf16.msra.mxu2 %v19199_v61  ;;  %7499 = vmatpush.bf16.msra.mxu0 %v19200_v44  ;;  %v6877_v19 = vpop.f32.mrf.mxu0 }
 0xb0b   :  { %7459 = vmatpush.bf16.msrb.mxu1 %v19197_v22  ;;  %7485 = vmatpush.bf16.msra.mxu3 %v19198_v29  ;;  %v19203_v29 = vld [vmem:[#allocation50_spill] sm:$0xff] }
 0xb0f   :  { %7460 = vmatpush.bf16.msrb.mxu1 %v19201_v49  ;;  %7486 = vmatpush.bf16.msra.mxu3 %v19202_v23  ;;  %v6838_v58 = vpop.f32.mrf.mxu1  ;;  %v6851_v13 = vpop.f32.mrf.mxu2 }
 0xb10   :  { %v6852_v52 = vadd.f32 %v6851_v13, %v6838_v58 }
 0xb11   :  { %v6879_v51 = vpop.f32.mrf.mxu0 }
 0xb12   :  { %v7045_v17 = vrot.slane %v6852_v52, 2  ;;  %v7053_v45 = vrot.slane %v6852_v52, 3 }
 0xb14   :  { %v7077_v25 = vadd.f32 %v7045_v17, %v19203_v29  ;;  %v7085_v44 = vadd.f32 %v7053_v45, %v19204_v24  ;;  %v19207_v24 = vld [vmem:[#allocation65_spill] sm:$0xff] }
 0xb15   :  { %v6864_v14 = vpop.f32.mrf.mxu3 }
 0xb16   :  { %v6878_v62 = vadd.f32 %v6877_v19, %v6864_v14  ;;  %v9854_v49 = vmul.f32 -1.442695, %v7077_v25  ;;  %v9856_v2 = vmul.f32 -1.442695, %v7085_v44 }
 0xb17   :  { %v6840_v16 = vpop.f32.mrf.mxu1  ;;  %v6853_v18 = vpop.f32.mrf.mxu2 }
 0xb18   :  { %v7046_v51 = vrot.slane %v6878_v62, 2  ;;  %10738 = vpow2.f32 %v9854_v49  ;;  %v7054_v13 = vrot.slane %v6878_v62, 3  ;;  %v19205_v18 = vld [vmem:[#allocation51_spill] sm:$0xff]  ;;  %v19208_v62 = vld [vmem:[#allocation146_spill] sm:$0xff] }
 0xb19   :  { %v6929_v22 = vpop.f32.mrf.mxu0  ;;  %10740 = vpow2.f32 %v9856_v2 }
 0xb1a   :  { %v7078_v52 = vadd.f32 %v7046_v51, %v19205_v18 }
 0xb1c   :  { %v9855_v49 = vmul.f32 -1.442695, %v7078_v52 }
 0xb1d   :  { %v6866_v61 = vpop.f32.mrf.mxu3 }
 0xb1e   :  { %v19206_v61 = vld [vmem:[#allocation82_spill] sm:$0xff]  ;;  %v10739_v14 = vpop.eup %10738  ;;  %10742 = vpow2.f32 %v9855_v49 }
 0xb1f   :  { %v6890_v48 = vpop.f32.mrf.mxu1  ;;  %v6903_v23 = vpop.f32.mrf.mxu2  ;;  %v7086_v29 = vadd.f32 %v7054_v13, %v19206_v61  ;;  %v16826_v46 = vadd.f32 1.0, %v10739_v14  ;;  %v19210_v13 = vld [vmem:[#allocation56_spill] sm:$0xff] }
 0xb20   :  { %v6904_v10 = vadd.f32 %v6903_v23, %v6890_v48  ;;  %v10741_v2 = vpop.eup %10740 }
 0xb21   :  { %v6931_v11 = vpop.f32.mrf.mxu0  ;;  %v9857_v7 = vmul.f32 -1.442695, %v7086_v29  ;;  %v16830_v61 = vadd.f32 1.0, %v10741_v2  ;;  %vm7114_vm2 = vweird.f32 %v16826_v46 }
 0xb22   :  { %v7047_v58 = vrot.slane %v6904_v10, 2  ;;  %v7055_v54 = vrot.slane %v6904_v10, 3  ;;  %v19209_v10 = vld [vmem:[#allocation78_spill] sm:$0xff] }
 0xb23   :  { %10744 = vpow2.f32 %v9857_v7  ;;  %vm7144_vm6 = vweird.f32 %v16830_v61 }
 0xb24   :  { %v7079_v48 = vadd.f32 %v7047_v58, %v19207_v24  ;;  %v7087_v23 = vadd.f32 %v7055_v54, %v19208_v62  ;;  %10746 = vrcp.f32 %v16826_v46  ;;  %v7150_v24 = vand.u32 2147483648, %v16830_v61 }
 0xb25   :  { %v6916_v16 = vpop.f32.mrf.mxu3 }
 0xb26   :  { %v6930_v17 = vadd.f32 %v6929_v22, %v6916_v16  ;;  %v9858_v51 = vmul.f32 -1.442695, %v7079_v48 }
 0xb27   :  { %v6892_v45 = vpop.f32.mrf.mxu1  ;;  %v6905_v19 = vpop.f32.mrf.mxu2 }
 0xb28   :  { %v7048_v25 = vrot.slane %v6930_v17, 2  ;;  %v7056_v11 = vrot.slane %v6930_v17, 3  ;;  %v9860_v19 = vmul.f32 -1.442695, %v7087_v23  ;;  %10748 = vpow2.f32 %v9858_v51 }
 0xb29   :  { %v16823_v44 = vpop.f32.mrf.mxu0 }
 0xb2a   :  { %v7080_v22 = vadd.f32 %v7048_v25, %v19209_v10  ;;  %v7088_v16 = vadd.f32 %v7056_v11, %v19210_v13  ;;  %10750 = vpow2.f32 %v9860_v19  ;;  %v10743_v25 = vpop.eup %10742 }
 0xb2b   :  { %10752 = vrcp.f32 %v16830_v61  ;;  %v10745_v14 = vpop.eup %10744  ;;  %v16838_v2 = vadd.f32 1.0, %v10743_v25 }
 0xb2c   :  { %v9859_v52 = vmul.f32 -1.442695, %v7080_v22  ;;  %v9861_v29 = vmul.f32 -1.442695, %v7088_v16  ;;  %v16834_v48 = vpop.eup %10746  ;;  %v16842_v16 = vadd.f32 1.0, %v10745_v14 }
 0xb2d   :  { %v6918_v45 = vpop.f32.mrf.mxu3  ;;  %v7135_v8 = vand.u32 2147483648, %v16838_v2  ;;  %vm7115_vm3 = vweird.f32 %v16834_v48 }
 0xb2e   :  { %10754 = vpow2.f32 %v9859_v52  ;;  %v10749_v7 = vpop.eup %10748  ;;  %vm16916_vm12 = vmor %vm7114_vm2, %vm7115_vm3 }
 0xb2f   :  { %v6955_v58 = vpop.f32.mrf.mxu2  ;;  %v6942_v54 = vpop.f32.mrf.mxu1  ;;  %10756 = vpow2.f32 %v9861_v29  ;;  %v16844_v19 = vadd.f32 1.0, %v10749_v7  ;;  %v7110_v29 = vmul.f32 %v16834_v48, %v16826_v46  ;;  %v16909_v55 = vor.u32 1.1754944e-38, %v7135_v8 }
 0xb30   :  { %v10751_v23 = vpop.eup %10750  ;;  %10758 = vrcp.f32 %v16838_v2  ;;  %v6956_v57 = vadd.f32 %v6955_v58, %v6942_v54 }
 0xb31   :  { %v6983_v17 = vpop.f32.mrf.mxu0  ;;  %v16840_v51 = vpop.eup %10752  ;;  %10760 = vrcp.f32 %v16842_v16  ;;  %vm7190_vm8 = vweird.f32 %v16844_v19 }
 0xb32   :  { %v16848_v17 = vadd.f32 1.0, %v10751_v23  ;;  %10762 = vrcp.f32 %v16844_v19  ;;  %v7049_v47 = vrot.slane %v6956_v57, 2  ;;  %v7057_v53 = vrot.slane %v6956_v57, 3 }
 0xb33   :  { %vm7145_vm7 = vweird.f32 %v16840_v51 }
 0xb34   :  { %v10755_v45 = vpop.eup %10754  ;;  %10764 = vrcp.f32 %v16848_v17  ;;  %v7226_v30 = vand.u32 2147483648, %v16848_v17  ;;  %vm7220_vm4 = vweird.f32 %v16848_v17  ;;  %v7224_v57 = vand.u32 2147483647, %v16848_v17 }
 0xb35   :  { %v16836_v11 = vpop.f32.mrf.mxu3  ;;  %v10757_v52 = vpop.eup %10756  ;;  %v16852_v25 = vadd.f32 1.0, %v10755_v45  ;;  %v7120_v45 = vand.u32 2147483648, %v16826_v46 }
 0xb36   :  { %v16857_v14 = vadd.f32 1.0, %v10757_v52  ;;  %v16861_v23 = vpop.eup %10758  ;;  %v6982_v12 = vadd.f32 %v16823_v44, %v16836_v11  ;;  %vm16966_vm11 = vcmp.eq.f32.partialorder %v7224_v57, 8.507059e+37 }
 0xb37   :  { %v6957_v49 = vpop.f32.mrf.mxu2  ;;  %v6944_v22 = vpop.f32.mrf.mxu1  ;;  %10766 = vrcp.f32 %v16852_v25  ;;  %v7125_v58 = vmul.f32 %v16861_v23, %v16838_v2  ;;  %vm7205_vm14 = vweird.f32 %v16852_v25  ;;  %vm7130_vm0 = vweird.f32 %v16861_v23 }
 0xb38   :  { %v7140_v49 = vmul.f32 %v16840_v51, %v16830_v61  ;;  %v7111_v22 = vsub.f32 1.0, %v7110_v29  ;;  %10768 = vrcp.f32 %v16857_v14  ;;  %v16866_v13 = vpop.eup %10760  ;;  %v7196_v29 = vand.u32 2147483648, %v16844_v19 }
 0xb39   :  { %v16869_v10 = vpop.eup %10762  ;;  %v16894_v54 = vmul.f32 %v16866_v13, %v16842_v16  ;;  %v7126_v1 = vsub.f32 1.0, %v7125_v58  ;;  %v16935_v58 = vor.u32 1.1754944e-38, %v7226_v30  ;;  %vm7235_vm15 = vweird.f32 %v16857_v14 }
 0xb3a   :  { %v7141_v62 = vsub.f32 1.0, %v7140_v49  ;;  %v7112_v52 = vmul.f32 %v16834_v48, %v7111_v22  ;;  %v16875_v60 = vpop.eup %10764  ;;  %v16880_v22 = vor.u32 1.1754944e-38, %v7120_v45  ;;  %v16931_v33 = vor.u32 1.1754944e-38, %v7196_v29 }
 0xb3b   :  { %v7216_v20 = vmul.f32 %v16875_v60, %v16848_v17  ;;  %v7156_v8 = vsub.f32 1.0, %v16894_v54  ;;  %v7081_v54 = vadd.f32 %v7049_v47, %v19037_v56  ;;  %v7211_v29 = vand.u32 2147483648, %v16852_v25 }
 0xb3c   :  { %v7142_v41 = vmul.f32 %v16840_v51, %v7141_v62  ;;  %v16897_v45 = vadd.f32 %v16834_v48, %v7112_v52  ;;  %v16945_v30 = vmul.f32 %v16861_v23, %v7126_v1  ;;  %vm7191_vm13 = vweird.f32 %v16869_v10 }
 0xb3d   :  { %v6970_v7 = vpop.f32.mrf.mxu3  ;;  %v16888_v49 = vpop.eup %10766  ;;  %v7217_v6 = vsub.f32 1.0, %v7216_v20  ;;  %v7089_v20 = vadd.f32 %v7057_v53, %v18492_v36  ;;  %v7050_v53 = vrot.slane %v6982_v12, 2  ;;  %10770 = vtanh.f32 %v7081_v54  ;;  %vm16983_vm3 = vmor %vm7190_vm8, %vm7191_vm13 }
 0xb3e   :  { %v16884_v7 = vor.u32 1.1754944e-38, %v7150_v24  ;;  %v16900_v62 = vpop.eup %10768  ;;  %v7186_v24 = vmul.f32 %v16869_v10, %v16844_v19  ;;  %v7201_v3 = vmul.f32 %v16888_v49, %v16852_v25  ;;  %v16921_v63 = vadd.f32 %v16840_v51, %v7142_v41 }
 0xb3f   :  { %v7231_v52 = vmul.f32 %v16900_v62, %v16857_v14  ;;  %v7194_v41 = vand.u32 2147483647, %v16844_v19  ;;  %vm7221_vm1 = vweird.f32 %v16875_v60  ;;  %vm7206_vm5 = vweird.f32 %v16888_v49 }
 0xb40   :  { %v7187_v35 = vsub.f32 1.0, %v7186_v24  ;;  %v7202_v24 = vsub.f32 1.0, %v7201_v3  ;;  %v7058_v3 = vrot.slane %v6982_v12, 3  ;;  %vm17000_vm8 = vmor %vm7220_vm4, %vm7221_vm1  ;;  %vm7236_vm13 = vweird.f32 %v16900_v62 }
 0xb41   :  { %v7232_v50 = vsub.f32 1.0, %v7231_v52  ;;  %vm16959_vm9 = vcmp.eq.f32.partialorder %v7194_v41, 8.507059e+37  ;;  %vm17031_vm1 = vmor %vm7205_vm14, %vm7206_vm5 }
 0xb42   :  { %v7188_v56 = vmul.f32 %v16869_v10, %v7187_v35  ;;  %v16957_v35 = vor.u32 1.1754944e-38, %v7211_v29  ;;  %vm17060_vm14 = vmor %vm7144_vm6, %vm7145_vm7  ;;  %vm19238_vm7 = vweird.f32 %v16838_v2 }
 0xb43   :  { %v7233_v11 = vmul.f32 %v16900_v62, %v7232_v50  ;;  %v7157_v50 = vmul.f32 %v16866_v13, %v7156_v8 }
 0xb44   :  { %v7189_v12 = vadd.f32 %v16869_v10, %v7188_v56 }
 0xb46   :  { %v7193_v17 = vsel %vm16983_vm3, %v16869_v10, %v7189_v12  ;;  %v7239_v10 = vand.u32 2147483647, %v16857_v14  ;;  %vm17040_vm3 = vmor %vm7235_vm15, %vm7236_vm13 }
 0xb47   :  { %v7198_v19 = vsel %vm16959_vm9, %v16931_v33, %v7193_v17  ;;  %vm17077_vm9 = vmor %vm19238_vm7, %vm7130_vm0  ;;  %vm19243_vm0 = vweird.f32 %v16842_v16 }
 0xb48   :  { %vm7240_vm6 = vcmp.eq.f32.partialorder %v7239_v10, 8.507059e+37 }
 0xb49   :  { %v16886_v18 = vpop.f32.mrf.mxu0 }
 0xb4f   :  { %v6994_v4 = vpop.f32.mrf.mxu1  ;;  %v7007_v37 = vpop.f32.mrf.mxu2 }
 0xb50   :  { %v7008_v5 = vadd.f32 %v7007_v37, %v6994_v4  ;;  %v7218_v37 = vmul.f32 %v16875_v60, %v7217_v6  ;;  %v7241_v4 = vand.u32 2147483648, %v16857_v14  ;;  %v7158_v14 = vadd.f32 %v16866_v13, %v7157_v50 }
 0xb51   :  { %v7035_v42 = vpop.f32.mrf.mxu0  ;;  %v19241_v50 = vrot.slane %v16629_v21, 7  ;;  %v19246_v21 = vsel %vm16916_vm12, %v16834_v48, %v16897_v45  ;;  %v19248_v48 = vand.u32 2147483648, %v16842_v16 }
 0xb52   :  { %v7051_v0 = vrot.slane %v7008_v5, 2  ;;  %v7059_v47 = vrot.slane %v7008_v5, 3  ;;  %v7203_v5 = vmul.f32 %v16888_v49, %v7202_v24  ;;  %v7219_v54 = vadd.f32 %v16875_v60, %v7218_v37 }
 0xb53   :  { %v7090_v37 = vadd.f32 %v7058_v3, %v18503_v28  ;;  %v7234_v3 = vadd.f32 %v16900_v62, %v7233_v11  ;;  %v7209_v11 = vand.u32 2147483647, %v16852_v25  ;;  %v7128_v25 = vadd.f32 %v16861_v23, %v16945_v30 }
 0xb54   :  { %v7083_v42 = vadd.f32 %v7051_v0, %v13782_v43  ;;  %v7091_v1 = vadd.f32 %v7059_v47, %v19048_v9  ;;  %v19217_v47 = vld [vmem:[#allocation107_spill] sm:$0xff]  ;;  %v7166_v45 = vor.u32 1.1754944e-38, %v19248_v48 }
 0xb55   :  { %v7020_v44 = vpop.f32.mrf.mxu3  ;;  %v7082_v9 = vadd.f32 %v7050_v53, %v19217_v47  ;;  %v7204_v53 = vadd.f32 %v16888_v49, %v7203_v5  ;;  %vm7210_vm15 = vcmp.eq.f32.partialorder %v7209_v11, 8.507059e+37  ;;  %v19251_v11 = vrot.slane %v16625_v15, 7 }
 0xb56   :  { %v9862_v52 = vmul.f32 -1.442695, %v7083_v42  ;;  %v9864_v41 = vmul.f32 -1.442695, %v7091_v1  ;;  %v7034_v24 = vadd.f32 %v16886_v18, %v7020_v44  ;;  %v19220_v18 = vand.u32 2147483647, %v16826_v46 }
 0xb57   :  { %v6996_v57 = vpop.f32.mrf.mxu1  ;;  %v7009_v29 = vpop.f32.mrf.mxu2  ;;  %v19225_v46 = vand.u32 2147483647, %v16830_v61 }
 0xb58   :  { %10772 = vpow2.f32 %v9862_v52  ;;  %v7052_v42 = vrot.slane %v7034_v24, 2  ;;  %v7060_v1 = vrot.slane %v7034_v24, 3  ;;  %vm16990_vm10 = vcmp.eq.f32.partialorder %v19220_v18, 8.507059e+37  ;;  %v19228_v52 = vld [vmem:[#allocation119_spill] sm:$0xff]  ;;  %v10771_v24 = vpop.eup %10770 }
 0xb59   :  { %10774 = vpow2.f32 %v9864_v41  ;;  %vm17007_vm2 = vcmp.eq.f32.partialorder %v19225_v46, 8.507059e+37  ;;  %v7223_v57 = vsel %vm17000_vm8, %v16875_v60, %v7219_v54  ;;  %v19229_v29 = vand.u32 2147483647, %v16838_v2 }
 0xb5a   :  { %v7084_v5 = vadd.f32 %v7052_v42, %v13863_v38  ;;  %v7092_v41 = vadd.f32 %v7060_v1, %v19228_v52  ;;  %10776 = vtanh.f32 %v7089_v20  ;;  %v7242_v54 = vor.u32 1.1754944e-38, %v7241_v4 }
 0xb5b   :  { %vm17022_vm4 = vcmp.eq.f32.partialorder %v19229_v29, 8.507059e+37  ;;  %10778 = vtanh.f32 %v7082_v9  ;;  %v7208_v1 = vsel %vm17031_vm1, %v16888_v49, %v7204_v53  ;;  %v7238_v4 = vsel %vm17040_vm3, %v16900_v62, %v7234_v3 }
 0xb5c   :  { %v9863_v60 = vmul.f32 -1.442695, %v7084_v5  ;;  %v9865_v20 = vmul.f32 -1.442695, %v7092_v41  ;;  %10780 = vtanh.f32 %v7090_v37  ;;  %v7228_v33 = vsel %vm16966_vm11, %v16935_v58, %v7223_v57 }
 0xb5d   :  { %v7022_v9 = vpop.f32.mrf.mxu3  ;;  %v7147_v62 = vsel %vm17060_vm14, %v16840_v51, %v16921_v63  ;;  %v7213_v6 = vsel %vm7210_vm15, %v16957_v35, %v7208_v1  ;;  %v7337_v37 = vmul.f32 %v19241_v50, %v7198_v19  ;;  %v7132_v63 = vsel %vm17077_vm9, %v16861_v23, %v7128_v25 }
 0xb5e   :  { %v10773_v56 = vpop.eup %10772  ;;  %10782 = vpow2.f32 %v9863_v60  ;;  %vm19242_vm11 = vweird.f32 %v16866_v13  ;;  %v7243_v51 = vsel %vm7240_vm6, %v7242_v54, %v7238_v4  ;;  %v7122_v23 = vsel %vm16990_vm10, %v16880_v22, %v19246_v21 }
 0xb5f   :  { %v10775_v46 = vpop.eup %10774  ;;  %v17067_v30 = vadd.f32 1.0, %v10773_v56  ;;  %10784 = vpow2.f32 %v9865_v20  ;;  %vm17093_vm5 = vmor %vm19243_vm0, %vm19242_vm11  ;;  %v19247_v53 = vrot.slane %v16632_v31, 7  ;;  %v7152_v34 = vsel %vm17007_vm2, %v16884_v7, %v7147_v62 }
 0xb60   :  { %v17082_v58 = vadd.f32 1.0, %v10775_v46  ;;  %v10777_v0 = vpop.eup %10776  ;;  %v7162_v5 = vsel %vm17093_vm5, %v16866_v13, %v7158_v14  ;;  %v7341_v17 = vmul.f32 %v10771_v24, %v7122_v23  ;;  %v19249_v22 = vrot.slane %v16621_v40, 7 }
 0xb61   :  { %10786 = vrcp.f32 %v17067_v30  ;;  %v10779_v35 = vpop.eup %10778  ;;  %v7339_v3 = vmul.f32 %v19247_v53, %v7228_v33  ;;  %v7343_v57 = vmul.f32 %v10777_v0, %v7152_v34  ;;  %v7137_v13 = vsel %vm17022_vm4, %v16909_v55, %v7132_v63 }
 0xb62   :  { %10788 = vrcp.f32 %v17082_v58  ;;  %v10781_v41 = vpop.eup %10780  ;;  %v7338_v8 = vmul.f32 %v19249_v22, %v7213_v6  ;;  %v19250_v29 = vand.u32 2147483647, %v16842_v16  ;;  %v7340_v44 = vmul.f32 %v19251_v11, %v7243_v51 }
 0xb63   :  { %v17126_v24 = vadd.f32 %v7341_v17, %v7337_v37  ;;  %v7342_v10 = vmul.f32 %v10779_v35, %v7137_v13  ;;  %v17130_v40 = vadd.f32 %v7343_v57, %v7339_v3  ;;  %v7274_v9 = vand.u32 2147483647, %v17067_v30 }
 0xb64   :  { %v10783_v31 = vpop.eup %10782  ;;  %vm7164_vm12 = vcmp.eq.f32.partialorder %v19250_v29, 8.507059e+37  ;;  %v7276_v56 = vand.u32 2147483648, %v17067_v30  ;;  %v7304_v14 = vand.u32 2147483647, %v17082_v58  ;;  %v7306_v4 = vand.u32 2147483648, %v17082_v58 }
 0xb65   :  { %v10785_v7 = vpop.eup %10784  ;;  %v7167_v42 = vsel %vm7164_vm12, %v7166_v45, %v7162_v5  ;;  %v17128_v60 = vadd.f32 1.0, %v10783_v31  ;;  %v17134_v55 = vadd.f32 %v7342_v10, %v7338_v8  ;;  %vm7270_vm2 = vweird.f32 %v17067_v30 }
 0xb66   :  { %v7344_v20 = vmul.f32 %v10781_v41, %v7167_v42  ;;  %v17132_v12 = vadd.f32 1.0, %v10785_v7  ;;  %vm7300_vm8 = vweird.f32 %v17082_v58  ;;  %vm17152_vm4 = vcmp.eq.f32.partialorder %v7274_v9, 8.507059e+37 }
 0xb67   :  { %v10787_v18 = vpop.eup %10786  ;;  %10790 = vrcp.f32 %v17128_v60  ;;  %v7277_v0 = vor.u32 1.1754944e-38, %v7276_v56  ;;  %vm7305_vm3 = vcmp.eq.f32.partialorder %v7304_v14, 8.507059e+37  ;;  %v7307_v2 = vor.u32 1.1754944e-38, %v7306_v4 }
 0xb68   :  { %v10789_v16 = vpop.eup %10788  ;;  %v17137_v15 = vadd.f32 %v7344_v20, %v7340_v44  ;;  %v7266_v54 = vmul.f32 %v10787_v18, %v17067_v30  ;;  %10792 = vrcp.f32 %v17132_v12  ;;  %vm7271_vm10 = vweird.f32 %v10787_v18 }
 0xb69   :  { %10794 = vtanh.f32 %v17126_v24  ;;  %v7296_v25 = vmul.f32 %v10789_v16, %v17082_v58  ;;  %vm7301_vm13 = vweird.f32 %v10789_v16  ;;  %vm7272_vm1 = vmor %vm7270_vm2, %vm7271_vm10  ;;  %v7289_v23 = vand.u32 2147483647, %v17128_v60 }
 0xb6a   :  { %10796 = vtanh.f32 %v17130_v40  ;;  %v7267_v1 = vsub.f32 1.0, %v7266_v54  ;;  %vm7302_vm14 = vmor %vm7300_vm8, %vm7301_vm13  ;;  %v7291_v53 = vand.u32 2147483648, %v17128_v60  ;;  %v7321_v17 = vand.u32 2147483648, %v17132_v12 }
 0xb6b   :  { %10798 = vtanh.f32 %v17134_v55  ;;  %v7297_v19 = vsub.f32 1.0, %v7296_v25  ;;  %v7319_v57 = vand.u32 2147483647, %v17132_v12  ;;  %vm7285_vm9 = vweird.f32 %v17128_v60 }
 0xb6c   :  { %10800 = vtanh.f32 %v17137_v15  ;;  %v7268_v46 = vmul.f32 %v10787_v18, %v7267_v1  ;;  %v7292_v44 = vor.u32 1.1754944e-38, %v7291_v53  ;;  %vm7315_vm11 = vweird.f32 %v17132_v12  ;;  %v19268_v53 = vld [vmem:[#allocation105_spill] sm:$0xff] }
 0xb6d   :  { %v10791_v49 = vpop.eup %10790  ;;  %v7298_v33 = vmul.f32 %v10789_v16, %v7297_v19  ;;  %vm7290_vm0 = vcmp.eq.f32.partialorder %v7289_v23, 8.507059e+37  ;;  %v7322_v20 = vor.u32 1.1754944e-38, %v7321_v17  ;;  %vm7320_vm12 = vcmp.eq.f32.partialorder %v7319_v57, 8.507059e+37  ;;  %v19267_v23 = vld [vmem:[#allocation93_spill] sm:$0xff]  ;;  %v19273_v17 = vld [vmem:[#allocation88_spill] sm:$0xff] }
 0xb6e   :  { %v10793_v62 = vpop.eup %10792  ;;  %v7269_v61 = vadd.f32 %v10787_v18, %v7268_v46  ;;  %v7281_v50 = vmul.f32 %v10791_v49, %v17128_v60  ;;  %vm7286_vm15 = vweird.f32 %v10791_v49  ;;  %vm19254_vm10 = vcmask 1041409   ;;  %v19280_v57 = vld [vmem:[#allocation116_spill] sm:$0xff] }
 0xb6f   :  { %v10795_v37 = vpop.eup %10794  ;;  %v7299_v63 = vadd.f32 %v10789_v16, %v7298_v33  ;;  %v7311_v30 = vmul.f32 %v10793_v62, %v17132_v12  ;;  %vm7316_vm7 = vweird.f32 %v10793_v62  ;;  %vm7287_vm6 = vmor %vm7285_vm9, %vm7286_vm15  ;;  %vm19258_vm13 = vcmask 1043459  }
 0xb70   :  { %v10797_v51 = vpop.eup %10796  ;;  %v7273_v35 = vsel %vm7272_vm1, %v10787_v18, %v7269_v61  ;;  %v7282_v21 = vsub.f32 1.0, %v7281_v50  ;;  %vm7317_vm5 = vmor %vm7315_vm11, %vm7316_vm7  ;;  %vm19262_vm1 = vcmask 1047559  }
 0xb71   :  { %v10799_v3 = vpop.eup %10798  ;;  %v7278_v5 = vsel %vm17152_vm4, %v7277_v0, %v7273_v35  ;;  %v7303_v41 = vsel %vm7302_vm14, %v10789_v16, %v7299_v63  ;;  %v7312_v34 = vsub.f32 1.0, %v7311_v30  ;;  %vm19255_vm2 = vmmov %vm19254_vm10  ;;  %v19260_v30 = vld [vmem:[#allocation79_spill] sm:$0xff]  ;;  %vm19261_vm4 = vcmask 1045509   ;;  %v19264_v35 = vld [vmem:[#allocation102_spill] sm:$0xff] }
 0xb72   :  { %v10801_v48 = vpop.eup %10800  ;;  %v7308_v45 = vsel %vm7305_vm3, %v7307_v2, %v7303_v41  ;;  %v7353_v22 = vmul.f32 %v10795_v37, %v7278_v5  ;;  %v7283_v8 = vmul.f32 %v10791_v49, %v7282_v21  ;;  %vm19257_vm8 = vmmov %vm19255_vm2  ;;  %v19259_v2 = vld [vmem:[#allocation77_spill] sm:$0xff]  ;;  %v19266_v21 = vld [vmem:[#allocation83_spill] sm:$0xff] }
 0xb73   :  { %v7355_v58 = vmul.f32 %v10797_v51, %v7308_v45  ;;  %v7313_v31 = vmul.f32 %v10793_v62, %v7312_v34  ;;  %v19263_v51 = vld [vmem:[#allocation89_spill] sm:$0xff]  ;;  %v19270_v5 = vld [vmem:[#allocation87_spill] sm:$0xff]  ;;  %v19271_v41 = vld [vmem:[#allocation96_spill] sm:$0xff] }
 0xb74   :  { %7361 = vst.sshfl [vmem:[#allocation1] sm:$0xff pattern:$0x73625140] %v7353_v22  ;;  %v7379_v13 = vpack.c.bf16 %v7353_v22, %v7353_v22  ;;  %v7284_v29 = vadd.f32 %v10791_v49, %v7283_v8  ;;  %v19272_v34 = vld [vmem:[#allocation109_spill] sm:$0xff]  ;;  %v19276_v22 = vld [vmem:[#allocation112_spill] sm:$0xff] }
 0xb75   :  { %7365 = vst.sshfl [vmem:[#allocation1 + $0x20] sm:$0xff pattern:$0x73625140] %v7355_v58  ;;  %v7381_v11 = vpack.c.bf16 %v7355_v58, %v7355_v58  ;;  %v7314_v7 = vadd.f32 %v10793_v62, %v7313_v31  ;;  %v19275_v45 = vld [vmem:[#allocation101_spill] sm:$0xff]  ;;  %v19277_v8 = vld [vmem:[#allocation92_spill] sm:$0xff]  ;;  %v19278_v58 = vld [vmem:[#allocation94_spill] sm:$0xff] }
 0xb76   :  { %v7387_v42 = vunpack.c.l.b16 %v7379_v13  ;;  %v7288_v10 = vsel %vm7287_vm6, %v10791_v49, %v7284_v29  ;;  %v19279_v31 = vld [vmem:[#allocation104_spill] sm:$0xff]  ;;  %v19281_v13 = vld [vmem:[#allocation95_spill] sm:$0xff]  ;;  %v19282_v29 = vld [vmem:[#allocation98_spill] sm:$0xff] }
 0xb77   :  { %v7389_v18 = vunpack.c.l.b16 %v7381_v11  ;;  %v7293_v16 = vsel %vm7290_vm0, %v7292_v44, %v7288_v10  ;;  %v7318_v54 = vsel %vm7317_vm5, %v10793_v62, %v7314_v7  ;;  %v19283_v11 = vld [vmem:[#allocation113_spill] sm:$0xff]  ;;  %v19285_v7 = vld [vmem:[#allocation108_spill] sm:$0xff] }
 0xb78   :  { %v7391_v25 = vrot.slane %v7387_v42, 6  ;;  %v7323_v1 = vsel %vm7320_vm12, %v7322_v20, %v7318_v54  ;;  %v7354_v60 = vmul.f32 %v10799_v3, %v7293_v16  ;;  %v19269_v3 = vld [vmem:[#allocation85_spill] sm:$0xff]  ;;  %v19286_v42 = vld [vmem:[#allocation120_spill] sm:$0xff]  ;;  %v19290_v16 = vld [vmem:[#allocation123_spill] sm:$0xff] }
 0xb79   :  { %v7392_v9 = vrot.slane %v7389_v18, 5  ;;  %v7356_v56 = vmul.f32 %v10801_v48, %v7323_v1  ;;  %v19274_v48 = vld [vmem:[#allocation90_spill] sm:$0xff]  ;;  %v19284_v44 = vld [vmem:[#allocation125_spill] sm:$0xff]  ;;  %v19288_v20 = vld [vmem:[#allocation128_spill] sm:$0xff] }
 0xb7a   :  { %7362 = vst.sshfl [vmem:[#allocation1 + $0x8] sm:$0xff pattern:$0x73625140] %v7354_v60  ;;  %v7380_v19 = vpack.c.bf16 %v7354_v60, %v7354_v60  ;;  %v19287_v10 = vld [vmem:[#allocation117_spill] sm:$0xff]  ;;  %v19289_v18 = vld [vmem:[#allocation111_spill] sm:$0xff]  ;;  %v19291_v54 = vld [vmem:[#allocation100_spill] sm:$0xff] }
 0xb7b   :  { %v7393_v14 = vsel %vm19254_vm10, %v7392_v9, %v7391_v25  ;;  %7366 = vst.sshfl [vmem:[#allocation1 + $0x28] sm:$0xff pattern:$0x73625140] %v7356_v56  ;;  %v7382_v12 = vpack.c.bf16 %v7356_v56, %v7356_v56  ;;  %v19292_v25 = vld [vmem:[#allocation134_spill] sm:$0xff]  ;;  %v19293_v1 = vld [vmem:[#allocation121_spill] sm:$0xff]  ;;  %v19295_v9 = vld [vmem:[#allocation103_spill] sm:$0xff] }
 0xb7c   :  { %v17170_v4 = vpack.c.b16 %v7393_v14, %v7393_v14  ;;  %v7388_v46 = vunpack.c.l.b16 %v7380_v19  ;;  %v19294_v60 = vld [vmem:[#allocation130_spill] sm:$0xff]  ;;  %v19296_v56 = vld [vmem:[#allocation136_spill] sm:$0xff] }
 0xb7d   :  { %v7390_v49 = vunpack.c.l.b16 %v7382_v12  ;;  %v19297_v19 = vld [vmem:[#allocation124_spill] sm:$0xff]  ;;  %v19299_v12 = vld [vmem:[#allocation106_spill] sm:$0xff] }
 0xb7e   :  { %v7394_v33 = vrot.slane %v7388_v46, 6  ;;  %7409 = vmatmul.bf16.vlgmr.msra.gmra.mxu1 %v17170_v4  ;;  %7435 = vmatmul.bf16.vlgmr.msrb.gmra.mxu3 %v17170_v4  ;;  %v19298_v14 = vld [vmem:[#allocation132_spill] sm:$0xff]  ;;  %v19300_v46 = vld [vmem:[#allocation138_spill] sm:$0xff] }
 0xb7f   :  { %v7395_v62 = vrot.slane %v7390_v49, 5  ;;  %7505 = vmatpush.bf16.msra.mxu1 %v18216_v39  ;;  %7531 = vmatpush.bf16.msrb.mxu3 %v19077_v26  ;;  %v19256_v39 = vld [vmem:[#allocation97_spill] sm:$0xff]  ;;  %v19301_v49 = vld [vmem:[#allocation127_spill] sm:$0xff] }
 0xb81   :  { %v7396_v61 = vsel %vm19255_vm2, %v7395_v62, %v7394_v33  ;;  %v7364_v37 = vld [vmem:[#allocation1 + $0x3] ss:$4 sm:$0xff] }
 0xb82   :  { %v17177_v6 = vpack.c.b16 %v7396_v61, %v7396_v61  ;;  %v7368_v0 = vld [vmem:[#allocation1 + $0x23] ss:$4 sm:$0xff] }
 0xb83   :  { %7506 = vmatpush.bf16.msra.mxu1 %v19083_v27  ;;  %7532 = vmatpush.bf16.msrb.mxu3 %v19084_v59  ;;  %v7371_v50 = vrot.slane %v7368_v0, 7  ;;  %v19302_v33 = vld [vmem:[#allocation135_spill] sm:$0xff]  ;;  %v19303_v62 = vld [vmem:[#allocation110_spill] sm:$0xff]  ;;  %v19304_v61 = vld [vmem:[#allocation140_spill] sm:$0xff] }
 0xb84   :  { %7422 = vmatmul.bf16.vlgmr.msrb.gmra.mxu2 %v17177_v6  ;;  %7448 = vmatmul.bf16.vlgmr.msrb.gmra.mxu0 %v17177_v6  ;;  %v19305_v0 = vld [vmem:[#allocation129_spill] sm:$0xff] }
 0xb85   :  { %7518 = vmatpush.bf16.msrb.mxu2 %v18232_v32  ;;  %7544 = vmatpush.bf16.msrb.mxu0 %v19256_v39  ;;  %v7372_v26 = vsel %vm19257_vm8, %v7371_v50, %v7364_v37  ;;  %v19265_v32 = vld [vmem:[#allocation81_spill] sm:$0xff]  ;;  %v19307_v37 = vld [vmem:[#allocation114_spill] sm:$0xff] }
 0xb86   :  { %v7373_v63 = vsel %vm19258_vm13, %v7371_v50, %v7372_v26  ;;  %v19308_v39 = vld [vmem:[#allocation142_spill] sm:$0xff]  ;;  %v19309_v26 = vld [vmem:[#allocation131_spill] sm:$0xff] }
 0xb87   :  { %7507 = vmatpush.bf16.msra.mxu1 %v19259_v2  ;;  %7533 = vmatpush.bf16.msrb.mxu3 %v19260_v30  ;;  %v7374_v27 = vsel %vm19261_vm4, %v7371_v50, %v7373_v63  ;;  %v19310_v63 = vld [vmem:[#allocation139_spill] sm:$0xff]  ;;  %v19311_v2 = vld [vmem:[#allocation118_spill] sm:$0xff] }
 0xb88   :  { %v7375_v59 = vsel %vm19262_vm1, %v7371_v50, %v7374_v27  ;;  %v19306_v50 = vld [vmem:[#allocation137_spill] sm:$0xff]  ;;  %v19312_v30 = vld [vmem:[#allocation143_spill] sm:$0xff] }
 0xb89   :  { %7519 = vmatpush.bf16.msrb.mxu2 %v19263_v51  ;;  %7545 = vmatpush.bf16.msrb.mxu0 %v19264_v35  ;;  %7378 = vst [vmem:[#allocation2 + $0x18] sm:$0xf] %v7375_v59  ;;  %v19313_v27 = vld [vmem:[#allocation133_spill] sm:$0xff]  ;;  %v19315_v51 = vld [vmem:[#allocation122_spill] sm:$0xff]  ;;  %v19316_v35 = vld [vmem:[#allocation144_spill] sm:$0xff] }
 0xb8a   :  { %v19314_v59 = vld [vmem:[#allocation141_spill] sm:$0xff] }
 0xb8b   :  { %7508 = vmatpush.bf16.msra.mxu1 %v19265_v32  ;;  %7534 = vmatpush.bf16.msrb.mxu3 %v19266_v21  ;;  %v19317_v32 = vld [vmem:[#allocation126_spill] sm:$0xff]  ;;  %v19318_v21 = vld [vmem:[#allocation145_spill] sm:$0xff] }
 0xb8d   :  { %7520 = vmatpush.bf16.msrb.mxu2 %v19267_v23  ;;  %7546 = vmatpush.bf16.msrb.mxu0 %v19268_v53 }
 0xb8e   :  { %7461 = vmatmul.bf16.vlgmr.msrb.gmra.mxu1 %v17170_v4  ;;  %7487 = vmatmul.bf16.vlgmr.msra.gmra.mxu3 %v17170_v4 }
 0xb8f   :  { %7509 = vmatpush.bf16.msra.mxu1 %v19269_v3  ;;  %7535 = vmatpush.bf16.msrb.mxu3 %v19270_v5 }
 0xb91   :  { %7521 = vmatpush.bf16.msrb.mxu2 %v19271_v41  ;;  %7547 = vmatpush.bf16.msrb.mxu0 %v19272_v34 }
 0xb93   :  { %7510 = vmatpush.bf16.msra.mxu1 %v19273_v17  ;;  %7536 = vmatpush.bf16.msrb.mxu3 %v19274_v48 }
 0xb94   :  { %7474 = vmatmul.bf16.vlgmr.msra.gmra.mxu2 %v17177_v6  ;;  %7500 = vmatmul.bf16.vlgmr.msra.gmra.mxu0 %v17177_v6 }
 0xb95   :  { %7522 = vmatpush.bf16.msrb.mxu2 %v19275_v45  ;;  %7548 = vmatpush.bf16.msrb.mxu0 %v19276_v22 }
 0xb97   :  { %7511 = vmatpush.bf16.msra.mxu1 %v19277_v8  ;;  %7537 = vmatpush.bf16.msrb.mxu3 %v19278_v58 }
 0xb99   :  { %7523 = vmatpush.bf16.msrb.mxu2 %v19279_v31  ;;  %7549 = vmatpush.bf16.msrb.mxu0 %v19280_v57  ;;  %v19320_v57 = vld [vmem:[#allocation82_spill] sm:$0xff] }
 0xb9b   :  { %7512 = vmatpush.bf16.msra.mxu1 %v19281_v13  ;;  %7538 = vmatpush.bf16.msrb.mxu3 %v19282_v29 }
 0xb9d   :  { %7524 = vmatpush.bf16.msrb.mxu2 %v19285_v7  ;;  %7550 = vmatpush.bf16.msrb.mxu0 %v19286_v42 }
 0xb9e   :  { %7513 = vmatmul.bf16.vlgmr.msra.gmra.mxu1 %v17170_v4  ;;  %7539 = vmatmul.bf16.vlgmr.msrb.gmra.mxu3 %v17170_v4 }
 0xb9f   :  { %7557 = vmatpush.bf16.msrb.mxu1 %v19283_v11  ;;  %7583 = vmatpush.bf16.msra.mxu3 %v19284_v44 }
 0xba1   :  { %7525 = vmatpush.bf16.msrb.mxu2 %v19289_v18  ;;  %7551 = vmatpush.bf16.msrb.mxu0 %v19290_v16 }
 0xba3   :  { %7558 = vmatpush.bf16.msrb.mxu1 %v19287_v10  ;;  %7584 = vmatpush.bf16.msra.mxu3 %v19288_v20 }
 0xba4   :  { %7526 = vmatmul.bf16.vlgmr.msrb.gmra.mxu2 %v17177_v6  ;;  %7552 = vmatmul.bf16.vlgmr.msrb.gmra.mxu0 %v17177_v6 }
 0xba5   :  { %7570 = vmatpush.bf16.msra.mxu2 %v19291_v54  ;;  %7596 = vmatpush.bf16.msra.mxu0 %v19292_v25  ;;  %v19321_v25 = vld [vmem:[#allocation50_spill] sm:$0xff] }
 0xba7   :  { %7559 = vmatpush.bf16.msrb.mxu1 %v19293_v1  ;;  %7585 = vmatpush.bf16.msra.mxu3 %v19294_v60 }
 0xba9   :  { %7571 = vmatpush.bf16.msra.mxu2 %v19295_v9  ;;  %7597 = vmatpush.bf16.msra.mxu0 %v19296_v56  ;;  %v19322_v56 = vld [vmem:[#allocation42_spill] sm:$0xff] }
 0xbab   :  { %7560 = vmatpush.bf16.msrb.mxu1 %v19297_v19  ;;  %7586 = vmatpush.bf16.msra.mxu3 %v19298_v14 }
 0xbad   :  { %7572 = vmatpush.bf16.msra.mxu2 %v19299_v12  ;;  %7598 = vmatpush.bf16.msra.mxu0 %v19300_v46 }
 0xbaf   :  { %7561 = vmatpush.bf16.msrb.mxu1 %v19301_v49  ;;  %7587 = vmatpush.bf16.msra.mxu3 %v19302_v33  ;;  %v19323_v33 = vld [vmem:[#allocation78_spill] sm:$0xff] }
 0xbb1   :  { %7573 = vmatpush.bf16.msra.mxu2 %v19303_v62  ;;  %7599 = vmatpush.bf16.msra.mxu0 %v19304_v61 }
 0xbb3   :  { %7562 = vmatpush.bf16.msrb.mxu1 %v19305_v0  ;;  %7588 = vmatpush.bf16.msra.mxu3 %v19306_v50 }
 0xbb5   :  { %7574 = vmatpush.bf16.msra.mxu2 %v19307_v37  ;;  %7600 = vmatpush.bf16.msra.mxu0 %v19308_v39  ;;  %v19324_v37 = vld [vmem:[#allocation56_spill] sm:$0xff] }
 0xbb7   :  { %7563 = vmatpush.bf16.msrb.mxu1 %v19309_v26  ;;  %7589 = vmatpush.bf16.msra.mxu3 %v19310_v63 }
 0xbb9   :  { %7575 = vmatpush.bf16.msra.mxu2 %v19311_v2  ;;  %7601 = vmatpush.bf16.msra.mxu0 %v19312_v30  ;;  %v19325_v30 = vld [vmem:[#allocation65_spill] sm:$0xff] }
 0xbbb   :  { %7564 = vmatpush.bf16.msrb.mxu1 %v19313_v27  ;;  %7590 = vmatpush.bf16.msra.mxu3 %v19314_v59 }
 0xbbd   :  { %7576 = vmatpush.bf16.msra.mxu2 %v19315_v51  ;;  %7602 = vmatpush.bf16.msra.mxu0 %v19316_v35  ;;  %v19326_v51 = vld [vmem:[#allocation146_spill] sm:$0xff] }
 0xbbe   :  { %7565 = vmatmul.bf16.vlgmr.msrb.gmra.mxu1 %v17170_v4  ;;  %7591 = vmatmul.bf16.vlgmr.msra.gmra.mxu3 %v17170_v4  ;;  %v19319_v4 = vld [vmem:[#allocation51_spill] sm:$0xff] }
 0xbc1   :  { %7577 = vmatpush.bf16.msra.mxu2 %v19317_v32  ;;  %7603 = vmatpush.bf16.msra.mxu0 %v19318_v21 }
 0xbc4   :  { %7578 = vmatmul.bf16.vlgmr.msra.gmra.mxu2 %v17177_v6  ;;  %7604 = vmatmul.bf16.vlgmr.msra.gmra.mxu0 %v17177_v6 }
 0xbfb   :  { %v7410_v23 = vpop.f32.mrf.mxu1 }
 0xc01   :  { %v7436_v53 = vpop.f32.mrf.mxu3  ;;  %v7449_v3 = vpop.f32.mrf.mxu0 }
 0xc02   :  { %v7450_v41 = vadd.f32 %v7449_v3, %v7436_v53 }
 0xc03   :  { %v7412_v5 = vpop.f32.mrf.mxu1 }
 0xc04   :  { %v7618_v17 = vrot.slane %v7450_v41, 1  ;;  %v7626_v8 = vrot.slane %v7450_v41, 2 }
 0xc06   :  { %v7650_v58 = vadd.f32 %v7618_v17, %v19319_v4  ;;  %v7658_v13 = vadd.f32 %v7626_v8, %v19320_v57 }
 0xc07   :  { %v7423_v34 = vpop.f32.mrf.mxu2 }
 0xc08   :  { %v7424_v29 = vadd.f32 %v7423_v34, %v7410_v23  ;;  %v9867_v11 = vmul.f32 -1.442695, %v7650_v58  ;;  %v9869_v10 = vmul.f32 -1.442695, %v7658_v13 }
 0xc09   :  { %v7438_v48 = vpop.f32.mrf.mxu3  ;;  %v7451_v45 = vpop.f32.mrf.mxu0 }
 0xc0a   :  { %v7617_v20 = vrot.slane %v7424_v29, 1  ;;  %10802 = vpow2.f32 %v9867_v11  ;;  %v7625_v18 = vrot.slane %v7424_v29, 2 }
 0xc0b   :  { %v7462_v22 = vpop.f32.mrf.mxu1  ;;  %10804 = vpow2.f32 %v9869_v10 }
 0xc0c   :  { %v7649_v1 = vadd.f32 %v7617_v20, %v19321_v25  ;;  %v7657_v19 = vadd.f32 %v7625_v18, %v19322_v56 }
 0xc0e   :  { %v9866_v50 = vmul.f32 -1.442695, %v7649_v1  ;;  %v9868_v26 = vmul.f32 -1.442695, %v7657_v19 }
 0xc0f   :  { %v7425_v31 = vpop.f32.mrf.mxu2 }
 0xc10   :  { %v10803_v49 = vpop.eup %10802  ;;  %10806 = vpow2.f32 %v9866_v50 }
 0xc11   :  { %v7488_v44 = vpop.f32.mrf.mxu3  ;;  %v7501_v6 = vpop.f32.mrf.mxu0  ;;  %v17267_v2 = vadd.f32 1.0, %v10803_v49  ;;  %10808 = vpow2.f32 %v9868_v26  ;;  %v7902_v49 = vrot.slane %v17134_v55, 7  ;;  %v10339_v55 = vld [vmem:[%s17698_s12 + $0x28] sm:$0xff] }
 0xc12   :  { %v7502_v7 = vadd.f32 %v7501_v6, %v7488_v44  ;;  %v10805_v63 = vpop.eup %10804 }
 0xc13   :  { %v7464_v42 = vpop.f32.mrf.mxu1  ;;  %v17271_v23 = vadd.f32 1.0, %v10805_v63  ;;  %10810 = vrcp.f32 %v17267_v2  ;;  %vm7701_vm3 = vweird.f32 %v17267_v2  ;;  %v7705_v50 = vand.u32 2147483647, %v17267_v2 }
 0xc14   :  { %v7620_v16 = vrot.slane %v7502_v7, 1  ;;  %v7628_v60 = vrot.slane %v7502_v7, 2 }
 0xc15   :  { %v7735_v63 = vand.u32 2147483647, %v17271_v23  ;;  %vm7731_vm2 = vweird.f32 %v17271_v23  ;;  %vm17431_vm1 = vcmp.eq.f32.partialorder %v7705_v50, 8.507059e+37 }
 0xc16   :  { %v7652_v62 = vadd.f32 %v7620_v16, %v19323_v33  ;;  %v7660_v39 = vadd.f32 %v7628_v60, %v19324_v37  ;;  %v10807_v17 = vpop.eup %10806  ;;  %v7707_v60 = vand.u32 2147483648, %v17267_v2 }
 0xc17   :  { %v7475_v54 = vpop.f32.mrf.mxu2  ;;  %v10809_v48 = vpop.eup %10808  ;;  %v17279_v31 = vadd.f32 1.0, %v10807_v17 }
 0xc18   :  { %v7476_v9 = vadd.f32 %v7475_v54, %v7462_v22  ;;  %v9871_v59 = vmul.f32 -1.442695, %v7652_v62  ;;  %v9873_v21 = vmul.f32 -1.442695, %v7660_v39  ;;  %v17283_v29 = vadd.f32 1.0, %v10809_v48 }
 0xc19   :  { %v7490_v14 = vpop.f32.mrf.mxu3  ;;  %v7503_v12 = vpop.f32.mrf.mxu0  ;;  %v7692_v37 = vand.u32 2147483648, %v17279_v31  ;;  %v17321_v39 = vor.u32 1.1754944e-38, %v7707_v60 }
 0xc1a   :  { %v7619_v46 = vrot.slane %v7476_v9, 1  ;;  %v7627_v61 = vrot.slane %v7476_v9, 2  ;;  %10812 = vpow2.f32 %v9871_v59  ;;  %v17275_v45 = vpop.eup %10810  ;;  %v7737_v9 = vand.u32 2147483648, %v17271_v23 }
 0xc1b   :  { %v17264_v0 = vpop.f32.mrf.mxu1  ;;  %10814 = vpow2.f32 %v9873_v21  ;;  %v7697_v7 = vmul.f32 %v17275_v45, %v17267_v2  ;;  %vm7702_vm14 = vweird.f32 %v17275_v45  ;;  %v17350_v48 = vor.u32 1.1754944e-38, %v7692_v37 }
 0xc1c   :  { %v7651_v27 = vadd.f32 %v7619_v46, %v19325_v30  ;;  %v7659_v35 = vadd.f32 %v7627_v61, %v19326_v51  ;;  %10816 = vrcp.f32 %v17271_v23  ;;  %v17325_v30 = vor.u32 1.1754944e-38, %v7737_v9  ;;  %vm17357_vm15 = vmor %vm7701_vm3, %vm7702_vm14 }
 0xc1d   :  { %v7698_v54 = vsub.f32 1.0, %v7697_v7  ;;  %vm17448_vm3 = vcmp.eq.f32.partialorder %v7735_v63, 8.507059e+37 }
 0xc1e   :  { %v9870_v3 = vmul.f32 -1.442695, %v7651_v27  ;;  %v9872_v41 = vmul.f32 -1.442695, %v7659_v35 }
 0xc1f   :  { %v7477_v32 = vpop.f32.mrf.mxu2  ;;  %v7699_v19 = vmul.f32 %v17275_v45, %v7698_v54 }
 0xc20   :  { %10818 = vpow2.f32 %v9870_v3  ;;  %v10813_v8 = vpop.eup %10812 }
 0xc21   :  { %v7540_v53 = vpop.f32.mrf.mxu3  ;;  %v7553_v5 = vpop.f32.mrf.mxu0  ;;  %10820 = vpow2.f32 %v9872_v41  ;;  %v17285_v44 = vadd.f32 1.0, %v10813_v8  ;;  %v17338_v32 = vadd.f32 %v17275_v45, %v7699_v19  ;;  %v7690_v41 = vand.u32 2147483647, %v17279_v31 }
 0xc22   :  { %v10815_v58 = vpop.eup %10814  ;;  %10822 = vrcp.f32 %v17279_v31  ;;  %v7554_v61 = vadd.f32 %v7553_v5, %v7540_v53 }
 0xc23   :  { %v7516_v34 = vpop.f32.mrf.mxu1  ;;  %v17281_v13 = vpop.eup %10816  ;;  %v17289_v42 = vadd.f32 1.0, %v10815_v58  ;;  %10824 = vrcp.f32 %v17283_v29  ;;  %v7783_v3 = vand.u32 2147483648, %v17285_v44  ;;  %v7704_v54 = vsel %vm17357_vm15, %v17275_v45, %v17338_v32 }
 0xc24   :  { %v7727_v20 = vmul.f32 %v17281_v13, %v17271_v23  ;;  %10826 = vrcp.f32 %v17285_v44  ;;  %v7622_v17 = vrot.slane %v7554_v61, 1  ;;  %v7630_v58 = vrot.slane %v7554_v61, 2 }
 0xc25   :  { %10828 = vrcp.f32 %v17289_v42  ;;  %v7813_v34 = vand.u32 2147483648, %v17289_v42  ;;  %v17372_v60 = vor.u32 1.1754944e-38, %v7783_v3  ;;  %v7781_v19 = vand.u32 2147483647, %v17285_v44 }
 0xc26   :  { %v10819_v11 = vpop.eup %10818  ;;  %v7728_v1 = vsub.f32 1.0, %v7727_v20  ;;  %vm7777_vm7 = vweird.f32 %v17285_v44  ;;  %vm7807_vm9 = vweird.f32 %v17289_v42  ;;  %v7811_v8 = vand.u32 2147483647, %v17289_v42 }
 0xc27   :  { %v17277_v22 = vpop.f32.mrf.mxu2  ;;  %v10821_v6 = vpop.eup %10820  ;;  %v17293_v10 = vadd.f32 1.0, %v10819_v11  ;;  %vm7732_vm5 = vweird.f32 %v17281_v13  ;;  %vm17400_vm12 = vcmp.eq.f32.partialorder %v7781_v19, 8.507059e+37  ;;  %v19359_v45 = vand.u32 2147483648, %v17283_v29 }
 0xc28   :  { %v17298_v18 = vadd.f32 1.0, %v10821_v6  ;;  %v17302_v25 = vpop.eup %10822  ;;  %v7729_v26 = vmul.f32 %v17281_v13, %v7728_v1  ;;  %vm17407_vm8 = vcmp.eq.f32.partialorder %v7811_v8, 8.507059e+37 }
 0xc29   :  { %v7542_v4 = vpop.f32.mrf.mxu3  ;;  %v7555_v57 = vpop.f32.mrf.mxu0  ;;  %10830 = vrcp.f32 %v17293_v10  ;;  %v7682_v51 = vmul.f32 %v17302_v25, %v17279_v31  ;;  %v7768_v3 = vand.u32 2147483648, %v17293_v10  ;;  %vm7762_vm6 = vweird.f32 %v17293_v10 }
 0xc2a   :  { %10832 = vrcp.f32 %v17298_v18  ;;  %v17307_v56 = vpop.eup %10824  ;;  %v17362_v11 = vadd.f32 %v17281_v13, %v7729_v26  ;;  %v17376_v26 = vor.u32 1.1754944e-38, %v7813_v34  ;;  %vm7792_vm0 = vweird.f32 %v17298_v18 }
 0xc2b   :  { %v17310_v14 = vpop.eup %10826  ;;  %v17335_v35 = vmul.f32 %v17307_v56, %v17283_v29  ;;  %v7683_v7 = vsub.f32 1.0, %v7682_v51  ;;  %v7654_v51 = vadd.f32 %v7622_v17, %v19217_v47  ;;  %vm7687_vm10 = vweird.f32 %v17302_v25 }
 0xc2c   :  { %v17316_v62 = vpop.eup %10828  ;;  %v7773_v53 = vmul.f32 %v17310_v14, %v17285_v44  ;;  %vm7778_vm11 = vweird.f32 %v17310_v14  ;;  %v7723_v32 = vor.u32 1.1754944e-38, %v19359_v45  ;;  %v19362_v44 = vrot.slane %v17130_v40, 7 }
 0xc2d   :  { %v7803_v5 = vmul.f32 %v17316_v62, %v17289_v42  ;;  %v7713_v20 = vsub.f32 1.0, %v17335_v35  ;;  %v7528_v35 = vadd.f32 %v17277_v22, %v17264_v0  ;;  %v17386_v34 = vmul.f32 %v17302_v25, %v7683_v7  ;;  %vm17424_vm14 = vmor %vm7777_vm7, %vm7778_vm11 }
 0xc2e   :  { %v7774_v1 = vsub.f32 1.0, %v7773_v53  ;;  %v7798_v22 = vand.u32 2147483648, %v17298_v18  ;;  %10834 = vtanh.f32 %v7654_v51  ;;  %vm7808_vm4 = vweird.f32 %v17316_v62 }
 0xc2f   :  { %v7529_v16 = vpop.f32.mrf.mxu2  ;;  %v17329_v59 = vpop.eup %10830  ;;  %v7804_v9 = vsub.f32 1.0, %v7803_v5  ;;  %v7662_v5 = vadd.f32 %v7630_v58, %v18503_v28  ;;  %v7621_v28 = vrot.slane %v7528_v35, 1  ;;  %v17398_v58 = vor.u32 1.1754944e-38, %v7768_v3  ;;  %vm17441_vm7 = vmor %vm7807_vm9, %vm7808_vm4 }
 0xc30   :  { %v17341_v21 = vpop.eup %10832  ;;  %v7758_v4 = vmul.f32 %v17329_v59, %v17293_v10  ;;  %v7775_v17 = vmul.f32 %v17310_v14, %v7774_v1  ;;  %vm7763_vm13 = vweird.f32 %v17329_v59  ;;  %vm17463_vm9 = vcmp.eq.f32.partialorder %v7690_v41, 8.507059e+37 }
 0xc31   :  { %v7788_v16 = vmul.f32 %v17341_v21, %v17298_v18  ;;  %v7805_v0 = vmul.f32 %v17316_v62, %v7804_v9  ;;  %vm7793_vm11 = vweird.f32 %v17341_v21  ;;  %vm17478_vm4 = vmor %vm7762_vm6, %vm7763_vm13  ;;  %v7796_v41 = vand.u32 2147483647, %v17298_v18  ;;  %v10340_v18 = vld [vmem:[%s17698_s12 + $0x30] sm:$0xff] }
 0xc32   :  { %v7759_v53 = vsub.f32 1.0, %v7758_v4  ;;  %vm17513_vm6 = vmor %vm7731_vm2, %vm7732_vm5  ;;  %vm19351_vm5 = vweird.f32 %v17279_v31 }
 0xc33   :  { %v7789_v6 = vsub.f32 1.0, %v7788_v16  ;;  %v7629_v16 = vrot.slane %v7528_v35, 2  ;;  %v19333_v35 = vld [vmem:[#allocation91_spill] sm:$0xff]  ;;  %vm7797_vm2 = vcmp.eq.f32.partialorder %v7796_v41, 8.507059e+37  ;;  %v10345_v41 = vld [vmem:[%s17698_s12 + $0x58] sm:$0xff] }
 0xc35   :  { %v7790_v9 = vmul.f32 %v17341_v21, %v7789_v6  ;;  %v7714_v6 = vmul.f32 %v17307_v56, %v7713_v20 }
 0xc3b   :  { %v17327_v27 = vpop.f32.mrf.mxu1 }
 0xc41   :  { %v7592_v61 = vpop.f32.mrf.mxu3  ;;  %v7605_v37 = vpop.f32.mrf.mxu0 }
 0xc42   :  { %v7606_v46 = vadd.f32 %v7605_v37, %v7592_v61  ;;  %v7776_v61 = vadd.f32 %v17310_v14, %v7775_v17  ;;  %v7806_v37 = vadd.f32 %v17316_v62, %v7805_v0  ;;  %v7661_v17 = vadd.f32 %v7629_v16, %v18492_v36  ;;  %v10341_v16 = vld [vmem:[%s17698_s12 + $0x38] sm:$0xff] }
 0xc43   :  { %v7568_v12 = vpop.f32.mrf.mxu1  ;;  %v7791_v36 = vadd.f32 %v17341_v21, %v7790_v9  ;;  %8124 = vmatpush.bf16.msra.mxu1 %v10341_v16 }
 0xc44   :  { %v7624_v33 = vrot.slane %v7606_v46, 1  ;;  %v7632_v47 = vrot.slane %v7606_v46, 2  ;;  %v7760_v46 = vmul.f32 %v17329_v59, %v7759_v53  ;;  %v7653_v53 = vadd.f32 %v7621_v28, %v19333_v35  ;;  %v19342_v28 = vld [vmem:[#allocation99_spill] sm:$0xff] }
 0xc45   :  { %v7780_v42 = vsel %vm17424_vm14, %v17310_v14, %v7776_v61  ;;  %v10349_v14 = vld [vmem:[%s17698_s12 + $0x78] sm:$0xff]  ;;  %vm17487_vm14 = vmor %vm7792_vm0, %vm7793_vm11  ;;  %v10348_v61 = vld [vmem:[%s17698_s12 + $0x70] sm:$0xff] }
 0xc46   :  { %v7656_v12 = vadd.f32 %v7624_v33, %v13863_v38  ;;  %v7664_v4 = vadd.f32 %v7632_v47, %v19228_v52  ;;  %v7761_v0 = vadd.f32 %v17329_v59, %v7760_v46  ;;  %v7810_v46 = vsel %vm17441_vm7, %v17316_v62, %v7806_v37  ;;  %8138 = vmatpush.bf16.msrb.mxu2 %v10349_v14  ;;  %v10337_v62 = vld [vmem:[%s17698_s12 + $0x18] sm:$0xff] }
 0xc47   :  { %v7579_v1 = vpop.f32.mrf.mxu2  ;;  %v7715_v37 = vadd.f32 %v17307_v56, %v7714_v6  ;;  %8125 = vmatpush.bf16.msra.mxu1 %v10340_v18 }
 0xc48   :  { %v9875_v52 = vmul.f32 -1.442695, %v7656_v12  ;;  %v9877_v33 = vmul.f32 -1.442695, %v7664_v4  ;;  %v7580_v19 = vadd.f32 %v7579_v1, %v17327_v27  ;;  %v10835_v4 = vpop.eup %10834 }
 0xc49   :  { %v7594_v8 = vpop.f32.mrf.mxu3  ;;  %v7607_v51 = vpop.f32.mrf.mxu0 }
 0xc4a   :  { %10836 = vpow2.f32 %v9875_v52  ;;  %v7623_v3 = vrot.slane %v7580_v19, 1  ;;  %v7631_v47 = vrot.slane %v7580_v19, 2  ;;  %v7799_v52 = vor.u32 1.1754944e-38, %v7798_v22  ;;  %8139 = vmatpush.bf16.msrb.mxu2 %v10348_v61 }
 0xc4b   :  { %10838 = vpow2.f32 %v9877_v33  ;;  %v7765_v33 = vsel %vm17478_vm4, %v17329_v59, %v7761_v0  ;;  %v7795_v59 = vsel %vm17487_vm14, %v17341_v21, %v7791_v36  ;;  %v7734_v21 = vsel %vm17513_vm6, %v17281_v13, %v17362_v11  ;;  %8126 = vmatpush.bf16.msra.mxu1 %v10339_v55 }
 0xc4c   :  { %v7655_v50 = vadd.f32 %v7623_v3, %v13782_v43  ;;  %v7663_v12 = vadd.f32 %v7631_v47, %v19342_v28  ;;  %10840 = vtanh.f32 %v7662_v5  ;;  %v7766_v43 = vand.u32 2147483647, %v17293_v10 }
 0xc4d   :  { %10842 = vtanh.f32 %v7653_v53  ;;  %v7685_v10 = vadd.f32 %v17302_v25, %v17386_v34  ;;  %v7785_v34 = vsel %vm17400_vm12, %v17372_v60, %v7780_v42  ;;  %v7815_v60 = vsel %vm17407_vm8, %v17376_v26, %v7810_v46  ;;  %vm17530_vm12 = vmor %vm19351_vm5, %vm7687_vm10 }
 0xc4e   :  { %v9874_v5 = vmul.f32 -1.442695, %v7655_v50  ;;  %v9876_v1 = vmul.f32 -1.442695, %v7663_v12  ;;  %10844 = vtanh.f32 %v7661_v17  ;;  %vm7767_vm0 = vcmp.eq.f32.partialorder %v7766_v43, 8.507059e+37 }
 0xc4f   :  { %v7581_v19 = vpop.f32.mrf.mxu2  ;;  %v7770_v38 = vsel %vm7767_vm0, %v17398_v58, %v7765_v33  ;;  %v7910_v35 = vmul.f32 %v7902_v49, %v7785_v34  ;;  %v7689_v13 = vsel %vm17530_vm12, %v17302_v25, %v7685_v10  ;;  %vm19354_vm8 = vweird.f32 %v17307_v56  ;;  %v10347_v25 = vld [vmem:[%s17698_s12 + $0x68] sm:$0xff]  ;;  %v10344_v34 = vld [vmem:[%s17698_s12 + $0x50] sm:$0xff] }
 0xc50   :  { %v10837_v22 = vpop.eup %10836  ;;  %10846 = vpow2.f32 %v9874_v5  ;;  %vm19355_vm10 = vweird.f32 %v17283_v29  ;;  %v7800_v11 = vsel %vm7797_vm2, %v7799_v52, %v7795_v59  ;;  %v7709_v58 = vsel %vm17431_vm1, %v17321_v39, %v7704_v54  ;;  %8140 = vmatpush.bf16.msrb.mxu2 %v10347_v25 }
 0xc51   :  { %v10839_v8 = vpop.eup %10838  ;;  %v17520_v7 = vadd.f32 1.0, %v10837_v22  ;;  %10848 = vpow2.f32 %v9876_v1  ;;  %vm17546_vm13 = vmor %vm19355_vm10, %vm19354_vm8  ;;  %v19358_v53 = vrot.slane %v17137_v15, 7  ;;  %v7739_v57 = vsel %vm17448_vm3, %v17325_v30, %v7734_v21  ;;  %v10336_v22 = vld [vmem:[%s17698_s12 + $0x10] sm:$0xff] }
 0xc52   :  { %v17535_v26 = vadd.f32 1.0, %v10839_v8  ;;  %v10841_v6 = vpop.eup %10840  ;;  %v7719_v47 = vsel %vm17546_vm13, %v17307_v56, %v7715_v37  ;;  %v7914_v17 = vmul.f32 %v10835_v4, %v7709_v58  ;;  %v19360_v39 = vrot.slane %v17126_v24, 7  ;;  %v10338_v24 = vld [vmem:[%s17698_s12 + $0x20] sm:$0xff] }
 0xc53   :  { %10850 = vrcp.f32 %v17520_v7  ;;  %v10843_v49 = vpop.eup %10842  ;;  %v7912_v3 = vmul.f32 %v19358_v53, %v7815_v60  ;;  %v7916_v20 = vmul.f32 %v10841_v6, %v7739_v57  ;;  %v7694_v56 = vsel %vm17463_vm9, %v17350_v48, %v7689_v13  ;;  %8127 = vmatpush.bf16.msra.mxu1 %v10338_v24 }
 0xc54   :  { %10852 = vrcp.f32 %v17535_v26  ;;  %v10845_v27 = vpop.eup %10844  ;;  %v7909_v54 = vmul.f32 %v19360_v39, %v7770_v38  ;;  %v19361_v0 = vand.u32 2147483647, %v17283_v29  ;;  %v7911_v2 = vmul.f32 %v19362_v44, %v7800_v11  ;;  %v10346_v29 = vld [vmem:[%s17698_s12 + $0x60] sm:$0xff] }
 0xc55   :  { %v7918_v36 = vadd.f32 %v7914_v17, %v7910_v35  ;;  %v7913_v28 = vmul.f32 %v10843_v49, %v7694_v56  ;;  %v7920_v48 = vadd.f32 %v7916_v20, %v7912_v3  ;;  %8141 = vmatpush.bf16.msrb.mxu2 %v10346_v29  ;;  %v7861_v1 = vand.u32 2147483647, %v17520_v7  ;;  %v10342_v44 = vld [vmem:[%s17698_s12 + $0x40] sm:$0xff]  ;;  %v7951_v29 = vld [vmem:[#allocation2] sm:$0xf] }
 0xc56   :  { %v10847_v15 = vpop.eup %10846  ;;  %vm7721_vm15 = vcmp.eq.f32.partialorder %v19361_v0, 8.507059e+37  ;;  %v7863_v9 = vand.u32 2147483648, %v17520_v7  ;;  %v7891_v10 = vand.u32 2147483647, %v17535_v26  ;;  %v7893_v33 = vand.u32 2147483648, %v17535_v26  ;;  %v10334_v0 = vld [vmem:[%s17698_s12] sm:$0xff] }
 0xc57   :  { %v10849_v30 = vpop.eup %10848  ;;  %v7724_v50 = vsel %vm7721_vm15, %v7723_v32, %v7719_v47  ;;  %v17585_v12 = vadd.f32 1.0, %v10847_v15  ;;  %v7917_v46 = vadd.f32 %v7913_v28, %v7909_v54  ;;  %vm7857_vm3 = vweird.f32 %v17520_v7  ;;  %8128 = vmatpush.bf16.msra.mxu1 %v10337_v62  ;;  %v10343_v47 = vld [vmem:[%s17698_s12 + $0x48] sm:$0xff] }
 0xc58   :  { %v7915_v4 = vmul.f32 %v10845_v27, %v7724_v50  ;;  %v17593_v40 = vadd.f32 1.0, %v10849_v30  ;;  %vm7887_vm7 = vweird.f32 %v17535_v26  ;;  %vm17617_vm9 = vcmp.eq.f32.partialorder %v7861_v1, 8.507059e+37 }
 0xc59   :  { %v10851_v42 = vpop.eup %10850  ;;  %10854 = vrcp.f32 %v17585_v12  ;;  %8142 = vmatpush.bf16.msrb.mxu2 %v10345_v41  ;;  %v7864_v51 = vor.u32 1.1754944e-38, %v7863_v9  ;;  %vm17623_vm14 = vcmp.eq.f32.partialorder %v7891_v10, 8.507059e+37  ;;  %v7894_v38 = vor.u32 1.1754944e-38, %v7893_v33 }
 0xc5a   :  { %v10853_v63 = vpop.eup %10852  ;;  %v7919_v43 = vadd.f32 %v7915_v4, %v7911_v2  ;;  %v7853_v16 = vmul.f32 %v10851_v42, %v17520_v7  ;;  %10856 = vrcp.f32 %v17593_v40  ;;  %vm7858_vm1 = vweird.f32 %v10851_v42  ;;  %v7953_v4 = vld [vmem:[#allocation2 + $0x8] sm:$0xf] }
 0xc5b   :  { %10858 = vtanh.f32 %v7918_v36  ;;  %v7883_v14 = vmul.f32 %v10853_v63, %v17535_v26  ;;  %vm7888_vm11 = vweird.f32 %v10853_v63  ;;  %vm7859_vm4 = vmor %vm7857_vm3, %vm7858_vm1  ;;  %v7846_v11 = vand.u32 2147483647, %v17585_v12  ;;  %8129 = vmatpush.bf16.msra.mxu1 %v10336_v22  ;;  %v10335_v26 = vld [vmem:[%s17698_s12 + $0x8] sm:$0xff] }
 0xc5c   :  { %10860 = vtanh.f32 %v7920_v48  ;;  %v7854_v5 = vsub.f32 1.0, %v7853_v16  ;;  %vm7889_vm6 = vmor %vm7887_vm7, %vm7888_vm11  ;;  %v7848_v55 = vand.u32 2147483648, %v17585_v12  ;;  %v7878_v3 = vand.u32 2147483648, %v17593_v40  ;;  %v7952_v48 = vld [vmem:[#allocation2 + $0x4] sm:$0xf] }
 0xc5d   :  { %10862 = vtanh.f32 %v7917_v46  ;;  %v7884_v52 = vsub.f32 1.0, %v7883_v14  ;;  %8143 = vmatpush.bf16.msrb.mxu2 %v10344_v34  ;;  %v7876_v54 = vand.u32 2147483647, %v17593_v40  ;;  %vm7842_vm12 = vweird.f32 %v17585_v12  ;;  %v7957_v46 = vld [vmem:[#allocation2 + $0x18] sm:$0xf] }
 0xc5e   :  { %10864 = vtanh.f32 %v7919_v43  ;;  %v7855_v19 = vmul.f32 %v10851_v42, %v7854_v5  ;;  %v7849_v20 = vor.u32 1.1754944e-38, %v7848_v55  ;;  %vm7872_vm8 = vweird.f32 %v17593_v40  ;;  %v7954_v43 = vld [vmem:[#allocation2 + $0xc] sm:$0xf]  ;;  %v10353_v34 = vld [vmem:[%s17697_s13] ss:$0 sm:$0xff] }
 0xc5f   :  { %v10855_v18 = vpop.eup %10854  ;;  %v7885_v61 = vmul.f32 %v10853_v63, %v7884_v52  ;;  %8130 = vmatpush.bf16.msra.mxu1 %v10335_v26  ;;  %vm7847_vm10 = vcmp.eq.f32.partialorder %v7846_v11, 8.507059e+37  ;;  %v7879_v30 = vor.u32 1.1754944e-38, %v7878_v3  ;;  %vm7877_vm15 = vcmp.eq.f32.partialorder %v7876_v54, 8.507059e+37 }
 0xc60   :  { %v10857_v37 = vpop.eup %10856  ;;  %v7856_v59 = vadd.f32 %v10851_v42, %v7855_v19  ;;  %v7838_v60 = vmul.f32 %v10855_v18, %v17585_v12  ;;  %vm7843_vm0 = vweird.f32 %v10855_v18  ;;  %vm19367_vm1 = vcmask 1041409  }
 0xc61   :  { %v10859_v7 = vpop.eup %10858  ;;  %v7886_v21 = vadd.f32 %v10853_v63, %v7885_v61  ;;  %v7868_v6 = vmul.f32 %v10857_v37, %v17593_v40  ;;  %vm7873_vm5 = vweird.f32 %v10857_v37  ;;  %vm7844_vm2 = vmor %vm7842_vm12, %vm7843_vm0  ;;  %8144 = vmatpush.bf16.msrb.mxu2 %v10343_v47  ;;  %v7955_v40 = vld [vmem:[#allocation2 + $0x10] sm:$0xf]  ;;  %vm19368_vm3 = vcmask 1043459  }
 0xc62   :  { %v10861_v35 = vpop.eup %10860  ;;  %v7860_v13 = vsel %vm7859_vm4, %v10851_v42, %v7856_v59  ;;  %v7839_v31 = vsub.f32 1.0, %v7838_v60  ;;  %vm7874_vm13 = vmor %vm7872_vm8, %vm7873_vm5  ;;  %v7956_v42 = vld [vmem:[#allocation2 + $0x14] sm:$0xf]  ;;  %vm19369_vm7 = vcmask 1045509   ;;  %vm19370_vm11 = vcmask 1047559  }
 0xc63   :  { %v10863_v25 = vpop.eup %10862  ;;  %v7865_v49 = vsel %vm17617_vm9, %v7864_v51, %v7860_v13  ;;  %v7890_v58 = vsel %vm7889_vm6, %v10853_v63, %v7886_v21  ;;  %v7869_v53 = vsub.f32 1.0, %v7868_v6  ;;  %8131 = vmatpush.bf16.msra.mxu1 %v10334_v0 }
 0xc64   :  { %v10865_v27 = vpop.eup %10864  ;;  %v7895_v57 = vsel %vm17623_vm14, %v7894_v38, %v7890_v58  ;;  %v7926_v17 = vmul.f32 %v10859_v7, %v7865_v49  ;;  %v7840_v45 = vmul.f32 %v10855_v18, %v7839_v31 }
 0xc65   :  { %v7928_v32 = vmul.f32 %v10861_v35, %v7895_v57  ;;  %v7870_v39 = vmul.f32 %v10857_v37, %v7869_v53  ;;  %8145 = vmatpush.bf16.msrb.mxu2 %v10342_v44 }
 0xc66   :  { %7934 = vst.sshfl [vmem:[#allocation1 + $0x8] sm:$0xff pattern:$0x73625140] %v7926_v17  ;;  %v7841_v15 = vadd.f32 %v10855_v18, %v7840_v45 }
 0xc67   :  { %7938 = vst.sshfl [vmem:[#allocation1 + $0x28] sm:$0xff pattern:$0x73625140] %v7928_v32  ;;  %v7871_v56 = vadd.f32 %v10857_v37, %v7870_v39 }
 0xc68   :  { %v7845_v2 = vsel %vm7844_vm2, %v10855_v18, %v7841_v15 }
 0xc69   :  { %v7850_v36 = vsel %vm7847_vm10, %v7849_v20, %v7845_v2  ;;  %v7875_v50 = vsel %vm7874_vm13, %v10857_v37, %v7871_v56 }
 0xc6a   :  { %v7880_v28 = vsel %vm7877_vm15, %v7879_v30, %v7875_v50  ;;  %v7925_v12 = vmul.f32 %v10863_v25, %v7850_v36 }
 0xc6b   :  { %v7927_v24 = vmul.f32 %v10865_v27, %v7880_v28 }
 0xc6c   :  { %7933 = vst.sshfl [vmem:[#allocation1] sm:$0xff pattern:$0x73625140] %v7925_v12 }
 0xc6d   :  { %7937 = vst.sshfl [vmem:[#allocation1 + $0x20] sm:$0xff pattern:$0x73625140] %v7927_v24 }
 0xc6e   :  { %7967 = vst [vmem:[#allocation1] ss:$4 sm:$0xff] %v7951_v29 }
 0xc6f   :  { %7969 = vst [vmem:[#allocation1 + $0x1] ss:$4 sm:$0xff] %v7952_v48 }
 0xc70   :  { %7971 = vst [vmem:[#allocation1 + $0x2] ss:$4 sm:$0xff] %v7953_v4 }
 0xc71   :  { %7975 = vst [vmem:[#allocation1 + $0x20] ss:$4 sm:$0xff] %v7955_v40 }
 0xc72   :  { %7977 = vst [vmem:[#allocation1 + $0x21] ss:$4 sm:$0xff] %v7956_v42 }
 0xc73   :  { %v7936_v63 = vld [vmem:[#allocation1 + $0x3] ss:$4 sm:$0xff]  ;;  %7979 = vst [vmem:[#allocation1 + $0x22] ss:$4 sm:$0xff] %v7957_v46 }
 0xc74   :  { %v7941_v16 = vrot.slane %v7936_v63, 1  ;;  %7973 = vst [vmem:[#allocation1 + $0x3] ss:$4 sm:$0xff] %v7954_v43  ;;  %v7940_v14 = vld [vmem:[#allocation1 + $0x23] ss:$4 sm:$0xff] }
 0xc76   :  { %v7944_v62 = vsel %vm19367_vm1, %v7940_v14, %v7941_v16 }
 0xc77   :  { %v7945_v41 = vsel %vm19368_vm3, %v7940_v14, %v7944_v62 }
 0xc78   :  { %v7946_v5 = vsel %vm19369_vm7, %v7940_v14, %v7945_v41 }
 0xc79   :  { %v7947_v1 = vsel %vm19370_vm11, %v7940_v14, %v7946_v5 }
 0xc7a   :  { %7950 = vst [vmem:[#allocation2 + $0x1c] sm:$0xf] %v7947_v1 }
 0xc7b   :  { %v7982_v52 = vld.sshfl [vmem:[#allocation1] sm:$0xff pattern:$0x73625140]  ;;  %v7983_v10 = vld.sshfl [vmem:[#allocation1 + $0x8] sm:$0xff pattern:$0x73625140] }
 0xc81   :  { %v7958_v9 = vld [vmem:[#allocation2 + $0x1c] sm:$0xf] }
 0xc82   :  { %7981 = vst [vmem:[#allocation1 + $0x23] ss:$4 sm:$0xff] %v7958_v9 }
 0xc89   :  { %v7984_v33 = vld.sshfl [vmem:[#allocation1 + $0x20] sm:$0xff pattern:$0x73625140]  ;;  %v7985_v19 = vld.sshfl [vmem:[#allocation1 + $0x28] sm:$0xff pattern:$0x73625140] }
 0xc8a   :  { %v7990_v18 = vpack.c.bf16 %v7984_v33, %v7982_v52  ;;  %v7991_v61 = vpack.c.bf16 %v7985_v19, %v7983_v10 }
 0xc8c   :  { %8132 = vmatmul.bf16.vlgmr.msra.gmra.mxu1 %v7990_v18  ;;  %8146 = vmatmul.bf16.vlgmr.msrb.gmra.mxu2 %v7991_v61 }
 0xd09   :  { %v8133_v22 = vpop.f32.mrf.mxu1 }
 0xd0a   :  { %v8134_v37 = vadd.f32 %v10353_v34, %v8133_v22 }
 0xd0f   :  { %v8147_v59 = vpop.f32.mrf.mxu2 }
 0xd10   :  { %v8148_v8 = vadd.f32 %v8147_v59, %v8134_v37 }
 0xd11   :  { %v8135_v21 = vpop.f32.mrf.mxu1 }
 0xd12   :  { %v8154_v51 = vrot.slane %v8148_v8, 2  ;;  %v8155_v60 = vrot.slane %v8148_v8, 4  ;;  %v8156_v7 = vrot.slane %v8148_v8, 6  ;;  %8166 = vst [vmem:[%s17699_s14] sm:$0x3] %v8148_v8  ;;  %v8136_v23 = vadd.f32 %v10353_v34, %v8135_v21 }
 0xd14   :  { %8167 = vst [vmem:[%s17699_s14 + $0x2] sm:$0x3] %v8154_v51 }
 0xd15   :  { %8168 = vst [vmem:[%s17699_s14 + $0x4] sm:$0x3] %v8155_v60 }
 0xd16   :  { %8169 = vst [vmem:[%s17699_s14 + $0x6] sm:$0x3] %v8156_v7 }
 0xd17   :  { %v8149_v38 = vpop.f32.mrf.mxu2 }
 0xd18   :  { %v8150_v6 = vadd.f32 %v8149_v38, %v8136_v23 }
 0xd1a   :  { %v8157_v35 = vrot.slane %v8150_v6, 2  ;;  %v8158_v13 = vrot.slane %v8150_v6, 4  ;;  %v8159_v31 = vrot.slane %v8150_v6, 6  ;;  %8170 = vst [vmem:[%s17699_s14 + $0x8] sm:$0x3] %v8150_v6 }
 0xd1c   :  { %8171 = vst [vmem:[%s17699_s14 + $0xa] sm:$0x3] %v8157_v35 }
 0xd1d   :  { %8172 = vst [vmem:[%s17699_s14 + $0xc] sm:$0x3] %v8158_v13 }
 0xd1e   :  { %8173 = vst [vmem:[%s17699_s14 + $0xe] sm:$0x3] %v8159_v31 }

</bundles_post_ra>
